<compile_context>
chip_gen: v7x
topology: tpu7x:2x2x1
jax: 0.10.0
libtpu: 0.0.40
codegen_flags: <defaults>
</compile_context>

<pallas_src>
import functools

import jax
import jax.numpy as jnp
from jax.experimental import pallas as pl
from jax.experimental.pallas import tpu as pltpu


def _round_up(x, m):
    return (x + m - 1) // m * m


def _conv_kernel(x_ref, w_ref, b_ref, o_ref, acc_ref, *,
                 taps, w_pad, p_lanes, t_stride, t_pad, t_total, folded):
    """Grid step (t_out, n, kt).

    x_ref  : (1, 1, K, L_pad)     bf16  spatially padded, row-flattened input
    w_ref  : (1, nTaps, Cout, K)  bf16  weights of temporal tap kt
    b_ref  : (Cout, 1)            f32
    o_ref  : (1, 1, Cout, P)            dense (spatially stride-1) output
    acc_ref: (Cout, P)            f32   VMEM accumulator
    """
    kt = pl.program_id(2)

    @pl.when(kt == 0)
    def _():
        # Fold the bias into the accumulator init (no zero-fill + add pass).
        acc_ref[...] = jnp.broadcast_to(b_ref[...], acc_ref.shape)

    def _accumulate():
        # kH*kW spatial taps: each is a static lane-offset view of the resident
        # block feeding one (Cout, K) @ (K, P) MXU matmul.
        for i, (kh, kw) in enumerate(taps):
            off = kh * w_pad + kw
            xs = x_ref[0, 0, :, pl.ds(off, p_lanes)]            # (K, P) bf16
            acc_ref[...] += jnp.dot(w_ref[0, i], xs,
                                    preferred_element_type=jnp.float32)

    if folded:            # temporal taps pre-folded into K -> always valid
        _accumulate()
    else:                 # kt grid axis; skip taps that fall in the zero pad
        t_in = pl.program_id(0) * t_stride + kt - t_pad
        valid = jnp.logical_and(t_in >= 0, t_in < t_total)

        @pl.when(valid)
        def _():
            _accumulate()

    @pl.when(kt == pl.num_programs(2) - 1)
    def _():
        o_ref[0, 0] = acc_ref[...].astype(o_ref.dtype)


def conv3d_dense_pallas(x, w, b, t_stride, *, out_dtype=jnp.float32,
                        compute_dtype=jnp.bfloat16):
    """'Same'-padded Conv3d via Pallas; spatially DENSE output.

    x: (N, T, C, H, W)   w: (Cout, Cin, kT, kH, kW)  (torch OIDHW)   b: (Cout,)
    Temporal stride is applied here; the spatial stride / valid-pixel slicing
    is done once by the caller (see _extract_valid) so it can be fused with the
    final concat + NCTHW transpose.
    Returns (N, T_out, Cout, P) with P = round_up(H * W_pad, 128): output row h
    occupies lanes [h*W_pad, h*W_pad + W) (lanes >= W within a row are junk).
    """
    N, T, C, H, W = x.shape
    Cout, Cin, kT, kH, kW = w.shape
    assert C == Cin
    st = t_stride
    pt, ph, pw = kT // 2, kH // 2, kW // 2
    T_out = (T - 1) // st + 1

    Hp, Wp = H + 2 * ph, W + 2 * pw
    P = _round_up(H * Wp, 128)                 # dense stride-1 rows, lane padded
    halo = (kH - 1) * Wp + (kW - 1)
    L_pad = _round_up(max(Hp * Wp, halo + P), 128)

    # Spatial 'same' zero padding + row flattening (tiny expansion, no im2col).
    xf = jnp.pad(x, ((0, 0), (0, 0), (0, 0), (ph, ph), (pw, pw)))
    xf = xf.reshape(N, T, C, Hp * Wp)
    xf = jnp.pad(xf, ((0, 0), (0, 0), (0, 0), (0, L_pad - Hp * Wp)))
    xf = xf.astype(compute_dtype)

    taps = tuple((kh, kw) for kh in range(kH) for kw in range(kW))
    folded = kT * Cin <= 32                    # small-Cin convs: fold kT into K
    if folded:
        # Temporal 'same' pad + gather -> (N, T_out, kT*Cin, L_pad); for the
        # 4-channel raw input this is only a ~20-channel tensor.
        xtp = jnp.pad(xf, ((0, 0), (pt, pt), (0, 0), (0, 0)))
        t_hi = (T_out - 1) * st + 1
        x_in = jnp.concatenate(
            [xtp[:, kt:kt + t_hi:st] for kt in range(kT)], axis=2)
        K, kT_grid = kT * Cin, 1
        wk = jnp.transpose(w, (3, 4, 0, 2, 1)).reshape(1, kH * kW, Cout, K)
        x_index = lambda t, n, kt: (n, t, 0, 0)
    else:
        x_in = xf
        K, kT_grid = Cin, kT
        wk = jnp.transpose(w, (2, 3, 4, 0, 1)).reshape(kT, kH * kW, Cout, K)
        x_index = lambda t, n, kt: (n, jnp.clip(t * st + kt - pt, 0, T - 1), 0, 0)

    # Sublane-align the contraction dim (zero rows contribute nothing).
    Kp = _round_up(K, 8)
    if Kp != K:
        x_in = jnp.pad(x_in, ((0, 0), (0, 0), (0, Kp - K), (0, 0)))
        wk = jnp.pad(wk, ((0, 0), (0, 0), (0, 0), (0, Kp - K)))
        K = Kp

    wk = wk.astype(compute_dtype)
    b2 = b.reshape(Cout, 1).astype(jnp.float32)

    kernel = functools.partial(
        _conv_kernel, taps=taps, w_pad=Wp, p_lanes=P,
        t_stride=st, t_pad=pt, t_total=T, folded=folded)

    # VMEM budget (x/w/out double-buffered + f32 accumulator); only raise the
    # scoped limit when the default (16-32 MiB) would not fit.
    csize = jnp.dtype(compute_dtype).itemsize
    vmem_need = (2 * K * L_pad * csize
                 + 2 * kH * kW * Cout * K * csize
                 + 2 * Cout * P * jnp.dtype(out_dtype).itemsize
                 + Cout * P * 4 + (1 << 20))
    cp = dict(dimension_semantics=("parallel", "parallel", "arbitrary"))
    if vmem_need > (16 << 20):
        cp["vmem_limit_bytes"] = int(min(vmem_need * 5 // 4, 96 << 20))
    # TODO(synk): for very large H*W planes, tile the lane axis with halo'd x
    # blocks instead of whole-plane blocks, and try allow_input_fusion so XLA
    # fuses the pad/flatten producer into the operand read.

    dense = pl.pallas_call(
        kernel,
        out_shape=jax.ShapeDtypeStruct((N, T_out, Cout, P), out_dtype),
        grid=(T_out, N, kT_grid),
        in_specs=[
            pl.BlockSpec((1, 1, K, L_pad), x_index),
            pl.BlockSpec((1, kH * kW, Cout, K), lambda t, n, kt: (kt, 0, 0, 0)),
            pl.BlockSpec((Cout, 1), lambda t, n, kt: (0, 0)),
        ],
        out_specs=pl.BlockSpec((1, 1, Cout, P), lambda t, n, kt: (n, t, 0, 0)),
        scratch_shapes=[pltpu.VMEM((Cout, P), jnp.float32)],
        compiler_params=pltpu.CompilerParams(**cp),
    )(x_in, wk, b2)
    return dense


def _extract_valid(dense, H, W, Wp, sh, sw):
    """Slice the valid (and spatially strided) pixels out of a dense output."""
    N, T_out, Cout, _ = dense.shape
    d = dense[..., :H * Wp].reshape(N, T_out, Cout, H, Wp)
    return d[:, :, :, ::sh, :W:sw]


def _init_conv(key, cout, cin, kt, kh, kw):
    wkey, bkey = jax.random.split(key)
    fan_in = cin * kt * kh * kw
    bound = 1.0 / float(fan_in) ** 0.5
    w = jax.random.uniform(wkey, (cout, cin, kt, kh, kw), jnp.float32, -bound, bound)
    b = jax.random.uniform(bkey, (cout,), jnp.float32, -bound, bound)
    return w, b


class InceptionLayerConcatPallas:
    """Pallas re-implementation of rodnet InceptionLayerConcat (forward only)."""

    def __init__(self, kernal_size, in_channel, stride, key):
        kx, ky = kernal_size
        self.kx, self.ky = kx, ky
        self.stride = tuple(stride)
        k1, k2a, k2b, k3a, k3b = jax.random.split(key, 5)
        self.w1, self.b1 = _init_conv(k1, 32, in_channel, 5, kx, ky)
        self.w2a, self.b2a = _init_conv(k2a, 64, in_channel, 5, kx, ky)
        self.w2b, self.b2b = _init_conv(k2b, 64, 64, 9, kx, ky)
        self.w3a, self.b3a = _init_conv(k3a, 64, in_channel, 5, kx, ky)
        self.w3b, self.b3b = _init_conv(k3b, 64, 64, 13, kx, ky)

    def __call__(self, x_ncthw):
        x = jnp.transpose(x_ncthw, (0, 2, 1, 3, 4))          # -> (N, T, C, H, W)
        N, T, C, H, W = x.shape
        st, sh, sw = self.stride
        Wp = W + 2 * (self.ky // 2)

        # Stage 1: branch2a + branch3a share input / kernel size / stride (1,1,1)
        # -> one fused 128-channel conv; intermediate kept in bf16.
        wA = jnp.concatenate([self.w2a, self.w3a], axis=0)
        bA = jnp.concatenate([self.b2a, self.b3a], axis=0)
        sA = conv3d_dense_pallas(x, wA, bA, 1, out_dtype=jnp.bfloat16)
        s = _extract_valid(sA, H, W, Wp, 1, 1)                # (N, T, 128, H, W)

        # Final stage: all three convs produce the same dense geometry.
        d1 = conv3d_dense_pallas(x, self.w1, self.b1, st)
        d2 = conv3d_dense_pallas(s[:, :, :64], self.w2b, self.b2b, st)
        d3 = conv3d_dense_pallas(s[:, :, 64:], self.w3b, self.b3b, st)

        # Concat the DENSE branch outputs, then one fused slice (valid pixels +
        # spatial stride) + transpose to NCTHW.
        # TODO(synk): channel-offset out_specs + input_output_aliases would let
        # the three calls write slices of a single buffer and drop the concat;
        # here we rely on XLA fusing concat+slice+transpose into one pass.
        dcat = jnp.concatenate([d1, d2, d3], axis=2)          # (N, T_out, 160, P)
        out = _extract_valid(dcat, H, W, Wp, sh, sw)          # (N, T_out, 160, Ho, Wo)
        return jnp.transpose(out, (0, 2, 1, 3, 4))            # -> NCTHW

    # ---- pure-JAX reference (correctness check only) ----
    def _conv_ref(self, x, w, b, stride):
        Cout = w.shape[0]
        kT, kH, kW = w.shape[2:]
        pad = [(kT // 2,) * 2, (kH // 2,) * 2, (kW // 2,) * 2]
        y = jax.lax.conv_general_dilated(
            x, w, window_strides=stride, padding=pad,
            dimension_numbers=("NCDHW", "OIDHW", "NCDHW"))
        return y + b.reshape(1, Cout, 1, 1, 1)

    def reference(self, x):
        b1 = self._conv_ref(x, self.w1, self.b1, self.stride)
        b2 = self._conv_ref(x, self.w2a, self.b2a, (1, 1, 1))
        b2 = self._conv_ref(b2, self.w2b, self.b2b, self.stride)
        b3 = self._conv_ref(x, self.w3a, self.b3a, (1, 1, 1))
        b3 = self._conv_ref(b3, self.w3b, self.b3b, self.stride)
        return jnp.concatenate([b1, b2, b3], axis=1)


if __name__ == "__main__":
    key = jax.random.PRNGKey(0)
    pkey, xkey = jax.random.split(key)

    N, Cin, T, H, W = 2, 4, 8, 16, 16
    x = jax.random.normal(xkey, (N, Cin, T, H, W), jnp.float32)

    def check(mod, x, want_shape, name):
        out = jax.block_until_ready(jax.jit(mod.__call__)(x))
        assert out.shape == want_shape, (name, out.shape)
        ref = mod.reference(x)
        err = float(jnp.max(jnp.abs(out - ref)))
        scale = float(jnp.max(jnp.abs(ref)))
        tol = 0.03 * max(1.0, scale)    # bf16-operand compute vs f32 reference
        assert err <= tol, f"{name}: max abs err {err:.4e} > tol {tol:.4e}"

    # stride (1,1,1)
    mod1 = InceptionLayerConcatPallas(kernal_size=(3, 3), in_channel=Cin,
                                      stride=(1, 1, 1), key=pkey)
    check(mod1, x, (N, 160, T, H, W), "stride(1,1,1)")

    # stride (2,2,2): temporal stride in the grid, spatial stride in the slice
    mod2 = InceptionLayerConcatPallas(kernal_size=(3, 3), in_channel=Cin,
                                      stride=(2, 2, 2), key=pkey)
    check(mod2, x, (N, 160, 4, 8, 8), "stride(2,2,2)")

    print("KERNEL_OK")
</pallas_src>

<mosaic_0001>
module attributes {stable_mosaic.version = 11 : i64} {
  func.func @_conv_kernel(%arg0: i32, %arg1: i32, %arg2: i32, %arg3: memref<1x1x24x512xbf16, #tpu.memory_space<vmem>>, %arg4: memref<1x9x32x24xbf16, #tpu.memory_space<vmem>>, %arg5: memref<32x1xf32, #tpu.memory_space<vmem>>, %arg6: memref<1x1x32x384xf32, #tpu.memory_space<vmem>>, %arg7: memref<32x384xf32, #tpu.memory_space<vmem>>) attributes {dimension_semantics = [#tpu.dimension_semantics<parallel>, #tpu.dimension_semantics<parallel>, #tpu.dimension_semantics<arbitrary>], iteration_bounds = array<i64: 8, 2, 1>, scalar_prefetch = 0 : i64, scratch_operands = 1 : i64, tpu.core_type = #tpu.core_type<tc>, window_params = [{transform_indices = @transform_0, window_bounds = array<i64: 1, 1, 24, 512>}, {transform_indices = @transform_1, window_bounds = array<i64: 1, 9, 32, 24>}, {pipeline_mode = #tpu.pipeline_mode<synchronous>, transform_indices = @transform_2, window_bounds = array<i64: 32, 1>}, {transform_indices = @transform_3, window_bounds = array<i64: 1, 1, 32, 384>}]} {
    %c0_i32 = arith.constant 0 : i32
    %0 = arith.cmpi eq, %arg2, %c0_i32 : i32
    %1 = arith.extui %0 : i1 to i32
    %c0_i32_0 = arith.constant 0 : i32
    %2 = arith.cmpi ne, %1, %c0_i32_0 : i32
    scf.if %2 {
      %c0_104 = arith.constant 0 : index
      %c0_105 = arith.constant 0 : index
      %78 = vector.load %arg5[%c0_104, %c0_105] : memref<32x1xf32, #tpu.memory_space<vmem>>, vector<32x1xf32>
      %79 = vector.shape_cast %78 : vector<32x1xf32> to vector<32x1xf32>
      %80 = vector.broadcast %79 : vector<32x1xf32> to vector<32x384xf32>
      %c0_106 = arith.constant 0 : index
      %c0_107 = arith.constant 0 : index
      %81 = vector.load %arg7[%c0_106, %c0_107] : memref<32x384xf32, #tpu.memory_space<vmem>>, vector<32x384xf32>
      tpu.vector_store %arg7[%c0_106, %c0_107], %80 {strides = array<i32>} : memref<32x384xf32, #tpu.memory_space<vmem>>, vector<32x384xf32>,
    } else {
    }
    %c0 = arith.constant 0 : index
    %c0_1 = arith.constant 0 : index
    %c0_2 = arith.constant 0 : index
    %c0_3 = arith.constant 0 : index
    %3 = vector.load %arg3[%c0, %c0_1, %c0_2, %c0_3] : memref<1x1x24x512xbf16, #tpu.memory_space<vmem>>, vector<1x1x24x384xbf16>
    %4 = vector.shape_cast %3 : vector<1x1x24x384xbf16> to vector<24x384xbf16>
    %c0_4 = arith.constant 0 : index
    %c0_5 = arith.constant 0 : index
    %5 = vector.load %arg7[%c0_4, %c0_5] : memref<32x384xf32, #tpu.memory_space<vmem>>, vector<32x384xf32>
    %c0_6 = arith.constant 0 : index
    %c0_7 = arith.constant 0 : index
    %c0_8 = arith.constant 0 : index
    %c0_9 = arith.constant 0 : index
    %6 = vector.load %arg4[%c0_6, %c0_7, %c0_8, %c0_9] : memref<1x9x32x24xbf16, #tpu.memory_space<vmem>>, vector<1x1x32x24xbf16>
    %7 = vector.shape_cast %6 : vector<1x1x32x24xbf16> to vector<32x24xbf16>
    %cst = arith.constant dense<0.000000e+00> : vector<32x384xf32>
    %8 = tpu.matmul %7, %4, %cst {dimension_numbers = #tpu.dot_dimension_numbers<[1], [0], [0], [1], [0, 0, 1, 1], [], []>} : vector<32x24xbf16>, vector<24x384xbf16>, vector<32x384xf32> -> vector<32x384xf32>
    %9 = arith.addf %5, %8 : vector<32x384xf32>
    %c0_10 = arith.constant 0 : index
    %c0_11 = arith.constant 0 : index
    %10 = vector.load %arg7[%c0_10, %c0_11] : memref<32x384xf32, #tpu.memory_space<vmem>>, vector<32x384xf32>
    tpu.vector_store %arg7[%c0_10, %c0_11], %9 {strides = array<i32>} : memref<32x384xf32, #tpu.memory_space<vmem>>, vector<32x384xf32>,
    %c0_12 = arith.constant 0 : index
    %c0_13 = arith.constant 0 : index
    %c0_14 = arith.constant 0 : index
    %c1 = arith.constant 1 : index
    %11 = vector.load %arg3[%c0_12, %c0_13, %c0_14, %c1] : memref<1x1x24x512xbf16, #tpu.memory_space<vmem>>, vector<1x1x24x384xbf16>
    %12 = vector.shape_cast %11 : vector<1x1x24x384xbf16> to vector<24x384xbf16>
    %c0_15 = arith.constant 0 : index
    %c0_16 = arith.constant 0 : index
    %13 = vector.load %arg7[%c0_15, %c0_16] : memref<32x384xf32, #tpu.memory_space<vmem>>, vector<32x384xf32>
    %c0_17 = arith.constant 0 : index
    %c1_18 = arith.constant 1 : index
    %c0_19 = arith.constant 0 : index
    %c0_20 = arith.constant 0 : index
    %14 = vector.load %arg4[%c0_17, %c1_18, %c0_19, %c0_20] : memref<1x9x32x24xbf16, #tpu.memory_space<vmem>>, vector<1x1x32x24xbf16>
    %15 = vector.shape_cast %14 : vector<1x1x32x24xbf16> to vector<32x24xbf16>
    %cst_21 = arith.constant dense<0.000000e+00> : vector<32x384xf32>
    %16 = tpu.matmul %15, %12, %cst_21 {dimension_numbers = #tpu.dot_dimension_numbers<[1], [0], [0], [1], [0, 0, 1, 1], [], []>} : vector<32x24xbf16>, vector<24x384xbf16>, vector<32x384xf32> -> vector<32x384xf32>
    %17 = arith.addf %13, %16 : vector<32x384xf32>
    %c0_22 = arith.constant 0 : index
    %c0_23 = arith.constant 0 : index
    %18 = vector.load %arg7[%c0_22, %c0_23] : memref<32x384xf32, #tpu.memory_space<vmem>>, vector<32x384xf32>
    tpu.vector_store %arg7[%c0_22, %c0_23], %17 {strides = array<i32>} : memref<32x384xf32, #tpu.memory_space<vmem>>, vector<32x384xf32>,
    %c0_24 = arith.constant 0 : index
    %c0_25 = arith.constant 0 : index
    %c0_26 = arith.constant 0 : index
    %c2 = arith.constant 2 : index
    %19 = vector.load %arg3[%c0_24, %c0_25, %c0_26, %c2] : memref<1x1x24x512xbf16, #tpu.memory_space<vmem>>, vector<1x1x24x384xbf16>
    %20 = vector.shape_cast %19 : vector<1x1x24x384xbf16> to vector<24x384xbf16>
    %c0_27 = arith.constant 0 : index
    %c0_28 = arith.constant 0 : index
    %21 = vector.load %arg7[%c0_27, %c0_28] : memref<32x384xf32, #tpu.memory_space<vmem>>, vector<32x384xf32>
    %c0_29 = arith.constant 0 : index
    %c2_30 = arith.constant 2 : index
    %c0_31 = arith.constant 0 : index
    %c0_32 = arith.constant 0 : index
    %22 = vector.load %arg4[%c0_29, %c2_30, %c0_31, %c0_32] : memref<1x9x32x24xbf16, #tpu.memory_space<vmem>>, vector<1x1x32x24xbf16>
    %23 = vector.shape_cast %22 : vector<1x1x32x24xbf16> to vector<32x24xbf16>
    %cst_33 = arith.constant dense<0.000000e+00> : vector<32x384xf32>
    %24 = tpu.matmul %23, %20, %cst_33 {dimension_numbers = #tpu.dot_dimension_numbers<[1], [0], [0], [1], [0, 0, 1, 1], [], []>} : vector<32x24xbf16>, vector<24x384xbf16>, vector<32x384xf32> -> vector<32x384xf32>
    %25 = arith.addf %21, %24 : vector<32x384xf32>
    %c0_34 = arith.constant 0 : index
    %c0_35 = arith.constant 0 : index
    %26 = vector.load %arg7[%c0_34, %c0_35] : memref<32x384xf32, #tpu.memory_space<vmem>>, vector<32x384xf32>
    tpu.vector_store %arg7[%c0_34, %c0_35], %25 {strides = array<i32>} : memref<32x384xf32, #tpu.memory_space<vmem>>, vector<32x384xf32>,
    %c0_36 = arith.constant 0 : index
    %c0_37 = arith.constant 0 : index
    %c0_38 = arith.constant 0 : index
    %c18 = arith.constant 18 : index
    %27 = vector.load %arg3[%c0_36, %c0_37, %c0_38, %c18] : memref<1x1x24x512xbf16, #tpu.memory_space<vmem>>, vector<1x1x24x384xbf16>
    %28 = vector.shape_cast %27 : vector<1x1x24x384xbf16> to vector<24x384xbf16>
    %c0_39 = arith.constant 0 : index
    %c0_40 = arith.constant 0 : index
    %29 = vector.load %arg7[%c0_39, %c0_40] : memref<32x384xf32, #tpu.memory_space<vmem>>, vector<32x384xf32>
    %c0_41 = arith.constant 0 : index
    %c3 = arith.constant 3 : index
    %c0_42 = arith.constant 0 : index
    %c0_43 = arith.constant 0 : index
    %30 = vector.load %arg4[%c0_41, %c3, %c0_42, %c0_43] : memref<1x9x32x24xbf16, #tpu.memory_space<vmem>>, vector<1x1x32x24xbf16>
    %31 = vector.shape_cast %30 : vector<1x1x32x24xbf16> to vector<32x24xbf16>
    %cst_44 = arith.constant dense<0.000000e+00> : vector<32x384xf32>
    %32 = tpu.matmul %31, %28, %cst_44 {dimension_numbers = #tpu.dot_dimension_numbers<[1], [0], [0], [1], [0, 0, 1, 1], [], []>} : vector<32x24xbf16>, vector<24x384xbf16>, vector<32x384xf32> -> vector<32x384xf32>
    %33 = arith.addf %29, %32 : vector<32x384xf32>
    %c0_45 = arith.constant 0 : index
    %c0_46 = arith.constant 0 : index
    %34 = vector.load %arg7[%c0_45, %c0_46] : memref<32x384xf32, #tpu.memory_space<vmem>>, vector<32x384xf32>
    tpu.vector_store %arg7[%c0_45, %c0_46], %33 {strides = array<i32>} : memref<32x384xf32, #tpu.memory_space<vmem>>, vector<32x384xf32>,
    %c0_47 = arith.constant 0 : index
    %c0_48 = arith.constant 0 : index
    %c0_49 = arith.constant 0 : index
    %c19 = arith.constant 19 : index
    %35 = vector.load %arg3[%c0_47, %c0_48, %c0_49, %c19] : memref<1x1x24x512xbf16, #tpu.memory_space<vmem>>, vector<1x1x24x384xbf16>
    %36 = vector.shape_cast %35 : vector<1x1x24x384xbf16> to vector<24x384xbf16>
    %c0_50 = arith.constant 0 : index
    %c0_51 = arith.constant 0 : index
    %37 = vector.load %arg7[%c0_50, %c0_51] : memref<32x384xf32, #tpu.memory_space<vmem>>, vector<32x384xf32>
    %c0_52 = arith.constant 0 : index
    %c4 = arith.constant 4 : index
    %c0_53 = arith.constant 0 : index
    %c0_54 = arith.constant 0 : index
    %38 = vector.load %arg4[%c0_52, %c4, %c0_53, %c0_54] : memref<1x9x32x24xbf16, #tpu.memory_space<vmem>>, vector<1x1x32x24xbf16>
    %39 = vector.shape_cast %38 : vector<1x1x32x24xbf16> to vector<32x24xbf16>
    %cst_55 = arith.constant dense<0.000000e+00> : vector<32x384xf32>
    %40 = tpu.matmul %39, %36, %cst_55 {dimension_numbers = #tpu.dot_dimension_numbers<[1], [0], [0], [1], [0, 0, 1, 1], [], []>} : vector<32x24xbf16>, vector<24x384xbf16>, vector<32x384xf32> -> vector<32x384xf32>
    %41 = arith.addf %37, %40 : vector<32x384xf32>
    %c0_56 = arith.constant 0 : index
    %c0_57 = arith.constant 0 : index
    %42 = vector.load %arg7[%c0_56, %c0_57] : memref<32x384xf32, #tpu.memory_space<vmem>>, vector<32x384xf32>
    tpu.vector_store %arg7[%c0_56, %c0_57], %41 {strides = array<i32>} : memref<32x384xf32, #tpu.memory_space<vmem>>, vector<32x384xf32>,
    %c0_58 = arith.constant 0 : index
    %c0_59 = arith.constant 0 : index
    %c0_60 = arith.constant 0 : index
    %c20 = arith.constant 20 : index
    %43 = vector.load %arg3[%c0_58, %c0_59, %c0_60, %c20] : memref<1x1x24x512xbf16, #tpu.memory_space<vmem>>, vector<1x1x24x384xbf16>
    %44 = vector.shape_cast %43 : vector<1x1x24x384xbf16> to vector<24x384xbf16>
    %c0_61 = arith.constant 0 : index
    %c0_62 = arith.constant 0 : index
    %45 = vector.load %arg7[%c0_61, %c0_62] : memref<32x384xf32, #tpu.memory_space<vmem>>, vector<32x384xf32>
    %c0_63 = arith.constant 0 : index
    %c5 = arith.constant 5 : index
    %c0_64 = arith.constant 0 : index
    %c0_65 = arith.constant 0 : index
    %46 = vector.load %arg4[%c0_63, %c5, %c0_64, %c0_65] : memref<1x9x32x24xbf16, #tpu.memory_space<vmem>>, vector<1x1x32x24xbf16>
    %47 = vector.shape_cast %46 : vector<1x1x32x24xbf16> to vector<32x24xbf16>
    %cst_66 = arith.constant dense<0.000000e+00> : vector<32x384xf32>
    %48 = tpu.matmul %47, %44, %cst_66 {dimension_numbers = #tpu.dot_dimension_numbers<[1], [0], [0], [1], [0, 0, 1, 1], [], []>} : vector<32x24xbf16>, vector<24x384xbf16>, vector<32x384xf32> -> vector<32x384xf32>
    %49 = arith.addf %45, %48 : vector<32x384xf32>
    %c0_67 = arith.constant 0 : index
    %c0_68 = arith.constant 0 : index
    %50 = vector.load %arg7[%c0_67, %c0_68] : memref<32x384xf32, #tpu.memory_space<vmem>>, vector<32x384xf32>
    tpu.vector_store %arg7[%c0_67, %c0_68], %49 {strides = array<i32>} : memref<32x384xf32, #tpu.memory_space<vmem>>, vector<32x384xf32>,
    %c0_69 = arith.constant 0 : index
    %c0_70 = arith.constant 0 : index
    %c0_71 = arith.constant 0 : index
    %c36 = arith.constant 36 : index
    %51 = vector.load %arg3[%c0_69, %c0_70, %c0_71, %c36] : memref<1x1x24x512xbf16, #tpu.memory_space<vmem>>, vector<1x1x24x384xbf16>
    %52 = vector.shape_cast %51 : vector<1x1x24x384xbf16> to vector<24x384xbf16>
    %c0_72 = arith.constant 0 : index
    %c0_73 = arith.constant 0 : index
    %53 = vector.load %arg7[%c0_72, %c0_73] : memref<32x384xf32, #tpu.memory_space<vmem>>, vector<32x384xf32>
    %c0_74 = arith.constant 0 : index
    %c6 = arith.constant 6 : index
    %c0_75 = arith.constant 0 : index
    %c0_76 = arith.constant 0 : index
    %54 = vector.load %arg4[%c0_74, %c6, %c0_75, %c0_76] : memref<1x9x32x24xbf16, #tpu.memory_space<vmem>>, vector<1x1x32x24xbf16>
    %55 = vector.shape_cast %54 : vector<1x1x32x24xbf16> to vector<32x24xbf16>
    %cst_77 = arith.constant dense<0.000000e+00> : vector<32x384xf32>
    %56 = tpu.matmul %55, %52, %cst_77 {dimension_numbers = #tpu.dot_dimension_numbers<[1], [0], [0], [1], [0, 0, 1, 1], [], []>} : vector<32x24xbf16>, vector<24x384xbf16>, vector<32x384xf32> -> vector<32x384xf32>
    %57 = arith.addf %53, %56 : vector<32x384xf32>
    %c0_78 = arith.constant 0 : index
    %c0_79 = arith.constant 0 : index
    %58 = vector.load %arg7[%c0_78, %c0_79] : memref<32x384xf32, #tpu.memory_space<vmem>>, vector<32x384xf32>
    tpu.vector_store %arg7[%c0_78, %c0_79], %57 {strides = array<i32>} : memref<32x384xf32, #tpu.memory_space<vmem>>, vector<32x384xf32>,
    %c0_80 = arith.constant 0 : index
    %c0_81 = arith.constant 0 : index
    %c0_82 = arith.constant 0 : index
    %c37 = arith.constant 37 : index
    %59 = vector.load %arg3[%c0_80, %c0_81, %c0_82, %c37] : memref<1x1x24x512xbf16, #tpu.memory_space<vmem>>, vector<1x1x24x384xbf16>
    %60 = vector.shape_cast %59 : vector<1x1x24x384xbf16> to vector<24x384xbf16>
    %c0_83 = arith.constant 0 : index
    %c0_84 = arith.constant 0 : index
    %61 = vector.load %arg7[%c0_83, %c0_84] : memref<32x384xf32, #tpu.memory_space<vmem>>, vector<32x384xf32>
    %c0_85 = arith.constant 0 : index
    %c7 = arith.constant 7 : index
    %c0_86 = arith.constant 0 : index
    %c0_87 = arith.constant 0 : index
    %62 = vector.load %arg4[%c0_85, %c7, %c0_86, %c0_87] : memref<1x9x32x24xbf16, #tpu.memory_space<vmem>>, vector<1x1x32x24xbf16>
    %63 = vector.shape_cast %62 : vector<1x1x32x24xbf16> to vector<32x24xbf16>
    %cst_88 = arith.constant dense<0.000000e+00> : vector<32x384xf32>
    %64 = tpu.matmul %63, %60, %cst_88 {dimension_numbers = #tpu.dot_dimension_numbers<[1], [0], [0], [1], [0, 0, 1, 1], [], []>} : vector<32x24xbf16>, vector<24x384xbf16>, vector<32x384xf32> -> vector<32x384xf32>
    %65 = arith.addf %61, %64 : vector<32x384xf32>
    %c0_89 = arith.constant 0 : index
    %c0_90 = arith.constant 0 : index
    %66 = vector.load %arg7[%c0_89, %c0_90] : memref<32x384xf32, #tpu.memory_space<vmem>>, vector<32x384xf32>
    tpu.vector_store %arg7[%c0_89, %c0_90], %65 {strides = array<i32>} : memref<32x384xf32, #tpu.memory_space<vmem>>, vector<32x384xf32>,
    %c0_91 = arith.constant 0 : index
    %c0_92 = arith.constant 0 : index
    %c0_93 = arith.constant 0 : index
    %c38 = arith.constant 38 : index
    %67 = vector.load %arg3[%c0_91, %c0_92, %c0_93, %c38] : memref<1x1x24x512xbf16, #tpu.memory_space<vmem>>, vector<1x1x24x384xbf16>
    %68 = vector.shape_cast %67 : vector<1x1x24x384xbf16> to vector<24x384xbf16>
    %c0_94 = arith.constant 0 : index
    %c0_95 = arith.constant 0 : index
    %69 = vector.load %arg7[%c0_94, %c0_95] : memref<32x384xf32, #tpu.memory_space<vmem>>, vector<32x384xf32>
    %c0_96 = arith.constant 0 : index
    %c8 = arith.constant 8 : index
    %c0_97 = arith.constant 0 : index
    %c0_98 = arith.constant 0 : index
    %70 = vector.load %arg4[%c0_96, %c8, %c0_97, %c0_98] : memref<1x9x32x24xbf16, #tpu.memory_space<vmem>>, vector<1x1x32x24xbf16>
    %71 = vector.shape_cast %70 : vector<1x1x32x24xbf16> to vector<32x24xbf16>
    %cst_99 = arith.constant dense<0.000000e+00> : vector<32x384xf32>
    %72 = tpu.matmul %71, %68, %cst_99 {dimension_numbers = #tpu.dot_dimension_numbers<[1], [0], [0], [1], [0, 0, 1, 1], [], []>} : vector<32x24xbf16>, vector<24x384xbf16>, vector<32x384xf32> -> vector<32x384xf32>
    %73 = arith.addf %69, %72 : vector<32x384xf32>
    %c0_100 = arith.constant 0 : index
    %c0_101 = arith.constant 0 : index
    %74 = vector.load %arg7[%c0_100, %c0_101] : memref<32x384xf32, #tpu.memory_space<vmem>>, vector<32x384xf32>
    tpu.vector_store %arg7[%c0_100, %c0_101], %73 {strides = array<i32>} : memref<32x384xf32, #tpu.memory_space<vmem>>, vector<32x384xf32>,
    %c0_i32_102 = arith.constant 0 : i32
    %75 = arith.cmpi eq, %arg2, %c0_i32_102 : i32
    %76 = arith.extui %75 : i1 to i32
    %c0_i32_103 = arith.constant 0 : i32
    %77 = arith.cmpi ne, %76, %c0_i32_103 : i32
    scf.if %77 {
      %c0_104 = arith.constant 0 : index
      %c0_105 = arith.constant 0 : index
      %78 = vector.load %arg7[%c0_104, %c0_105] : memref<32x384xf32, #tpu.memory_space<vmem>>, vector<32x384xf32>
      %c0_106 = arith.constant 0 : index
      %c0_107 = arith.constant 0 : index
      %c0_108 = arith.constant 0 : index
      %c0_109 = arith.constant 0 : index
      %79 = vector.load %arg6[%c0_106, %c0_107, %c0_108, %c0_109] : memref<1x1x32x384xf32, #tpu.memory_space<vmem>>, vector<1x1x32x384xf32>
      %80 = vector.shape_cast %79 : vector<1x1x32x384xf32> to vector<32x384xf32>
      %81 = vector.shape_cast %78 : vector<32x384xf32> to vector<1x1x32x384xf32>
      tpu.vector_store %arg6[%c0_106, %c0_107, %c0_108, %c0_109], %81 {strides = array<i32>} : memref<1x1x32x384xf32, #tpu.memory_space<vmem>>, vector<1x1x32x384xf32>,
    } else {
    }
    return
  }
  func.func @transform_0(%arg0: i32, %arg1: i32, %arg2: i32) -> (i32, i32, i32, i32) {
    %c0_i32 = arith.constant 0 : i32
    %c0_i32_0 = arith.constant 0 : i32
    %c0_i32_1 = arith.constant 0 : i32
    return %arg1, %arg0, %c0_i32, %c0_i32_0 : i32, i32, i32, i32
  }
  func.func @transform_1(%arg0: i32, %arg1: i32, %arg2: i32) -> (i32, i32, i32, i32) {
    %c0_i32 = arith.constant 0 : i32
    %c0_i32_0 = arith.constant 0 : i32
    %c0_i32_1 = arith.constant 0 : i32
    %c0_i32_2 = arith.constant 0 : i32
    return %arg2, %c0_i32, %c0_i32_0, %c0_i32_1 : i32, i32, i32, i32
  }
  func.func @transform_2(%arg0: i32, %arg1: i32, %arg2: i32) -> (i32, i32) {
    %c0_i32 = arith.constant 0 : i32
    %c0_i32_0 = arith.constant 0 : i32
    %c0_i32_1 = arith.constant 0 : i32
    return %c0_i32, %c0_i32_0 : i32, i32
  }
  func.func @transform_3(%arg0: i32, %arg1: i32, %arg2: i32) -> (i32, i32, i32, i32) {
    %c0_i32 = arith.constant 0 : i32
    %c0_i32_0 = arith.constant 0 : i32
    %c0_i32_1 = arith.constant 0 : i32
    return %arg1, %arg0, %c0_i32, %c0_i32_0 : i32, i32, i32, i32
  }
}

module attributes {stable_mosaic.version = 11 : i64} {
  func.func @_conv_kernel(%arg0: i32, %arg1: i32, %arg2: i32, %arg3: memref<1x1x24x512xbf16, #tpu.memory_space<vmem>>, %arg4: memref<1x9x128x24xbf16, #tpu.memory_space<vmem>>, %arg5: memref<128x1xf32, #tpu.memory_space<vmem>>, %arg6: memref<1x1x128x384xbf16, #tpu.memory_space<vmem>>, %arg7: memref<128x384xf32, #tpu.memory_space<vmem>>) attributes {dimension_semantics = [#tpu.dimension_semantics<parallel>, #tpu.dimension_semantics<parallel>, #tpu.dimension_semantics<arbitrary>], iteration_bounds = array<i64: 8, 2, 1>, scalar_prefetch = 0 : i64, scratch_operands = 1 : i64, tpu.core_type = #tpu.core_type<tc>, window_params = [{transform_indices = @transform_0, window_bounds = array<i64: 1, 1, 24, 512>}, {transform_indices = @transform_1, window_bounds = array<i64: 1, 9, 128, 24>}, {pipeline_mode = #tpu.pipeline_mode<synchronous>, transform_indices = @transform_2, window_bounds = array<i64: 128, 1>}, {transform_indices = @transform_3, window_bounds = array<i64: 1, 1, 128, 384>}]} {
    %c0_i32 = arith.constant 0 : i32
    %0 = arith.cmpi eq, %arg2, %c0_i32 : i32
    %1 = arith.extui %0 : i1 to i32
    %c0_i32_0 = arith.constant 0 : i32
    %2 = arith.cmpi ne, %1, %c0_i32_0 : i32
    scf.if %2 {
      %c0_104 = arith.constant 0 : index
      %c0_105 = arith.constant 0 : index
      %78 = vector.load %arg5[%c0_104, %c0_105] : memref<128x1xf32, #tpu.memory_space<vmem>>, vector<128x1xf32>
      %79 = vector.shape_cast %78 : vector<128x1xf32> to vector<128x1xf32>
      %80 = vector.broadcast %79 : vector<128x1xf32> to vector<128x384xf32>
      %c0_106 = arith.constant 0 : index
      %c0_107 = arith.constant 0 : index
      %81 = vector.load %arg7[%c0_106, %c0_107] : memref<128x384xf32, #tpu.memory_space<vmem>>, vector<128x384xf32>
      tpu.vector_store %arg7[%c0_106, %c0_107], %80 {strides = array<i32>} : memref<128x384xf32, #tpu.memory_space<vmem>>, vector<128x384xf32>,
    } else {
    }
    %c0 = arith.constant 0 : index
    %c0_1 = arith.constant 0 : index
    %c0_2 = arith.constant 0 : index
    %c0_3 = arith.constant 0 : index
    %3 = vector.load %arg3[%c0, %c0_1, %c0_2, %c0_3] : memref<1x1x24x512xbf16, #tpu.memory_space<vmem>>, vector<1x1x24x384xbf16>
    %4 = vector.shape_cast %3 : vector<1x1x24x384xbf16> to vector<24x384xbf16>
    %c0_4 = arith.constant 0 : index
    %c0_5 = arith.constant 0 : index
    %5 = vector.load %arg7[%c0_4, %c0_5] : memref<128x384xf32, #tpu.memory_space<vmem>>, vector<128x384xf32>
    %c0_6 = arith.constant 0 : index
    %c0_7 = arith.constant 0 : index
    %c0_8 = arith.constant 0 : index
    %c0_9 = arith.constant 0 : index
    %6 = vector.load %arg4[%c0_6, %c0_7, %c0_8, %c0_9] : memref<1x9x128x24xbf16, #tpu.memory_space<vmem>>, vector<1x1x128x24xbf16>
    %7 = vector.shape_cast %6 : vector<1x1x128x24xbf16> to vector<128x24xbf16>
    %cst = arith.constant dense<0.000000e+00> : vector<128x384xf32>
    %8 = tpu.matmul %7, %4, %cst {dimension_numbers = #tpu.dot_dimension_numbers<[1], [0], [0], [1], [0, 0, 1, 1], [], []>} : vector<128x24xbf16>, vector<24x384xbf16>, vector<128x384xf32> -> vector<128x384xf32>
    %9 = arith.addf %5, %8 : vector<128x384xf32>
    %c0_10 = arith.constant 0 : index
    %c0_11 = arith.constant 0 : index
    %10 = vector.load %arg7[%c0_10, %c0_11] : memref<128x384xf32, #tpu.memory_space<vmem>>, vector<128x384xf32>
    tpu.vector_store %arg7[%c0_10, %c0_11], %9 {strides = array<i32>} : memref<128x384xf32, #tpu.memory_space<vmem>>, vector<128x384xf32>,
    %c0_12 = arith.constant 0 : index
    %c0_13 = arith.constant 0 : index
    %c0_14 = arith.constant 0 : index
    %c1 = arith.constant 1 : index
    %11 = vector.load %arg3[%c0_12, %c0_13, %c0_14, %c1] : memref<1x1x24x512xbf16, #tpu.memory_space<vmem>>, vector<1x1x24x384xbf16>
    %12 = vector.shape_cast %11 : vector<1x1x24x384xbf16> to vector<24x384xbf16>
    %c0_15 = arith.constant 0 : index
    %c0_16 = arith.constant 0 : index
    %13 = vector.load %arg7[%c0_15, %c0_16] : memref<128x384xf32, #tpu.memory_space<vmem>>, vector<128x384xf32>
    %c0_17 = arith.constant 0 : index
    %c1_18 = arith.constant 1 : index
    %c0_19 = arith.constant 0 : index
    %c0_20 = arith.constant 0 : index
    %14 = vector.load %arg4[%c0_17, %c1_18, %c0_19, %c0_20] : memref<1x9x128x24xbf16, #tpu.memory_space<vmem>>, vector<1x1x128x24xbf16>
    %15 = vector.shape_cast %14 : vector<1x1x128x24xbf16> to vector<128x24xbf16>
    %cst_21 = arith.constant dense<0.000000e+00> : vector<128x384xf32>
    %16 = tpu.matmul %15, %12, %cst_21 {dimension_numbers = #tpu.dot_dimension_numbers<[1], [0], [0], [1], [0, 0, 1, 1], [], []>} : vector<128x24xbf16>, vector<24x384xbf16>, vector<128x384xf32> -> vector<128x384xf32>
    %17 = arith.addf %13, %16 : vector<128x384xf32>
    %c0_22 = arith.constant 0 : index
    %c0_23 = arith.constant 0 : index
    %18 = vector.load %arg7[%c0_22, %c0_23] : memref<128x384xf32, #tpu.memory_space<vmem>>, vector<128x384xf32>
    tpu.vector_store %arg7[%c0_22, %c0_23], %17 {strides = array<i32>} : memref<128x384xf32, #tpu.memory_space<vmem>>, vector<128x384xf32>,
    %c0_24 = arith.constant 0 : index
    %c0_25 = arith.constant 0 : index
    %c0_26 = arith.constant 0 : index
    %c2 = arith.constant 2 : index
    %19 = vector.load %arg3[%c0_24, %c0_25, %c0_26, %c2] : memref<1x1x24x512xbf16, #tpu.memory_space<vmem>>, vector<1x1x24x384xbf16>
    %20 = vector.shape_cast %19 : vector<1x1x24x384xbf16> to vector<24x384xbf16>
    %c0_27 = arith.constant 0 : index
    %c0_28 = arith.constant 0 : index
    %21 = vector.load %arg7[%c0_27, %c0_28] : memref<128x384xf32, #tpu.memory_space<vmem>>, vector<128x384xf32>
    %c0_29 = arith.constant 0 : index
    %c2_30 = arith.constant 2 : index
    %c0_31 = arith.constant 0 : index
    %c0_32 = arith.constant 0 : index
    %22 = vector.load %arg4[%c0_29, %c2_30, %c0_31, %c0_32] : memref<1x9x128x24xbf16, #tpu.memory_space<vmem>>, vector<1x1x128x24xbf16>
    %23 = vector.shape_cast %22 : vector<1x1x128x24xbf16> to vector<128x24xbf16>
    %cst_33 = arith.constant dense<0.000000e+00> : vector<128x384xf32>
    %24 = tpu.matmul %23, %20, %cst_33 {dimension_numbers = #tpu.dot_dimension_numbers<[1], [0], [0], [1], [0, 0, 1, 1], [], []>} : vector<128x24xbf16>, vector<24x384xbf16>, vector<128x384xf32> -> vector<128x384xf32>
    %25 = arith.addf %21, %24 : vector<128x384xf32>
    %c0_34 = arith.constant 0 : index
    %c0_35 = arith.constant 0 : index
    %26 = vector.load %arg7[%c0_34, %c0_35] : memref<128x384xf32, #tpu.memory_space<vmem>>, vector<128x384xf32>
    tpu.vector_store %arg7[%c0_34, %c0_35], %25 {strides = array<i32>} : memref<128x384xf32, #tpu.memory_space<vmem>>, vector<128x384xf32>,
    %c0_36 = arith.constant 0 : index
    %c0_37 = arith.constant 0 : index
    %c0_38 = arith.constant 0 : index
    %c18 = arith.constant 18 : index
    %27 = vector.load %arg3[%c0_36, %c0_37, %c0_38, %c18] : memref<1x1x24x512xbf16, #tpu.memory_space<vmem>>, vector<1x1x24x384xbf16>
    %28 = vector.shape_cast %27 : vector<1x1x24x384xbf16> to vector<24x384xbf16>
    %c0_39 = arith.constant 0 : index
    %c0_40 = arith.constant 0 : index
    %29 = vector.load %arg7[%c0_39, %c0_40] : memref<128x384xf32, #tpu.memory_space<vmem>>, vector<128x384xf32>
    %c0_41 = arith.constant 0 : index
    %c3 = arith.constant 3 : index
    %c0_42 = arith.constant 0 : index
    %c0_43 = arith.constant 0 : index
    %30 = vector.load %arg4[%c0_41, %c3, %c0_42, %c0_43] : memref<1x9x128x24xbf16, #tpu.memory_space<vmem>>, vector<1x1x128x24xbf16>
    %31 = vector.shape_cast %30 : vector<1x1x128x24xbf16> to vector<128x24xbf16>
    %cst_44 = arith.constant dense<0.000000e+00> : vector<128x384xf32>
    %32 = tpu.matmul %31, %28, %cst_44 {dimension_numbers = #tpu.dot_dimension_numbers<[1], [0], [0], [1], [0, 0, 1, 1], [], []>} : vector<128x24xbf16>, vector<24x384xbf16>, vector<128x384xf32> -> vector<128x384xf32>
    %33 = arith.addf %29, %32 : vector<128x384xf32>
    %c0_45 = arith.constant 0 : index
    %c0_46 = arith.constant 0 : index
    %34 = vector.load %arg7[%c0_45, %c0_46] : memref<128x384xf32, #tpu.memory_space<vmem>>, vector<128x384xf32>
    tpu.vector_store %arg7[%c0_45, %c0_46], %33 {strides = array<i32>} : memref<128x384xf32, #tpu.memory_space<vmem>>, vector<128x384xf32>,
    %c0_47 = arith.constant 0 : index
    %c0_48 = arith.constant 0 : index
    %c0_49 = arith.constant 0 : index
    %c19 = arith.constant 19 : index
    %35 = vector.load %arg3[%c0_47, %c0_48, %c0_49, %c19] : memref<1x1x24x512xbf16, #tpu.memory_space<vmem>>, vector<1x1x24x384xbf16>
    %36 = vector.shape_cast %35 : vector<1x1x24x384xbf16> to vector<24x384xbf16>
    %c0_50 = arith.constant 0 : index
    %c0_51 = arith.constant 0 : index
    %37 = vector.load %arg7[%c0_50, %c0_51] : memref<128x384xf32, #tpu.memory_space<vmem>>, vector<128x384xf32>
    %c0_52 = arith.constant 0 : index
    %c4 = arith.constant 4 : index
    %c0_53 = arith.constant 0 : index
    %c0_54 = arith.constant 0 : index
    %38 = vector.load %arg4[%c0_52, %c4, %c0_53, %c0_54] : memref<1x9x128x24xbf16, #tpu.memory_space<vmem>>, vector<1x1x128x24xbf16>
    %39 = vector.shape_cast %38 : vector<1x1x128x24xbf16> to vector<128x24xbf16>
    %cst_55 = arith.constant dense<0.000000e+00> : vector<128x384xf32>
    %40 = tpu.matmul %39, %36, %cst_55 {dimension_numbers = #tpu.dot_dimension_numbers<[1], [0], [0], [1], [0, 0, 1, 1], [], []>} : vector<128x24xbf16>, vector<24x384xbf16>, vector<128x384xf32> -> vector<128x384xf32>
    %41 = arith.addf %37, %40 : vector<128x384xf32>
    %c0_56 = arith.constant 0 : index
    %c0_57 = arith.constant 0 : index
    %42 = vector.load %arg7[%c0_56, %c0_57] : memref<128x384xf32, #tpu.memory_space<vmem>>, vector<128x384xf32>
    tpu.vector_store %arg7[%c0_56, %c0_57], %41 {strides = array<i32>} : memref<128x384xf32, #tpu.memory_space<vmem>>, vector<128x384xf32>,
    %c0_58 = arith.constant 0 : index
    %c0_59 = arith.constant 0 : index
    %c0_60 = arith.constant 0 : index
    %c20 = arith.constant 20 : index
    %43 = vector.load %arg3[%c0_58, %c0_59, %c0_60, %c20] : memref<1x1x24x512xbf16, #tpu.memory_space<vmem>>, vector<1x1x24x384xbf16>
    %44 = vector.shape_cast %43 : vector<1x1x24x384xbf16> to vector<24x384xbf16>
    %c0_61 = arith.constant 0 : index
    %c0_62 = arith.constant 0 : index
    %45 = vector.load %arg7[%c0_61, %c0_62] : memref<128x384xf32, #tpu.memory_space<vmem>>, vector<128x384xf32>
    %c0_63 = arith.constant 0 : index
    %c5 = arith.constant 5 : index
    %c0_64 = arith.constant 0 : index
    %c0_65 = arith.constant 0 : index
    %46 = vector.load %arg4[%c0_63, %c5, %c0_64, %c0_65] : memref<1x9x128x24xbf16, #tpu.memory_space<vmem>>, vector<1x1x128x24xbf16>
    %47 = vector.shape_cast %46 : vector<1x1x128x24xbf16> to vector<128x24xbf16>
    %cst_66 = arith.constant dense<0.000000e+00> : vector<128x384xf32>
    %48 = tpu.matmul %47, %44, %cst_66 {dimension_numbers = #tpu.dot_dimension_numbers<[1], [0], [0], [1], [0, 0, 1, 1], [], []>} : vector<128x24xbf16>, vector<24x384xbf16>, vector<128x384xf32> -> vector<128x384xf32>
    %49 = arith.addf %45, %48 : vector<128x384xf32>
    %c0_67 = arith.constant 0 : index
    %c0_68 = arith.constant 0 : index
    %50 = vector.load %arg7[%c0_67, %c0_68] : memref<128x384xf32, #tpu.memory_space<vmem>>, vector<128x384xf32>
    tpu.vector_store %arg7[%c0_67, %c0_68], %49 {strides = array<i32>} : memref<128x384xf32, #tpu.memory_space<vmem>>, vector<128x384xf32>,
    %c0_69 = arith.constant 0 : index
    %c0_70 = arith.constant 0 : index
    %c0_71 = arith.constant 0 : index
    %c36 = arith.constant 36 : index
    %51 = vector.load %arg3[%c0_69, %c0_70, %c0_71, %c36] : memref<1x1x24x512xbf16, #tpu.memory_space<vmem>>, vector<1x1x24x384xbf16>
    %52 = vector.shape_cast %51 : vector<1x1x24x384xbf16> to vector<24x384xbf16>
    %c0_72 = arith.constant 0 : index
    %c0_73 = arith.constant 0 : index
    %53 = vector.load %arg7[%c0_72, %c0_73] : memref<128x384xf32, #tpu.memory_space<vmem>>, vector<128x384xf32>
    %c0_74 = arith.constant 0 : index
    %c6 = arith.constant 6 : index
    %c0_75 = arith.constant 0 : index
    %c0_76 = arith.constant 0 : index
    %54 = vector.load %arg4[%c0_74, %c6, %c0_75, %c0_76] : memref<1x9x128x24xbf16, #tpu.memory_space<vmem>>, vector<1x1x128x24xbf16>
    %55 = vector.shape_cast %54 : vector<1x1x128x24xbf16> to vector<128x24xbf16>
    %cst_77 = arith.constant dense<0.000000e+00> : vector<128x384xf32>
    %56 = tpu.matmul %55, %52, %cst_77 {dimension_numbers = #tpu.dot_dimension_numbers<[1], [0], [0], [1], [0, 0, 1, 1], [], []>} : vector<128x24xbf16>, vector<24x384xbf16>, vector<128x384xf32> -> vector<128x384xf32>
    %57 = arith.addf %53, %56 : vector<128x384xf32>
    %c0_78 = arith.constant 0 : index
    %c0_79 = arith.constant 0 : index
    %58 = vector.load %arg7[%c0_78, %c0_79] : memref<128x384xf32, #tpu.memory_space<vmem>>, vector<128x384xf32>
    tpu.vector_store %arg7[%c0_78, %c0_79], %57 {strides = array<i32>} : memref<128x384xf32, #tpu.memory_space<vmem>>, vector<128x384xf32>,
    %c0_80 = arith.constant 0 : index
    %c0_81 = arith.constant 0 : index
    %c0_82 = arith.constant 0 : index
    %c37 = arith.constant 37 : index
    %59 = vector.load %arg3[%c0_80, %c0_81, %c0_82, %c37] : memref<1x1x24x512xbf16, #tpu.memory_space<vmem>>, vector<1x1x24x384xbf16>
    %60 = vector.shape_cast %59 : vector<1x1x24x384xbf16> to vector<24x384xbf16>
    %c0_83 = arith.constant 0 : index
    %c0_84 = arith.constant 0 : index
    %61 = vector.load %arg7[%c0_83, %c0_84] : memref<128x384xf32, #tpu.memory_space<vmem>>, vector<128x384xf32>
    %c0_85 = arith.constant 0 : index
    %c7 = arith.constant 7 : index
    %c0_86 = arith.constant 0 : index
    %c0_87 = arith.constant 0 : index
    %62 = vector.load %arg4[%c0_85, %c7, %c0_86, %c0_87] : memref<1x9x128x24xbf16, #tpu.memory_space<vmem>>, vector<1x1x128x24xbf16>
    %63 = vector.shape_cast %62 : vector<1x1x128x24xbf16> to vector<128x24xbf16>
    %cst_88 = arith.constant dense<0.000000e+00> : vector<128x384xf32>
    %64 = tpu.matmul %63, %60, %cst_88 {dimension_numbers = #tpu.dot_dimension_numbers<[1], [0], [0], [1], [0, 0, 1, 1], [], []>} : vector<128x24xbf16>, vector<24x384xbf16>, vector<128x384xf32> -> vector<128x384xf32>
    %65 = arith.addf %61, %64 : vector<128x384xf32>
    %c0_89 = arith.constant 0 : index
    %c0_90 = arith.constant 0 : index
    %66 = vector.load %arg7[%c0_89, %c0_90] : memref<128x384xf32, #tpu.memory_space<vmem>>, vector<128x384xf32>
    tpu.vector_store %arg7[%c0_89, %c0_90], %65 {strides = array<i32>} : memref<128x384xf32, #tpu.memory_space<vmem>>, vector<128x384xf32>,
    %c0_91 = arith.constant 0 : index
    %c0_92 = arith.constant 0 : index
    %c0_93 = arith.constant 0 : index
    %c38 = arith.constant 38 : index
    %67 = vector.load %arg3[%c0_91, %c0_92, %c0_93, %c38] : memref<1x1x24x512xbf16, #tpu.memory_space<vmem>>, vector<1x1x24x384xbf16>
    %68 = vector.shape_cast %67 : vector<1x1x24x384xbf16> to vector<24x384xbf16>
    %c0_94 = arith.constant 0 : index
    %c0_95 = arith.constant 0 : index
    %69 = vector.load %arg7[%c0_94, %c0_95] : memref<128x384xf32, #tpu.memory_space<vmem>>, vector<128x384xf32>
    %c0_96 = arith.constant 0 : index
    %c8 = arith.constant 8 : index
    %c0_97 = arith.constant 0 : index
    %c0_98 = arith.constant 0 : index
    %70 = vector.load %arg4[%c0_96, %c8, %c0_97, %c0_98] : memref<1x9x128x24xbf16, #tpu.memory_space<vmem>>, vector<1x1x128x24xbf16>
    %71 = vector.shape_cast %70 : vector<1x1x128x24xbf16> to vector<128x24xbf16>
    %cst_99 = arith.constant dense<0.000000e+00> : vector<128x384xf32>
    %72 = tpu.matmul %71, %68, %cst_99 {dimension_numbers = #tpu.dot_dimension_numbers<[1], [0], [0], [1], [0, 0, 1, 1], [], []>} : vector<128x24xbf16>, vector<24x384xbf16>, vector<128x384xf32> -> vector<128x384xf32>
    %73 = arith.addf %69, %72 : vector<128x384xf32>
    %c0_100 = arith.constant 0 : index
    %c0_101 = arith.constant 0 : index
    %74 = vector.load %arg7[%c0_100, %c0_101] : memref<128x384xf32, #tpu.memory_space<vmem>>, vector<128x384xf32>
    tpu.vector_store %arg7[%c0_100, %c0_101], %73 {strides = array<i32>} : memref<128x384xf32, #tpu.memory_space<vmem>>, vector<128x384xf32>,
    %c0_i32_102 = arith.constant 0 : i32
    %75 = arith.cmpi eq, %arg2, %c0_i32_102 : i32
    %76 = arith.extui %75 : i1 to i32
    %c0_i32_103 = arith.constant 0 : i32
    %77 = arith.cmpi ne, %76, %c0_i32_103 : i32
    scf.if %77 {
      %c0_104 = arith.constant 0 : index
      %c0_105 = arith.constant 0 : index
      %78 = vector.load %arg7[%c0_104, %c0_105] : memref<128x384xf32, #tpu.memory_space<vmem>>, vector<128x384xf32>
      %79 = arith.truncf %78 : vector<128x384xf32> to vector<128x384xbf16>
      %c0_106 = arith.constant 0 : index
      %c0_107 = arith.constant 0 : index
      %c0_108 = arith.constant 0 : index
      %c0_109 = arith.constant 0 : index
      %80 = vector.load %arg6[%c0_106, %c0_107, %c0_108, %c0_109] : memref<1x1x128x384xbf16, #tpu.memory_space<vmem>>, vector<1x1x128x384xbf16>
      %81 = vector.shape_cast %80 : vector<1x1x128x384xbf16> to vector<128x384xbf16>
      %82 = vector.shape_cast %79 : vector<128x384xbf16> to vector<1x1x128x384xbf16>
      tpu.vector_store %arg6[%c0_106, %c0_107, %c0_108, %c0_109], %82 {strides = array<i32>} : memref<1x1x128x384xbf16, #tpu.memory_space<vmem>>, vector<1x1x128x384xbf16>,
    } else {
    }
    return
  }
  func.func @transform_0(%arg0: i32, %arg1: i32, %arg2: i32) -> (i32, i32, i32, i32) {
    %c0_i32 = arith.constant 0 : i32
    %c0_i32_0 = arith.constant 0 : i32
    %c0_i32_1 = arith.constant 0 : i32
    return %arg1, %arg0, %c0_i32, %c0_i32_0 : i32, i32, i32, i32
  }
  func.func @transform_1(%arg0: i32, %arg1: i32, %arg2: i32) -> (i32, i32, i32, i32) {
    %c0_i32 = arith.constant 0 : i32
    %c0_i32_0 = arith.constant 0 : i32
    %c0_i32_1 = arith.constant 0 : i32
    %c0_i32_2 = arith.constant 0 : i32
    return %arg2, %c0_i32, %c0_i32_0, %c0_i32_1 : i32, i32, i32, i32
  }
  func.func @transform_2(%arg0: i32, %arg1: i32, %arg2: i32) -> (i32, i32) {
    %c0_i32 = arith.constant 0 : i32
    %c0_i32_0 = arith.constant 0 : i32
    %c0_i32_1 = arith.constant 0 : i32
    return %c0_i32, %c0_i32_0 : i32, i32
  }
  func.func @transform_3(%arg0: i32, %arg1: i32, %arg2: i32) -> (i32, i32, i32, i32) {
    %c0_i32 = arith.constant 0 : i32
    %c0_i32_0 = arith.constant 0 : i32
    %c0_i32_1 = arith.constant 0 : i32
    return %arg1, %arg0, %c0_i32, %c0_i32_0 : i32, i32, i32, i32
  }
}

module attributes {stable_mosaic.version = 11 : i64} {
  func.func @_conv_kernel(%arg0: i32, %arg1: i32, %arg2: i32, %arg3: memref<1x1x64x512xbf16, #tpu.memory_space<vmem>>, %arg4: memref<1x9x64x64xbf16, #tpu.memory_space<vmem>>, %arg5: memref<64x1xf32, #tpu.memory_space<vmem>>, %arg6: memref<1x1x64x384xf32, #tpu.memory_space<vmem>>, %arg7: memref<64x384xf32, #tpu.memory_space<vmem>>) attributes {dimension_semantics = [#tpu.dimension_semantics<parallel>, #tpu.dimension_semantics<parallel>, #tpu.dimension_semantics<arbitrary>], iteration_bounds = array<i64: 8, 2, 9>, scalar_prefetch = 0 : i64, scratch_operands = 1 : i64, tpu.core_type = #tpu.core_type<tc>, window_params = [{transform_indices = @transform_0, window_bounds = array<i64: 1, 1, 64, 512>}, {transform_indices = @transform_1, window_bounds = array<i64: 1, 9, 64, 64>}, {pipeline_mode = #tpu.pipeline_mode<synchronous>, transform_indices = @transform_2, window_bounds = array<i64: 64, 1>}, {transform_indices = @transform_3, window_bounds = array<i64: 1, 1, 64, 384>}]} {
    %c0_i32 = arith.constant 0 : i32
    %0 = arith.cmpi eq, %arg2, %c0_i32 : i32
    %1 = arith.extui %0 : i1 to i32
    %c0_i32_0 = arith.constant 0 : i32
    %2 = arith.cmpi ne, %1, %c0_i32_0 : i32
    scf.if %2 {
      %c0 = arith.constant 0 : index
      %c0_5 = arith.constant 0 : index
      %14 = vector.load %arg5[%c0, %c0_5] : memref<64x1xf32, #tpu.memory_space<vmem>>, vector<64x1xf32>
      %15 = vector.shape_cast %14 : vector<64x1xf32> to vector<64x1xf32>
      %16 = vector.broadcast %15 : vector<64x1xf32> to vector<64x384xf32>
      %c0_6 = arith.constant 0 : index
      %c0_7 = arith.constant 0 : index
      %17 = vector.load %arg7[%c0_6, %c0_7] : memref<64x384xf32, #tpu.memory_space<vmem>>, vector<64x384xf32>
      tpu.vector_store %arg7[%c0_6, %c0_7], %16 {strides = array<i32>} : memref<64x384xf32, #tpu.memory_space<vmem>>, vector<64x384xf32>,
    } else {
    }
    %c1_i32 = arith.constant 1 : i32
    %3 = arith.muli %arg0, %c1_i32 : i32
    %4 = arith.addi %3, %arg2 : i32
    %c4_i32 = arith.constant 4 : i32
    %5 = arith.subi %4, %c4_i32 : i32
    %c0_i32_1 = arith.constant 0 : i32
    %6 = arith.cmpi sge, %5, %c0_i32_1 : i32
    %c8_i32 = arith.constant 8 : i32
    %7 = arith.cmpi slt, %5, %c8_i32 : i32
    %8 = arith.andi %6, %7 : i1
    %9 = arith.extui %8 : i1 to i32
    %c0_i32_2 = arith.constant 0 : i32
    %10 = arith.cmpi ne, %9, %c0_i32_2 : i32
    scf.if %10 {
      %c0 = arith.constant 0 : index
      %c0_5 = arith.constant 0 : index
      %c0_6 = arith.constant 0 : index
      %c0_7 = arith.constant 0 : index
      %14 = vector.load %arg3[%c0, %c0_5, %c0_6, %c0_7] : memref<1x1x64x512xbf16, #tpu.memory_space<vmem>>, vector<1x1x64x384xbf16>
      %15 = vector.shape_cast %14 : vector<1x1x64x384xbf16> to vector<64x384xbf16>
      %c0_8 = arith.constant 0 : index
      %c0_9 = arith.constant 0 : index
      %16 = vector.load %arg7[%c0_8, %c0_9] : memref<64x384xf32, #tpu.memory_space<vmem>>, vector<64x384xf32>
      %c0_10 = arith.constant 0 : index
      %c0_11 = arith.constant 0 : index
      %c0_12 = arith.constant 0 : index
      %c0_13 = arith.constant 0 : index
      %17 = vector.load %arg4[%c0_10, %c0_11, %c0_12, %c0_13] : memref<1x9x64x64xbf16, #tpu.memory_space<vmem>>, vector<1x1x64x64xbf16>
      %18 = vector.shape_cast %17 : vector<1x1x64x64xbf16> to vector<64x64xbf16>
      %cst = arith.constant dense<0.000000e+00> : vector<64x384xf32>
      %19 = tpu.matmul %18, %15, %cst {dimension_numbers = #tpu.dot_dimension_numbers<[1], [0], [0], [1], [0, 0, 1, 1], [], []>} : vector<64x64xbf16>, vector<64x384xbf16>, vector<64x384xf32> -> vector<64x384xf32>
      %20 = arith.addf %16, %19 : vector<64x384xf32>
      %c0_14 = arith.constant 0 : index
      %c0_15 = arith.constant 0 : index
      %21 = vector.load %arg7[%c0_14, %c0_15] : memref<64x384xf32, #tpu.memory_space<vmem>>, vector<64x384xf32>
      tpu.vector_store %arg7[%c0_14, %c0_15], %20 {strides = array<i32>} : memref<64x384xf32, #tpu.memory_space<vmem>>, vector<64x384xf32>,
      %c0_16 = arith.constant 0 : index
      %c0_17 = arith.constant 0 : index
      %c0_18 = arith.constant 0 : index
      %c1 = arith.constant 1 : index
      %22 = vector.load %arg3[%c0_16, %c0_17, %c0_18, %c1] : memref<1x1x64x512xbf16, #tpu.memory_space<vmem>>, vector<1x1x64x384xbf16>
      %23 = vector.shape_cast %22 : vector<1x1x64x384xbf16> to vector<64x384xbf16>
      %c0_19 = arith.constant 0 : index
      %c0_20 = arith.constant 0 : index
      %24 = vector.load %arg7[%c0_19, %c0_20] : memref<64x384xf32, #tpu.memory_space<vmem>>, vector<64x384xf32>
      %c0_21 = arith.constant 0 : index
      %c1_22 = arith.constant 1 : index
      %c0_23 = arith.constant 0 : index
      %c0_24 = arith.constant 0 : index
      %25 = vector.load %arg4[%c0_21, %c1_22, %c0_23, %c0_24] : memref<1x9x64x64xbf16, #tpu.memory_space<vmem>>, vector<1x1x64x64xbf16>
      %26 = vector.shape_cast %25 : vector<1x1x64x64xbf16> to vector<64x64xbf16>
      %cst_25 = arith.constant dense<0.000000e+00> : vector<64x384xf32>
      %27 = tpu.matmul %26, %23, %cst_25 {dimension_numbers = #tpu.dot_dimension_numbers<[1], [0], [0], [1], [0, 0, 1, 1], [], []>} : vector<64x64xbf16>, vector<64x384xbf16>, vector<64x384xf32> -> vector<64x384xf32>
      %28 = arith.addf %24, %27 : vector<64x384xf32>
      %c0_26 = arith.constant 0 : index
      %c0_27 = arith.constant 0 : index
      %29 = vector.load %arg7[%c0_26, %c0_27] : memref<64x384xf32, #tpu.memory_space<vmem>>, vector<64x384xf32>
      tpu.vector_store %arg7[%c0_26, %c0_27], %28 {strides = array<i32>} : memref<64x384xf32, #tpu.memory_space<vmem>>, vector<64x384xf32>,
      %c0_28 = arith.constant 0 : index
      %c0_29 = arith.constant 0 : index
      %c0_30 = arith.constant 0 : index
      %c2 = arith.constant 2 : index
      %30 = vector.load %arg3[%c0_28, %c0_29, %c0_30, %c2] : memref<1x1x64x512xbf16, #tpu.memory_space<vmem>>, vector<1x1x64x384xbf16>
      %31 = vector.shape_cast %30 : vector<1x1x64x384xbf16> to vector<64x384xbf16>
      %c0_31 = arith.constant 0 : index
      %c0_32 = arith.constant 0 : index
      %32 = vector.load %arg7[%c0_31, %c0_32] : memref<64x384xf32, #tpu.memory_space<vmem>>, vector<64x384xf32>
      %c0_33 = arith.constant 0 : index
      %c2_34 = arith.constant 2 : index
      %c0_35 = arith.constant 0 : index
      %c0_36 = arith.constant 0 : index
      %33 = vector.load %arg4[%c0_33, %c2_34, %c0_35, %c0_36] : memref<1x9x64x64xbf16, #tpu.memory_space<vmem>>, vector<1x1x64x64xbf16>
      %34 = vector.shape_cast %33 : vector<1x1x64x64xbf16> to vector<64x64xbf16>
      %cst_37 = arith.constant dense<0.000000e+00> : vector<64x384xf32>
      %35 = tpu.matmul %34, %31, %cst_37 {dimension_numbers = #tpu.dot_dimension_numbers<[1], [0], [0], [1], [0, 0, 1, 1], [], []>} : vector<64x64xbf16>, vector<64x384xbf16>, vector<64x384xf32> -> vector<64x384xf32>
      %36 = arith.addf %32, %35 : vector<64x384xf32>
      %c0_38 = arith.constant 0 : index
      %c0_39 = arith.constant 0 : index
      %37 = vector.load %arg7[%c0_38, %c0_39] : memref<64x384xf32, #tpu.memory_space<vmem>>, vector<64x384xf32>
      tpu.vector_store %arg7[%c0_38, %c0_39], %36 {strides = array<i32>} : memref<64x384xf32, #tpu.memory_space<vmem>>, vector<64x384xf32>,
      %c0_40 = arith.constant 0 : index
      %c0_41 = arith.constant 0 : index
      %c0_42 = arith.constant 0 : index
      %c18 = arith.constant 18 : index
      %38 = vector.load %arg3[%c0_40, %c0_41, %c0_42, %c18] : memref<1x1x64x512xbf16, #tpu.memory_space<vmem>>, vector<1x1x64x384xbf16>
      %39 = vector.shape_cast %38 : vector<1x1x64x384xbf16> to vector<64x384xbf16>
      %c0_43 = arith.constant 0 : index
      %c0_44 = arith.constant 0 : index
      %40 = vector.load %arg7[%c0_43, %c0_44] : memref<64x384xf32, #tpu.memory_space<vmem>>, vector<64x384xf32>
      %c0_45 = arith.constant 0 : index
      %c3 = arith.constant 3 : index
      %c0_46 = arith.constant 0 : index
      %c0_47 = arith.constant 0 : index
      %41 = vector.load %arg4[%c0_45, %c3, %c0_46, %c0_47] : memref<1x9x64x64xbf16, #tpu.memory_space<vmem>>, vector<1x1x64x64xbf16>
      %42 = vector.shape_cast %41 : vector<1x1x64x64xbf16> to vector<64x64xbf16>
      %cst_48 = arith.constant dense<0.000000e+00> : vector<64x384xf32>
      %43 = tpu.matmul %42, %39, %cst_48 {dimension_numbers = #tpu.dot_dimension_numbers<[1], [0], [0], [1], [0, 0, 1, 1], [], []>} : vector<64x64xbf16>, vector<64x384xbf16>, vector<64x384xf32> -> vector<64x384xf32>
      %44 = arith.addf %40, %43 : vector<64x384xf32>
      %c0_49 = arith.constant 0 : index
      %c0_50 = arith.constant 0 : index
      %45 = vector.load %arg7[%c0_49, %c0_50] : memref<64x384xf32, #tpu.memory_space<vmem>>, vector<64x384xf32>
      tpu.vector_store %arg7[%c0_49, %c0_50], %44 {strides = array<i32>} : memref<64x384xf32, #tpu.memory_space<vmem>>, vector<64x384xf32>,
      %c0_51 = arith.constant 0 : index
      %c0_52 = arith.constant 0 : index
      %c0_53 = arith.constant 0 : index
      %c19 = arith.constant 19 : index
      %46 = vector.load %arg3[%c0_51, %c0_52, %c0_53, %c19] : memref<1x1x64x512xbf16, #tpu.memory_space<vmem>>, vector<1x1x64x384xbf16>
      %47 = vector.shape_cast %46 : vector<1x1x64x384xbf16> to vector<64x384xbf16>
      %c0_54 = arith.constant 0 : index
      %c0_55 = arith.constant 0 : index
      %48 = vector.load %arg7[%c0_54, %c0_55] : memref<64x384xf32, #tpu.memory_space<vmem>>, vector<64x384xf32>
      %c0_56 = arith.constant 0 : index
      %c4 = arith.constant 4 : index
      %c0_57 = arith.constant 0 : index
      %c0_58 = arith.constant 0 : index
      %49 = vector.load %arg4[%c0_56, %c4, %c0_57, %c0_58] : memref<1x9x64x64xbf16, #tpu.memory_space<vmem>>, vector<1x1x64x64xbf16>
      %50 = vector.shape_cast %49 : vector<1x1x64x64xbf16> to vector<64x64xbf16>
      %cst_59 = arith.constant dense<0.000000e+00> : vector<64x384xf32>
      %51 = tpu.matmul %50, %47, %cst_59 {dimension_numbers = #tpu.dot_dimension_numbers<[1], [0], [0], [1], [0, 0, 1, 1], [], []>} : vector<64x64xbf16>, vector<64x384xbf16>, vector<64x384xf32> -> vector<64x384xf32>
      %52 = arith.addf %48, %51 : vector<64x384xf32>
      %c0_60 = arith.constant 0 : index
      %c0_61 = arith.constant 0 : index
      %53 = vector.load %arg7[%c0_60, %c0_61] : memref<64x384xf32, #tpu.memory_space<vmem>>, vector<64x384xf32>
      tpu.vector_store %arg7[%c0_60, %c0_61], %52 {strides = array<i32>} : memref<64x384xf32, #tpu.memory_space<vmem>>, vector<64x384xf32>,
      %c0_62 = arith.constant 0 : index
      %c0_63 = arith.constant 0 : index
      %c0_64 = arith.constant 0 : index
      %c20 = arith.constant 20 : index
      %54 = vector.load %arg3[%c0_62, %c0_63, %c0_64, %c20] : memref<1x1x64x512xbf16, #tpu.memory_space<vmem>>, vector<1x1x64x384xbf16>
      %55 = vector.shape_cast %54 : vector<1x1x64x384xbf16> to vector<64x384xbf16>
      %c0_65 = arith.constant 0 : index
      %c0_66 = arith.constant 0 : index
      %56 = vector.load %arg7[%c0_65, %c0_66] : memref<64x384xf32, #tpu.memory_space<vmem>>, vector<64x384xf32>
      %c0_67 = arith.constant 0 : index
      %c5 = arith.constant 5 : index
      %c0_68 = arith.constant 0 : index
      %c0_69 = arith.constant 0 : index
      %57 = vector.load %arg4[%c0_67, %c5, %c0_68, %c0_69] : memref<1x9x64x64xbf16, #tpu.memory_space<vmem>>, vector<1x1x64x64xbf16>
      %58 = vector.shape_cast %57 : vector<1x1x64x64xbf16> to vector<64x64xbf16>
      %cst_70 = arith.constant dense<0.000000e+00> : vector<64x384xf32>
      %59 = tpu.matmul %58, %55, %cst_70 {dimension_numbers = #tpu.dot_dimension_numbers<[1], [0], [0], [1], [0, 0, 1, 1], [], []>} : vector<64x64xbf16>, vector<64x384xbf16>, vector<64x384xf32> -> vector<64x384xf32>
      %60 = arith.addf %56, %59 : vector<64x384xf32>
      %c0_71 = arith.constant 0 : index
      %c0_72 = arith.constant 0 : index
      %61 = vector.load %arg7[%c0_71, %c0_72] : memref<64x384xf32, #tpu.memory_space<vmem>>, vector<64x384xf32>
      tpu.vector_store %arg7[%c0_71, %c0_72], %60 {strides = array<i32>} : memref<64x384xf32, #tpu.memory_space<vmem>>, vector<64x384xf32>,
      %c0_73 = arith.constant 0 : index
      %c0_74 = arith.constant 0 : index
      %c0_75 = arith.constant 0 : index
      %c36 = arith.constant 36 : index
      %62 = vector.load %arg3[%c0_73, %c0_74, %c0_75, %c36] : memref<1x1x64x512xbf16, #tpu.memory_space<vmem>>, vector<1x1x64x384xbf16>
      %63 = vector.shape_cast %62 : vector<1x1x64x384xbf16> to vector<64x384xbf16>
      %c0_76 = arith.constant 0 : index
      %c0_77 = arith.constant 0 : index
      %64 = vector.load %arg7[%c0_76, %c0_77] : memref<64x384xf32, #tpu.memory_space<vmem>>, vector<64x384xf32>
      %c0_78 = arith.constant 0 : index
      %c6 = arith.constant 6 : index
      %c0_79 = arith.constant 0 : index
      %c0_80 = arith.constant 0 : index
      %65 = vector.load %arg4[%c0_78, %c6, %c0_79, %c0_80] : memref<1x9x64x64xbf16, #tpu.memory_space<vmem>>, vector<1x1x64x64xbf16>
      %66 = vector.shape_cast %65 : vector<1x1x64x64xbf16> to vector<64x64xbf16>
      %cst_81 = arith.constant dense<0.000000e+00> : vector<64x384xf32>
      %67 = tpu.matmul %66, %63, %cst_81 {dimension_numbers = #tpu.dot_dimension_numbers<[1], [0], [0], [1], [0, 0, 1, 1], [], []>} : vector<64x64xbf16>, vector<64x384xbf16>, vector<64x384xf32> -> vector<64x384xf32>
      %68 = arith.addf %64, %67 : vector<64x384xf32>
      %c0_82 = arith.constant 0 : index
      %c0_83 = arith.constant 0 : index
      %69 = vector.load %arg7[%c0_82, %c0_83] : memref<64x384xf32, #tpu.memory_space<vmem>>, vector<64x384xf32>
      tpu.vector_store %arg7[%c0_82, %c0_83], %68 {strides = array<i32>} : memref<64x384xf32, #tpu.memory_space<vmem>>, vector<64x384xf32>,
      %c0_84 = arith.constant 0 : index
      %c0_85 = arith.constant 0 : index
      %c0_86 = arith.constant 0 : index
      %c37 = arith.constant 37 : index
      %70 = vector.load %arg3[%c0_84, %c0_85, %c0_86, %c37] : memref<1x1x64x512xbf16, #tpu.memory_space<vmem>>, vector<1x1x64x384xbf16>
      %71 = vector.shape_cast %70 : vector<1x1x64x384xbf16> to vector<64x384xbf16>
      %c0_87 = arith.constant 0 : index
      %c0_88 = arith.constant 0 : index
      %72 = vector.load %arg7[%c0_87, %c0_88] : memref<64x384xf32, #tpu.memory_space<vmem>>, vector<64x384xf32>
      %c0_89 = arith.constant 0 : index
      %c7 = arith.constant 7 : index
      %c0_90 = arith.constant 0 : index
      %c0_91 = arith.constant 0 : index
      %73 = vector.load %arg4[%c0_89, %c7, %c0_90, %c0_91] : memref<1x9x64x64xbf16, #tpu.memory_space<vmem>>, vector<1x1x64x64xbf16>
      %74 = vector.shape_cast %73 : vector<1x1x64x64xbf16> to vector<64x64xbf16>
      %cst_92 = arith.constant dense<0.000000e+00> : vector<64x384xf32>
      %75 = tpu.matmul %74, %71, %cst_92 {dimension_numbers = #tpu.dot_dimension_numbers<[1], [0], [0], [1], [0, 0, 1, 1], [], []>} : vector<64x64xbf16>, vector<64x384xbf16>, vector<64x384xf32> -> vector<64x384xf32>
      %76 = arith.addf %72, %75 : vector<64x384xf32>
      %c0_93 = arith.constant 0 : index
      %c0_94 = arith.constant 0 : index
      %77 = vector.load %arg7[%c0_93, %c0_94] : memref<64x384xf32, #tpu.memory_space<vmem>>, vector<64x384xf32>
      tpu.vector_store %arg7[%c0_93, %c0_94], %76 {strides = array<i32>} : memref<64x384xf32, #tpu.memory_space<vmem>>, vector<64x384xf32>,
      %c0_95 = arith.constant 0 : index
      %c0_96 = arith.constant 0 : index
      %c0_97 = arith.constant 0 : index
      %c38 = arith.constant 38 : index
      %78 = vector.load %arg3[%c0_95, %c0_96, %c0_97, %c38] : memref<1x1x64x512xbf16, #tpu.memory_space<vmem>>, vector<1x1x64x384xbf16>
      %79 = vector.shape_cast %78 : vector<1x1x64x384xbf16> to vector<64x384xbf16>
      %c0_98 = arith.constant 0 : index
      %c0_99 = arith.constant 0 : index
      %80 = vector.load %arg7[%c0_98, %c0_99] : memref<64x384xf32, #tpu.memory_space<vmem>>, vector<64x384xf32>
      %c0_100 = arith.constant 0 : index
      %c8 = arith.constant 8 : index
      %c0_101 = arith.constant 0 : index
      %c0_102 = arith.constant 0 : index
      %81 = vector.load %arg4[%c0_100, %c8, %c0_101, %c0_102] : memref<1x9x64x64xbf16, #tpu.memory_space<vmem>>, vector<1x1x64x64xbf16>
      %82 = vector.shape_cast %81 : vector<1x1x64x64xbf16> to vector<64x64xbf16>
      %cst_103 = arith.constant dense<0.000000e+00> : vector<64x384xf32>
      %83 = tpu.matmul %82, %79, %cst_103 {dimension_numbers = #tpu.dot_dimension_numbers<[1], [0], [0], [1], [0, 0, 1, 1], [], []>} : vector<64x64xbf16>, vector<64x384xbf16>, vector<64x384xf32> -> vector<64x384xf32>
      %84 = arith.addf %80, %83 : vector<64x384xf32>
      %c0_104 = arith.constant 0 : index
      %c0_105 = arith.constant 0 : index
      %85 = vector.load %arg7[%c0_104, %c0_105] : memref<64x384xf32, #tpu.memory_space<vmem>>, vector<64x384xf32>
      tpu.vector_store %arg7[%c0_104, %c0_105], %84 {strides = array<i32>} : memref<64x384xf32, #tpu.memory_space<vmem>>, vector<64x384xf32>,
    } else {
    }
    %c8_i32_3 = arith.constant 8 : i32
    %11 = arith.cmpi eq, %arg2, %c8_i32_3 : i32
    %12 = arith.extui %11 : i1 to i32
    %c0_i32_4 = arith.constant 0 : i32
    %13 = arith.cmpi ne, %12, %c0_i32_4 : i32
    scf.if %13 {
      %c0 = arith.constant 0 : index
      %c0_5 = arith.constant 0 : index
      %14 = vector.load %arg7[%c0, %c0_5] : memref<64x384xf32, #tpu.memory_space<vmem>>, vector<64x384xf32>
      %c0_6 = arith.constant 0 : index
      %c0_7 = arith.constant 0 : index
      %c0_8 = arith.constant 0 : index
      %c0_9 = arith.constant 0 : index
      %15 = vector.load %arg6[%c0_6, %c0_7, %c0_8, %c0_9] : memref<1x1x64x384xf32, #tpu.memory_space<vmem>>, vector<1x1x64x384xf32>
      %16 = vector.shape_cast %15 : vector<1x1x64x384xf32> to vector<64x384xf32>
      %17 = vector.shape_cast %14 : vector<64x384xf32> to vector<1x1x64x384xf32>
      tpu.vector_store %arg6[%c0_6, %c0_7, %c0_8, %c0_9], %17 {strides = array<i32>} : memref<1x1x64x384xf32, #tpu.memory_space<vmem>>, vector<1x1x64x384xf32>,
    } else {
    }
    return
  }
  func.func @transform_0(%arg0: i32, %arg1: i32, %arg2: i32) -> (i32, i32, i32, i32) {
    %c1_i32 = arith.constant 1 : i32
    %0 = arith.muli %arg0, %c1_i32 : i32
    %1 = arith.addi %0, %arg2 : i32
    %c4_i32 = arith.constant 4 : i32
    %2 = arith.subi %1, %c4_i32 : i32
    %c0_i32 = arith.constant 0 : i32
    %c7_i32 = arith.constant 7 : i32
    %3 = arith.maxsi %c0_i32, %2 : i32
    %4 = arith.minsi %c7_i32, %3 : i32
    %c0_i32_0 = arith.constant 0 : i32
    %c0_i32_1 = arith.constant 0 : i32
    %c0_i32_2 = arith.constant 0 : i32
    return %arg1, %4, %c0_i32_0, %c0_i32_1 : i32, i32, i32, i32
  }
  func.func @transform_1(%arg0: i32, %arg1: i32, %arg2: i32) -> (i32, i32, i32, i32) {
    %c0_i32 = arith.constant 0 : i32
    %c0_i32_0 = arith.constant 0 : i32
    %c0_i32_1 = arith.constant 0 : i32
    %c0_i32_2 = arith.constant 0 : i32
    return %arg2, %c0_i32, %c0_i32_0, %c0_i32_1 : i32, i32, i32, i32
  }
  func.func @transform_2(%arg0: i32, %arg1: i32, %arg2: i32) -> (i32, i32) {
    %c0_i32 = arith.constant 0 : i32
    %c0_i32_0 = arith.constant 0 : i32
    %c0_i32_1 = arith.constant 0 : i32
    return %c0_i32, %c0_i32_0 : i32, i32
  }
  func.func @transform_3(%arg0: i32, %arg1: i32, %arg2: i32) -> (i32, i32, i32, i32) {
    %c0_i32 = arith.constant 0 : i32
    %c0_i32_0 = arith.constant 0 : i32
    %c0_i32_1 = arith.constant 0 : i32
    return %arg1, %arg0, %c0_i32, %c0_i32_0 : i32, i32, i32, i32
  }
}

module attributes {stable_mosaic.version = 11 : i64} {
  func.func @_conv_kernel(%arg0: i32, %arg1: i32, %arg2: i32, %arg3: memref<1x1x64x512xbf16, #tpu.memory_space<vmem>>, %arg4: memref<1x9x64x64xbf16, #tpu.memory_space<vmem>>, %arg5: memref<64x1xf32, #tpu.memory_space<vmem>>, %arg6: memref<1x1x64x384xf32, #tpu.memory_space<vmem>>, %arg7: memref<64x384xf32, #tpu.memory_space<vmem>>) attributes {dimension_semantics = [#tpu.dimension_semantics<parallel>, #tpu.dimension_semantics<parallel>, #tpu.dimension_semantics<arbitrary>], iteration_bounds = array<i64: 8, 2, 13>, scalar_prefetch = 0 : i64, scratch_operands = 1 : i64, tpu.core_type = #tpu.core_type<tc>, window_params = [{transform_indices = @transform_0, window_bounds = array<i64: 1, 1, 64, 512>}, {transform_indices = @transform_1, window_bounds = array<i64: 1, 9, 64, 64>}, {pipeline_mode = #tpu.pipeline_mode<synchronous>, transform_indices = @transform_2, window_bounds = array<i64: 64, 1>}, {transform_indices = @transform_3, window_bounds = array<i64: 1, 1, 64, 384>}]} {
    %c0_i32 = arith.constant 0 : i32
    %0 = arith.cmpi eq, %arg2, %c0_i32 : i32
    %1 = arith.extui %0 : i1 to i32
    %c0_i32_0 = arith.constant 0 : i32
    %2 = arith.cmpi ne, %1, %c0_i32_0 : i32
    scf.if %2 {
      %c0 = arith.constant 0 : index
      %c0_4 = arith.constant 0 : index
      %14 = vector.load %arg5[%c0, %c0_4] : memref<64x1xf32, #tpu.memory_space<vmem>>, vector<64x1xf32>
      %15 = vector.shape_cast %14 : vector<64x1xf32> to vector<64x1xf32>
      %16 = vector.broadcast %15 : vector<64x1xf32> to vector<64x384xf32>
      %c0_5 = arith.constant 0 : index
      %c0_6 = arith.constant 0 : index
      %17 = vector.load %arg7[%c0_5, %c0_6] : memref<64x384xf32, #tpu.memory_space<vmem>>, vector<64x384xf32>
      tpu.vector_store %arg7[%c0_5, %c0_6], %16 {strides = array<i32>} : memref<64x384xf32, #tpu.memory_space<vmem>>, vector<64x384xf32>,
    } else {
    }
    %c1_i32 = arith.constant 1 : i32
    %3 = arith.muli %arg0, %c1_i32 : i32
    %4 = arith.addi %3, %arg2 : i32
    %c6_i32 = arith.constant 6 : i32
    %5 = arith.subi %4, %c6_i32 : i32
    %c0_i32_1 = arith.constant 0 : i32
    %6 = arith.cmpi sge, %5, %c0_i32_1 : i32
    %c8_i32 = arith.constant 8 : i32
    %7 = arith.cmpi slt, %5, %c8_i32 : i32
    %8 = arith.andi %6, %7 : i1
    %9 = arith.extui %8 : i1 to i32
    %c0_i32_2 = arith.constant 0 : i32
    %10 = arith.cmpi ne, %9, %c0_i32_2 : i32
    scf.if %10 {
      %c0 = arith.constant 0 : index
      %c0_4 = arith.constant 0 : index
      %c0_5 = arith.constant 0 : index
      %c0_6 = arith.constant 0 : index
      %14 = vector.load %arg3[%c0, %c0_4, %c0_5, %c0_6] : memref<1x1x64x512xbf16, #tpu.memory_space<vmem>>, vector<1x1x64x384xbf16>
      %15 = vector.shape_cast %14 : vector<1x1x64x384xbf16> to vector<64x384xbf16>
      %c0_7 = arith.constant 0 : index
      %c0_8 = arith.constant 0 : index
      %16 = vector.load %arg7[%c0_7, %c0_8] : memref<64x384xf32, #tpu.memory_space<vmem>>, vector<64x384xf32>
      %c0_9 = arith.constant 0 : index
      %c0_10 = arith.constant 0 : index
      %c0_11 = arith.constant 0 : index
      %c0_12 = arith.constant 0 : index
      %17 = vector.load %arg4[%c0_9, %c0_10, %c0_11, %c0_12] : memref<1x9x64x64xbf16, #tpu.memory_space<vmem>>, vector<1x1x64x64xbf16>
      %18 = vector.shape_cast %17 : vector<1x1x64x64xbf16> to vector<64x64xbf16>
      %cst = arith.constant dense<0.000000e+00> : vector<64x384xf32>
      %19 = tpu.matmul %18, %15, %cst {dimension_numbers = #tpu.dot_dimension_numbers<[1], [0], [0], [1], [0, 0, 1, 1], [], []>} : vector<64x64xbf16>, vector<64x384xbf16>, vector<64x384xf32> -> vector<64x384xf32>
      %20 = arith.addf %16, %19 : vector<64x384xf32>
      %c0_13 = arith.constant 0 : index
      %c0_14 = arith.constant 0 : index
      %21 = vector.load %arg7[%c0_13, %c0_14] : memref<64x384xf32, #tpu.memory_space<vmem>>, vector<64x384xf32>
      tpu.vector_store %arg7[%c0_13, %c0_14], %20 {strides = array<i32>} : memref<64x384xf32, #tpu.memory_space<vmem>>, vector<64x384xf32>,
      %c0_15 = arith.constant 0 : index
      %c0_16 = arith.constant 0 : index
      %c0_17 = arith.constant 0 : index
      %c1 = arith.constant 1 : index
      %22 = vector.load %arg3[%c0_15, %c0_16, %c0_17, %c1] : memref<1x1x64x512xbf16, #tpu.memory_space<vmem>>, vector<1x1x64x384xbf16>
      %23 = vector.shape_cast %22 : vector<1x1x64x384xbf16> to vector<64x384xbf16>
      %c0_18 = arith.constant 0 : index
      %c0_19 = arith.constant 0 : index
      %24 = vector.load %arg7[%c0_18, %c0_19] : memref<64x384xf32, #tpu.memory_space<vmem>>, vector<64x384xf32>
      %c0_20 = arith.constant 0 : index
      %c1_21 = arith.constant 1 : index
      %c0_22 = arith.constant 0 : index
      %c0_23 = arith.constant 0 : index
      %25 = vector.load %arg4[%c0_20, %c1_21, %c0_22, %c0_23] : memref<1x9x64x64xbf16, #tpu.memory_space<vmem>>, vector<1x1x64x64xbf16>
      %26 = vector.shape_cast %25 : vector<1x1x64x64xbf16> to vector<64x64xbf16>
      %cst_24 = arith.constant dense<0.000000e+00> : vector<64x384xf32>
      %27 = tpu.matmul %26, %23, %cst_24 {dimension_numbers = #tpu.dot_dimension_numbers<[1], [0], [0], [1], [0, 0, 1, 1], [], []>} : vector<64x64xbf16>, vector<64x384xbf16>, vector<64x384xf32> -> vector<64x384xf32>
      %28 = arith.addf %24, %27 : vector<64x384xf32>
      %c0_25 = arith.constant 0 : index
      %c0_26 = arith.constant 0 : index
      %29 = vector.load %arg7[%c0_25, %c0_26] : memref<64x384xf32, #tpu.memory_space<vmem>>, vector<64x384xf32>
      tpu.vector_store %arg7[%c0_25, %c0_26], %28 {strides = array<i32>} : memref<64x384xf32, #tpu.memory_space<vmem>>, vector<64x384xf32>,
      %c0_27 = arith.constant 0 : index
      %c0_28 = arith.constant 0 : index
      %c0_29 = arith.constant 0 : index
      %c2 = arith.constant 2 : index
      %30 = vector.load %arg3[%c0_27, %c0_28, %c0_29, %c2] : memref<1x1x64x512xbf16, #tpu.memory_space<vmem>>, vector<1x1x64x384xbf16>
      %31 = vector.shape_cast %30 : vector<1x1x64x384xbf16> to vector<64x384xbf16>
      %c0_30 = arith.constant 0 : index
      %c0_31 = arith.constant 0 : index
      %32 = vector.load %arg7[%c0_30, %c0_31] : memref<64x384xf32, #tpu.memory_space<vmem>>, vector<64x384xf32>
      %c0_32 = arith.constant 0 : index
      %c2_33 = arith.constant 2 : index
      %c0_34 = arith.constant 0 : index
      %c0_35 = arith.constant 0 : index
      %33 = vector.load %arg4[%c0_32, %c2_33, %c0_34, %c0_35] : memref<1x9x64x64xbf16, #tpu.memory_space<vmem>>, vector<1x1x64x64xbf16>
      %34 = vector.shape_cast %33 : vector<1x1x64x64xbf16> to vector<64x64xbf16>
      %cst_36 = arith.constant dense<0.000000e+00> : vector<64x384xf32>
      %35 = tpu.matmul %34, %31, %cst_36 {dimension_numbers = #tpu.dot_dimension_numbers<[1], [0], [0], [1], [0, 0, 1, 1], [], []>} : vector<64x64xbf16>, vector<64x384xbf16>, vector<64x384xf32> -> vector<64x384xf32>
      %36 = arith.addf %32, %35 : vector<64x384xf32>
      %c0_37 = arith.constant 0 : index
      %c0_38 = arith.constant 0 : index
      %37 = vector.load %arg7[%c0_37, %c0_38] : memref<64x384xf32, #tpu.memory_space<vmem>>, vector<64x384xf32>
      tpu.vector_store %arg7[%c0_37, %c0_38], %36 {strides = array<i32>} : memref<64x384xf32, #tpu.memory_space<vmem>>, vector<64x384xf32>,
      %c0_39 = arith.constant 0 : index
      %c0_40 = arith.constant 0 : index
      %c0_41 = arith.constant 0 : index
      %c18 = arith.constant 18 : index
      %38 = vector.load %arg3[%c0_39, %c0_40, %c0_41, %c18] : memref<1x1x64x512xbf16, #tpu.memory_space<vmem>>, vector<1x1x64x384xbf16>
      %39 = vector.shape_cast %38 : vector<1x1x64x384xbf16> to vector<64x384xbf16>
      %c0_42 = arith.constant 0 : index
      %c0_43 = arith.constant 0 : index
      %40 = vector.load %arg7[%c0_42, %c0_43] : memref<64x384xf32, #tpu.memory_space<vmem>>, vector<64x384xf32>
      %c0_44 = arith.constant 0 : index
      %c3 = arith.constant 3 : index
      %c0_45 = arith.constant 0 : index
      %c0_46 = arith.constant 0 : index
      %41 = vector.load %arg4[%c0_44, %c3, %c0_45, %c0_46] : memref<1x9x64x64xbf16, #tpu.memory_space<vmem>>, vector<1x1x64x64xbf16>
      %42 = vector.shape_cast %41 : vector<1x1x64x64xbf16> to vector<64x64xbf16>
      %cst_47 = arith.constant dense<0.000000e+00> : vector<64x384xf32>
      %43 = tpu.matmul %42, %39, %cst_47 {dimension_numbers = #tpu.dot_dimension_numbers<[1], [0], [0], [1], [0, 0, 1, 1], [], []>} : vector<64x64xbf16>, vector<64x384xbf16>, vector<64x384xf32> -> vector<64x384xf32>
      %44 = arith.addf %40, %43 : vector<64x384xf32>
      %c0_48 = arith.constant 0 : index
      %c0_49 = arith.constant 0 : index
      %45 = vector.load %arg7[%c0_48, %c0_49] : memref<64x384xf32, #tpu.memory_space<vmem>>, vector<64x384xf32>
      tpu.vector_store %arg7[%c0_48, %c0_49], %44 {strides = array<i32>} : memref<64x384xf32, #tpu.memory_space<vmem>>, vector<64x384xf32>,
      %c0_50 = arith.constant 0 : index
      %c0_51 = arith.constant 0 : index
      %c0_52 = arith.constant 0 : index
      %c19 = arith.constant 19 : index
      %46 = vector.load %arg3[%c0_50, %c0_51, %c0_52, %c19] : memref<1x1x64x512xbf16, #tpu.memory_space<vmem>>, vector<1x1x64x384xbf16>
      %47 = vector.shape_cast %46 : vector<1x1x64x384xbf16> to vector<64x384xbf16>
      %c0_53 = arith.constant 0 : index
      %c0_54 = arith.constant 0 : index
      %48 = vector.load %arg7[%c0_53, %c0_54] : memref<64x384xf32, #tpu.memory_space<vmem>>, vector<64x384xf32>
      %c0_55 = arith.constant 0 : index
      %c4 = arith.constant 4 : index
      %c0_56 = arith.constant 0 : index
      %c0_57 = arith.constant 0 : index
      %49 = vector.load %arg4[%c0_55, %c4, %c0_56, %c0_57] : memref<1x9x64x64xbf16, #tpu.memory_space<vmem>>, vector<1x1x64x64xbf16>
      %50 = vector.shape_cast %49 : vector<1x1x64x64xbf16> to vector<64x64xbf16>
      %cst_58 = arith.constant dense<0.000000e+00> : vector<64x384xf32>
      %51 = tpu.matmul %50, %47, %cst_58 {dimension_numbers = #tpu.dot_dimension_numbers<[1], [0], [0], [1], [0, 0, 1, 1], [], []>} : vector<64x64xbf16>, vector<64x384xbf16>, vector<64x384xf32> -> vector<64x384xf32>
      %52 = arith.addf %48, %51 : vector<64x384xf32>
      %c0_59 = arith.constant 0 : index
      %c0_60 = arith.constant 0 : index
      %53 = vector.load %arg7[%c0_59, %c0_60] : memref<64x384xf32, #tpu.memory_space<vmem>>, vector<64x384xf32>
      tpu.vector_store %arg7[%c0_59, %c0_60], %52 {strides = array<i32>} : memref<64x384xf32, #tpu.memory_space<vmem>>, vector<64x384xf32>,
      %c0_61 = arith.constant 0 : index
      %c0_62 = arith.constant 0 : index
      %c0_63 = arith.constant 0 : index
      %c20 = arith.constant 20 : index
      %54 = vector.load %arg3[%c0_61, %c0_62, %c0_63, %c20] : memref<1x1x64x512xbf16, #tpu.memory_space<vmem>>, vector<1x1x64x384xbf16>
      %55 = vector.shape_cast %54 : vector<1x1x64x384xbf16> to vector<64x384xbf16>
      %c0_64 = arith.constant 0 : index
      %c0_65 = arith.constant 0 : index
      %56 = vector.load %arg7[%c0_64, %c0_65] : memref<64x384xf32, #tpu.memory_space<vmem>>, vector<64x384xf32>
      %c0_66 = arith.constant 0 : index
      %c5 = arith.constant 5 : index
      %c0_67 = arith.constant 0 : index
      %c0_68 = arith.constant 0 : index
      %57 = vector.load %arg4[%c0_66, %c5, %c0_67, %c0_68] : memref<1x9x64x64xbf16, #tpu.memory_space<vmem>>, vector<1x1x64x64xbf16>
      %58 = vector.shape_cast %57 : vector<1x1x64x64xbf16> to vector<64x64xbf16>
      %cst_69 = arith.constant dense<0.000000e+00> : vector<64x384xf32>
      %59 = tpu.matmul %58, %55, %cst_69 {dimension_numbers = #tpu.dot_dimension_numbers<[1], [0], [0], [1], [0, 0, 1, 1], [], []>} : vector<64x64xbf16>, vector<64x384xbf16>, vector<64x384xf32> -> vector<64x384xf32>
      %60 = arith.addf %56, %59 : vector<64x384xf32>
      %c0_70 = arith.constant 0 : index
      %c0_71 = arith.constant 0 : index
      %61 = vector.load %arg7[%c0_70, %c0_71] : memref<64x384xf32, #tpu.memory_space<vmem>>, vector<64x384xf32>
      tpu.vector_store %arg7[%c0_70, %c0_71], %60 {strides = array<i32>} : memref<64x384xf32, #tpu.memory_space<vmem>>, vector<64x384xf32>,
      %c0_72 = arith.constant 0 : index
      %c0_73 = arith.constant 0 : index
      %c0_74 = arith.constant 0 : index
      %c36 = arith.constant 36 : index
      %62 = vector.load %arg3[%c0_72, %c0_73, %c0_74, %c36] : memref<1x1x64x512xbf16, #tpu.memory_space<vmem>>, vector<1x1x64x384xbf16>
      %63 = vector.shape_cast %62 : vector<1x1x64x384xbf16> to vector<64x384xbf16>
      %c0_75 = arith.constant 0 : index
      %c0_76 = arith.constant 0 : index
      %64 = vector.load %arg7[%c0_75, %c0_76] : memref<64x384xf32, #tpu.memory_space<vmem>>, vector<64x384xf32>
      %c0_77 = arith.constant 0 : index
      %c6 = arith.constant 6 : index
      %c0_78 = arith.constant 0 : index
      %c0_79 = arith.constant 0 : index
      %65 = vector.load %arg4[%c0_77, %c6, %c0_78, %c0_79] : memref<1x9x64x64xbf16, #tpu.memory_space<vmem>>, vector<1x1x64x64xbf16>
      %66 = vector.shape_cast %65 : vector<1x1x64x64xbf16> to vector<64x64xbf16>
      %cst_80 = arith.constant dense<0.000000e+00> : vector<64x384xf32>
      %67 = tpu.matmul %66, %63, %cst_80 {dimension_numbers = #tpu.dot_dimension_numbers<[1], [0], [0], [1], [0, 0, 1, 1], [], []>} : vector<64x64xbf16>, vector<64x384xbf16>, vector<64x384xf32> -> vector<64x384xf32>
      %68 = arith.addf %64, %67 : vector<64x384xf32>
      %c0_81 = arith.constant 0 : index
      %c0_82 = arith.constant 0 : index
      %69 = vector.load %arg7[%c0_81, %c0_82] : memref<64x384xf32, #tpu.memory_space<vmem>>, vector<64x384xf32>
      tpu.vector_store %arg7[%c0_81, %c0_82], %68 {strides = array<i32>} : memref<64x384xf32, #tpu.memory_space<vmem>>, vector<64x384xf32>,
      %c0_83 = arith.constant 0 : index
      %c0_84 = arith.constant 0 : index
      %c0_85 = arith.constant 0 : index
      %c37 = arith.constant 37 : index
      %70 = vector.load %arg3[%c0_83, %c0_84, %c0_85, %c37] : memref<1x1x64x512xbf16, #tpu.memory_space<vmem>>, vector<1x1x64x384xbf16>
      %71 = vector.shape_cast %70 : vector<1x1x64x384xbf16> to vector<64x384xbf16>
      %c0_86 = arith.constant 0 : index
      %c0_87 = arith.constant 0 : index
      %72 = vector.load %arg7[%c0_86, %c0_87] : memref<64x384xf32, #tpu.memory_space<vmem>>, vector<64x384xf32>
      %c0_88 = arith.constant 0 : index
      %c7 = arith.constant 7 : index
      %c0_89 = arith.constant 0 : index
      %c0_90 = arith.constant 0 : index
      %73 = vector.load %arg4[%c0_88, %c7, %c0_89, %c0_90] : memref<1x9x64x64xbf16, #tpu.memory_space<vmem>>, vector<1x1x64x64xbf16>
      %74 = vector.shape_cast %73 : vector<1x1x64x64xbf16> to vector<64x64xbf16>
      %cst_91 = arith.constant dense<0.000000e+00> : vector<64x384xf32>
      %75 = tpu.matmul %74, %71, %cst_91 {dimension_numbers = #tpu.dot_dimension_numbers<[1], [0], [0], [1], [0, 0, 1, 1], [], []>} : vector<64x64xbf16>, vector<64x384xbf16>, vector<64x384xf32> -> vector<64x384xf32>
      %76 = arith.addf %72, %75 : vector<64x384xf32>
      %c0_92 = arith.constant 0 : index
      %c0_93 = arith.constant 0 : index
      %77 = vector.load %arg7[%c0_92, %c0_93] : memref<64x384xf32, #tpu.memory_space<vmem>>, vector<64x384xf32>
      tpu.vector_store %arg7[%c0_92, %c0_93], %76 {strides = array<i32>} : memref<64x384xf32, #tpu.memory_space<vmem>>, vector<64x384xf32>,
      %c0_94 = arith.constant 0 : index
      %c0_95 = arith.constant 0 : index
      %c0_96 = arith.constant 0 : index
      %c38 = arith.constant 38 : index
      %78 = vector.load %arg3[%c0_94, %c0_95, %c0_96, %c38] : memref<1x1x64x512xbf16, #tpu.memory_space<vmem>>, vector<1x1x64x384xbf16>
      %79 = vector.shape_cast %78 : vector<1x1x64x384xbf16> to vector<64x384xbf16>
      %c0_97 = arith.constant 0 : index
      %c0_98 = arith.constant 0 : index
      %80 = vector.load %arg7[%c0_97, %c0_98] : memref<64x384xf32, #tpu.memory_space<vmem>>, vector<64x384xf32>
      %c0_99 = arith.constant 0 : index
      %c8 = arith.constant 8 : index
      %c0_100 = arith.constant 0 : index
      %c0_101 = arith.constant 0 : index
      %81 = vector.load %arg4[%c0_99, %c8, %c0_100, %c0_101] : memref<1x9x64x64xbf16, #tpu.memory_space<vmem>>, vector<1x1x64x64xbf16>
      %82 = vector.shape_cast %81 : vector<1x1x64x64xbf16> to vector<64x64xbf16>
      %cst_102 = arith.constant dense<0.000000e+00> : vector<64x384xf32>
      %83 = tpu.matmul %82, %79, %cst_102 {dimension_numbers = #tpu.dot_dimension_numbers<[1], [0], [0], [1], [0, 0, 1, 1], [], []>} : vector<64x64xbf16>, vector<64x384xbf16>, vector<64x384xf32> -> vector<64x384xf32>
      %84 = arith.addf %80, %83 : vector<64x384xf32>
      %c0_103 = arith.constant 0 : index
      %c0_104 = arith.constant 0 : index
      %85 = vector.load %arg7[%c0_103, %c0_104] : memref<64x384xf32, #tpu.memory_space<vmem>>, vector<64x384xf32>
      tpu.vector_store %arg7[%c0_103, %c0_104], %84 {strides = array<i32>} : memref<64x384xf32, #tpu.memory_space<vmem>>, vector<64x384xf32>,
    } else {
    }
    %c12_i32 = arith.constant 12 : i32
    %11 = arith.cmpi eq, %arg2, %c12_i32 : i32
    %12 = arith.extui %11 : i1 to i32
    %c0_i32_3 = arith.constant 0 : i32
    %13 = arith.cmpi ne, %12, %c0_i32_3 : i32
    scf.if %13 {
      %c0 = arith.constant 0 : index
      %c0_4 = arith.constant 0 : index
      %14 = vector.load %arg7[%c0, %c0_4] : memref<64x384xf32, #tpu.memory_space<vmem>>, vector<64x384xf32>
      %c0_5 = arith.constant 0 : index
      %c0_6 = arith.constant 0 : index
      %c0_7 = arith.constant 0 : index
      %c0_8 = arith.constant 0 : index
      %15 = vector.load %arg6[%c0_5, %c0_6, %c0_7, %c0_8] : memref<1x1x64x384xf32, #tpu.memory_space<vmem>>, vector<1x1x64x384xf32>
      %16 = vector.shape_cast %15 : vector<1x1x64x384xf32> to vector<64x384xf32>
      %17 = vector.shape_cast %14 : vector<64x384xf32> to vector<1x1x64x384xf32>
      tpu.vector_store %arg6[%c0_5, %c0_6, %c0_7, %c0_8], %17 {strides = array<i32>} : memref<1x1x64x384xf32, #tpu.memory_space<vmem>>, vector<1x1x64x384xf32>,
    } else {
    }
    return
  }
  func.func @transform_0(%arg0: i32, %arg1: i32, %arg2: i32) -> (i32, i32, i32, i32) {
    %c1_i32 = arith.constant 1 : i32
    %0 = arith.muli %arg0, %c1_i32 : i32
    %1 = arith.addi %0, %arg2 : i32
    %c6_i32 = arith.constant 6 : i32
    %2 = arith.subi %1, %c6_i32 : i32
    %c0_i32 = arith.constant 0 : i32
    %c7_i32 = arith.constant 7 : i32
    %3 = arith.maxsi %c0_i32, %2 : i32
    %4 = arith.minsi %c7_i32, %3 : i32
    %c0_i32_0 = arith.constant 0 : i32
    %c0_i32_1 = arith.constant 0 : i32
    %c0_i32_2 = arith.constant 0 : i32
    return %arg1, %4, %c0_i32_0, %c0_i32_1 : i32, i32, i32, i32
  }
  func.func @transform_1(%arg0: i32, %arg1: i32, %arg2: i32) -> (i32, i32, i32, i32) {
    %c0_i32 = arith.constant 0 : i32
    %c0_i32_0 = arith.constant 0 : i32
    %c0_i32_1 = arith.constant 0 : i32
    %c0_i32_2 = arith.constant 0 : i32
    return %arg2, %c0_i32, %c0_i32_0, %c0_i32_1 : i32, i32, i32, i32
  }
  func.func @transform_2(%arg0: i32, %arg1: i32, %arg2: i32) -> (i32, i32) {
    %c0_i32 = arith.constant 0 : i32
    %c0_i32_0 = arith.constant 0 : i32
    %c0_i32_1 = arith.constant 0 : i32
    return %c0_i32, %c0_i32_0 : i32, i32
  }
  func.func @transform_3(%arg0: i32, %arg1: i32, %arg2: i32) -> (i32, i32, i32, i32) {
    %c0_i32 = arith.constant 0 : i32
    %c0_i32_0 = arith.constant 0 : i32
    %c0_i32_1 = arith.constant 0 : i32
    return %arg1, %arg0, %c0_i32, %c0_i32_0 : i32, i32, i32, i32
  }
}

</mosaic_0001>

<bundles_post_ra>
// kernel: a_call__.5
= control target key start
LH: loop header
LB: loop body
LE: loop exit
PB: predicated region body
PF: predicated region fallthrough
CT: control target
= control target key end

     0   :  { %s2975_s12 = smov 0   ;;  %s2977_s13 = smov 0   ;;  %s3380_s0 = inlined_call_operand.vmem [shape: bf16[2,8,24,512], index: 0, kind: input, shape index: {}]   ;;  %s3381_s1 = inlined_call_operand.vmem [shape: bf16[1,9,32,24], index: 1, kind: input, shape index: {}]   ;;  %s3382_s2 = inlined_call_operand.vmem [shape: f32[32,1], index: 2, kind: input, shape index: {}]   ;;  %s3383_s3 = inlined_call_operand.vmem [shape: f32[2,8,32,384], index: 3, kind: output, shape index: {}]  }
   0x1   :  { %s2979_s14 = smov 0   ;;  %s2981_s15 = smov 0  }
   0x2   :  { %s2983_s16 = smov 0  }
   0x3 LB: > { %s28_s17 = sadd.s32 1, %s2936_s14  ;;  %s32_s18 = sadd.s32 1, %s2940_s15  ;;  %s2944_s16 = sphi %s2983_s16, %s13_s16   ;;  %s2940_s15 = sphi %s2981_s15, %s3387_s15   ;;  %s2936_s14 = sphi %s2979_s14, %s3386_s14   ;;  %s2932_s13 = sphi %s2977_s13, %s3385_s13   ;;  %s2928_s12 = sphi %s2975_s12, %s3384_s12  }
   0x4   : > { %p30_p0 = scmp.ge.s32.totalorder %s28_s17, 2  ;;  %p2428_p1 = scmp.ge.s32.totalorder %s2944_s16, 1 }
   0x5   : > { %p174_p2 = scmp.lt.s32.totalorder %s2944_s16, 17 }
   0x6   : > { %s3389_s17 = smov (%p30_p0, %s28_s17), 0  ;;  %s3391_s18 = smov (!%p30_p0, %s32_s18), %s2940_s15 }
   0x7   : > { %p175_p3 = pnand %p2428_p1, %p174_p2  ;;  %p34_p4 = scmp.ge.s32.totalorder %s3391_s18, 8 }
   0x8   : > { %p211_p5 = scmp.lt.s32.totalorder (!%p175_p3), %s2928_s12, 1  ;;  %p213_p6 = scmp.lt.s32.totalorder (!%p175_p3), %s2932_s13, 7  ;;  %v2946_v0 = vmov (!%p175_p3), 0   ;;  %vm338_vm0 = vcmask (!%p175_p3), 1043456   ;;  %v2886_v9 = vld [vmem:[%s3381_s1] sm:$0xff] (!%p175_p3)   ;;  %vm331_vm1 = vcmask (!%p175_p3), 195584  }
   0x9   : > { %s3393_s18 = smov (%p34_p4, %s3391_s18), 0  ;;  %178 = sbr.rel (%p175_p3) target bundleno = 491 (0x1eb), region = 32 }
   0xa   : > { %380 = vmatprep.mubr.bf16.mxu1 (!%p175_p3), %v2946_v0  ;;  %832 = vmatprep.mubr.bf16.mxu0 (!%p175_p3), %v2946_v0  ;;  %s2947_s26 = smov (!%p175_p3), 126   ;;  %s2948_s29 = smov (!%p175_p3), 127   ;;  %v2889_v14 = vld [vmem:[%s3381_s1 + $0x8] sm:$0xff] (!%p175_p3)   ;;  %vm775_vm2 = vcmask (!%p175_p3), 1031168   ;;  %vm549_vm3 = vcmask (!%p175_p3), 1039360   ;;  %v239_v26 = vld [vmem:[%s3382_s2] sm:$0xff] (!%p175_p3) }
   0xb   : > { %2874 = vset.pattern.permute.xlu0 (!%p175_p3), %v2946_v0  ;;  %2875 = vset.pattern.permute.xlu1 (!%p175_p3), %v2946_v0  ;;  %s2949_s5 = smov (!%p175_p3), 110   ;;  %s2950_s6 = smov (!%p175_p3), 109   ;;  %v240_v28 = vld [vmem:[%s3382_s2 + $0x8] sm:$0xff] (!%p175_p3)  ;;  %v3163_v33 = vld [vmem:[%s3381_s1 + $0x20] sm:$0xff] (!%p175_p3)   ;;  %v242_v34 = vld [vmem:[%s3382_s2 + $0x18] sm:$0xff] (!%p175_p3)  ;;  %vm1001_vm4 = vcmask (!%p175_p3), 900096  }
   0xc   : > { %s2951_s7 = smov (!%p175_p3), 108   ;;  %s2952_s8 = smov (!%p175_p3), 92   ;;  %v241_v36 = vld [vmem:[%s3382_s2 + $0x10] sm:$0xff] (!%p175_p3)  ;;  %v3185_v46 = vld [vmem:[%s3381_s1 + $0x28] sm:$0xff] (!%p175_p3)   ;;  %v2892_v53 = vld [vmem:[%s3381_s1 + $0x18] sm:$0xff] (!%p175_p3)   ;;  %vm1227_vm5 = vcmask (!%p175_p3), 891904  }
   0xd   : > { %s2953_s9 = smov (!%p175_p3), 91   ;;  %s2954_s10 = smov (!%p175_p3), 90   ;;  %v2890_v44 = vld [vmem:[%s3381_s1 + $0x10] sm:$0xff] (!%p175_p3)   ;;  %vm1453_vm6 = vcmask (!%p175_p3), 883712   ;;  %vm1679_vm7 = vcmask (!%p175_p3), 752640   ;;  %vm1905_vm8 = vcmask (!%p175_p3), 744448  }
   0xe   : > { %v2894_v62 = vld [vmem:[%s3381_s1 + $0x30] sm:$0xff] (!%p175_p3)   ;;  %vm2131_vm9 = vcmask (!%p175_p3), 736256  }
  0x10   : > { %s3395_s12 = smov (!%p211_p5, %s2928_s12), 1  ;;  %s3397_s13 = smov (!%p213_p6, %s2932_s13), 7 }
  0x11   : > { %s2824_s19 = smul.u32 96, %s3395_s12 }
  0x12   : > { %s2823_s20 = smul.u32 12, %s3397_s13 }
  0x14   : > { %s3009_s21 = sadd.s32 %s2824_s19, %s2823_s20 }
  0x15   : > { %s2429_s22 = sshll.u32 %s3009_s21, 2 }
  0x16   : > { %s3015_s25 = scalar_lea.vmem %s3380_s0, %s2429_s22 }
  0x17   : > { %v3018_v1 = vld [vmem:[%s3015_s25 + $0x4] ss:$16 sps:$4 sm:$0xff]   ;;  %v3021_v2 = vld [vmem:[%s3015_s25] ss:$16 sps:$4 sm:$0xff]   ;;  %v3026_v3 = vld [vmem:[%s3015_s25 + $0x8] ss:$16 sps:$4 sm:$0xff]  }
  0x18   : > { %761 = vrot.lane.b32.xlu0 %v3018_v1, %s2947_s26  ;;  %v704_v4 = vld [vmem:[%s3015_s25 + $0x20] sm:$0xff]  ;;  %348 = vmatprep.subr.bf16.mxu1 %v3018_v1  ;;  %v2887_v7 = vld [vmem:[%s3015_s25 + $0x8] ss:$16 sps:$4 sm:$0xff]   ;;  %v3081_v15 = vld [vmem:[%s3015_s25 + $0xc] ss:$16 sps:$4 sm:$0xff]  }
  0x19   : > { %759 = vrot.lane.b32.xlu1 %v3021_v2, %s2947_s26  ;;  %v3032_v5 = vcombine.low %v704_v4, %v704_v4  ;;  %v3034_v6 = vcombine.high %v704_v4, %v704_v4  ;;  %349 = vmatpush1.bf16.msra.mxu1 %v3021_v2  ;;  %v705_v10 = vld [vmem:[%s3015_s25 + $0x28] sm:$0xff] }
  0x1a   : > { %v2888_v11 = vld [vmem:[%s3015_s25 + $0x28] ss:$0 sps:$4 sm:$0xff]   ;;  %v3055_v12 = vcombine.low %v705_v10, %v705_v10  ;;  %v3090_v16 = vcombine.high %v705_v10, %v705_v10 }
  0x1b   : > { %2439 = vmatprep.subr.msk.bf16.mxu1 %vm338_vm0, %v3034_v6  ;;  %v340_v8 = vsel %vm338_vm0, %v3032_v5, 0  ;;  %v346_v13 = vsel %vm338_vm0, %v2888_v11, 0 }
  0x1c   : > { %763 = vrot.lane.b32.xlu0 %v3026_v3, %s2947_s26 }
  0x1d   : > { %535 = vrot.lane.b32.xlu1 %v3018_v1, %s2948_s29  ;;  %351 = vmatpush1.bf16.msra.mxu1 %v340_v8  ;;  %v2895_v8 = vld [vmem:[%s3381_s1 + $0x38] sm:$0xff]  }
  0x1e   : > { %2634 = vmatprep.subr.bf16.mxu1 %v2887_v7 }
  0x20   : > { %537 = vrot.lane.b32.xlu0 %v3026_v3, %s2948_s29  ;;  %2440 = vmatmul.mubr.msk.bf16.vlgmr.msra.gmra.mrb[0].mxu1 %vm331_vm1, %v2886_v9 }
  0x21   : > { %767 = vrot.lane.b32.xlu1 %v3032_v5, %s2947_s26  ;;  %2635 = vmatpush3.bf16.msra.mxu1 %v2887_v7 }
  0x22   : > { %390 = vmatprep.mubr.bf16.mxu1 %v2946_v0  ;;  %2814 = vmatprep.subr.msk.bf16.mxu1 %vm338_vm0, %v2888_v11 }
  0x24   : > { %769 = vrot.lane.b32.xlu0 %v3034_v6, %s2947_s26 }
  0x25   : > { %771 = vrot.lane.b32.xlu1 %v3055_v12, %s2947_s26  ;;  %2637 = vmatpush3.bf16.msra.mxu1 %v346_v13 }
  0x28   : > { %533 = vrot.lane.b32.xlu0 %v3021_v2, %s2948_s29  ;;  %2441 = vmatmul.mubr.msk.bf16.gmra.mrb[4].mxu1 %vm331_vm1, %v2889_v14 }
  0x29   : > { %541 = vrot.lane.b32.xlu1 %v3032_v5, %s2948_s29  ;;  %2638 = vmatprep.mubr.msk.bf16.mxu1 %vm331_vm1, %v2886_v9 }
  0x2c   : > { %543 = vrot.lane.b32.xlu0 %v3034_v6, %s2948_s29 }
  0x2d   : > { %545 = vrot.lane.b32.xlu1 %v3055_v12, %s2948_s29 }
  0x30   : > { %987 = vrot.lane.b32.xlu0 %v3018_v1, %s2949_s5  ;;  %2639 = vmatmul.mubr.msk.bf16.vlgmr.msra.gmra.mrb[8].mxu1 %vm331_vm1, %v2889_v14 }
  0x31   : > { %989 = vrot.lane.b32.xlu1 %v3026_v3, %s2949_s5  ;;  %606 = vmatprep.mubr.bf16.mxu1 %v2946_v0 }
  0x34   : > { %985 = vrot.lane.b32.xlu0 %v3021_v2, %s2949_s5 }
  0x35   : > { %539 = vrot.lane.b32.xlu1 %v3081_v15, %s2948_s29 }
  0x38   : > { %993 = vrot.lane.b32.xlu0 %v3032_v5, %s2949_s5 }
  0x39   : > { %995 = vrot.lane.b32.xlu1 %v3034_v6, %s2949_s5 }
  0x3c   : > { %997 = vrot.lane.b32.xlu0 %v3055_v12, %s2949_s5 }
  0x3d   : > { %547 = vrot.lane.b32.xlu1 %v3090_v16, %s2948_s29 }
  0x40   : > { %765 = vrot.lane.b32.xlu0 %v3081_v15, %s2947_s26 }
  0x41   : > { %1213 = vrot.lane.b32.xlu1 %v3018_v1, %s2950_s6 }
  0x44   : > { %1215 = vrot.lane.b32.xlu0 %v3026_v3, %s2950_s6 }
  0x45   : > { %1211 = vrot.lane.b32.xlu1 %v3021_v2, %s2950_s6 }
  0x48   : > { %773 = vrot.lane.b32.xlu0 %v3090_v16, %s2947_s26 }
  0x49   : > { %1219 = vrot.lane.b32.xlu1 %v3032_v5, %s2950_s6 }
  0x4c   : > { %1221 = vrot.lane.b32.xlu0 %v3034_v6, %s2950_s6 }
  0x4d   : > { %1223 = vrot.lane.b32.xlu1 %v3055_v12, %s2950_s6 }
  0x50   : > { %991 = vrot.lane.b32.xlu0 %v3081_v15, %s2949_s5 }
  0x51   : > { %999 = vrot.lane.b32.xlu1 %v3090_v16, %s2949_s5 }
  0x54   : > { %1439 = vrot.lane.b32.xlu0 %v3018_v1, %s2951_s7 }
  0x55   : > { %1441 = vrot.lane.b32.xlu1 %v3026_v3, %s2951_s7 }
  0x58   : > { %1437 = vrot.lane.b32.xlu0 %v3021_v2, %s2951_s7 }
  0x59   : > { %1445 = vrot.lane.b32.xlu1 %v3032_v5, %s2951_s7 }
  0x5c   : > { %1447 = vrot.lane.b32.xlu0 %v3034_v6, %s2951_s7 }
  0x5d   : > { %1449 = vrot.lane.b32.xlu1 %v3055_v12, %s2951_s7 }
  0x60   : > { %1217 = vrot.lane.b32.xlu0 %v3081_v15, %s2950_s6 }
  0x61   : > { %1225 = vrot.lane.b32.xlu1 %v3090_v16, %s2950_s6 }
  0x64   : > { %1665 = vrot.lane.b32.xlu0 %v3018_v1, %s2952_s8 }
  0x65   : > { %1667 = vrot.lane.b32.xlu1 %v3026_v3, %s2952_s8 }
  0x68   : > { %1663 = vrot.lane.b32.xlu0 %v3021_v2, %s2952_s8 }
  0x69   : > { %1443 = vrot.lane.b32.xlu1 %v3081_v15, %s2951_s7 }
  0x6c   : > { %1671 = vrot.lane.b32.xlu0 %v3032_v5, %s2952_s8 }
  0x6d   : > { %1673 = vrot.lane.b32.xlu1 %v3034_v6, %s2952_s8 }
  0x70   : > { %1675 = vrot.lane.b32.xlu0 %v3055_v12, %s2952_s8 }
  0x71   : > { %1451 = vrot.lane.b32.xlu1 %v3090_v16, %s2951_s7 }
  0x74   : > { %1669 = vrot.lane.b32.xlu0 %v3081_v15, %s2952_s8 }
  0x75   : > { %1891 = vrot.lane.b32.xlu1 %v3018_v1, %s2953_s9 }
  0x78   : > { %1893 = vrot.lane.b32.xlu0 %v3026_v3, %s2953_s9 }
  0x79   : > { %1889 = vrot.lane.b32.xlu1 %v3021_v2, %s2953_s9 }
  0x7c   : > { %1677 = vrot.lane.b32.xlu0 %v3090_v16, %s2952_s8 }
  0x7d   : > { %1897 = vrot.lane.b32.xlu1 %v3032_v5, %s2953_s9 }
  0x80   : > { %1899 = vrot.lane.b32.xlu0 %v3034_v6, %s2953_s9 }
  0x81   : > { %1901 = vrot.lane.b32.xlu1 %v3055_v12, %s2953_s9 }
  0x84   : > { %1895 = vrot.lane.b32.xlu0 %v3081_v15, %s2953_s9 }
  0x85   : > { %1903 = vrot.lane.b32.xlu1 %v3090_v16, %s2953_s9  ;;  %s2430_s9 = sshll.u32 %s3009_s21, 3 }
  0x86   : > { %s3351_s12 = scalar_lea.vmem %s3383_s3, %s2430_s9 }
  0x88   : > { %2117 = vrot.lane.b32.xlu0 %v3018_v1, %s2954_s10 }
  0x89   : > { %2119 = vrot.lane.b32.xlu1 %v3026_v3, %s2954_s10 }
  0x8a   : > { %v762_v17 = vpop.permute.xlu0 %761 }
  0x8b   : > { %v760_v18 = vpop.permute.xlu1 %759 }
  0x8c   : > { %2115 = vrot.lane.b32.xlu0 %v3021_v2, %s2954_s10  ;;  %v776_v22 = vsel %vm775_vm2, %v760_v18, %v762_v17  ;;  %v2896_v18 = vld [vmem:[%s3381_s1 + $0x40] sm:$0xff]  }
  0x8d   : > { %2123 = vrot.lane.b32.xlu1 %v3032_v5, %s2954_s10 }
  0x8e   : > { %v3137_v19 = vpop.permute.xlu0 %763 }
  0x8f   : > { %v536_v20 = vpop.permute.xlu1 %535  ;;  %v777_v21 = vsel %vm775_vm2, %v762_v17, %v3137_v19 }
  0x90   : > { %800 = vmatprep.subr.bf16.mxu0 %v777_v21  ;;  %2125 = vrot.lane.b32.xlu0 %v3034_v6, %s2954_s10 }
  0x91   : > { %2127 = vrot.lane.b32.xlu1 %v3055_v12, %s2954_s10  ;;  %801 = vmatpush1.bf16.msra.mxu0 %v776_v22 }
  0x92   : > { %v538_v23 = vpop.permute.xlu0 %537 }
  0x93   : > { %v768_v24 = vpop.permute.xlu1 %767  ;;  %v551_v25 = vsel %vm549_vm3, %v536_v20, %v538_v23 }
  0x94   : > { %2121 = vrot.lane.b32.xlu0 %v3081_v15, %s2954_s10  ;;  %574 = vmatprep.subr.bf16.mxu1 %v551_v25 }
  0x95   : > { %2129 = vrot.lane.b32.xlu1 %v3090_v16, %s2954_s10 }
  0x96   : > { %v770_v27 = vpop.permute.xlu0 %769 }
  0x97   : > { %v779_v29 = vsel %vm775_vm2, %v768_v24, %v770_v27  ;;  %v3154_v30 = vpop.permute.xlu1 %771 }
  0x98   : > { %v780_v31 = vsel %vm775_vm2, %v770_v27, %v3154_v30  ;;  %v792_v32 = vsel %vm338_vm0, %v779_v29, 0  ;;  %245 = vperm.xlu0 %2874, %v239_v26   ;;  %v2897_v27 = vld [vmem:[%s3381_s1 + $0x48] sm:$0xff]  }
  0x99   : > { %2477 = vmatprep.subr.msk.bf16.mxu0 %vm338_vm0, %v780_v31  ;;  %250 = vperm.xlu1 %2875, %v240_v28  }
  0x9a   : > { %803 = vmatpush1.bf16.msra.mxu0 %v792_v32  ;;  %v534_v35 = vpop.permute.xlu0 %533 }
  0x9b   : > { %v542_v37 = vpop.permute.xlu1 %541  ;;  %v550_v38 = vsel %vm549_vm3, %v534_v35, %v536_v20 }
  0x9c   : > { %575 = vmatpush1.bf16.msra.mxu1 %v550_v38  ;;  %260 = vperm.xlu0 %2874, %v242_v34  }
  0x9d   : > { %2478 = vmatmul.mubr.msk.bf16.vlgmr.msra.gmra.mrb[0].mxu0 %vm331_vm1, %v3163_v33  ;;  %255 = vperm.xlu1 %2875, %v241_v36   ;;  %v2898_v36 = vld [vmem:[%s3381_s1 + $0x50] sm:$0xff]  }
  0x9e   : > { %v544_v39 = vpop.permute.xlu0 %543  ;;  %842 = vmatprep.mubr.bf16.mxu0 %v2946_v0 }
  0x9f   : > { %v546_v40 = vpop.permute.xlu1 %545  ;;  %v553_v41 = vsel %vm549_vm3, %v542_v37, %v544_v39 }
  0xa0   : > { %v554_v42 = vsel %vm549_vm3, %v544_v39, %v546_v40  ;;  %v566_v43 = vsel %vm338_vm0, %v553_v41, 0 }
  0xa1   : > { %2458 = vmatprep.subr.msk.bf16.mxu1 %vm338_vm0, %v554_v42 }
  0xa2   : > { %577 = vmatpush1.bf16.msra.mxu1 %v566_v43  ;;  %v988_v45 = vpop.permute.xlu0 %987 }
  0xa3   : > { %v3187_v47 = vpop.permute.xlu1 %989 }
  0xa4   : > { %v1003_v48 = vsel %vm1001_vm4, %v988_v45, %v3187_v47 }
  0xa5   : > { %2459 = vmatmul.mubr.msk.bf16.vlgmr.msra.gmra.mrb[0].mxu1 %vm331_vm1, %v2890_v44  ;;  %1026 = vmatprep.subr.bf16.mxu0 %v1003_v48 }
  0xa6   : > { %v986_v49 = vpop.permute.xlu0 %985  ;;  %616 = vmatprep.mubr.bf16.mxu1 %v2946_v0  ;;  %2479 = vmatmul.mubr.msk.bf16.gmra.mrb[4].mxu0 %vm331_vm1, %v3185_v46 }
  0xa7   : > { %v540_v50 = vpop.permute.xlu1 %539  ;;  %v1002_v51 = vsel %vm1001_vm4, %v986_v49, %v988_v45  ;;  %1058 = vmatprep.mubr.bf16.mxu0 %v2946_v0  ;;  %v2899_v45 = vld [vmem:[%s3381_s1 + $0x58] sm:$0xff]  }
  0xa8   : > { %v552_v52 = vsel %vm549_vm3, %v538_v23, %v540_v50  ;;  %1027 = vmatpush1.bf16.msra.mxu0 %v1002_v51 }
  0xa9   : > { %2642 = vmatprep.subr.bf16.mxu1 %v552_v52 }
  0xaa   : > { %2643 = vmatpush3.bf16.msra.mxu1 %v552_v52  ;;  %v994_v54 = vpop.permute.xlu0 %993 }
  0xab   : > { %v996_v55 = vpop.permute.xlu1 %995 }
  0xac   : > { %v1005_v56 = vsel %vm1001_vm4, %v994_v54, %v996_v55 }
  0xad   : > { %2460 = vmatmul.mubr.msk.bf16.gmra.mrb[4].mxu1 %vm331_vm1, %v2892_v53  ;;  %v1018_v60 = vsel %vm338_vm0, %v1005_v56, 0 }
  0xae   : > { %v998_v57 = vpop.permute.xlu0 %997  ;;  %2646 = vmatprep.mubr.msk.bf16.mxu1 %vm331_vm1, %v2890_v44 }
  0xaf   : > { %v548_v58 = vpop.permute.xlu1 %547  ;;  %v1006_v59 = vsel %vm1001_vm4, %v996_v55, %v998_v57 }
  0xb0   : > { %v555_v61 = vsel %vm549_vm3, %v546_v40, %v548_v58  ;;  %2496 = vmatprep.subr.msk.bf16.mxu0 %vm338_vm0, %v1006_v59  ;;  %v2900_v58 = vld [vmem:[%s3381_s1 + $0x60] sm:$0xff]  }
  0xb1   : > { %v572_v63 = vsel %vm338_vm0, %v555_v61, 0  ;;  %2815 = vmatprep.subr.msk.bf16.mxu1 %vm338_vm0, %v555_v61  ;;  %1029 = vmatpush1.bf16.msra.mxu0 %v1018_v60 }
  0xb2   : > { %2645 = vmatpush3.bf16.msra.mxu1 %v572_v63  ;;  %v766_v1 = vpop.permute.xlu0 %765 }
  0xb3   : > { %v1214_v2 = vpop.permute.xlu1 %1213  ;;  %v778_v3 = vsel %vm775_vm2, %v3137_v19, %v766_v1 }
  0xb4   : > { %2650 = vmatprep.subr.bf16.mxu1 %v778_v3  ;;  %2497 = vmatmul.mubr.msk.bf16.vlgmr.msra.gmra.mrb[0].mxu0 %vm331_vm1, %v2894_v62 }
  0xb5   : > { %2647 = vmatmul.mubr.msk.bf16.vlgmr.msra.gmra.mrb[8].mxu1 %vm331_vm1, %v2892_v53  ;;  %1068 = vmatprep.mubr.bf16.mxu0 %v2946_v0 }
  0xb6   : > { %2651 = vmatpush3.bf16.msra.mxu1 %v778_v3  ;;  %v1216_v4 = vpop.permute.xlu0 %1215  ;;  %2654 = vmatprep.mubr.msk.bf16.mxu1 %vm331_vm1, %v3163_v33 }
  0xb7   : > { %v1212_v5 = vpop.permute.xlu1 %1211  ;;  %v1229_v6 = vsel %vm1227_vm5, %v1214_v2, %v1216_v4 }
  0xb8   : > { %v1228_v7 = vsel %vm1227_vm5, %v1212_v5, %v1214_v2  ;;  %1252 = vmatprep.subr.bf16.mxu0 %v1229_v6 }
  0xb9   : > { %1253 = vmatpush1.bf16.msra.mxu0 %v1228_v7 }
  0xba   : > { %v774_v9 = vpop.permute.xlu0 %773 }
  0xbb   : > { %v1220_v10 = vpop.permute.xlu1 %1219  ;;  %v781_v11 = vsel %vm775_vm2, %v3154_v30, %v774_v9 }
  0xbc   : > { %v798_v12 = vsel %vm338_vm0, %v781_v11, 0  ;;  %2816 = vmatprep.subr.msk.bf16.mxu1 %vm338_vm0, %v781_v11  ;;  %2498 = vmatmul.mubr.msk.bf16.gmra.mrb[4].mxu0 %vm331_vm1, %v2895_v8 }
  0xbd   : > { %2653 = vmatpush3.bf16.msra.mxu1 %v798_v12  ;;  %1284 = vmatprep.mubr.bf16.mxu0 %v2946_v0 }
  0xbe   : > { %v1222_v13 = vpop.permute.xlu0 %1221 }
  0xbf   : > { %v1224_v14 = vpop.permute.xlu1 %1223  ;;  %v1231_v15 = vsel %vm1227_vm5, %v1220_v10, %v1222_v13 }
  0xc0   : > { %v1232_v16 = vsel %vm1227_vm5, %v1222_v13, %v1224_v14  ;;  %v1244_v17 = vsel %vm338_vm0, %v1231_v15, 0 }
  0xc1   : > { %2515 = vmatprep.subr.msk.bf16.mxu0 %vm338_vm0, %v1232_v16  ;;  %2655 = vmatmul.mubr.msk.bf16.vlgmr.msra.gmra.mrb[8].mxu1 %vm331_vm1, %v3185_v46 }
  0xc2   : > { %1255 = vmatpush1.bf16.msra.mxu0 %v1244_v17  ;;  %v992_v19 = vpop.permute.xlu0 %991  ;;  %2662 = vmatprep.mubr.msk.bf16.mxu1 %vm331_vm1, %v2894_v62 }
  0xc3   : > { %v1000_v20 = vpop.permute.xlu1 %999  ;;  %v1004_v21 = vsel %vm1001_vm4, %v3187_v47, %v992_v19 }
  0xc4   : > { %2658 = vmatprep.subr.bf16.mxu1 %v1004_v21  ;;  %v1007_v22 = vsel %vm1001_vm4, %v998_v57, %v1000_v20 }
  0xc5   : > { %2659 = vmatpush3.bf16.msra.mxu1 %v1004_v21  ;;  %2516 = vmatmul.mubr.msk.bf16.vlgmr.msra.gmra.mrb[0].mxu0 %vm331_vm1, %v2896_v18  ;;  %v1024_v25 = vsel %vm338_vm0, %v1007_v22, 0 }
  0xc6   : > { %v1440_v23 = vpop.permute.xlu0 %1439  ;;  %2817 = vmatprep.subr.msk.bf16.mxu1 %vm338_vm0, %v1007_v22  ;;  %1294 = vmatprep.mubr.bf16.mxu0 %v2946_v0 }
  0xc7   : > { %v1442_v24 = vpop.permute.xlu1 %1441 }
  0xc8   : > { %v1455_v26 = vsel %vm1453_vm6, %v1440_v23, %v1442_v24 }
  0xc9   : > { %1478 = vmatprep.subr.bf16.mxu0 %v1455_v26  ;;  %2661 = vmatpush3.bf16.msra.mxu1 %v1024_v25 }
  0xca   : > { %v1438_v28 = vpop.permute.xlu0 %1437 }
  0xcb   : > { %v1446_v29 = vpop.permute.xlu1 %1445  ;;  %v1454_v30 = vsel %vm1453_vm6, %v1438_v28, %v1440_v23  ;;  %v2903_v23 = vld [vmem:[%s3381_s1 + $0x78] sm:$0xff]  }
  0xcc   : > { %1479 = vmatpush1.bf16.msra.mxu0 %v1454_v30 }
  0xcd   : > { %2517 = vmatmul.mubr.msk.bf16.gmra.mrb[4].mxu0 %vm331_vm1, %v2897_v27  ;;  %2663 = vmatmul.mubr.msk.bf16.vlgmr.msra.gmra.mrb[8].mxu1 %vm331_vm1, %v2895_v8 }
  0xce   : > { %v1448_v31 = vpop.permute.xlu0 %1447  ;;  %1510 = vmatprep.mubr.bf16.mxu0 %v2946_v0  ;;  %2670 = vmatprep.mubr.msk.bf16.mxu1 %vm331_vm1, %v2896_v18 }
  0xcf   : > { %v1450_v32 = vpop.permute.xlu1 %1449  ;;  %v1457_v33 = vsel %vm1453_vm6, %v1446_v29, %v1448_v31 }
  0xd0   : > { %v1458_v34 = vsel %vm1453_vm6, %v1448_v31, %v1450_v32  ;;  %v1470_v35 = vsel %vm338_vm0, %v1457_v33, 0 }
  0xd1   : > { %2534 = vmatprep.subr.msk.bf16.mxu0 %vm338_vm0, %v1458_v34 }
  0xd2   : > { %1481 = vmatpush1.bf16.msra.mxu0 %v1470_v35  ;;  %v1218_v37 = vpop.permute.xlu0 %1217 }
  0xd3   : > { %v1226_v38 = vpop.permute.xlu1 %1225  ;;  %v1230_v39 = vsel %vm1227_vm5, %v1216_v4, %v1218_v37  ;;  %v2901_v4 = vld [vmem:[%s3381_s1 + $0x68] sm:$0xff]  }
  0xd4   : > { %2666 = vmatprep.subr.bf16.mxu1 %v1230_v39  ;;  %v1233_v40 = vsel %vm1227_vm5, %v1224_v14, %v1226_v38  ;;  %v2902_v14 = vld [vmem:[%s3381_s1 + $0x70] sm:$0xff]   ;;  %v2905_v38 = vld [vmem:[%s3381_s1 + $0x88] sm:$0xff]  }
  0xd5   : > { %2667 = vmatpush3.bf16.msra.mxu1 %v1230_v39  ;;  %2535 = vmatmul.mubr.msk.bf16.vlgmr.msra.gmra.mrb[0].mxu0 %vm331_vm1, %v2898_v36  ;;  %v1250_v43 = vsel %vm338_vm0, %v1233_v40, 0 }
  0xd6   : > { %v1666_v41 = vpop.permute.xlu0 %1665  ;;  %2818 = vmatprep.subr.msk.bf16.mxu1 %vm338_vm0, %v1233_v40  ;;  %1520 = vmatprep.mubr.bf16.mxu0 %v2946_v0 }
  0xd7   : > { %v1668_v42 = vpop.permute.xlu1 %1667 }
  0xd8   : > { %v1681_v44 = vsel %vm1679_vm7, %v1666_v41, %v1668_v42 }
  0xd9   : > { %1704 = vmatprep.subr.bf16.mxu0 %v1681_v44  ;;  %2669 = vmatpush3.bf16.msra.mxu1 %v1250_v43 }
  0xda   : > { %v1664_v46 = vpop.permute.xlu0 %1663 }
  0xdb   : > { %v1444_v47 = vpop.permute.xlu1 %1443  ;;  %v1680_v48 = vsel %vm1679_vm7, %v1664_v46, %v1666_v41 }
  0xdc   : > { %v1456_v49 = vsel %vm1453_vm6, %v1442_v24, %v1444_v47  ;;  %1705 = vmatpush1.bf16.msra.mxu0 %v1680_v48  ;;  %2671 = vmatmul.mubr.msk.bf16.vlgmr.msra.gmra.mrb[8].mxu1 %vm331_vm1, %v2897_v27  ;;  %v2904_v27 = vld [vmem:[%s3381_s1 + $0x80] sm:$0xff]  }
  0xdd   : > { %2674 = vmatprep.subr.bf16.mxu1 %v1456_v49  ;;  %2536 = vmatmul.mubr.msk.bf16.gmra.mrb[4].mxu0 %vm331_vm1, %v2899_v45 }
  0xde   : > { %2675 = vmatpush3.bf16.msra.mxu1 %v1456_v49  ;;  %v1672_v50 = vpop.permute.xlu0 %1671  ;;  %1736 = vmatprep.mubr.bf16.mxu0 %v2946_v0 }
  0xdf   : > { %v1674_v51 = vpop.permute.xlu1 %1673  ;;  %2678 = vmatprep.mubr.msk.bf16.mxu1 %vm331_vm1, %v2898_v36 }
  0xe0   : > { %v1683_v52 = vsel %vm1679_vm7, %v1672_v50, %v1674_v51 }
  0xe1   : > { %v1696_v56 = vsel %vm338_vm0, %v1683_v52, 0 }
  0xe2   : > { %v1676_v53 = vpop.permute.xlu0 %1675 }
  0xe3   : > { %v1452_v54 = vpop.permute.xlu1 %1451  ;;  %v1684_v55 = vsel %vm1679_vm7, %v1674_v51, %v1676_v53 }
  0xe4   : > { %v1459_v57 = vsel %vm1453_vm6, %v1450_v32, %v1452_v54  ;;  %2553 = vmatprep.subr.msk.bf16.mxu0 %vm338_vm0, %v1684_v55 }
  0xe5   : > { %v1476_v59 = vsel %vm338_vm0, %v1459_v57, 0  ;;  %2819 = vmatprep.subr.msk.bf16.mxu1 %vm338_vm0, %v1459_v57  ;;  %1707 = vmatpush1.bf16.msra.mxu0 %v1696_v56 }
  0xe6   : > { %2677 = vmatpush3.bf16.msra.mxu1 %v1476_v59  ;;  %v1670_v60 = vpop.permute.xlu0 %1669 }
  0xe7   : > { %v1892_v61 = vpop.permute.xlu1 %1891  ;;  %v1682_v62 = vsel %vm1679_vm7, %v1668_v42, %v1670_v60 }
  0xe8   : > { %2554 = vmatmul.mubr.msk.bf16.vlgmr.msra.gmra.mrb[0].mxu0 %vm331_vm1, %v2900_v58  ;;  %2682 = vmatprep.subr.bf16.mxu1 %v1682_v62 }
  0xe9   : > { %2679 = vmatmul.mubr.msk.bf16.vlgmr.msra.gmra.mrb[8].mxu1 %vm331_vm1, %v2899_v45  ;;  %1746 = vmatprep.mubr.bf16.mxu0 %v2946_v0 }
  0xea   : > { %2683 = vmatpush3.bf16.msra.mxu1 %v1682_v62  ;;  %v1894_v63 = vpop.permute.xlu0 %1893  ;;  %2686 = vmatprep.mubr.msk.bf16.mxu1 %vm331_vm1, %v2900_v58 }
  0xeb   : > { %v1890_v1 = vpop.permute.xlu1 %1889  ;;  %v1907_v2 = vsel %vm1905_vm8, %v1892_v61, %v1894_v63 }
  0xec   : > { %v1906_v3 = vsel %vm1905_vm8, %v1890_v1, %v1892_v61  ;;  %1930 = vmatprep.subr.bf16.mxu0 %v1907_v2 }
  0xed   : > { %1931 = vmatpush1.bf16.msra.mxu0 %v1906_v3 }
  0xee   : > { %v1678_v5 = vpop.permute.xlu0 %1677 }
  0xef   : > { %v1898_v6 = vpop.permute.xlu1 %1897  ;;  %v1685_v7 = vsel %vm1679_vm7, %v1676_v53, %v1678_v5 }
  0xf0   : > { %v1702_v8 = vsel %vm338_vm0, %v1685_v7, 0  ;;  %2555 = vmatmul.mubr.msk.bf16.gmra.mrb[4].mxu0 %vm331_vm1, %v2901_v4  ;;  %2820 = vmatprep.subr.msk.bf16.mxu1 %vm338_vm0, %v1685_v7 }
  0xf1   : > { %2685 = vmatpush3.bf16.msra.mxu1 %v1702_v8  ;;  %1962 = vmatprep.mubr.bf16.mxu0 %v2946_v0 }
  0xf2   : > { %v1900_v9 = vpop.permute.xlu0 %1899 }
  0xf3   : > { %v1902_v10 = vpop.permute.xlu1 %1901  ;;  %v1909_v11 = vsel %vm1905_vm8, %v1898_v6, %v1900_v9 }
  0xf4   : > { %v1910_v12 = vsel %vm1905_vm8, %v1900_v9, %v1902_v10  ;;  %v1922_v13 = vsel %vm338_vm0, %v1909_v11, 0 }
  0xf5   : > { %2572 = vmatprep.subr.msk.bf16.mxu0 %vm338_vm0, %v1910_v12  ;;  %2687 = vmatmul.mubr.msk.bf16.vlgmr.msra.gmra.mrb[8].mxu1 %vm331_vm1, %v2901_v4 }
  0xf6   : > { %1933 = vmatpush1.bf16.msra.mxu0 %v1922_v13  ;;  %v1896_v15 = vpop.permute.xlu0 %1895  ;;  %2694 = vmatprep.mubr.msk.bf16.mxu1 %vm331_vm1, %v2902_v14 }
  0xf7   : > { %v1904_v16 = vpop.permute.xlu1 %1903  ;;  %v1908_v17 = vsel %vm1905_vm8, %v1894_v63, %v1896_v15 }
  0xf8   : > { %2690 = vmatprep.subr.bf16.mxu1 %v1908_v17  ;;  %v1911_v18 = vsel %vm1905_vm8, %v1902_v10, %v1904_v16 }
  0xf9   : > { %2573 = vmatmul.mubr.msk.bf16.vlgmr.msra.gmra.mrb[0].mxu0 %vm331_vm1, %v2902_v14  ;;  %2691 = vmatpush3.bf16.msra.mxu1 %v1908_v17  ;;  %v1928_v21 = vsel %vm338_vm0, %v1911_v18, 0 }
  0xfa   : > { %v2118_v19 = vpop.permute.xlu0 %2117  ;;  %2821 = vmatprep.subr.msk.bf16.mxu1 %vm338_vm0, %v1911_v18  ;;  %1972 = vmatprep.mubr.bf16.mxu0 %v2946_v0 }
  0xfb   : > { %v2120_v20 = vpop.permute.xlu1 %2119 }
  0xfc   : > { %v2133_v22 = vsel %vm2131_vm9, %v2118_v19, %v2120_v20 }
  0xfd   : > { %2156 = vmatprep.subr.bf16.mxu0 %v2133_v22  ;;  %2693 = vmatpush3.bf16.msra.mxu1 %v1928_v21 }
  0xfe   : > { %v2116_v24 = vpop.permute.xlu0 %2115 }
  0xff   : > { %v2124_v25 = vpop.permute.xlu1 %2123  ;;  %v2132_v26 = vsel %vm2131_vm9, %v2116_v24, %v2118_v19 }
 0x100   : > { %2157 = vmatpush1.bf16.msra.mxu0 %v2132_v26 }
 0x101   : > { %2574 = vmatmul.mubr.msk.bf16.gmra.mrb[4].mxu0 %vm331_vm1, %v2903_v23  ;;  %2695 = vmatmul.mubr.msk.bf16.vlgmr.msra.gmra.mrb[8].mxu1 %vm331_vm1, %v2903_v23 }
 0x102   : > { %v2126_v28 = vpop.permute.xlu0 %2125  ;;  %2188 = vmatprep.mubr.bf16.mxu0 %v2946_v0  ;;  %2702 = vmatprep.mubr.msk.bf16.mxu1 %vm331_vm1, %v2904_v27 }
 0x103   : > { %v2128_v29 = vpop.permute.xlu1 %2127  ;;  %v2135_v30 = vsel %vm2131_vm9, %v2124_v25, %v2126_v28 }
 0x104   : > { %v2136_v31 = vsel %vm2131_vm9, %v2126_v28, %v2128_v29  ;;  %v2148_v32 = vsel %vm338_vm0, %v2135_v30, 0 }
 0x105   : > { %2591 = vmatprep.subr.msk.bf16.mxu0 %vm338_vm0, %v2136_v31 }
 0x106   : > { %2159 = vmatpush1.bf16.msra.mxu0 %v2148_v32  ;;  %v2122_v33 = vpop.permute.xlu0 %2121 }
 0x107   : > { %v2130_v34 = vpop.permute.xlu1 %2129  ;;  %v2134_v35 = vsel %vm2131_vm9, %v2120_v20, %v2122_v33 }
 0x108   : > { %2698 = vmatprep.subr.bf16.mxu1 %v2134_v35  ;;  %v2137_v36 = vsel %vm2131_vm9, %v2128_v29, %v2130_v34 }
 0x109   : > { %2592 = vmatmul.mubr.msk.bf16.vlgmr.msra.gmra.mrb[0].mxu0 %vm331_vm1, %v2904_v27  ;;  %2699 = vmatpush3.bf16.msra.mxu1 %v2134_v35  ;;  %v2154_v37 = vsel %vm338_vm0, %v2137_v36, 0 }
 0x10a   : > { %2822 = vmatprep.subr.msk.bf16.mxu1 %vm338_vm0, %v2137_v36  ;;  %2198 = vmatprep.mubr.bf16.mxu0 %v2946_v0 }
 0x10d   : > { %2701 = vmatpush3.bf16.msra.mxu1 %v2154_v37 }
 0x110   : > { %2703 = vmatmul.mubr.msk.bf16.vlgmr.msra.gmra.mrb[8].mxu1 %vm331_vm1, %v2905_v38 }
 0x111   : > { %2593 = vmatmul.mubr.msk.bf16.gmra.mrb[4].mxu0 %vm331_vm1, %v2905_v38 }
 0x117   : > { %v246_v0 = vpop.permute.xlu0 %245 }
 0x118   : > { %v251_v47 = vpop.permute.xlu1 %250 }
 0x11b   : > { %v261_v61 = vpop.permute.xlu0 %260 }
 0x11c   : > { %v256_v59 = vpop.permute.xlu1 %255 }
 0x178   : > { %v608_v39 = vpop.f32.mrb[0].mxu1 }
 0x179   : > { %v610_v40 = vpop.f32.mrb[1].mxu1  ;;  %v2706_v48 = vadd.f32 %v608_v39, %v246_v0 }
 0x17a   : > { %v612_v41 = vpop.f32.mrb[2].mxu1  ;;  %v2708_v49 = vadd.f32 %v610_v40, %v246_v0 }
 0x17b   : > { %v614_v42 = vpop.f32.mrb[3].mxu1  ;;  %v2710_v51 = vadd.f32 %v612_v41, %v251_v47 }
 0x17c   : > { %v2712_v54 = vadd.f32 %v614_v42, %v251_v47 }
 0x180   : > { %v618_v43 = vpop.f32.mrb[4].mxu1 }
 0x181   : > { %v620_v44 = vpop.f32.mrb[5].mxu1  ;;  %v2714_v62 = vadd.f32 %v618_v43, %v256_v59 }
 0x182   : > { %v622_v45 = vpop.f32.mrb[6].mxu1  ;;  %v2716_v1 = vadd.f32 %v620_v44, %v256_v59 }
 0x183   : > { %v624_v46 = vpop.f32.mrb[7].mxu1  ;;  %v2718_v5 = vadd.f32 %v622_v45, %v261_v61 }
 0x184   : > { %v2720_v10 = vadd.f32 %v624_v46, %v261_v61 }
 0x1dc   : > { %v2190_v50 = vpop.f32.mrb[0].mxu0 }
 0x1dd   : > { %v2707_v52 = vadd.f32 %v2706_v48, %v2190_v50  ;;  %v2192_v53 = vpop.f32.mrb[1].mxu0 }
 0x1de   : > { %v2709_v55 = vadd.f32 %v2708_v49, %v2192_v53  ;;  %v2194_v56 = vpop.f32.mrb[2].mxu0 }
 0x1df   : > { %2297 = vst [vmem:[%s3351_s12] sm:$0xff] %v2707_v52  ;;  %v2711_v57 = vadd.f32 %v2710_v51, %v2194_v56  ;;  %v2196_v58 = vpop.f32.mrb[3].mxu0 }
 0x1e0   : > { %2298 = vst [vmem:[%s3351_s12 + $0x8] sm:$0xff] %v2709_v55  ;;  %v2713_v60 = vadd.f32 %v2712_v54, %v2196_v58 }
 0x1e1   : > { %2300 = vst [vmem:[%s3351_s12 + $0x18] sm:$0xff] %v2711_v57 }
 0x1e2   : > { %2301 = vst [vmem:[%s3351_s12 + $0x20] sm:$0xff] %v2713_v60 }
 0x1e3   : > { %v2704_v63 = vpop.f32.mrb[8].mxu1 }
 0x1e4   : > { %v2200_v2 = vpop.f32.mrb[4].mxu0  ;;  %v2722_v3 = vadd.f32 %v2704_v63, %v256_v59  ;;  %v2243_v4 = vpop.f32.mrb[9].mxu1 }
 0x1e5   : > { %v2715_v6 = vadd.f32 %v2714_v62, %v2200_v2  ;;  %v2202_v7 = vpop.f32.mrb[5].mxu0  ;;  %v2723_v8 = vadd.f32 %v2243_v4, %v246_v0  ;;  %v2705_v9 = vpop.f32.mrb[10].mxu1 }
 0x1e6   : > { %2305 = vst [vmem:[%s3351_s12 + $0x40] sm:$0xff] %v2722_v3  ;;  %v2717_v11 = vadd.f32 %v2716_v1, %v2202_v7  ;;  %v2204_v12 = vpop.f32.mrb[6].mxu0  ;;  %v2724_v13 = vadd.f32 %v2705_v9, %v261_v61  ;;  %v2246_v14 = vpop.f32.mrb[11].mxu1 }
 0x1e7   : > { %2303 = vst [vmem:[%s3351_s12 + $0x30] sm:$0xff] %v2715_v6  ;;  %2299 = vst [vmem:[%s3351_s12 + $0x10] sm:$0xff] %v2723_v8  ;;  %v2719_v15 = vadd.f32 %v2718_v5, %v2204_v12  ;;  %v2206_v16 = vpop.f32.mrb[7].mxu0  ;;  %v2725_v17 = vadd.f32 %v2246_v14, %v251_v47 }
 0x1e8   : > { %2304 = vst [vmem:[%s3351_s12 + $0x38] sm:$0xff] %v2717_v11  ;;  %2308 = vst [vmem:[%s3351_s12 + $0x58] sm:$0xff] %v2724_v13  ;;  %v2721_v18 = vadd.f32 %v2720_v10, %v2206_v16 }
 0x1e9   : > { %2306 = vst [vmem:[%s3351_s12 + $0x48] sm:$0xff] %v2719_v15  ;;  %2302 = vst [vmem:[%s3351_s12 + $0x28] sm:$0xff] %v2725_v17 }
 0x1ea   : > { %2307 = vst [vmem:[%s3351_s12 + $0x50] sm:$0xff] %v2721_v18 }
 0x1eb PF: > { %s13_s16 = sadd.s32 1, %s2944_s16   ;;  %s3384_s12 = smov %s2936_s14 }
 0x1ec   : > { %p10_p7 = scmp.ge.s32.totalorder %s13_s16, 18   ;;  %s3385_s13 = smov %s2940_s15 }
 0x1ed   : > { %s3386_s14 = smov %s3389_s17  ;;  %s3387_s15 = smov %s3393_s18 }
 0x1ee   :  { %12 = sbr.rel (!%p10_p7) target bundleno = 3 (0x3), region = 81 }

// kernel: a_call__.4
= control target key start
LH: loop header
LB: loop body
LE: loop exit
PB: predicated region body
PF: predicated region fallthrough
CT: control target
= control target key end

     0   :  { %s6651_s12 = smov 0   ;;  %s6653_s13 = smov 0   ;;  %s7867_s0 = inlined_call_operand.vmem [shape: bf16[2,8,24,512], index: 0, kind: input, shape index: {}]   ;;  %s7868_s1 = inlined_call_operand.vmem [shape: bf16[1,9,128,24], index: 1, kind: input, shape index: {}]   ;;  %s7869_s2 = inlined_call_operand.vmem [shape: f32[128,1], index: 2, kind: input, shape index: {}]   ;;  %s7870_s3 = inlined_call_operand.vmem [shape: bf16[2,8,128,384], index: 3, kind: output, shape index: {}]  }
   0x1   :  { %s6655_s14 = smov 0   ;;  %s6657_s15 = smov 0  }
   0x2   :  { %s6659_s16 = smov 0  }
   0x3 LB: > { %s28_s17 = sadd.s32 1, %s6612_s14  ;;  %s32_s18 = sadd.s32 1, %s6616_s15  ;;  %s6620_s16 = sphi %s6659_s16, %s13_s16   ;;  %s6616_s15 = sphi %s6657_s15, %s7874_s15   ;;  %s6612_s14 = sphi %s6655_s14, %s7873_s14   ;;  %s6608_s13 = sphi %s6653_s13, %s7872_s13   ;;  %s6604_s12 = sphi %s6651_s12, %s7871_s12  }
   0x4   : > { %p30_p0 = scmp.ge.s32.totalorder %s28_s17, 2  ;;  %p5236_p1 = scmp.ge.s32.totalorder %s6620_s16, 1 }
   0x5   : > { %p174_p2 = scmp.lt.s32.totalorder %s6620_s16, 17 }
   0x6   : > { %s7876_s17 = smov (%p30_p0, %s28_s17), 0  ;;  %s7878_s18 = smov (!%p30_p0, %s32_s18), %s6616_s15 }
   0x7   : > { %p175_p3 = pnand %p5236_p1, %p174_p2  ;;  %p34_p4 = scmp.ge.s32.totalorder %s7878_s18, 8 }
   0x8   : > { %p211_p5 = scmp.lt.s32.totalorder (!%p175_p3), %s6604_s12, 1  ;;  %p213_p6 = scmp.lt.s32.totalorder (!%p175_p3), %s6608_s13, 7  ;;  %v6622_v0 = vmov (!%p175_p3), 0   ;;  %vm542_vm0 = vcmask (!%p175_p3), 1043456   ;;  %v6728_v11 = vld [vmem:[%s7868_s1] sm:$0xff] (!%p175_p3)   ;;  %vm517_vm1 = vcmask (!%p175_p3), 195584  }
   0x9   : > { %s7880_s18 = smov (%p34_p4, %s7878_s18), 0  ;;  %178 = sbr.rel (%p175_p3) target bundleno = 797 (0x31d), region = 32 }
   0xa   : > { %584 = vmatprep.mubr.bf16.mxu1 (!%p175_p3), %v6622_v0  ;;  %1588 = vmatprep.mubr.bf16.mxu0 (!%p175_p3), %v6622_v0  ;;  %s6623_s26 = smov (!%p175_p3), 126   ;;  %v6509_v14 = vld [vmem:[%s7868_s1 + $0x8] sm:$0xff] (!%p175_p3)   ;;  %s6624_s4 = smov (!%p175_p3), 110   ;;  %v6510_v15 = vld [vmem:[%s7868_s1 + $0x10] sm:$0xff] (!%p175_p3)   ;;  %v6511_v16 = vld [vmem:[%s7868_s1 + $0x18] sm:$0xff] (!%p175_p3)   ;;  %vm1513_vm2 = vcmask (!%p175_p3), 1031168  }
   0xb   : > { %6496 = vset.pattern.permute.xlu0 (!%p175_p3), %v6622_v0  ;;  %6497 = vset.pattern.permute.xlu1 (!%p175_p3), %v6622_v0  ;;  %s6625_s7 = smov (!%p175_p3), 127   ;;  %v6512_v17 = vld [vmem:[%s7868_s1 + $0x20] sm:$0xff] (!%p175_p3)   ;;  %v6513_v19 = vld [vmem:[%s7868_s1 + $0x28] sm:$0xff] (!%p175_p3)   ;;  %v6514_v21 = vld [vmem:[%s7868_s1 + $0x30] sm:$0xff] (!%p175_p3)   ;;  %s6628_s28 = smov (!%p175_p3), 92   ;;  %vm2015_vm3 = vcmask (!%p175_p3), 900096  }
   0xc   : > { %v6515_v22 = vld [vmem:[%s7868_s1 + $0x38] sm:$0xff] (!%p175_p3)   ;;  %s6630_s29 = smov (!%p175_p3), 90   ;;  %v6901_v34 = vld [vmem:[%s7868_s1 + $0x80] sm:$0xff] (!%p175_p3)   ;;  %v240_v38 = vld [vmem:[%s7869_s2 + $0x8] sm:$0xff] (!%p175_p3)  ;;  %vm1011_vm4 = vcmask (!%p175_p3), 1039360   ;;  %vm2517_vm5 = vcmask (!%p175_p3), 891904  }
   0xd   : > { %v239_v35 = vld [vmem:[%s7869_s2] sm:$0xff] (!%p175_p3)  ;;  %v242_v40 = vld [vmem:[%s7869_s2 + $0x18] sm:$0xff] (!%p175_p3)  ;;  %v241_v44 = vld [vmem:[%s7869_s2 + $0x10] sm:$0xff] (!%p175_p3)  ;;  %vm3019_vm6 = vcmask (!%p175_p3), 883712   ;;  %vm3521_vm7 = vcmask (!%p175_p3), 752640   ;;  %vm4023_vm8 = vcmask (!%p175_p3), 744448  }
   0xe   : > { %v6928_v45 = vld [vmem:[%s7868_s1 + $0x88] sm:$0xff] (!%p175_p3)   ;;  %v243_v52 = vld [vmem:[%s7869_s2 + $0x20] sm:$0xff] (!%p175_p3)  ;;  %v246_v53 = vld [vmem:[%s7869_s2 + $0x38] sm:$0xff] (!%p175_p3)  ;;  %vm4525_vm9 = vcmask (!%p175_p3), 736256  }
   0xf   : > { %v244_v46 = vld [vmem:[%s7869_s2 + $0x28] sm:$0xff] (!%p175_p3)  ;;  %v245_v57 = vld [vmem:[%s7869_s2 + $0x30] sm:$0xff] (!%p175_p3)  ;;  %v247_v63 = vld [vmem:[%s7869_s2 + $0x40] sm:$0xff] (!%p175_p3) }
  0x10   : > { %s7882_s12 = smov (!%p211_p5, %s6604_s12), 1  ;;  %s7884_s13 = smov (!%p213_p6, %s6608_s13), 7  ;;  %v6956_v58 = vld [vmem:[%s7868_s1 + $0x90] sm:$0xff]   ;;  %v248_v62 = vld [vmem:[%s7869_s2 + $0x48] sm:$0xff] }
  0x11   : > { %s6444_s19 = smul.u32 96, %s7882_s12 }
  0x12   : > { %s6443_s20 = smul.u32 12, %s7884_s13 }
  0x13   : > { %s6445_s30 = smul.u32 48, %s7884_s13 }
  0x14   : > { %s217_s21 = sadd.s32 %s6444_s19, %s6443_s20  ;;  %s6626_s19 = smov 109  }
  0x15   : > { %s5237_s22 = sshll.u32 %s217_s21, 2 }
  0x16   : > { %s6694_s25 = scalar_lea.vmem %s7867_s0, %s5237_s22  ;;  %s6627_s22 = smov 108  }
  0x17   : > { %v6697_v1 = vld [vmem:[%s6694_s25 + $0x4] ss:$16 sps:$4 sm:$0xff]   ;;  %v6700_v2 = vld [vmem:[%s6694_s25] ss:$16 sps:$4 sm:$0xff]   ;;  %v6705_v3 = vld [vmem:[%s6694_s25 + $0x8] ss:$16 sps:$4 sm:$0xff]  }
  0x18   : > { %1499 = vrot.lane.b32.xlu0 %v6697_v1, %s6623_s26  ;;  %v1364_v4 = vld [vmem:[%s6694_s25 + $0x20] sm:$0xff]  ;;  %552 = vmatprep.subr.bf16.mxu1 %v6697_v1  ;;  %v1365_v7 = vld [vmem:[%s6694_s25 + $0x28] sm:$0xff] }
  0x19   : > { %1497 = vrot.lane.b32.xlu1 %v6700_v2, %s6623_s26  ;;  %v6711_v5 = vcombine.low %v1364_v4, %v1364_v4  ;;  %v6713_v6 = vcombine.high %v1364_v4, %v1364_v4  ;;  %553 = vmatpush1.bf16.msra.mxu1 %v6700_v2  ;;  %v6516_v8 = vld [vmem:[%s6694_s25 + $0x8] ss:$16 sps:$4 sm:$0xff]   ;;  %v6732_v12 = vcombine.low %v1365_v7, %v1365_v7  ;;  %v6790_v18 = vld [vmem:[%s6694_s25 + $0xc] ss:$16 sps:$4 sm:$0xff]  }
  0x1a   : > { %v6517_v10 = vld [vmem:[%s6694_s25 + $0x28] ss:$0 sps:$4 sm:$0xff]   ;;  %v6799_v20 = vcombine.high %v1365_v7, %v1365_v7  ;;  %v249_v7 = vld [vmem:[%s7869_s2 + $0x50] sm:$0xff] }
  0x1b   : > { %5253 = vmatprep.subr.msk.bf16.mxu1 %vm542_vm0, %v6713_v6  ;;  %v544_v9 = vsel %vm542_vm0, %v6711_v5, 0  ;;  %v550_v13 = vsel %vm542_vm0, %v6517_v10, 0 }
  0x1c   : > { %1501 = vrot.lane.b32.xlu0 %v6705_v3, %s6623_s26 }
  0x1d   : > { %1505 = vrot.lane.b32.xlu1 %v6711_v5, %s6623_s26  ;;  %555 = vmatpush1.bf16.msra.mxu1 %v544_v9  ;;  %v6986_v9 = vld [vmem:[%s7868_s1 + $0x98] sm:$0xff]  }
  0x1e   : > { %5818 = vmatprep.subr.bf16.mxu1 %v6516_v8 }
  0x20   : > { %1507 = vrot.lane.b32.xlu0 %v6713_v6, %s6623_s26  ;;  %5254 = vmatmul.mubr.msk.bf16.vlgmr.msra.gmra.mrb[0].mxu1 %vm517_vm1, %v6728_v11 }
  0x21   : > { %1509 = vrot.lane.b32.xlu1 %v6732_v12, %s6623_s26  ;;  %594 = vmatprep.mubr.bf16.mxu1 %v6622_v0 }
  0x22   : > { %5819 = vmatpush3.bf16.msra.mxu1 %v6516_v8  ;;  %v6981_v8 = vld [vmem:[%s7868_s1 + $0x40] sm:$0xff]  }
  0x23   : > { %6434 = vmatprep.subr.msk.bf16.mxu1 %vm542_vm0, %v6517_v10 }
  0x24   : > { %2001 = vrot.lane.b32.xlu0 %v6697_v1, %s6624_s4 }
  0x25   : > { %2003 = vrot.lane.b32.xlu1 %v6705_v3, %s6624_s4 }
  0x26   : > { %5821 = vmatpush3.bf16.msra.mxu1 %v550_v13 }
  0x28   : > { %1999 = vrot.lane.b32.xlu0 %v6700_v2, %s6624_s4  ;;  %5255 = vmatmul.mubr.msk.bf16.gmra.mrb[4].mxu1 %vm517_vm1, %v6509_v14 }
  0x29   : > { %2007 = vrot.lane.b32.xlu1 %v6711_v5, %s6624_s4  ;;  %604 = vmatprep.mubr.bf16.mxu1 %v6622_v0 }
  0x2c   : > { %2009 = vrot.lane.b32.xlu0 %v6713_v6, %s6624_s4 }
  0x2d   : > { %2011 = vrot.lane.b32.xlu1 %v6732_v12, %s6624_s4 }
  0x30   : > { %997 = vrot.lane.b32.xlu0 %v6697_v1, %s6625_s7  ;;  %5256 = vmatmul.mubr.msk.bf16.gmra.mrb[8].mxu1 %vm517_vm1, %v6510_v15 }
  0x31   : > { %999 = vrot.lane.b32.xlu1 %v6705_v3, %s6625_s7  ;;  %614 = vmatprep.mubr.bf16.mxu1 %v6622_v0 }
  0x34   : > { %995 = vrot.lane.b32.xlu0 %v6700_v2, %s6625_s7 }
  0x35   : > { %1003 = vrot.lane.b32.xlu1 %v6711_v5, %s6625_s7 }
  0x38   : > { %1005 = vrot.lane.b32.xlu0 %v6713_v6, %s6625_s7  ;;  %5257 = vmatmul.mubr.msk.bf16.gmra.mrb[12].mxu1 %vm517_vm1, %v6511_v16 }
  0x39   : > { %1007 = vrot.lane.b32.xlu1 %v6732_v12, %s6625_s7  ;;  %624 = vmatprep.mubr.bf16.mxu1 %v6622_v0 }
  0x3c   : > { %2503 = vrot.lane.b32.xlu0 %v6697_v1, %s6626_s19 }
  0x3d   : > { %2505 = vrot.lane.b32.xlu1 %v6705_v3, %s6626_s19 }
  0x40   : > { %2501 = vrot.lane.b32.xlu0 %v6700_v2, %s6626_s19  ;;  %5258 = vmatmul.mubr.msk.bf16.gmra.mrb[16].mxu1 %vm517_vm1, %v6512_v17 }
  0x41   : > { %2509 = vrot.lane.b32.xlu1 %v6711_v5, %s6626_s19  ;;  %634 = vmatprep.mubr.bf16.mxu1 %v6622_v0 }
  0x44   : > { %2511 = vrot.lane.b32.xlu0 %v6713_v6, %s6626_s19 }
  0x45   : > { %2513 = vrot.lane.b32.xlu1 %v6732_v12, %s6626_s19 }
  0x48   : > { %1001 = vrot.lane.b32.xlu0 %v6790_v18, %s6625_s7  ;;  %5259 = vmatmul.mubr.msk.bf16.gmra.mrb[20].mxu1 %vm517_vm1, %v6513_v19 }
  0x49   : > { %1009 = vrot.lane.b32.xlu1 %v6799_v20, %s6625_s7  ;;  %644 = vmatprep.mubr.bf16.mxu1 %v6622_v0 }
  0x4c   : > { %3005 = vrot.lane.b32.xlu0 %v6697_v1, %s6627_s22 }
  0x4d   : > { %3007 = vrot.lane.b32.xlu1 %v6705_v3, %s6627_s22 }
  0x50   : > { %3003 = vrot.lane.b32.xlu0 %v6700_v2, %s6627_s22  ;;  %5260 = vmatmul.mubr.msk.bf16.gmra.mrb[24].mxu1 %vm517_vm1, %v6514_v21 }
  0x51   : > { %3011 = vrot.lane.b32.xlu1 %v6711_v5, %s6627_s22  ;;  %654 = vmatprep.mubr.bf16.mxu1 %v6622_v0 }
  0x54   : > { %3013 = vrot.lane.b32.xlu0 %v6713_v6, %s6627_s22 }
  0x55   : > { %3015 = vrot.lane.b32.xlu1 %v6732_v12, %s6627_s22 }
  0x58   : > { %1503 = vrot.lane.b32.xlu0 %v6790_v18, %s6623_s26  ;;  %5261 = vmatmul.mubr.msk.bf16.gmra.mrb[28].mxu1 %vm517_vm1, %v6515_v22 }
  0x59   : > { %1511 = vrot.lane.b32.xlu1 %v6799_v20, %s6623_s26  ;;  %5822 = vmatprep.mubr.msk.bf16.mxu1 %vm517_vm1, %v6728_v11  ;;  %s6629_s26 = smov 91  }
  0x5c   : > { %2005 = vrot.lane.b32.xlu0 %v6790_v18, %s6624_s4 }
  0x5d   : > { %3507 = vrot.lane.b32.xlu1 %v6697_v1, %s6628_s28 }
  0x60   : > { %3509 = vrot.lane.b32.xlu0 %v6705_v3, %s6628_s28  ;;  %5823 = vmatmul.mubr.msk.bf16.vlgmr.msra.gmra.mrb[32].mxu1 %vm517_vm1, %v6509_v14 }
  0x61   : > { %3505 = vrot.lane.b32.xlu1 %v6700_v2, %s6628_s28  ;;  %5826 = vmatprep.mubr.msk.bf16.mxu1 %vm517_vm1, %v6510_v15  ;;  %v7001_v15 = vld [vmem:[%s7868_s1 + $0x48] sm:$0xff]  }
  0x64   : > { %2013 = vrot.lane.b32.xlu0 %v6799_v20, %s6624_s4  ;;  %s6446_s4 = smul.u32 384, %s7882_s12 }
  0x65   : > { %3513 = vrot.lane.b32.xlu1 %v6711_v5, %s6628_s28 }
  0x66   : > { %s231_s5 = sadd.s32 %s6446_s4, %s6445_s30 }
  0x67   : > { %s5238_s6 = sshll.u32 %s231_s5, 2 }
  0x68   : > { %3515 = vrot.lane.b32.xlu0 %v6713_v6, %s6628_s28  ;;  %5827 = vmatmul.mubr.msk.bf16.gmra.mrb[36].mxu1 %vm517_vm1, %v6511_v16  ;;  %v7006_v16 = vld [vmem:[%s7868_s1 + $0xa0] sm:$0xff]   ;;  %s7739_s9 = scalar_lea.vmem %s7870_s3, %s5238_s6 }
  0x69   : > { %3517 = vrot.lane.b32.xlu1 %v6732_v12, %s6628_s28  ;;  %5830 = vmatprep.mubr.msk.bf16.mxu1 %vm517_vm1, %v6512_v17 }
  0x6c   : > { %2507 = vrot.lane.b32.xlu0 %v6790_v18, %s6626_s19 }
  0x6d   : > { %2515 = vrot.lane.b32.xlu1 %v6799_v20, %s6626_s19 }
  0x70   : > { %3009 = vrot.lane.b32.xlu0 %v6790_v18, %s6627_s22  ;;  %5831 = vmatmul.mubr.msk.bf16.gmra.mrb[40].mxu1 %vm517_vm1, %v6513_v19 }
  0x71   : > { %4009 = vrot.lane.b32.xlu1 %v6697_v1, %s6629_s26  ;;  %5834 = vmatprep.mubr.msk.bf16.mxu1 %vm517_vm1, %v6514_v21 }
  0x74   : > { %4011 = vrot.lane.b32.xlu0 %v6705_v3, %s6629_s26 }
  0x75   : > { %4007 = vrot.lane.b32.xlu1 %v6700_v2, %s6629_s26 }
  0x78   : > { %3017 = vrot.lane.b32.xlu0 %v6799_v20, %s6627_s22  ;;  %5835 = vmatmul.mubr.msk.bf16.gmra.mrb[44].mxu1 %vm517_vm1, %v6515_v22 }
  0x79   : > { %4015 = vrot.lane.b32.xlu1 %v6711_v5, %s6629_s26  ;;  %1086 = vmatprep.mubr.bf16.mxu1 %v6622_v0 }
  0x7c   : > { %4017 = vrot.lane.b32.xlu0 %v6713_v6, %s6629_s26 }
  0x7d   : > { %4019 = vrot.lane.b32.xlu1 %v6732_v12, %s6629_s26 }
  0x80   : > { %3511 = vrot.lane.b32.xlu0 %v6790_v18, %s6628_s28 }
  0x81   : > { %3519 = vrot.lane.b32.xlu1 %v6799_v20, %s6628_s28 }
  0x84   : > { %4013 = vrot.lane.b32.xlu0 %v6790_v18, %s6629_s26 }
  0x85   : > { %4511 = vrot.lane.b32.xlu1 %v6697_v1, %s6630_s29  ;;  %v250_v1 = vld [vmem:[%s7869_s2 + $0x58] sm:$0xff] }
  0x88   : > { %4513 = vrot.lane.b32.xlu0 %v6705_v3, %s6630_s29 }
  0x89   : > { %4509 = vrot.lane.b32.xlu1 %v6700_v2, %s6630_s29 }
  0x8a   : > { %v1500_v23 = vpop.permute.xlu0 %1499 }
  0x8b   : > { %v1498_v24 = vpop.permute.xlu1 %1497 }
  0x8c   : > { %4021 = vrot.lane.b32.xlu0 %v6799_v20, %s6629_s26  ;;  %v6880_v28 = vsel %vm1513_vm2, %v1498_v24, %v1500_v23  ;;  %v7026_v24 = vld [vmem:[%s7868_s1 + $0xa8] sm:$0xff]  }
  0x8d   : > { %4517 = vrot.lane.b32.xlu1 %v6711_v5, %s6630_s29 }
  0x8e   : > { %v6872_v25 = vpop.permute.xlu0 %1501 }
  0x8f   : > { %v1506_v26 = vpop.permute.xlu1 %1505  ;;  %v6876_v27 = vsel %vm1513_vm2, %v1500_v23, %v6872_v25  ;;  %v7021_v23 = vld [vmem:[%s7868_s1 + $0x50] sm:$0xff]  }
  0x90   : > { %1556 = vmatprep.subr.bf16.mxu0 %v6876_v27  ;;  %4519 = vrot.lane.b32.xlu0 %v6713_v6, %s6630_s29 }
  0x91   : > { %1557 = vmatpush1.bf16.msra.mxu0 %v6880_v28  ;;  %4521 = vrot.lane.b32.xlu1 %v6732_v12, %s6630_s29 }
  0x92   : > { %v1508_v29 = vpop.permute.xlu0 %1507 }
  0x93   : > { %v1517_v30 = vsel %vm1513_vm2, %v1506_v26, %v1508_v29  ;;  %v6886_v31 = vpop.permute.xlu1 %1509 }
  0x94   : > { %v6890_v32 = vsel %vm1513_vm2, %v1508_v29, %v6886_v31  ;;  %v6893_v33 = vsel %vm542_vm0, %v1517_v30, 0  ;;  %4515 = vrot.lane.b32.xlu0 %v6790_v18, %s6630_s29 }
  0x95   : > { %5351 = vmatprep.subr.msk.bf16.mxu0 %vm542_vm0, %v6890_v32  ;;  %4523 = vrot.lane.b32.xlu1 %v6799_v20, %s6630_s29 }
  0x96   : > { %1559 = vmatpush1.bf16.msra.mxu0 %v6893_v33  ;;  %v2002_v36 = vpop.permute.xlu0 %2001 }
  0x97   : > { %v6908_v37 = vpop.permute.xlu1 %2003 }
  0x98   : > { %v2017_v39 = vsel %vm2015_vm3, %v2002_v36, %v6908_v37  ;;  %257 = vperm.xlu0 %6496, %v239_v35  }
  0x99   : > { %5352 = vmatmul.mubr.msk.bf16.vlgmr.msra.gmra.mrb[0].mxu0 %vm517_vm1, %v6901_v34  ;;  %2058 = vmatprep.subr.bf16.mxu0 %v2017_v39  ;;  %v7053_v39 = vld [vmem:[%s7868_s1 + $0xc0] sm:$0xff]  }
  0x9a   : > { %v2000_v41 = vpop.permute.xlu0 %1999  ;;  %1598 = vmatprep.mubr.bf16.mxu0 %v6622_v0  ;;  %262 = vperm.xlu1 %6497, %v240_v38   ;;  %v7048_v38 = vld [vmem:[%s7868_s1 + $0x58] sm:$0xff]  }
  0x9b   : > { %v2016_v42 = vsel %vm2015_vm3, %v2000_v41, %v2002_v36  ;;  %v2008_v43 = vpop.permute.xlu1 %2007 }
  0x9c   : > { %2059 = vmatpush1.bf16.msra.mxu0 %v2016_v42  ;;  %272 = vperm.xlu0 %6496, %v242_v40  }
  0x9e   : > { %v2010_v47 = vpop.permute.xlu0 %2009  ;;  %267 = vperm.xlu1 %6497, %v241_v44  }
  0x9f   : > { %v2019_v48 = vsel %vm2015_vm3, %v2008_v43, %v2010_v47  ;;  %v6934_v49 = vpop.permute.xlu1 %2011 }
  0xa0   : > { %v2050_v50 = vsel %vm542_vm0, %v2019_v48, 0  ;;  %v2020_v51 = vsel %vm2015_vm3, %v2010_v47, %v6934_v49  ;;  %282 = vperm.xlu0 %6496, %v244_v46  }
  0xa1   : > { %5353 = vmatmul.mubr.msk.bf16.gmra.mrb[4].mxu0 %vm517_vm1, %v6928_v45  ;;  %5400 = vmatprep.subr.msk.bf16.mxu0 %vm542_vm0, %v2020_v51 }
  0xa2   : > { %v998_v54 = vpop.permute.xlu0 %997  ;;  %1608 = vmatprep.mubr.bf16.mxu0 %v6622_v0  ;;  %2061 = vmatpush1.bf16.msra.mxu0 %v2050_v50 }
  0xa3   : > { %v1000_v55 = vpop.permute.xlu1 %999  ;;  %277 = vperm.xlu1 %6497, %v243_v52   ;;  %v7085_v52 = vld [vmem:[%s7868_s1 + $0x60] sm:$0xff]  }
  0xa4   : > { %v1013_v56 = vsel %vm1011_vm4, %v998_v54, %v1000_v55  ;;  %292 = vperm.xlu0 %6496, %v246_v53   ;;  %v7090_v53 = vld [vmem:[%s7868_s1 + $0xc8] sm:$0xff]  }
  0xa5   : > { %1054 = vmatprep.subr.bf16.mxu1 %v1013_v56 }
  0xa6   : > { %v996_v59 = vpop.permute.xlu0 %995 }
  0xa7   : > { %v1004_v60 = vpop.permute.xlu1 %1003  ;;  %v1012_v61 = vsel %vm1011_vm4, %v996_v59, %v998_v54  ;;  %287 = vperm.xlu1 %6497, %v245_v57   ;;  %v7111_v57 = vld [vmem:[%s7868_s1 + $0x68] sm:$0xff]  }
  0xa8   : > { %1055 = vmatpush1.bf16.msra.mxu1 %v1012_v61  ;;  %302 = vperm.xlu0 %6496, %v248_v62  }
  0xa9   : > { %5354 = vmatmul.mubr.msk.bf16.gmra.mrb[8].mxu0 %vm517_vm1, %v6956_v58 }
  0xaa   : > { %v1006_v2 = vpop.permute.xlu0 %1005  ;;  %1618 = vmatprep.mubr.bf16.mxu0 %v6622_v0 }
  0xab   : > { %v1008_v3 = vpop.permute.xlu1 %1007  ;;  %v1015_v4 = vsel %vm1011_vm4, %v1004_v60, %v1006_v2  ;;  %297 = vperm.xlu1 %6497, %v247_v63  }
  0xac   : > { %v1016_v5 = vsel %vm1011_vm4, %v1006_v2, %v1008_v3  ;;  %v1046_v6 = vsel %vm542_vm0, %v1015_v4, 0  ;;  %312 = vperm.xlu0 %6496, %v250_v1   ;;  %v7140_v1 = vld [vmem:[%s7868_s1 + $0xd8] sm:$0xff]  }
  0xad   : > { %5302 = vmatprep.subr.msk.bf16.mxu1 %vm542_vm0, %v1016_v5 }
  0xae   : > { %1057 = vmatpush1.bf16.msra.mxu1 %v1046_v6  ;;  %v2504_v10 = vpop.permute.xlu0 %2503 }
  0xaf   : > { %v6988_v11 = vpop.permute.xlu1 %2505  ;;  %307 = vperm.xlu1 %6497, %v249_v7  }
  0xb0   : > { %v2519_v12 = vsel %vm2517_vm5, %v2504_v10, %v6988_v11 }
  0xb1   : > { %5303 = vmatmul.mubr.msk.bf16.vlgmr.msra.gmra.mrb[0].mxu1 %vm517_vm1, %v6981_v8  ;;  %5355 = vmatmul.mubr.msk.bf16.gmra.mrb[12].mxu0 %vm517_vm1, %v6986_v9 }
  0xb2   : > { %v2502_v13 = vpop.permute.xlu0 %2501  ;;  %1628 = vmatprep.mubr.bf16.mxu0 %v6622_v0  ;;  %1096 = vmatprep.mubr.bf16.mxu1 %v6622_v0 }
  0xb3   : > { %v2510_v14 = vpop.permute.xlu1 %2509  ;;  %2560 = vmatprep.subr.bf16.mxu0 %v2519_v12  ;;  %v2518_v41 = vsel %vm2517_vm5, %v2502_v13, %v2504_v10  ;;  %v6535_v12 = vld [vmem:[%s7868_s1 + $0x78] sm:$0xff]   ;;  %v7170_v13 = vld [vmem:[%s7868_s1 + $0xe0] sm:$0xff]  }
  0xb6   : > { %v2512_v17 = vpop.permute.xlu0 %2511 }
  0xb7   : > { %v7008_v18 = vpop.permute.xlu1 %2513 }
  0xb8   : > { %v2522_v43 = vsel %vm2517_vm5, %v2512_v17, %v7008_v18 }
  0xb9   : > { %5304 = vmatmul.mubr.msk.bf16.gmra.mrb[4].mxu1 %vm517_vm1, %v7001_v15  ;;  %5356 = vmatmul.mubr.msk.bf16.gmra.mrb[16].mxu0 %vm517_vm1, %v7006_v16 }
  0xba   : > { %v1002_v19 = vpop.permute.xlu0 %1001  ;;  %1106 = vmatprep.mubr.bf16.mxu1 %v6622_v0  ;;  %1638 = vmatprep.mubr.bf16.mxu0 %v6622_v0 }
  0xbb   : > { %v1010_v20 = vpop.permute.xlu1 %1009  ;;  %v1014_v21 = vsel %vm1011_vm4, %v1000_v55, %v1002_v19  ;;  %v253_v19 = vld [vmem:[%s7869_s2 + $0x70] sm:$0xff] }
  0xbc   : > { %v1017_v22 = vsel %vm1011_vm4, %v1008_v3, %v1010_v20  ;;  %5838 = vmatprep.subr.bf16.mxu1 %v1014_v21  ;;  %v254_v20 = vld [vmem:[%s7869_s2 + $0x78] sm:$0xff] }
  0xbd   : > { %5839 = vmatpush3.bf16.msra.mxu1 %v1014_v21  ;;  %v1052_v29 = vsel %vm542_vm0, %v1017_v22, 0 }
  0xbe   : > { %v7028_v26 = vpop.permute.xlu0 %3005  ;;  %6435 = vmatprep.subr.msk.bf16.mxu1 %vm542_vm0, %v1017_v22 }
  0xbf   : > { %v7032_v30 = vpop.permute.xlu1 %3007 }
  0xc0   : > { %v3021_v51 = vsel %vm3019_vm6, %v7028_v26, %v7032_v30 }
  0xc1   : > { %5305 = vmatmul.mubr.msk.bf16.gmra.mrb[8].mxu1 %vm517_vm1, %v7021_v23  ;;  %5357 = vmatmul.mubr.msk.bf16.gmra.mrb[20].mxu0 %vm517_vm1, %v7026_v24 }
  0xc2   : > { %5841 = vmatpush3.bf16.msra.mxu1 %v1052_v29  ;;  %v7038_v35 = vpop.permute.xlu0 %3003  ;;  %1116 = vmatprep.mubr.bf16.mxu1 %v6622_v0 }
  0xc3   : > { %v7041_v36 = vpop.permute.xlu1 %3011  ;;  %5998 = vmatprep.subr.bf16.mxu1 %v6876_v27  ;;  %2090 = vmatprep.mubr.bf16.mxu0 %v6622_v0  ;;  %v2521_v27 = vsel %vm2517_vm5, %v2510_v14, %v2512_v17 }
  0xc4   : > { %v2552_v46 = vsel %vm542_vm0, %v2521_v27, 0 }
  0xc6   : > { %v7055_v40 = vpop.permute.xlu0 %3013 }
  0xc7   : > { %v7058_v42 = vpop.permute.xlu1 %3015 }
  0xc9   : > { %5306 = vmatmul.mubr.msk.bf16.gmra.mrb[12].mxu1 %vm517_vm1, %v7048_v38  ;;  %5401 = vmatmul.mubr.msk.bf16.vlgmr.msra.gmra.mrb[0].mxu0 %vm517_vm1, %v7053_v39 }
  0xca   : > { %2561 = vmatpush1.bf16.msra.mxu0 %v2518_v41  ;;  %v1504_v44 = vpop.permute.xlu0 %1503  ;;  %1126 = vmatprep.mubr.bf16.mxu1 %v6622_v0 }
  0xcb   : > { %v1512_v47 = vpop.permute.xlu1 %1511  ;;  %2100 = vmatprep.mubr.bf16.mxu0 %v6622_v0  ;;  %5449 = vmatprep.subr.msk.bf16.mxu0 %vm542_vm0, %v2522_v43  ;;  %v7073_v48 = vsel %vm1513_vm2, %v6872_v25, %v1504_v44 }
  0xcc   : > { %v7077_v50 = vsel %vm1513_vm2, %v6886_v31, %v1512_v47 }
  0xce   : > { %v2006_v25 = vpop.permute.xlu0 %2005  ;;  %2563 = vmatpush1.bf16.msra.mxu0 %v2552_v46  ;;  %v3024_v46 = vsel %vm3019_vm6, %v7055_v40, %v7058_v42 }
  0xcf   : > { %v7092_v54 = vpop.permute.xlu1 %3507  ;;  %3062 = vmatprep.subr.bf16.mxu0 %v3021_v51  ;;  %v7096_v31 = vsel %vm2015_vm3, %v6908_v37, %v2006_v25  ;;  %v7116_v37 = vld [vmem:[%s7868_s1 + $0xd0] sm:$0xff]  }
  0xd0   : > { %v7297_v51 = vld [vmem:[%s7868_s1 + $0x110] sm:$0xff]  }
  0xd1   : > { %5307 = vmatmul.mubr.msk.bf16.gmra.mrb[16].mxu1 %vm517_vm1, %v7085_v52  ;;  %5402 = vmatmul.mubr.msk.bf16.gmra.mrb[4].mxu0 %vm517_vm1, %v7090_v53 }
  0xd2   : > { %v7102_v55 = vpop.permute.xlu0 %3509  ;;  %2110 = vmatprep.mubr.bf16.mxu0 %v6622_v0  ;;  %1136 = vmatprep.mubr.bf16.mxu1 %v6622_v0 }
  0xd3   : > { %v7106_v56 = vpop.permute.xlu1 %3505 }
  0xd6   : > { %v2014_v59 = vpop.permute.xlu0 %2013 }
  0xd7   : > { %v7120_v60 = vsel %vm2015_vm3, %v6934_v49, %v2014_v59  ;;  %v7122_v61 = vpop.permute.xlu1 %3513  ;;  %v6533_v49 = vld [vmem:[%s7868_s1 + $0x70] sm:$0xff]   ;;  %v6555_v59 = vld [vmem:[%s7868_s1 + $0x168] sm:$0xff]  }
  0xd9   : > { %5308 = vmatmul.mubr.msk.bf16.gmra.mrb[20].mxu1 %vm517_vm1, %v7111_v57  ;;  %5403 = vmatmul.mubr.msk.bf16.gmra.mrb[8].mxu0 %vm517_vm1, %v7116_v37 }
  0xda   : > { %v7128_v62 = vpop.permute.xlu0 %3515  ;;  %1146 = vmatprep.mubr.bf16.mxu1 %v6622_v0  ;;  %2120 = vmatprep.mubr.bf16.mxu0 %v6622_v0 }
  0xdb   : > { %v7132_v63 = vpop.permute.xlu1 %3517 }
  0xde   : > { %v2508_v2 = vpop.permute.xlu0 %2507 }
  0xdf   : > { %v2516_v3 = vpop.permute.xlu1 %2515  ;;  %v7144_v4 = vsel %vm2517_vm5, %v6988_v11, %v2508_v2  ;;  %v251_v11 = vld [vmem:[%s7869_s2 + $0x60] sm:$0xff] }
  0xe0   : > { %v7148_v5 = vsel %vm2517_vm5, %v7008_v18, %v2516_v3  ;;  %317 = vperm.xlu1 %6497, %v251_v11   ;;  %v252_v18 = vld [vmem:[%s7869_s2 + $0x68] sm:$0xff]  ;;  %v6558_v3 = vld [vmem:[%s7868_s1 + $0x180] sm:$0xff]  }
  0xe1   : > { %5309 = vmatmul.mubr.msk.bf16.gmra.mrb[24].mxu1 %vm517_vm1, %v6533_v49  ;;  %5404 = vmatmul.mubr.msk.bf16.gmra.mrb[12].mxu0 %vm517_vm1, %v7140_v1 }
  0xe2   : > { %1156 = vmatprep.mubr.bf16.mxu1 %v6622_v0  ;;  %2130 = vmatprep.mubr.bf16.mxu0 %v6622_v0  ;;  %v3010_v6 = vpop.permute.xlu0 %3009 }
  0xe3   : > { %v7157_v7 = vsel %vm3019_vm6, %v7032_v30, %v3010_v6  ;;  %v7159_v10 = vpop.permute.xlu1 %4009  ;;  %322 = vperm.xlu0 %6496, %v252_v18   ;;  %v7200_v30 = vld [vmem:[%s7868_s1 + $0xe8] sm:$0xff]  }
  0xe4   : > { %327 = vperm.xlu1 %6497, %v253_v19   ;;  %v6559_v19 = vld [vmem:[%s7868_s1 + $0x188] sm:$0xff]  }
  0xe6   : > { %v7172_v14 = vpop.permute.xlu0 %4011 }
  0xe7   : > { %v7174_v17 = vpop.permute.xlu1 %4007  ;;  %332 = vperm.xlu0 %6496, %v254_v20  }
  0xe9   : > { %5310 = vmatmul.mubr.msk.bf16.gmra.mrb[28].mxu1 %vm517_vm1, %v6535_v12  ;;  %5405 = vmatmul.mubr.msk.bf16.gmra.mrb[16].mxu0 %vm517_vm1, %v7170_v13 }
  0xea   : > { %5842 = vmatprep.mubr.msk.bf16.mxu1 %vm517_vm1, %v6981_v8  ;;  %2140 = vmatprep.mubr.bf16.mxu0 %v6622_v0  ;;  %v3018_v21 = vpop.permute.xlu0 %3017 }
  0xeb   : > { %v7193_v22 = vsel %vm3019_vm6, %v7058_v42, %v3018_v21  ;;  %v7195_v29 = vpop.permute.xlu1 %4015  ;;  %v6543_v42 = vld [vmem:[%s7868_s1 + $0xb8] sm:$0xff]  }
  0xee   : > { %v7202_v41 = vpop.permute.xlu0 %4017 }
  0xef   : > { %v7204_v27 = vpop.permute.xlu1 %4019 }
  0xf0   : > { %v4028_v11 = vsel %vm4023_vm8, %v7202_v41, %v7204_v27 }
  0xf1   : > { %5406 = vmatmul.mubr.msk.bf16.gmra.mrb[20].mxu0 %vm517_vm1, %v7200_v30  ;;  %5843 = vmatmul.mubr.msk.bf16.vlgmr.msra.gmra.mrb[32].mxu1 %vm517_vm1, %v7001_v15 }
  0xf2   : > { %6000 = vmatpush1.bf16.msra.mxu1 %v6880_v28  ;;  %5846 = vmatprep.mubr.msk.bf16.mxu1 %vm517_vm1, %v7021_v23  ;;  %v3512_v8 = vpop.permute.xlu0 %3511  ;;  %v7227_v28 = vld [vmem:[%s7868_s1 + $0xf0] sm:$0xff]   ;;  %v3020_v23 = vsel %vm3019_vm6, %v7038_v35, %v7028_v26  ;;  %v3523_v26 = vsel %vm3521_vm7, %v7092_v54, %v7102_v55 }
  0xf3   : > { %5999 = vmatprep.subr.msk.bf16.mxu1 %vm542_vm0, %v6890_v32  ;;  %2150 = vmatprep.mubr.bf16.mxu0 %v6622_v0  ;;  %v7218_v43 = vsel %vm3521_vm7, %v7102_v55, %v3512_v8  ;;  %v3520_v44 = vpop.permute.xlu1 %3519  ;;  %v7241_v32 = vld [vmem:[%s7868_s1 + $0xf8] sm:$0xff]   ;;  %v6541_v35 = vld [vmem:[%s7868_s1 + $0xb0] sm:$0xff]  }
  0xf4   : > { %v7222_v15 = vsel %vm3521_vm7, %v7132_v63, %v3520_v44  ;;  %v6552_v55 = vld [vmem:[%s7868_s1 + $0x150] sm:$0xff]  }
  0xf6   : > { %6001 = vmatpush1.bf16.msra.mxu1 %v6893_v33  ;;  %v7252_v33 = vld [vmem:[%s7868_s1 + $0x100] sm:$0xff]  }
  0xf7   : > { %5858 = vmatprep.subr.bf16.mxu1 %v7073_v48 }
  0xf9   : > { %5407 = vmatmul.mubr.msk.bf16.gmra.mrb[24].mxu0 %vm517_vm1, %v7227_v28  ;;  %5847 = vmatmul.mubr.msk.bf16.gmra.mrb[36].mxu1 %vm517_vm1, %v7048_v38  ;;  %v3023_v38 = vsel %vm3019_vm6, %v7041_v36, %v7055_v40  ;;  %v7279_v36 = vld [vmem:[%s7868_s1 + $0x108] sm:$0xff]   ;;  %v1554_v40 = vsel %vm542_vm0, %v7077_v50, 0 }
  0xfa   : > { %5850 = vmatprep.mubr.msk.bf16.mxu1 %vm517_vm1, %v7085_v52  ;;  %2160 = vmatprep.mubr.bf16.mxu0 %v6622_v0  ;;  %v3054_v47 = vsel %vm542_vm0, %v3023_v38, 0  ;;  %v3525_v52 = vsel %vm3521_vm7, %v7122_v61, %v7128_v62  ;;  %v6557_v61 = vld [vmem:[%s7868_s1 + $0x178] sm:$0xff]  }
  0xfb   : > { %v3556_v25 = vsel %vm542_vm0, %v3525_v52, 0 }
 0x101   : > { %5408 = vmatmul.mubr.msk.bf16.gmra.mrb[28].mxu0 %vm517_vm1, %v7241_v32  ;;  %5851 = vmatmul.mubr.msk.bf16.gmra.mrb[40].mxu1 %vm517_vm1, %v7111_v57  ;;  %v3060_v57 = vsel %vm542_vm0, %v7193_v22, 0 }
 0x102   : > { %5854 = vmatprep.mubr.msk.bf16.mxu1 %vm517_vm1, %v6533_v49  ;;  %2592 = vmatprep.mubr.bf16.mxu0 %v6622_v0 }
 0x109   : > { %5855 = vmatmul.mubr.msk.bf16.gmra.mrb[44].mxu1 %vm517_vm1, %v6535_v12  ;;  %5450 = vmatmul.mubr.msk.bf16.vlgmr.msra.gmra.mrb[0].mxu0 %vm517_vm1, %v7252_v33  ;;  %v7484_v12 = vpop.permute.xlu1 %4511 }
 0x10a   : > { %3063 = vmatpush1.bf16.msra.mxu0 %v3020_v23  ;;  %1648 = vmatprep.mubr.bf16.mxu1 %v6622_v0 }
 0x10b   : > { %2602 = vmatprep.mubr.bf16.mxu0 %v6622_v0  ;;  %5498 = vmatprep.subr.msk.bf16.mxu0 %vm542_vm0, %v3024_v46 }
 0x10e   : > { %3065 = vmatpush1.bf16.msra.mxu0 %v3054_v47 }
 0x10f   : > { %3564 = vmatprep.subr.bf16.mxu0 %v3523_v26 }
 0x111   : > { %5358 = vmatmul.mubr.msk.bf16.vlgmr.msra.gmra.mrb[24].mxu1 %vm517_vm1, %v6541_v35  ;;  %5451 = vmatmul.mubr.msk.bf16.gmra.mrb[4].mxu0 %vm517_vm1, %v7279_v36 }
 0x112   : > { %5859 = vmatpush3.bf16.msra.mxu1 %v7073_v48  ;;  %1658 = vmatprep.mubr.bf16.mxu1 %v6622_v0  ;;  %v7309_v48 = vld [vmem:[%s7868_s1 + $0x118] sm:$0xff]  }
 0x113   : > { %6436 = vmatprep.subr.msk.bf16.mxu1 %vm542_vm0, %v7077_v50  ;;  %2612 = vmatprep.mubr.bf16.mxu0 %v6622_v0  ;;  %v3522_v50 = vsel %vm3521_vm7, %v7106_v56, %v7092_v54  ;;  %v4025_v54 = vsel %vm4023_vm8, %v7159_v10, %v7172_v14  ;;  %v6553_v56 = vld [vmem:[%s7868_s1 + $0x158] sm:$0xff]  }
 0x116   : > { %5861 = vmatpush3.bf16.msra.mxu1 %v1554_v40 }
 0x117   : > { %5878 = vmatprep.subr.bf16.mxu1 %v7096_v31 }
 0x119   : > { %5359 = vmatmul.mubr.msk.bf16.gmra.mrb[28].mxu1 %vm517_vm1, %v6543_v42  ;;  %5452 = vmatmul.mubr.msk.bf16.gmra.mrb[8].mxu0 %vm517_vm1, %v7297_v51 }
 0x11a   : > { %5862 = vmatprep.mubr.msk.bf16.mxu1 %vm517_vm1, %v6901_v34  ;;  %2622 = vmatprep.mubr.bf16.mxu0 %v6622_v0  ;;  %v2056_v34 = vsel %vm542_vm0, %v7120_v60, 0 }
 0x121   : > { %5863 = vmatmul.mubr.msk.bf16.vlgmr.msra.gmra.mrb[32].mxu1 %vm517_vm1, %v6928_v45  ;;  %5453 = vmatmul.mubr.msk.bf16.gmra.mrb[12].mxu0 %vm517_vm1, %v7309_v48  ;;  %v7326_v45 = vld [vmem:[%s7868_s1 + $0x120] sm:$0xff]  }
 0x122   : > { %5879 = vmatpush3.bf16.msra.mxu1 %v7096_v31  ;;  %5866 = vmatprep.mubr.msk.bf16.mxu1 %vm517_vm1, %v6956_v58  ;;  %v6547_v58 = vld [vmem:[%s7868_s1 + $0x128] sm:$0xff]  }
 0x123   : > { %6437 = vmatprep.subr.msk.bf16.mxu1 %vm542_vm0, %v7120_v60  ;;  %2632 = vmatprep.mubr.bf16.mxu0 %v6622_v0  ;;  %v6551_v31 = vld [vmem:[%s7868_s1 + $0x148] sm:$0xff]   ;;  %v6556_v60 = vld [vmem:[%s7868_s1 + $0x170] sm:$0xff]  }
 0x126   : > { %5881 = vmatpush3.bf16.msra.mxu1 %v2056_v34  ;;  %v6563_v34 = vld [vmem:[%s7868_s1 + $0x1a8] sm:$0xff]  }
 0x127   : > { %5898 = vmatprep.subr.bf16.mxu1 %v7144_v4 }
 0x129   : > { %5867 = vmatmul.mubr.msk.bf16.gmra.mrb[36].mxu1 %vm517_vm1, %v6986_v9  ;;  %5454 = vmatmul.mubr.msk.bf16.gmra.mrb[16].mxu0 %vm517_vm1, %v7326_v45  ;;  %v6548_v9 = vld [vmem:[%s7868_s1 + $0x130] sm:$0xff]  }
 0x12a   : > { %5870 = vmatprep.mubr.msk.bf16.mxu1 %vm517_vm1, %v7006_v16  ;;  %2642 = vmatprep.mubr.bf16.mxu0 %v6622_v0  ;;  %v6549_v16 = vld [vmem:[%s7868_s1 + $0x138] sm:$0xff]  }
 0x131   : > { %5871 = vmatmul.mubr.msk.bf16.gmra.mrb[40].mxu1 %vm517_vm1, %v7026_v24  ;;  %5455 = vmatmul.mubr.msk.bf16.gmra.mrb[20].mxu0 %vm517_vm1, %v6547_v58  ;;  %v2558_v24 = vsel %vm542_vm0, %v7148_v5, 0 }
 0x132   : > { %5874 = vmatprep.mubr.msk.bf16.mxu1 %vm517_vm1, %v6541_v35  ;;  %2652 = vmatprep.mubr.bf16.mxu0 %v6622_v0 }
 0x139   : > { %5875 = vmatmul.mubr.msk.bf16.gmra.mrb[44].mxu1 %vm517_vm1, %v6543_v42  ;;  %5456 = vmatmul.mubr.msk.bf16.gmra.mrb[24].mxu0 %vm517_vm1, %v6548_v9 }
 0x13a   : > { %5882 = vmatprep.mubr.msk.bf16.mxu1 %vm517_vm1, %v7053_v39  ;;  %2662 = vmatprep.mubr.bf16.mxu0 %v6622_v0  ;;  %v6550_v39 = vld [vmem:[%s7868_s1 + $0x140] sm:$0xff]  }
 0x141   : > { %5883 = vmatmul.mubr.msk.bf16.vlgmr.msra.gmra.mrb[32].mxu1 %vm517_vm1, %v7090_v53  ;;  %5457 = vmatmul.mubr.msk.bf16.gmra.mrb[28].mxu0 %vm517_vm1, %v6549_v16  ;;  %v3526_v53 = vsel %vm3521_vm7, %v7128_v62, %v7132_v63  ;;  %v3562_v62 = vsel %vm542_vm0, %v7222_v15, 0  ;;  %v4014_v63 = vpop.permute.xlu0 %4013 }
 0x142   : > { %5899 = vmatpush3.bf16.msra.mxu1 %v7144_v4  ;;  %5886 = vmatprep.mubr.msk.bf16.mxu1 %vm517_vm1, %v7116_v37  ;;  %v6554_v37 = vld [vmem:[%s7868_s1 + $0x160] sm:$0xff]  }
 0x143   : > { %6438 = vmatprep.subr.msk.bf16.mxu1 %vm542_vm0, %v7148_v5  ;;  %3094 = vmatprep.mubr.bf16.mxu0 %v6622_v0  ;;  %v4024_v5 = vsel %vm4023_vm8, %v7174_v17, %v7159_v10 }
 0x146   : > { %5901 = vmatpush3.bf16.msra.mxu1 %v2558_v24 }
 0x147   : > { %5918 = vmatprep.subr.bf16.mxu1 %v7157_v7 }
 0x149   : > { %5887 = vmatmul.mubr.msk.bf16.gmra.mrb[36].mxu1 %vm517_vm1, %v7140_v1  ;;  %5499 = vmatmul.mubr.msk.bf16.vlgmr.msra.gmra.mrb[0].mxu0 %vm517_vm1, %v6550_v39  ;;  %v4026_v1 = vsel %vm4023_vm8, %v7172_v14, %v4014_v63 }
 0x14a   : > { %3565 = vmatpush1.bf16.msra.mxu0 %v3522_v50  ;;  %5890 = vmatprep.mubr.msk.bf16.mxu1 %vm517_vm1, %v7170_v13  ;;  %v4514_v13 = vpop.permute.xlu0 %4513  ;;  %v6566_v50 = vld [vmem:[%s7868_s1 + $0x1c0] sm:$0xff]  }
 0x14b   : > { %3104 = vmatprep.mubr.bf16.mxu0 %v6622_v0  ;;  %5547 = vmatprep.subr.msk.bf16.mxu0 %vm542_vm0, %v3526_v53  ;;  %v4527_v17 = vsel %vm4525_vm9, %v7484_v12, %v4514_v13  ;;  %v6567_v53 = vld [vmem:[%s7868_s1 + $0x1c8] sm:$0xff]  }
 0x14e   : > { %3567 = vmatpush1.bf16.msra.mxu0 %v3556_v25  ;;  %v4022_v8 = vpop.permute.xlu0 %4021  ;;  %v6568_v25 = vld [vmem:[%s7868_s1 + $0x1d0] sm:$0xff]  }
 0x14f   : > { %4066 = vmatprep.subr.bf16.mxu0 %v4025_v54  ;;  %v4029_v38 = vsel %vm4023_vm8, %v7204_v27, %v4022_v8  ;;  %v6562_v27 = vld [vmem:[%s7868_s1 + $0x1a0] sm:$0xff]  }
 0x150   : > { %v4064_v46 = vsel %vm542_vm0, %v4029_v38, 0 }
 0x151   : > { %5891 = vmatmul.mubr.msk.bf16.gmra.mrb[40].mxu1 %vm517_vm1, %v7200_v30  ;;  %5500 = vmatmul.mubr.msk.bf16.gmra.mrb[4].mxu0 %vm517_vm1, %v6551_v31  ;;  %v6560_v30 = vld [vmem:[%s7868_s1 + $0x190] sm:$0xff]  }
 0x152   : > { %5894 = vmatprep.mubr.msk.bf16.mxu1 %vm517_vm1, %v7227_v28  ;;  %3114 = vmatprep.mubr.bf16.mxu0 %v6622_v0 }
 0x159   : > { %5895 = vmatmul.mubr.msk.bf16.gmra.mrb[44].mxu1 %vm517_vm1, %v7241_v32  ;;  %5501 = vmatmul.mubr.msk.bf16.gmra.mrb[8].mxu0 %vm517_vm1, %v6552_v55  ;;  %v6561_v32 = vld [vmem:[%s7868_s1 + $0x198] sm:$0xff]  }
 0x15a   : > { %5902 = vmatprep.mubr.msk.bf16.mxu1 %vm517_vm1, %v7252_v33  ;;  %3124 = vmatprep.mubr.bf16.mxu0 %v6622_v0 }
 0x161   : > { %5903 = vmatmul.mubr.msk.bf16.vlgmr.msra.gmra.mrb[32].mxu1 %vm517_vm1, %v7279_v36  ;;  %5502 = vmatmul.mubr.msk.bf16.gmra.mrb[12].mxu0 %vm517_vm1, %v6553_v56 }
 0x162   : > { %5919 = vmatpush3.bf16.msra.mxu1 %v7157_v7  ;;  %5906 = vmatprep.mubr.msk.bf16.mxu1 %vm517_vm1, %v7297_v51  ;;  %v4027_v7 = vsel %vm4023_vm8, %v7195_v29, %v7202_v41 }
 0x163   : > { %6439 = vmatprep.subr.msk.bf16.mxu1 %vm542_vm0, %v7193_v22  ;;  %3134 = vmatprep.mubr.bf16.mxu0 %v6622_v0  ;;  %v4058_v10 = vsel %vm542_vm0, %v4027_v7, 0 }
 0x166   : > { %5921 = vmatpush3.bf16.msra.mxu1 %v3060_v57 }
 0x167   : > { %5938 = vmatprep.subr.bf16.mxu1 %v7218_v43 }
 0x169   : > { %5907 = vmatmul.mubr.msk.bf16.gmra.mrb[36].mxu1 %vm517_vm1, %v7309_v48  ;;  %5503 = vmatmul.mubr.msk.bf16.gmra.mrb[16].mxu0 %vm517_vm1, %v6554_v37 }
 0x16a   : > { %3144 = vmatprep.mubr.bf16.mxu0 %v6622_v0  ;;  %5910 = vmatprep.mubr.msk.bf16.mxu1 %vm517_vm1, %v7326_v45  ;;  %v4510_v45 = vpop.permute.xlu1 %4509 }
 0x16b   : > { %v4526_v57 = vsel %vm4525_vm9, %v4510_v45, %v7484_v12  ;;  %v6573_v12 = vld [vmem:[%s7868_s1 + $0x1f8] sm:$0xff]  }
 0x16e   : > { %v4518_v24 = vpop.permute.xlu1 %4517 }
 0x171   : > { %5911 = vmatmul.mubr.msk.bf16.gmra.mrb[40].mxu1 %vm517_vm1, %v6547_v58  ;;  %5504 = vmatmul.mubr.msk.bf16.gmra.mrb[20].mxu0 %vm517_vm1, %v6555_v59 }
 0x172   : > { %3154 = vmatprep.mubr.bf16.mxu0 %v6622_v0  ;;  %5914 = vmatprep.mubr.msk.bf16.mxu1 %vm517_vm1, %v6548_v9  ;;  %v6564_v9 = vld [vmem:[%s7868_s1 + $0x1b0] sm:$0xff]   ;;  %v4522_v52 = vpop.permute.xlu1 %4521 }
 0x176   : > { %v4524_v54 = vpop.permute.xlu1 %4523 }
 0x179   : > { %5915 = vmatmul.mubr.msk.bf16.gmra.mrb[44].mxu1 %vm517_vm1, %v6549_v16  ;;  %5505 = vmatmul.mubr.msk.bf16.gmra.mrb[24].mxu0 %vm517_vm1, %v6556_v60 }
 0x17a   : > { %3164 = vmatprep.mubr.bf16.mxu0 %v6622_v0  ;;  %5922 = vmatprep.mubr.msk.bf16.mxu1 %vm517_vm1, %v6550_v39  ;;  %v6565_v39 = vld [vmem:[%s7868_s1 + $0x1b8] sm:$0xff]  }
 0x181   : > { %5506 = vmatmul.mubr.msk.bf16.gmra.mrb[28].mxu0 %vm517_vm1, %v6557_v61  ;;  %5923 = vmatmul.mubr.msk.bf16.vlgmr.msra.gmra.mrb[32].mxu1 %vm517_vm1, %v6551_v31  ;;  %v4531_v31 = vsel %vm4525_vm9, %v4522_v52, %v4524_v54 }
 0x182   : > { %5939 = vmatpush3.bf16.msra.mxu1 %v7218_v43  ;;  %5926 = vmatprep.mubr.msk.bf16.mxu1 %vm517_vm1, %v6552_v55  ;;  %v4566_v55 = vsel %vm542_vm0, %v4531_v31, 0 }
 0x183   : > { %6440 = vmatprep.subr.msk.bf16.mxu1 %vm542_vm0, %v7222_v15  ;;  %3596 = vmatprep.mubr.bf16.mxu0 %v6622_v0  ;;  %v4520_v15 = vpop.permute.xlu0 %4519 }
 0x184   : > { %v7458_v49 = vpop.f32.mrb[0].mxu1 }
 0x185   : > { %v7462_v2 = vpop.f32.mrb[1].mxu1 }
 0x186   : > { %5941 = vmatpush3.bf16.msra.mxu1 %v3562_v62  ;;  %v7467_v4 = vpop.f32.mrb[2].mxu1 }
 0x187   : > { %v7472_v6 = vpop.f32.mrb[3].mxu1  ;;  %5958 = vmatprep.subr.bf16.mxu1 %v4026_v1  ;;  %v4516_v47 = vpop.permute.xlu0 %4515 }
 0x188   : > { %v4528_v35 = vsel %vm4525_vm9, %v4514_v13, %v4516_v47 }
 0x189   : > { %5927 = vmatmul.mubr.msk.bf16.gmra.mrb[36].mxu1 %vm517_vm1, %v6553_v56  ;;  %5548 = vmatmul.mubr.msk.bf16.vlgmr.msra.gmra.mrb[0].mxu0 %vm517_vm1, %v6558_v3  ;;  %v6569_v56 = vld [vmem:[%s7868_s1 + $0x1d8] sm:$0xff]  }
 0x18a   : > { %4067 = vmatpush1.bf16.msra.mxu0 %v4024_v5  ;;  %5930 = vmatprep.mubr.msk.bf16.mxu1 %vm517_vm1, %v6554_v37  ;;  %v6570_v37 = vld [vmem:[%s7868_s1 + $0x1e0] sm:$0xff]   ;;  %v6572_v5 = vld [vmem:[%s7868_s1 + $0x1f0] sm:$0xff]  }
 0x18b   : > { %3606 = vmatprep.mubr.bf16.mxu0 %v6622_v0  ;;  %5596 = vmatprep.subr.msk.bf16.mxu0 %vm542_vm0, %v4028_v11  ;;  %v7614_v63 = vpop.permute.xlu0 %257 }
 0x18c   : > { %v7488_v14 = vpop.f32.mrb[4].mxu1 }
 0x18d   : > { %v7492_v18 = vpop.f32.mrb[5].mxu1 }
 0x18e   : > { %v7497_v20 = vpop.f32.mrb[6].mxu1  ;;  %4069 = vmatpush1.bf16.msra.mxu0 %v4058_v10 }
 0x18f   : > { %v7499_v21 = vpop.f32.mrb[7].mxu1  ;;  %4568 = vmatprep.subr.bf16.mxu0 %v4527_v17  ;;  %v7624_v7 = vpop.permute.xlu0 %272  ;;  %v6574_v17 = vld [vmem:[%s7868_s1 + $0x200] sm:$0xff]  }
 0x191   : > { %5931 = vmatmul.mubr.msk.bf16.gmra.mrb[40].mxu1 %vm517_vm1, %v6555_v59  ;;  %5549 = vmatmul.mubr.msk.bf16.gmra.mrb[4].mxu0 %vm517_vm1, %v6559_v19  ;;  %v4529_v59 = vsel %vm4525_vm9, %v4518_v24, %v4520_v15 }
 0x192   : > { %5934 = vmatprep.mubr.msk.bf16.mxu1 %vm517_vm1, %v6556_v60  ;;  %3616 = vmatprep.mubr.bf16.mxu0 %v6622_v0  ;;  %v4530_v60 = vsel %vm4525_vm9, %v4520_v15, %v4522_v52  ;;  %v4560_v62 = vsel %vm542_vm0, %v4529_v59, 0  ;;  %v6575_v15 = vld [vmem:[%s7868_s1 + $0x208] sm:$0xff]   ;;  %v6581_v59 = vld [vmem:[%s7868_s1 + $0x238] sm:$0xff]  }
 0x193   : > { %v7632_v10 = vpop.permute.xlu0 %282 }
 0x194   : > { %v7505_v22 = vpop.f32.mrb[8].mxu1 }
 0x195   : > { %v7507_v29 = vpop.f32.mrb[9].mxu1 }
 0x196   : > { %v7512_v41 = vpop.f32.mrb[10].mxu1 }
 0x197   : > { %v7514_v43 = vpop.f32.mrb[11].mxu1 }
 0x199   : > { %5935 = vmatmul.mubr.msk.bf16.gmra.mrb[44].mxu1 %vm517_vm1, %v6557_v61  ;;  %5550 = vmatmul.mubr.msk.bf16.gmra.mrb[8].mxu0 %vm517_vm1, %v6560_v30  ;;  %v7608_v61 = vpop.permute.xlu1 %262 }
 0x19a   : > { %3626 = vmatprep.mubr.bf16.mxu0 %v6622_v0  ;;  %5942 = vmatprep.mubr.msk.bf16.mxu1 %vm517_vm1, %v6558_v3 }
 0x19c   : > { %v7520_v44 = vpop.f32.mrb[12].mxu1 }
 0x19d   : > { %v7522_v28 = vpop.f32.mrb[13].mxu1  ;;  %v7619_v3 = vpop.permute.xlu1 %267 }
 0x19e   : > { %v7527_v33 = vpop.f32.mrb[14].mxu1 }
 0x19f   : > { %v7529_v23 = vpop.f32.mrb[15].mxu1 }
 0x1a1   : > { %5551 = vmatmul.mubr.msk.bf16.gmra.mrb[12].mxu0 %vm517_vm1, %v6561_v32  ;;  %5943 = vmatmul.mubr.msk.bf16.vlgmr.msra.gmra.mrb[32].mxu1 %vm517_vm1, %v6559_v19  ;;  %v7628_v11 = vpop.permute.xlu1 %277  ;;  %v7642_v19 = vpop.permute.xlu0 %292 }
 0x1a2   : > { %5959 = vmatpush3.bf16.msra.mxu1 %v4026_v1  ;;  %3636 = vmatprep.mubr.bf16.mxu0 %v6622_v0  ;;  %v6571_v1 = vld [vmem:[%s7868_s1 + $0x1e8] sm:$0xff]  }
 0x1a3   : > { %5946 = vmatprep.mubr.msk.bf16.mxu1 %vm517_vm1, %v6560_v30  ;;  %6441 = vmatprep.subr.msk.bf16.mxu1 %vm542_vm0, %v4029_v38  ;;  %v6576_v38 = vld [vmem:[%s7868_s1 + $0x210] sm:$0xff]  }
 0x1a4   : > { %v7539_v26 = vpop.f32.mrb[16].mxu1 }
 0x1a5   : > { %v7542_v36 = vpop.f32.mrb[17].mxu1  ;;  %v7637_v13 = vpop.permute.xlu1 %287 }
 0x1a6   : > { %v7547_v40 = vpop.f32.mrb[18].mxu1  ;;  %5961 = vmatpush3.bf16.msra.mxu1 %v4064_v46  ;;  %v7650_v8 = vpop.permute.xlu0 %302 }
 0x1a7   : > { %v7549_v42 = vpop.f32.mrb[19].mxu1  ;;  %5978 = vmatprep.subr.bf16.mxu1 %v4528_v35 }
 0x1a9   : > { %5552 = vmatmul.mubr.msk.bf16.gmra.mrb[16].mxu0 %vm517_vm1, %v6562_v27  ;;  %5947 = vmatmul.mubr.msk.bf16.gmra.mrb[36].mxu1 %vm517_vm1, %v6561_v32  ;;  %v7646_v30 = vpop.permute.xlu1 %297 }
 0x1aa   : > { %3646 = vmatprep.mubr.bf16.mxu0 %v6622_v0  ;;  %5950 = vmatprep.mubr.msk.bf16.mxu1 %vm517_vm1, %v6562_v27  ;;  %v7660_v46 = vpop.permute.xlu0 %312 }
 0x1ac   : > { %v7555_v51 = vpop.f32.mrb[20].mxu1 }
 0x1ad   : > { %v7557_v48 = vpop.f32.mrb[21].mxu1  ;;  %v7655_v32 = vpop.permute.xlu1 %307 }
 0x1ae   : > { %v7562_v58 = vpop.f32.mrb[22].mxu1  ;;  %v7668_v27 = vpop.permute.xlu0 %322 }
 0x1af   : > { %v7567_v16 = vpop.f32.mrb[23].mxu1 }
 0x1b1   : > { %5553 = vmatmul.mubr.msk.bf16.gmra.mrb[20].mxu0 %vm517_vm1, %v6563_v34  ;;  %5951 = vmatmul.mubr.msk.bf16.gmra.mrb[40].mxu1 %vm517_vm1, %v6563_v34  ;;  %v7664_v47 = vpop.permute.xlu1 %317 }
 0x1b2   : > { %3656 = vmatprep.mubr.bf16.mxu0 %v6622_v0  ;;  %5954 = vmatprep.mubr.msk.bf16.mxu1 %vm517_vm1, %v6564_v9 }
 0x1b9   : > { %5554 = vmatmul.mubr.msk.bf16.gmra.mrb[24].mxu0 %vm517_vm1, %v6564_v9  ;;  %5955 = vmatmul.mubr.msk.bf16.gmra.mrb[44].mxu1 %vm517_vm1, %v6565_v39  ;;  %v6577_v9 = vld [vmem:[%s7868_s1 + $0x218] sm:$0xff]  }
 0x1ba   : > { %3666 = vmatprep.mubr.bf16.mxu0 %v6622_v0  ;;  %5962 = vmatprep.mubr.msk.bf16.mxu1 %vm517_vm1, %v6566_v50 }
 0x1c1   : > { %5555 = vmatmul.mubr.msk.bf16.gmra.mrb[28].mxu0 %vm517_vm1, %v6565_v39  ;;  %5963 = vmatmul.mubr.msk.bf16.vlgmr.msra.gmra.mrb[32].mxu1 %vm517_vm1, %v6567_v53 }
 0x1c2   : > { %4098 = vmatprep.mubr.bf16.mxu0 %v6622_v0  ;;  %5966 = vmatprep.mubr.msk.bf16.mxu1 %vm517_vm1, %v6568_v25 }
 0x1c3   : > { %5979 = vmatpush3.bf16.msra.mxu1 %v4528_v35 }
 0x1c4   : > { %6442 = vmatprep.subr.msk.bf16.mxu1 %vm542_vm0, %v4531_v31 }
 0x1c7   : > { %5981 = vmatpush3.bf16.msra.mxu1 %v4566_v55  ;;  %v6579_v55 = vld [vmem:[%s7868_s1 + $0x228] sm:$0xff]  }
 0x1c9   : > { %5597 = vmatmul.mubr.msk.bf16.vlgmr.msra.gmra.mrb[0].mxu0 %vm517_vm1, %v6566_v50  ;;  %5967 = vmatmul.mubr.msk.bf16.gmra.mrb[36].mxu1 %vm517_vm1, %v6569_v56  ;;  %v6578_v50 = vld [vmem:[%s7868_s1 + $0x220] sm:$0xff]  }
 0x1ca   : > { %4569 = vmatpush1.bf16.msra.mxu0 %v4526_v57  ;;  %4108 = vmatprep.mubr.bf16.mxu0 %v6622_v0  ;;  %v6580_v57 = vld [vmem:[%s7868_s1 + $0x230] sm:$0xff]  }
 0x1cb   : > { %5970 = vmatprep.mubr.msk.bf16.mxu1 %vm517_vm1, %v6570_v37  ;;  %5645 = vmatprep.subr.msk.bf16.mxu0 %vm542_vm0, %v4530_v60 }
 0x1ce   : > { %4571 = vmatpush1.bf16.msra.mxu0 %v4560_v62 }
 0x1d1   : > { %5598 = vmatmul.mubr.msk.bf16.gmra.mrb[4].mxu0 %vm517_vm1, %v6567_v53  ;;  %5971 = vmatmul.mubr.msk.bf16.gmra.mrb[40].mxu1 %vm517_vm1, %v6571_v1 }
 0x1d2   : > { %4118 = vmatprep.mubr.bf16.mxu0 %v6622_v0  ;;  %5974 = vmatprep.mubr.msk.bf16.mxu1 %vm517_vm1, %v6572_v5 }
 0x1d9   : > { %5599 = vmatmul.mubr.msk.bf16.gmra.mrb[8].mxu0 %vm517_vm1, %v6568_v25  ;;  %5975 = vmatmul.mubr.msk.bf16.gmra.mrb[44].mxu1 %vm517_vm1, %v6573_v12 }
 0x1da   : > { %4128 = vmatprep.mubr.bf16.mxu0 %v6622_v0  ;;  %5982 = vmatprep.mubr.msk.bf16.mxu1 %vm517_vm1, %v6574_v17 }
 0x1e1   : > { %5600 = vmatmul.mubr.msk.bf16.gmra.mrb[12].mxu0 %vm517_vm1, %v6569_v56  ;;  %5983 = vmatmul.mubr.msk.bf16.vlgmr.msra.gmra.mrb[32].mxu1 %vm517_vm1, %v6575_v15 }
 0x1e2   : > { %4138 = vmatprep.mubr.bf16.mxu0 %v6622_v0  ;;  %5986 = vmatprep.mubr.msk.bf16.mxu1 %vm517_vm1, %v6576_v38 }
 0x1e4   : > { %v1650_v35 = vpop.f32.mrb[24].mxu1 }
 0x1e5   : > { %v7671_v34 = vadd.f32 %v1650_v35, %v7664_v47  ;;  %v1652_v45 = vpop.f32.mrb[25].mxu1 }
 0x1e6   : > { %v7677_v24 = vadd.f32 %v1652_v45, %v7664_v47  ;;  %v1654_v39 = vpop.f32.mrb[26].mxu1 }
 0x1e7   : > { %v7683_v52 = vadd.f32 %v1654_v39, %v7668_v27  ;;  %v1656_v53 = vpop.f32.mrb[27].mxu1 }
 0x1e8   : > { %v7686_v25 = vadd.f32 %v1656_v53, %v7668_v27 }
 0x1e9   : > { %5601 = vmatmul.mubr.msk.bf16.gmra.mrb[16].mxu0 %vm517_vm1, %v6570_v37  ;;  %5987 = vmatmul.mubr.msk.bf16.gmra.mrb[36].mxu1 %vm517_vm1, %v6577_v9 }
 0x1ea   : > { %4148 = vmatprep.mubr.bf16.mxu0 %v6622_v0  ;;  %5990 = vmatprep.mubr.msk.bf16.mxu1 %vm517_vm1, %v6578_v50 }
 0x1ec   : > { %v7692_v54 = vpop.f32.mrb[28].mxu1 }
 0x1ed   : > { %v7694_v31 = vpop.f32.mrb[29].mxu1 }
 0x1ee   : > { %v7699_v56 = vpop.f32.mrb[30].mxu1 }
 0x1ef   : > { %v7704_v37 = vpop.f32.mrb[31].mxu1 }
 0x1f1   : > { %5602 = vmatmul.mubr.msk.bf16.gmra.mrb[20].mxu0 %vm517_vm1, %v6571_v1  ;;  %5991 = vmatmul.mubr.msk.bf16.gmra.mrb[40].mxu1 %vm517_vm1, %v6579_v55 }
 0x1f2   : > { %4158 = vmatprep.mubr.bf16.mxu0 %v6622_v0  ;;  %5994 = vmatprep.mubr.msk.bf16.mxu1 %vm517_vm1, %v6580_v57 }
 0x1f9   : > { %5603 = vmatmul.mubr.msk.bf16.gmra.mrb[24].mxu0 %vm517_vm1, %v6572_v5  ;;  %5995 = vmatmul.mubr.msk.bf16.gmra.mrb[44].mxu1 %vm517_vm1, %v6581_v59 }
 0x1fa   : > { %4168 = vmatprep.mubr.bf16.mxu0 %v6622_v0 }
 0x201   : > { %5604 = vmatmul.mubr.msk.bf16.gmra.mrb[28].mxu0 %vm517_vm1, %v6573_v12 }
 0x202   : > { %4600 = vmatprep.mubr.bf16.mxu0 %v6622_v0 }
 0x209   : > { %5646 = vmatmul.mubr.msk.bf16.vlgmr.msra.gmra.mrb[0].mxu0 %vm517_vm1, %v6574_v17 }
 0x20a   : > { %4610 = vmatprep.mubr.bf16.mxu0 %v6622_v0 }
 0x211   : > { %5647 = vmatmul.mubr.msk.bf16.gmra.mrb[4].mxu0 %vm517_vm1, %v6575_v15 }
 0x212   : > { %4620 = vmatprep.mubr.bf16.mxu0 %v6622_v0 }
 0x219   : > { %5648 = vmatmul.mubr.msk.bf16.gmra.mrb[8].mxu0 %vm517_vm1, %v6576_v38 }
 0x21a   : > { %4630 = vmatprep.mubr.bf16.mxu0 %v6622_v0 }
 0x221   : > { %5649 = vmatmul.mubr.msk.bf16.gmra.mrb[12].mxu0 %vm517_vm1, %v6577_v9 }
 0x222   : > { %4640 = vmatprep.mubr.bf16.mxu0 %v6622_v0 }
 0x229   : > { %5650 = vmatmul.mubr.msk.bf16.gmra.mrb[16].mxu0 %vm517_vm1, %v6578_v50 }
 0x22a   : > { %4650 = vmatprep.mubr.bf16.mxu0 %v6622_v0 }
 0x231   : > { %5651 = vmatmul.mubr.msk.bf16.gmra.mrb[20].mxu0 %vm517_vm1, %v6579_v55 }
 0x232   : > { %4660 = vmatprep.mubr.bf16.mxu0 %v6622_v0 }
 0x239   : > { %5652 = vmatmul.mubr.msk.bf16.gmra.mrb[24].mxu0 %vm517_vm1, %v6580_v57 }
 0x23a   : > { %4670 = vmatprep.mubr.bf16.mxu0 %v6622_v0 }
 0x241   : > { %5653 = vmatmul.mubr.msk.bf16.gmra.mrb[28].mxu0 %vm517_vm1, %v6581_v59 }
 0x2b4   : > { %v5984_v60 = vpop.f32.mrb[32].mxu1 }
 0x2b5   : > { %v6066_v62 = vadd.f32 %v5984_v60, %v7619_v3  ;;  %v4715_v1 = vpop.f32.mrb[33].mxu1 }
 0x2b6   : > { %v6067_v0 = vadd.f32 %v4715_v1, %v7614_v63  ;;  %v5985_v5 = vpop.f32.mrb[34].mxu1 }
 0x2b7   : > { %v5701_v12 = vpack.c.bf16 %v6066_v62, %v6066_v62  ;;  %v6068_v17 = vadd.f32 %v5985_v5, %v7624_v7  ;;  %v4718_v15 = vpop.f32.mrb[35].mxu1 }
 0x2b8   : > { %v5697_v38 = vpack.c.bf16 %v6067_v0, %v6067_v0  ;;  %v6069_v35 = vadd.f32 %v4718_v15, %v7608_v61 }
 0x2b9   : > { %5090 = vst [vmem:[%s7739_s9 + $0x20] sm:$0xf] %v5701_v12  ;;  %v5703_v45 = vpack.c.bf16 %v6068_v17, %v6068_v17 }
 0x2ba   : > { %5086 = vst [vmem:[%s7739_s9 + $0x8] sm:$0xf] %v5697_v38  ;;  %v5699_v9 = vpack.c.bf16 %v6069_v35, %v6069_v35 }
 0x2bb   : > { %5092 = vst [vmem:[%s7739_s9 + $0x2c] sm:$0xf] %v5703_v45 }
 0x2bc   : > { %5088 = vst [vmem:[%s7739_s9 + $0x14] sm:$0xf] %v5699_v9  ;;  %v5988_v39 = vpop.f32.mrb[36].mxu1 }
 0x2bd   : > { %v6070_v50 = vadd.f32 %v5988_v39, %v7637_v13  ;;  %v4731_v53 = vpop.f32.mrb[37].mxu1 }
 0x2be   : > { %v6071_v55 = vadd.f32 %v4731_v53, %v7628_v11  ;;  %v5989_v57 = vpop.f32.mrb[38].mxu1 }
 0x2bf   : > { %v5709_v59 = vpack.c.bf16 %v6070_v50, %v6070_v50  ;;  %v6072_v60 = vadd.f32 %v5989_v57, %v7642_v19  ;;  %v4734_v62 = vpop.f32.mrb[39].mxu1 }
 0x2c0   : > { %v5705_v1 = vpack.c.bf16 %v6071_v55, %v6071_v55  ;;  %v6073_v0 = vadd.f32 %v4734_v62, %v7632_v10 }
 0x2c1   : > { %5098 = vst [vmem:[%s7739_s9 + $0x50] sm:$0xf] %v5709_v59  ;;  %v5711_v5 = vpack.c.bf16 %v6072_v60, %v6072_v60  ;;  %v7763_v60 = vpop.permute.xlu1 %327 }
 0x2c2   : > { %5094 = vst [vmem:[%s7739_s9 + $0x38] sm:$0xf] %v5705_v1  ;;  %v5707_v12 = vpack.c.bf16 %v6073_v0, %v6073_v0 }
 0x2c3   : > { %5100 = vst [vmem:[%s7739_s9 + $0x5c] sm:$0xf] %v5711_v5  ;;  %v7767_v5 = vpop.permute.xlu0 %332 }
 0x2c4   : > { %5096 = vst [vmem:[%s7739_s9 + $0x44] sm:$0xf] %v5707_v12  ;;  %v5992_v17 = vpop.f32.mrb[40].mxu1 }
 0x2c5   : > { %v6074_v15 = vadd.f32 %v5992_v17, %v7655_v32  ;;  %v4747_v38 = vpop.f32.mrb[41].mxu1 }
 0x2c6   : > { %v6075_v35 = vadd.f32 %v4747_v38, %v7646_v30  ;;  %v5993_v45 = vpop.f32.mrb[42].mxu1 }
 0x2c7   : > { %v5717_v9 = vpack.c.bf16 %v6074_v15, %v6074_v15  ;;  %v6076_v39 = vadd.f32 %v5993_v45, %v7660_v46  ;;  %v4750_v50 = vpop.f32.mrb[43].mxu1 }
 0x2c8   : > { %v5713_v53 = vpack.c.bf16 %v6075_v35, %v6075_v35  ;;  %v6077_v55 = vadd.f32 %v4750_v50, %v7650_v8 }
 0x2c9   : > { %5106 = vst [vmem:[%s7739_s9 + $0x80] sm:$0xf] %v5717_v9  ;;  %v5719_v57 = vpack.c.bf16 %v6076_v39, %v6076_v39 }
 0x2ca   : > { %5102 = vst [vmem:[%s7739_s9 + $0x68] sm:$0xf] %v5713_v53  ;;  %v5715_v59 = vpack.c.bf16 %v6077_v55, %v6077_v55  ;;  %v6002_v53 = vadd.f32 %v7458_v49, %v7614_v63 }
 0x2cb   : > { %5108 = vst [vmem:[%s7739_s9 + $0x8c] sm:$0xf] %v5719_v57  ;;  %v6006_v57 = vadd.f32 %v7467_v4, %v7608_v61  ;;  %v6012_v4 = vadd.f32 %v7492_v18, %v7619_v3 }
 0x2cc   : > { %5104 = vst [vmem:[%s7739_s9 + $0x74] sm:$0xf] %v5715_v59  ;;  %v5996_v62 = vpop.f32.mrb[44].mxu1 }
 0x2cd   : > { %v6078_v1 = vadd.f32 %v5996_v62, %v7763_v60  ;;  %v4763_v0 = vpop.f32.mrb[45].mxu1  ;;  %v6008_v62 = vadd.f32 %v7472_v6, %v7608_v61  ;;  %v6014_v6 = vadd.f32 %v7497_v20, %v7624_v7  ;;  %v6020_v20 = vadd.f32 %v7507_v29, %v7628_v11 }
 0x2ce   : > { %v6079_v12 = vadd.f32 %v4763_v0, %v7664_v47  ;;  %v5997_v17 = vpop.f32.mrb[46].mxu1  ;;  %v6004_v47 = vadd.f32 %v7462_v2, %v7614_v63  ;;  %v6010_v2 = vadd.f32 %v7488_v14, %v7619_v3  ;;  %v6018_v3 = vadd.f32 %v7505_v22, %v7628_v11 }
 0x2cf   : > { %v5725_v15 = vpack.c.bf16 %v6078_v1, %v6078_v1  ;;  %v6080_v38 = vadd.f32 %v5997_v17, %v7767_v5  ;;  %v4766_v35 = vpop.f32.mrb[47].mxu1  ;;  %v6026_v11 = vadd.f32 %v7520_v44, %v7637_v13 }
 0x2d0   : > { %v5721_v45 = vpack.c.bf16 %v6079_v12, %v6079_v12  ;;  %v6081_v9 = vadd.f32 %v4766_v35, %v7668_v27 }
 0x2d1   : > { %5114 = vst [vmem:[%s7739_s9 + $0xb0] sm:$0xf] %v5725_v15  ;;  %v5727_v39 = vpack.c.bf16 %v6080_v38, %v6080_v38 }
 0x2d2   : > { %5110 = vst [vmem:[%s7739_s9 + $0x98] sm:$0xf] %v5721_v45  ;;  %v5723_v50 = vpack.c.bf16 %v6081_v9, %v6081_v9  ;;  %v6016_v45 = vadd.f32 %v7499_v21, %v7624_v7  ;;  %v6022_v21 = vadd.f32 %v7512_v41, %v7632_v10  ;;  %v6028_v41 = vadd.f32 %v7522_v28, %v7637_v13 }
 0x2d3   : > { %5116 = vst [vmem:[%s7739_s9 + $0xbc] sm:$0xf] %v5727_v39  ;;  %v6034_v13 = vadd.f32 %v7539_v26, %v7646_v30 }
 0x2d4   : > { %5112 = vst [vmem:[%s7739_s9 + $0xa4] sm:$0xf] %v5723_v50 }
 0x2dc   : > { %v4602_v55 = vpop.f32.mrb[0].mxu0 }
 0x2dd   : > { %v6003_v59 = vadd.f32 %v6002_v53, %v4602_v55  ;;  %v4604_v27 = vpop.f32.mrb[1].mxu0 }
 0x2de   : > { %v6005_v1 = vadd.f32 %v6004_v47, %v4604_v27  ;;  %v4606_v0 = vpop.f32.mrb[2].mxu0 }
 0x2df   : > { %v6007_v12 = vadd.f32 %v6006_v57, %v4606_v0  ;;  %v4608_v17 = vpop.f32.mrb[3].mxu0 }
 0x2e0   : > { %v5696_v15 = vpack.c.bf16 %v6005_v1, %v6003_v59  ;;  %v6009_v38 = vadd.f32 %v6008_v62, %v4608_v17  ;;  %v6024_v59 = vadd.f32 %v7514_v43, %v7632_v10  ;;  %v6030_v43 = vadd.f32 %v7527_v33, %v7642_v19 }
 0x2e1   : > { %v6036_v33 = vadd.f32 %v7542_v36, %v7646_v30  ;;  %v6042_v30 = vadd.f32 %v7555_v51, %v7655_v32 }
 0x2e2   : > { %5085 = vst [vmem:[%s7739_s9] sm:$0xff] %v5696_v15  ;;  %v5698_v49 = vpack.c.bf16 %v6009_v38, %v6007_v12  ;;  %v6032_v38 = vadd.f32 %v7529_v23, %v7642_v19  ;;  %v6038_v23 = vadd.f32 %v7547_v40, %v7650_v8  ;;  %v6044_v40 = vadd.f32 %v7557_v48, %v7655_v32 }
 0x2e4   : > { %5087 = vst [vmem:[%s7739_s9 + $0xc] sm:$0xff] %v5698_v49  ;;  %v4612_v63 = vpop.f32.mrb[4].mxu0 }
 0x2e5   : > { %v6011_v61 = vadd.f32 %v6010_v2, %v4612_v63  ;;  %v4614_v35 = vpop.f32.mrb[5].mxu0 }
 0x2e6   : > { %v6013_v9 = vadd.f32 %v6012_v4, %v4614_v35  ;;  %v4616_v39 = vpop.f32.mrb[6].mxu0 }
 0x2e7   : > { %v6015_v50 = vadd.f32 %v6014_v6, %v4616_v39  ;;  %v4618_v53 = vpop.f32.mrb[7].mxu0 }
 0x2e8   : > { %v5700_v47 = vpack.c.bf16 %v6013_v9, %v6011_v61  ;;  %v6017_v14 = vadd.f32 %v6016_v45, %v4618_v53  ;;  %v6040_v45 = vadd.f32 %v7549_v42, %v7650_v8  ;;  %v6046_v42 = vadd.f32 %v7562_v58, %v7660_v46 }
 0x2ea   : > { %5089 = vst [vmem:[%s7739_s9 + $0x18] sm:$0xff] %v5700_v47  ;;  %v5702_v18 = vpack.c.bf16 %v6017_v14, %v6015_v50 }
 0x2ec   : > { %5091 = vst [vmem:[%s7739_s9 + $0x24] sm:$0xff] %v5702_v18  ;;  %v4622_v55 = vpop.f32.mrb[8].mxu0 }
 0x2ed   : > { %v6019_v7 = vadd.f32 %v6018_v3, %v4622_v55  ;;  %v4624_v57 = vpop.f32.mrb[9].mxu0  ;;  %v6048_v3 = vadd.f32 %v7567_v16, %v7660_v46 }
 0x2ee   : > { %v6021_v27 = vadd.f32 %v6020_v20, %v4624_v57  ;;  %v4626_v62 = vpop.f32.mrb[10].mxu0 }
 0x2ef   : > { %v6023_v1 = vadd.f32 %v6022_v21, %v4626_v62  ;;  %v4628_v0 = vpop.f32.mrb[11].mxu0 }
 0x2f0   : > { %v5704_v12 = vpack.c.bf16 %v6021_v27, %v6019_v7  ;;  %v6025_v22 = vadd.f32 %v6024_v59, %v4628_v0 }
 0x2f2   : > { %5093 = vst [vmem:[%s7739_s9 + $0x30] sm:$0xff] %v5704_v12  ;;  %v5706_v29 = vpack.c.bf16 %v6025_v22, %v6023_v1  ;;  %v6058_v22 = vadd.f32 %v7692_v54, %v7763_v60 }
 0x2f4   : > { %5095 = vst [vmem:[%s7739_s9 + $0x3c] sm:$0xff] %v5706_v29  ;;  %v4632_v17 = vpop.f32.mrb[12].mxu0 }
 0x2f5   : > { %v6027_v10 = vadd.f32 %v6026_v11, %v4632_v17  ;;  %v4634_v15 = vpop.f32.mrb[13].mxu0 }
 0x2f6   : > { %v6029_v49 = vadd.f32 %v6028_v41, %v4634_v15  ;;  %v4636_v2 = vpop.f32.mrb[14].mxu0 }
 0x2f7   : > { %v6031_v4 = vadd.f32 %v6030_v43, %v4636_v2  ;;  %v4638_v63 = vpop.f32.mrb[15].mxu0 }
 0x2f8   : > { %v5708_v6 = vpack.c.bf16 %v6029_v49, %v6027_v10  ;;  %v6033_v44 = vadd.f32 %v6032_v38, %v4638_v63 }
 0x2fa   : > { %5097 = vst [vmem:[%s7739_s9 + $0x48] sm:$0xff] %v5708_v6  ;;  %v5710_v28 = vpack.c.bf16 %v6033_v44, %v6031_v4 }
 0x2fc   : > { %5099 = vst [vmem:[%s7739_s9 + $0x54] sm:$0xff] %v5710_v28  ;;  %v4642_v61 = vpop.f32.mrb[16].mxu0 }
 0x2fd   : > { %v6035_v19 = vadd.f32 %v6034_v13, %v4642_v61  ;;  %v4644_v35 = vpop.f32.mrb[17].mxu0 }
 0x2fe   : > { %v6037_v9 = vadd.f32 %v6036_v33, %v4644_v35  ;;  %v4646_v39 = vpop.f32.mrb[18].mxu0 }
 0x2ff   : > { %v6039_v50 = vadd.f32 %v6038_v23, %v4646_v39  ;;  %v4648_v53 = vpop.f32.mrb[19].mxu0 }
 0x300   : > { %v5712_v47 = vpack.c.bf16 %v6037_v9, %v6035_v19  ;;  %v6041_v26 = vadd.f32 %v6040_v45, %v4648_v53 }
 0x302   : > { %5101 = vst [vmem:[%s7739_s9 + $0x60] sm:$0xff] %v5712_v47  ;;  %v5714_v36 = vpack.c.bf16 %v6041_v26, %v6039_v50 }
 0x304   : > { %5103 = vst [vmem:[%s7739_s9 + $0x6c] sm:$0xff] %v5714_v36  ;;  %v4652_v14 = vpop.f32.mrb[20].mxu0 }
 0x305   : > { %v6043_v8 = vadd.f32 %v6042_v30, %v4652_v14  ;;  %v4654_v18 = vpop.f32.mrb[21].mxu0 }
 0x306   : > { %v6045_v20 = vadd.f32 %v6044_v40, %v4654_v18  ;;  %v4656_v55 = vpop.f32.mrb[22].mxu0 }
 0x307   : > { %v6047_v21 = vadd.f32 %v6046_v42, %v4656_v55  ;;  %v4658_v7 = vpop.f32.mrb[23].mxu0 }
 0x308   : > { %v5716_v51 = vpack.c.bf16 %v6045_v20, %v6043_v8  ;;  %v6049_v57 = vadd.f32 %v6048_v3, %v4658_v7 }
 0x30a   : > { %5105 = vst [vmem:[%s7739_s9 + $0x78] sm:$0xff] %v5716_v51  ;;  %v5718_v48 = vpack.c.bf16 %v6049_v57, %v6047_v21 }
 0x30c   : > { %5107 = vst [vmem:[%s7739_s9 + $0x84] sm:$0xff] %v5718_v48  ;;  %v4662_v32 = vpop.f32.mrb[24].mxu0 }
 0x30d   : > { %v6051_v59 = vadd.f32 %v7671_v34, %v4662_v32  ;;  %v4664_v58 = vpop.f32.mrb[25].mxu0  ;;  %v6060_v34 = vadd.f32 %v7694_v31, %v7763_v60 }
 0x30e   : > { %v6053_v27 = vadd.f32 %v7677_v24, %v4664_v58  ;;  %v4666_v62 = vpop.f32.mrb[26].mxu0  ;;  %v6062_v24 = vadd.f32 %v7699_v56, %v7767_v5 }
 0x30f   : > { %v6055_v16 = vadd.f32 %v7683_v52, %v4666_v62  ;;  %v4668_v46 = vpop.f32.mrb[27].mxu0 }
 0x310   : > { %v5720_v1 = vpack.c.bf16 %v6053_v27, %v6051_v59  ;;  %v6057_v0 = vadd.f32 %v7686_v25, %v4668_v46  ;;  %v6064_v25 = vadd.f32 %v7704_v37, %v7767_v5 }
 0x312   : > { %5109 = vst [vmem:[%s7739_s9 + $0x90] sm:$0xff] %v5720_v1  ;;  %v5722_v12 = vpack.c.bf16 %v6057_v0, %v6055_v16 }
 0x314   : > { %5111 = vst [vmem:[%s7739_s9 + $0x9c] sm:$0xff] %v5722_v12  ;;  %v4672_v29 = vpop.f32.mrb[28].mxu0 }
 0x315   : > { %v6059_v52 = vadd.f32 %v6058_v22, %v4672_v29  ;;  %v4674_v11 = vpop.f32.mrb[29].mxu0 }
 0x316   : > { %v6061_v41 = vadd.f32 %v6060_v34, %v4674_v11  ;;  %v4676_v17 = vpop.f32.mrb[30].mxu0 }
 0x317   : > { %v6063_v43 = vadd.f32 %v6062_v24, %v4676_v17  ;;  %v4678_v10 = vpop.f32.mrb[31].mxu0 }
 0x318   : > { %v5724_v15 = vpack.c.bf16 %v6061_v41, %v6059_v52  ;;  %v6065_v54 = vadd.f32 %v6064_v25, %v4678_v10 }
 0x31a   : > { %5113 = vst [vmem:[%s7739_s9 + $0xa8] sm:$0xff] %v5724_v15  ;;  %v5726_v38 = vpack.c.bf16 %v6065_v54, %v6063_v43 }
 0x31c   : > { %5115 = vst [vmem:[%s7739_s9 + $0xb4] sm:$0xff] %v5726_v38 }
 0x31d PF: > { %s13_s16 = sadd.s32 1, %s6620_s16   ;;  %s7871_s12 = smov %s6612_s14 }
 0x31e   : > { %p10_p7 = scmp.ge.s32.totalorder %s13_s16, 18   ;;  %s7872_s13 = smov %s6616_s15 }
 0x31f   : > { %s7873_s14 = smov %s7876_s17  ;;  %s7874_s15 = smov %s7880_s18 }
 0x320   :  { %12 = sbr.rel (!%p10_p7) target bundleno = 3 (0x3), region = 81 }

// kernel: a_call__.7
= control target key start
LH: loop header
LB: loop body
LE: loop exit
PB: predicated region body
PF: predicated region fallthrough
CT: control target
= control target key end

     0   :  { %s5069_s12 = smov 0   ;;  %s5071_s13 = smov 0   ;;  %s5994_s0 = inlined_call_operand.vmem [shape: bf16[2,8,64,512], index: 0, kind: input, shape index: {}]   ;;  %s5995_s1 = inlined_call_operand.vmem [shape: bf16[13,9,64,64], index: 1, kind: input, shape index: {}]   ;;  %s5996_s2 = inlined_call_operand.vmem [shape: f32[64,1], index: 2, kind: input, shape index: {}]   ;;  %s5997_s3 = inlined_call_operand.vmem [shape: f32[2,8,64,384], index: 3, kind: output, shape index: {}]  }
   0x1   :  { %s5073_s14 = smov 0   ;;  %s5075_s15 = smov 0  }
   0x2   :  { %s5077_s16 = smov 0   ;;  %s5079_s17 = smov 0  }
   0x3   :  { %s5081_s18 = smov 0  }
   0x4 LB: > { %s25_s19 = sadd.s32 1, %s5025_s15  ;;  %s28_s20 = sadd.s32 1, %s5029_s16  ;;  %s5037_s18 = sphi %s5081_s18, %s13_s18   ;;  %s5033_s17 = sphi %s5079_s17, %s6007_s17   ;;  %s5029_s16 = sphi %s5077_s16, %s6006_s16   ;;  %s5025_s15 = sphi %s5075_s15, %s6005_s15   ;;  %s5021_s14 = sphi %s5073_s14, %s6004_s14   ;;  %s5017_s13 = sphi %s5071_s13, %s6003_s13   ;;  %s5013_s12 = sphi %s5069_s12, %s6002_s12  }
   0x5   : > { %p26_p0 = scmp.ge.s32.totalorder %s25_s19, 13  ;;  %p3977_p1 = scmp.ge.s32.totalorder %s5037_s18, 1 }
   0x6   : > { %p198_p2 = scmp.lt.s32.totalorder %s5037_s18, 209  ;;  %s32_s21 = sadd.s32 1, %s5033_s17 }
   0x7   : > { %s6009_s19 = smov (%p26_p0, %s25_s19), 0  ;;  %s6011_s20 = smov (!%p26_p0, %s28_s20), %s5029_s16 }
   0x8   : > { %p199_p3 = pnand %p3977_p1, %p198_p2  ;;  %p30_p4 = scmp.ge.s32.totalorder %s6011_s20, 2 }
   0x9   : > { %s241_s22 = sadd.s32 (!%p199_p3), %s5013_s12, %s5021_s14  ;;  %p247_p6 = scmp.lt.s32.totalorder (!%p199_p3), %s5017_s13, 1 }
   0xa   : > { %s6013_s20 = smov (%p30_p4, %s6011_s20), 0  ;;  %s6015_s21 = smov (!%p30_p4, %s32_s21), %s5033_s17 }
   0xb   : > { %5998 = sst [smem:[#allocation3_spill]] %s6013_s20  ;;  %p34_p5 = scmp.ge.s32.totalorder %s6015_s21, 8 }
   0xc   : > { %202 = sbr.rel (%p199_p3) target bundleno = 791 (0x317), region = 32  ;;  %s5117_s23 = sadd.s32 (!%p199_p3), 4294967290, %s241_s22 }
   0xd   : > { %s6017_s21 = smov (%p34_p5, %s6015_s21), 0  ;;  %p243_p7 = scmp.gt.s32.totalorder (!%p199_p3), %s5117_s23, 0 }
   0xe   : > { %5999 = sst [smem:[#allocation4_spill]] %s6017_s21  ;;  %p3979_p8 = scmp.lt.s32.totalorder (!%p199_p3), %s5117_s23, 7 }
   0xf   : > { %p262_p9 = scmp.lt.s32.totalorder (!%p199_p3), %s5013_s12, 12  ;;  %p269_p11 = scmp.lt.s32.totalorder (!%p199_p3), %s5021_s14, 7 }
  0x10   : > { %p3989_p12 = scmp.ne.s32.totalorder (!%p199_p3), %s5013_s12, 0 }
  0x13   : > { %s244_s24 = scalar_select %p243_p7, %s5117_s23, 0 }
  0x14   : > { %s6019_s13 = smov (!%p247_p6, %s5017_s13), 1  ;;  %s6025_s14 = smov (!%p269_p11, %s5021_s14), 7 }
  0x15   : > { %s6021_s24 = smov (!%p3979_p8, %s244_s24), 7  ;;  %s3985_s26 = sshll.u32 %s6019_s13, 8  ;;  %v283_v0 = vld [vmem:[%s5996_s2 + $0x10] sm:$0xff] (!%p3989_p12)  ;;  %v281_v1 = vld [vmem:[%s5996_s2] sm:$0xff] (!%p3989_p12)  ;;  %v5039_v2 = vmov (!%p3989_p12), 0   ;;  %v284_v3 = vld [vmem:[%s5996_s2 + $0x18] sm:$0xff] (!%p3989_p12) }
  0x16   : > { %s263_s25 = scalar_select %p262_p9, %s5013_s12, 12 }
  0x17   : > { %p249_p10 = scmp.lt.s32.totalorder %s6021_s24, 7  ;;  %s4826_s10 = smul.u32 192, %s6019_s13  ;;  %4894 = vset.pattern.permute.xlu1 (!%p3989_p12), %v5039_v2  ;;  %4893 = vset.pattern.permute.xlu0 (!%p3989_p12), %v5039_v2  ;;  %v282_v4 = vld [vmem:[%s5996_s2 + $0x8] sm:$0xff] (!%p3989_p12)  ;;  %v285_v6 = vld [vmem:[%s5996_s2 + $0x20] sm:$0xff] (!%p3989_p12)  ;;  %v288_v7 = vld [vmem:[%s5996_s2 + $0x38] sm:$0xff] (!%p3989_p12) }
  0x18   : > { %s4824_s27 = smul.u32 288, %s263_s25  ;;  %301 = vperm.xlu1 (!%p3989_p12), %4894, %v283_v0   ;;  %291 = vperm.xlu0 (!%p3989_p12), %4893, %v281_v1   ;;  %v286_v5 = vld [vmem:[%s5996_s2 + $0x28] sm:$0xff] (!%p3989_p12)  ;;  %v287_v8 = vld [vmem:[%s5996_s2 + $0x30] sm:$0xff] (!%p3989_p12) }
  0x19   : > { %s6023_s24 = smov (!%p249_p10, %s6021_s24), 7  ;;  %s4825_s11 = smul.u32 24, %s6025_s14 }
  0x1a   : > { %s5127_s30 = scalar_lea.vmem %s5995_s1, %s4824_s27  ;;  %s3984_s4 = sshll.u32 %s6023_s24, 5 }
  0x1b   : > { %s253_s5 = sadd.s32 %s3985_s26, %s3984_s4  ;;  %s273_s22 = sadd.s32 %s4826_s10, %s4825_s11 }
  0x1c   : > { %s3986_s6 = sshll.u32 %s253_s5, 2  ;;  %s3988_s25 = sshll.u32 %s273_s22, 3  ;;  %306 = vperm.xlu1 (!%p3989_p12), %4894, %v284_v3   ;;  %296 = vperm.xlu0 (!%p3989_p12), %4893, %v282_v4  }
  0x1d   : > { %s5133_s9 = scalar_lea.vmem %s5994_s0, %s3986_s6  ;;  %s5139_s28 = scalar_lea.vmem %s5997_s3, %s3988_s25 }
  0x1e   : > { %280 = sbr.rel (%p3989_p12) target bundleno = 167 (0xa7), region = 36 }
  0x20   : > { %316 = vperm.xlu1 (!%p3989_p12), %4894, %v286_v5   ;;  %311 = vperm.xlu0 (!%p3989_p12), %4893, %v285_v6  }
  0x24   : > { %326 = vperm.xlu1 (!%p3989_p12), %4894, %v288_v7   ;;  %321 = vperm.xlu0 (!%p3989_p12), %4893, %v287_v8  }
  0x97   : > { %v302_v9 = vpop.permute.xlu1 %301  ;;  %v292_v10 = vpop.permute.xlu0 %291 }
  0x98   : > { %335 = vst [vmem:[#allocation2 + $0x30] sm:$0xff] %v302_v9  ;;  %336 = vst [vmem:[#allocation2 + $0x38] sm:$0xff] %v302_v9 }
  0x99   : > { %337 = vst [vmem:[#allocation2 + $0x40] sm:$0xff] %v302_v9  ;;  %329 = vst [vmem:[#allocation2] sm:$0xff] %v292_v10 }
  0x9a   : > { %330 = vst [vmem:[#allocation2 + $0x8] sm:$0xff] %v292_v10  ;;  %331 = vst [vmem:[#allocation2 + $0x10] sm:$0xff] %v292_v10 }
  0x9b   : > { %v307_v11 = vpop.permute.xlu1 %306  ;;  %v297_v12 = vpop.permute.xlu0 %296 }
  0x9c   : > { %338 = vst [vmem:[#allocation2 + $0x48] sm:$0xff] %v307_v11  ;;  %339 = vst [vmem:[#allocation2 + $0x50] sm:$0xff] %v307_v11 }
  0x9d   : > { %340 = vst [vmem:[#allocation2 + $0x58] sm:$0xff] %v307_v11  ;;  %332 = vst [vmem:[#allocation2 + $0x18] sm:$0xff] %v297_v12 }
  0x9e   : > { %333 = vst [vmem:[#allocation2 + $0x20] sm:$0xff] %v297_v12  ;;  %334 = vst [vmem:[#allocation2 + $0x28] sm:$0xff] %v297_v12 }
  0x9f   : > { %v317_v13 = vpop.permute.xlu1 %316  ;;  %v312_v14 = vpop.permute.xlu0 %311 }
  0xa0   : > { %344 = vst [vmem:[#allocation2 + $0x78] sm:$0xff] %v317_v13  ;;  %345 = vst [vmem:[#allocation2 + $0x80] sm:$0xff] %v317_v13 }
  0xa1   : > { %346 = vst [vmem:[#allocation2 + $0x88] sm:$0xff] %v317_v13  ;;  %341 = vst [vmem:[#allocation2 + $0x60] sm:$0xff] %v312_v14 }
  0xa2   : > { %342 = vst [vmem:[#allocation2 + $0x68] sm:$0xff] %v312_v14  ;;  %343 = vst [vmem:[#allocation2 + $0x70] sm:$0xff] %v312_v14 }
  0xa3   : > { %v327_v15 = vpop.permute.xlu1 %326  ;;  %v322_v16 = vpop.permute.xlu0 %321 }
  0xa4   : > { %350 = vst [vmem:[#allocation2 + $0xa8] sm:$0xff] %v327_v15  ;;  %351 = vst [vmem:[#allocation2 + $0xb0] sm:$0xff] %v327_v15 }
  0xa5   : > { %352 = vst [vmem:[#allocation2 + $0xb8] sm:$0xff] %v327_v15  ;;  %347 = vst [vmem:[#allocation2 + $0x90] sm:$0xff] %v322_v16 }
  0xa6   : > { %348 = vst [vmem:[#allocation2 + $0x98] sm:$0xff] %v322_v16  ;;  %349 = vst [vmem:[#allocation2 + $0xa0] sm:$0xff] %v322_v16 }
  0xa7 PF: > { %p355_p13 = scmp.ge.s32.totalorder %s5117_s23, 0  ;;  %p356_p0 = scmp.lt.s32.totalorder %s5117_s23, 8 }
  0xa9   : > { %p357_p1 = pnand %p356_p0, %p355_p13 }
  0xaa   : > { %v5169_v17 = vld [vmem:[%s5133_s9 + $0x4] ss:$16 sps:$4 sm:$0xff] (!%p357_p1)   ;;  %v5172_v18 = vld [vmem:[%s5133_s9] ss:$16 sps:$4 sm:$0xff] (!%p357_p1)   ;;  %s5040_s25 = smov (!%p357_p1), 126   ;;  %v5041_v29 = vmov (!%p357_p1), 0  }
  0xab   : > { %360 = sbr.rel (%p357_p1) target bundleno = 777 (0x309), region = 40  ;;  %1215 = vrot.lane.b32.xlu0 (!%p357_p1), %v5169_v17, %s5040_s25  ;;  %v5177_v19 = vld [vmem:[%s5133_s9 + $0x8] ss:$16 sps:$4 sm:$0xff] (!%p357_p1)   ;;  %506 = vmatprep.subr.bf16.mxu1 (!%p357_p1), %v5169_v17  ;;  %v5183_v20 = vld [vmem:[%s5133_s9 + $0x24] ss:$16 sps:$4 sm:$0xff] (!%p357_p1)   ;;  %vm493_vm0 = vcmask (!%p357_p1), 523264  }
  0xac   : > { %1213 = vrot.lane.b32.xlu1 (!%p357_p1), %v5172_v18, %s5040_s25  ;;  %507 = vmatpush1.bf16.msra.mxu1 (!%p357_p1), %v5172_v18  ;;  %v5187_v21 = vld [vmem:[%s5133_s9 + $0x20] ss:$16 sps:$4 sm:$0xff] (!%p357_p1)   ;;  %v5193_v22 = vld [vmem:[%s5133_s9 + $0x28] ss:$16 sps:$4 sm:$0xff] (!%p357_p1)   ;;  %v5196_v23 = vld [vmem:[%s5133_s9 + $0x44] ss:$16 sps:$4 sm:$0xff] (!%p357_p1)  }
  0xad   : > { %508 = vmatprep.subr.bf16.mxu1 (!%p357_p1), %v5183_v20  ;;  %v5203_v24 = vld [vmem:[%s5133_s9 + $0x40] ss:$16 sps:$4 sm:$0xff] (!%p357_p1)   ;;  %v5208_v25 = vld [vmem:[%s5133_s9 + $0x48] ss:$16 sps:$4 sm:$0xff] (!%p357_p1)   ;;  %v5211_v26 = vld [vmem:[%s5133_s9 + $0x64] ss:$16 sps:$4 sm:$0xff] (!%p357_p1)   ;;  %538 = vmatprep.mubr.bf16.mxu1 (!%p357_p1), %v5041_v29 }
  0xae   : > { %v5218_v27 = vld [vmem:[%s5133_s9 + $0x60] ss:$16 sps:$4 sm:$0xff] (!%p357_p1)   ;;  %v5228_v30 = vld [vmem:[%s5133_s9 + $0x68] ss:$16 sps:$4 sm:$0xff] (!%p357_p1)   ;;  %1314 = vmatprep.mubr.bf16.mxu0 (!%p357_p1), %v5041_v29  ;;  %s5042_s23 = smov (!%p357_p1), 110   ;;  %s5043_s24 = smov (!%p357_p1), 127  }
  0xaf   : > { %1217 = vrot.lane.b32.xlu0 (!%p357_p1), %v5177_v19, %s5040_s25  ;;  %v4919_v28 = vld [vmem:[%s5127_s30] sm:$0xff] (!%p357_p1)   ;;  %v4921_v31 = vld [vmem:[%s5127_s30 + $0x8] sm:$0xff] (!%p357_p1)   ;;  %v4925_v34 = vld [vmem:[%s5127_s30 + $0x10] sm:$0xff] (!%p357_p1)   ;;  %s5044_s26 = smov (!%p357_p1), 109   ;;  %s5045_s27 = smov (!%p357_p1), 108   ;;  %vm1245_vm1 = vcmask (!%p357_p1), 1031168  }
  0xb0   : > { %1223 = vrot.lane.b32.xlu1 (!%p357_p1), %v5183_v20, %s5040_s25  ;;  %509 = vmatpush1.bf16.msra.mxu1 (!%p357_p1), %v5187_v21  ;;  %v4923_v32 = vld [vmem:[%s5133_s9 + $0x8] ss:$16 sps:$4 sm:$0xff] (!%p357_p1)   ;;  %v5329_v38 = vld [vmem:[%s5133_s9 + $0xc] ss:$16 sps:$4 sm:$0xff] (!%p357_p1)   ;;  %v5405_v62 = vld [vmem:[%s5127_s30 + $0x40] sm:$0xff] (!%p357_p1)   ;;  %s5046_s29 = smov (!%p357_p1), 92  }
  0xb1   : > { %510 = vmatprep.subr.bf16.mxu1 (!%p357_p1), %v5196_v23  ;;  %v4924_v33 = vld [vmem:[%s5133_s9 + $0x28] ss:$16 sps:$4 sm:$0xff] (!%p357_p1)   ;;  %v5340_v39 = vld [vmem:[%s5133_s9 + $0x2c] ss:$16 sps:$4 sm:$0xff] (!%p357_p1)   ;;  %vm1633_vm2 = vcmask (!%p357_p1), 900096   ;;  %v5447_v13 = vld [vmem:[%s5127_s30 + $0x50] sm:$0xff] (!%p357_p1)  }
  0xb2   : > { %v4927_v35 = vld [vmem:[%s5133_s9 + $0x48] ss:$16 sps:$4 sm:$0xff]   ;;  %v5351_v40 = vld [vmem:[%s5133_s9 + $0x4c] ss:$16 sps:$4 sm:$0xff]   ;;  %vm857_vm3 = vcmask 1039360   ;;  %vm2021_vm4 = vcmask 891904  }
  0xb3   : > { %1225 = vrot.lane.b32.xlu0 %v5193_v22, %s5040_s25  ;;  %v4928_v36 = vld [vmem:[%s5133_s9 + $0x68] ss:$16 sps:$4 sm:$0xff]   ;;  %v5362_v43 = vld [vmem:[%s5133_s9 + $0x6c] ss:$16 sps:$4 sm:$0xff]   ;;  %s5047_s13 = smov 91   ;;  %vm2409_vm5 = vcmask 883712  }
  0xb4   : > { %1221 = vrot.lane.b32.xlu1 %v5187_v21, %s5040_s25  ;;  %511 = vmatpush1.bf16.msra.mxu1 %v5203_v24  ;;  %v4929_v37 = vld [vmem:[%s5127_s30 + $0x18] sm:$0xff]   ;;  %v5424_v5 = vld [vmem:[%s5127_s30 + $0x48] sm:$0xff]   ;;  %s5048_s14 = smov 90   ;;  %vm2797_vm6 = vcmask 752640   ;;  %vm3185_vm7 = vcmask 744448   ;;  %vm3573_vm8 = vcmask 736256  }
  0xb5   : > { %512 = vmatprep.subr.bf16.mxu1 %v5211_v26 }
  0xb7   : > { %1231 = vrot.lane.b32.xlu0 %v5196_v23, %s5040_s25 }
  0xb8   : > { %1233 = vrot.lane.b32.xlu1 %v5208_v25, %s5040_s25  ;;  %513 = vmatpush1.bf16.msra.mxu1 %v5218_v27 }
  0xb9   : > { %4384 = vmatprep.subr.bf16.mxu1 %v4923_v32 }
  0xbb   : > { %1229 = vrot.lane.b32.xlu0 %v5203_v24, %s5040_s25  ;;  %4007 = vmatmul.mubr.msk.bf16.vlgmr.msra.gmra.mrb[0].mxu1 %vm493_vm0, %v4919_v28 }
  0xbc   : > { %1239 = vrot.lane.b32.xlu1 %v5211_v26, %s5040_s25  ;;  %548 = vmatprep.mubr.bf16.mxu1 %v5041_v29 }
  0xbd   : > { %4385 = vmatpush3.bf16.msra.mxu1 %v4923_v32 }
  0xbe   : > { %4386 = vmatprep.subr.bf16.mxu1 %v4924_v33 }
  0xbf   : > { %1241 = vrot.lane.b32.xlu0 %v5228_v30, %s5040_s25 }
  0xc0   : > { %1237 = vrot.lane.b32.xlu1 %v5218_v27, %s5040_s25 }
  0xc1   : > { %4387 = vmatpush3.bf16.msra.mxu1 %v4924_v33 }
  0xc2   : > { %4388 = vmatprep.subr.bf16.mxu1 %v4927_v35 }
  0xc3   : > { %1603 = vrot.lane.b32.xlu0 %v5169_v17, %s5042_s23  ;;  %4008 = vmatmul.mubr.msk.bf16.gmra.mrb[4].mxu1 %vm493_vm0, %v4921_v31 }
  0xc4   : > { %1605 = vrot.lane.b32.xlu1 %v5177_v19, %s5042_s23  ;;  %558 = vmatprep.mubr.bf16.mxu1 %v5041_v29 }
  0xc5   : > { %4389 = vmatpush3.bf16.msra.mxu1 %v4927_v35 }
  0xc6   : > { %4390 = vmatprep.subr.bf16.mxu1 %v4928_v36 }
  0xc7   : > { %1601 = vrot.lane.b32.xlu0 %v5172_v18, %s5042_s23 }
  0xc8   : > { %1611 = vrot.lane.b32.xlu1 %v5183_v20, %s5042_s23 }
  0xc9   : > { %4391 = vmatpush3.bf16.msra.mxu1 %v4928_v36 }
  0xcb   : > { %1613 = vrot.lane.b32.xlu0 %v5193_v22, %s5042_s23  ;;  %4009 = vmatmul.mubr.msk.bf16.gmra.mrb[8].mxu1 %vm493_vm0, %v4925_v34 }
  0xcc   : > { %1609 = vrot.lane.b32.xlu1 %v5187_v21, %s5042_s23  ;;  %568 = vmatprep.mubr.bf16.mxu1 %v5041_v29 }
  0xcf   : > { %1619 = vrot.lane.b32.xlu0 %v5196_v23, %s5042_s23 }
  0xd0   : > { %1621 = vrot.lane.b32.xlu1 %v5208_v25, %s5042_s23 }
  0xd3   : > { %1617 = vrot.lane.b32.xlu0 %v5203_v24, %s5042_s23  ;;  %4010 = vmatmul.mubr.msk.bf16.gmra.mrb[12].mxu1 %vm493_vm0, %v4929_v37 }
  0xd4   : > { %1627 = vrot.lane.b32.xlu1 %v5211_v26, %s5042_s23  ;;  %4392 = vmatprep.mubr.msk.bf16.mxu1 %vm493_vm0, %v4919_v28 }
  0xd7   : > { %1629 = vrot.lane.b32.xlu0 %v5228_v30, %s5042_s23 }
  0xd8   : > { %1625 = vrot.lane.b32.xlu1 %v5218_v27, %s5042_s23 }
  0xdb   : > { %827 = vrot.lane.b32.xlu0 %v5169_v17, %s5043_s24  ;;  %4393 = vmatmul.mubr.msk.bf16.vlgmr.msra.gmra.mrb[16].mxu1 %vm493_vm0, %v4921_v31 }
  0xdc   : > { %829 = vrot.lane.b32.xlu1 %v5177_v19, %s5043_s24  ;;  %4396 = vmatprep.mubr.msk.bf16.mxu1 %vm493_vm0, %v4925_v34  ;;  %v5467_v34 = vld [vmem:[%s5127_s30 + $0x58] sm:$0xff]  }
  0xdf   : > { %1991 = vrot.lane.b32.xlu0 %v5169_v17, %s5044_s26 }
  0xe0   : > { %1993 = vrot.lane.b32.xlu1 %v5177_v19, %s5044_s26 }
  0xe3   : > { %825 = vrot.lane.b32.xlu0 %v5172_v18, %s5043_s24  ;;  %4397 = vmatmul.mubr.msk.bf16.gmra.mrb[20].mxu1 %vm493_vm0, %v4929_v37 }
  0xe4   : > { %1989 = vrot.lane.b32.xlu1 %v5172_v18, %s5044_s26  ;;  %926 = vmatprep.mubr.bf16.mxu1 %v5041_v29 }
  0xe7   : > { %835 = vrot.lane.b32.xlu0 %v5183_v20, %s5043_s24 }
  0xe8   : > { %837 = vrot.lane.b32.xlu1 %v5193_v22, %s5043_s24 }
  0xeb   : > { %1999 = vrot.lane.b32.xlu0 %v5183_v20, %s5044_s26 }
  0xec   : > { %2001 = vrot.lane.b32.xlu1 %v5193_v22, %s5044_s26 }
  0xef   : > { %833 = vrot.lane.b32.xlu0 %v5187_v21, %s5043_s24 }
  0xf0   : > { %1997 = vrot.lane.b32.xlu1 %v5187_v21, %s5044_s26 }
  0xf3   : > { %843 = vrot.lane.b32.xlu0 %v5196_v23, %s5043_s24 }
  0xf4   : > { %845 = vrot.lane.b32.xlu1 %v5208_v25, %s5043_s24 }
  0xf7   : > { %2007 = vrot.lane.b32.xlu0 %v5196_v23, %s5044_s26 }
  0xf8   : > { %2009 = vrot.lane.b32.xlu1 %v5208_v25, %s5044_s26 }
  0xfb   : > { %841 = vrot.lane.b32.xlu0 %v5203_v24, %s5043_s24 }
  0xfc   : > { %2005 = vrot.lane.b32.xlu1 %v5203_v24, %s5044_s26 }
  0xff   : > { %851 = vrot.lane.b32.xlu0 %v5211_v26, %s5043_s24 }
 0x100   : > { %853 = vrot.lane.b32.xlu1 %v5228_v30, %s5043_s24 }
 0x103   : > { %2015 = vrot.lane.b32.xlu0 %v5211_v26, %s5044_s26 }
 0x104   : > { %2017 = vrot.lane.b32.xlu1 %v5228_v30, %s5044_s26 }
 0x107   : > { %849 = vrot.lane.b32.xlu0 %v5218_v27, %s5043_s24 }
 0x108   : > { %2013 = vrot.lane.b32.xlu1 %v5218_v27, %s5044_s26 }
 0x10b   : > { %831 = vrot.lane.b32.xlu0 %v5329_v38, %s5043_s24 }
 0x10c   : > { %2379 = vrot.lane.b32.xlu1 %v5169_v17, %s5045_s27 }
 0x10f   : > { %2381 = vrot.lane.b32.xlu0 %v5177_v19, %s5045_s27 }
 0x110   : > { %2377 = vrot.lane.b32.xlu1 %v5172_v18, %s5045_s27 }
 0x113   : > { %839 = vrot.lane.b32.xlu0 %v5340_v39, %s5043_s24 }
 0x114   : > { %2387 = vrot.lane.b32.xlu1 %v5183_v20, %s5045_s27 }
 0x117   : > { %2389 = vrot.lane.b32.xlu0 %v5193_v22, %s5045_s27 }
 0x118   : > { %2385 = vrot.lane.b32.xlu1 %v5187_v21, %s5045_s27 }
 0x11b   : > { %847 = vrot.lane.b32.xlu0 %v5351_v40, %s5043_s24 }
 0x11c   : > { %2395 = vrot.lane.b32.xlu1 %v5196_v23, %s5045_s27 }
 0x11d   : > { %v1216_v41 = vpop.permute.xlu0 %1215 }
 0x11e   : > { %v1214_v42 = vpop.permute.xlu1 %1213 }
 0x11f   : > { %2397 = vrot.lane.b32.xlu0 %v5208_v25, %s5045_s27  ;;  %v1246_v47 = vsel %vm1245_vm1, %v1214_v42, %v1216_v41 }
 0x120   : > { %2393 = vrot.lane.b32.xlu1 %v5203_v24, %s5045_s27 }
 0x121   : > { %v5366_v44 = vpop.permute.xlu0 %1217 }
 0x122   : > { %v1224_v45 = vpop.permute.xlu1 %1223  ;;  %v1247_v46 = vsel %vm1245_vm1, %v1216_v41, %v5366_v44 }
 0x123   : > { %1282 = vmatprep.subr.bf16.mxu0 %v1247_v46  ;;  %855 = vrot.lane.b32.xlu0 %v5362_v43, %s5043_s24  ;;  %v5491_v46 = vld [vmem:[%s5127_s30 + $0x60] sm:$0xff]  }
 0x124   : > { %2403 = vrot.lane.b32.xlu1 %v5211_v26, %s5045_s27  ;;  %1283 = vmatpush1.bf16.msra.mxu0 %v1246_v47 }
 0x125   : > { %v5375_v48 = vpop.permute.xlu0 %1225 }
 0x126   : > { %v1222_v49 = vpop.permute.xlu1 %1221  ;;  %v1250_v50 = vsel %vm1245_vm1, %v1224_v45, %v5375_v48 }
 0x127   : > { %1284 = vmatprep.subr.bf16.mxu0 %v1250_v50  ;;  %2405 = vrot.lane.b32.xlu0 %v5228_v30, %s5045_s27  ;;  %v1249_v51 = vsel %vm1245_vm1, %v1222_v49, %v1224_v45 }
 0x128   : > { %2401 = vrot.lane.b32.xlu1 %v5218_v27, %s5045_s27  ;;  %1285 = vmatpush1.bf16.msra.mxu0 %v1249_v51 }
 0x129   : > { %v1232_v52 = vpop.permute.xlu0 %1231 }
 0x12a   : > { %v5384_v53 = vpop.permute.xlu1 %1233 }
 0x12b   : > { %v1253_v54 = vsel %vm1245_vm1, %v1232_v52, %v5384_v53  ;;  %1219 = vrot.lane.b32.xlu0 %v5329_v38, %s5040_s25 }
 0x12c   : > { %1286 = vmatprep.subr.bf16.mxu0 %v1253_v54  ;;  %1227 = vrot.lane.b32.xlu1 %v5340_v39, %s5040_s25 }
 0x12d   : > { %v1230_v55 = vpop.permute.xlu0 %1229 }
 0x12e   : > { %v1240_v56 = vpop.permute.xlu1 %1239  ;;  %v1252_v57 = vsel %vm1245_vm1, %v1230_v55, %v1232_v52 }
 0x12f   : > { %1287 = vmatpush1.bf16.msra.mxu0 %v1252_v57  ;;  %1235 = vrot.lane.b32.xlu0 %v5351_v40, %s5040_s25  ;;  %v5511_v57 = vld [vmem:[%s5127_s30 + $0x68] sm:$0xff]  }
 0x130   : > { %1243 = vrot.lane.b32.xlu1 %v5362_v43, %s5040_s25 }
 0x131   : > { %v5397_v58 = vpop.permute.xlu0 %1241 }
 0x132   : > { %v1238_v59 = vpop.permute.xlu1 %1237  ;;  %v1256_v60 = vsel %vm1245_vm1, %v1240_v56, %v5397_v58 }
 0x133   : > { %1288 = vmatprep.subr.bf16.mxu0 %v1256_v60  ;;  %1607 = vrot.lane.b32.xlu0 %v5329_v38, %s5042_s23  ;;  %v1255_v61 = vsel %vm1245_vm1, %v1238_v59, %v1240_v56 }
 0x134   : > { %2767 = vrot.lane.b32.xlu1 %v5169_v17, %s5046_s29  ;;  %1289 = vmatpush1.bf16.msra.mxu0 %v1255_v61 }
 0x135   : > { %v1604_v63 = vpop.permute.xlu0 %1603 }
 0x136   : > { %v5409_v0 = vpop.permute.xlu1 %1605 }
 0x137   : > { %v1635_v1 = vsel %vm1633_vm2, %v1604_v63, %v5409_v0  ;;  %2769 = vrot.lane.b32.xlu0 %v5177_v19, %s5046_s29  ;;  %4079 = vmatmul.mubr.msk.bf16.vlgmr.msra.gmra.mrb[0].mxu0 %vm493_vm0, %v5405_v62 }
 0x138   : > { %1670 = vmatprep.subr.bf16.mxu0 %v1635_v1  ;;  %2765 = vrot.lane.b32.xlu1 %v5172_v18, %s5046_s29 }
 0x139   : > { %v1602_v2 = vpop.permute.xlu0 %1601  ;;  %1324 = vmatprep.mubr.bf16.mxu0 %v5041_v29 }
 0x13a   : > { %v1634_v3 = vsel %vm1633_vm2, %v1602_v2, %v1604_v63  ;;  %v1612_v4 = vpop.permute.xlu1 %1611 }
 0x13b   : > { %1615 = vrot.lane.b32.xlu0 %v5340_v39, %s5042_s23  ;;  %1671 = vmatpush1.bf16.msra.mxu0 %v1634_v3 }
 0x13c   : > { %2775 = vrot.lane.b32.xlu1 %v5183_v20, %s5046_s29 }
 0x13d   : > { %v5428_v6 = vpop.permute.xlu0 %1613 }
 0x13e   : > { %v1610_v7 = vpop.permute.xlu1 %1609  ;;  %v1638_v8 = vsel %vm1633_vm2, %v1612_v4, %v5428_v6 }
 0x13f   : > { %v1637_v9 = vsel %vm1633_vm2, %v1610_v7, %v1612_v4  ;;  %2777 = vrot.lane.b32.xlu0 %v5193_v22, %s5046_s29  ;;  %4080 = vmatmul.mubr.msk.bf16.gmra.mrb[4].mxu0 %vm493_vm0, %v5424_v5  ;;  %v5553_v7 = vld [vmem:[%s5127_s30 + $0x78] sm:$0xff]  }
 0x140   : > { %2773 = vrot.lane.b32.xlu1 %v5187_v21, %s5046_s29  ;;  %1672 = vmatprep.subr.bf16.mxu0 %v1638_v8 }
 0x141   : > { %1673 = vmatpush1.bf16.msra.mxu0 %v1637_v9  ;;  %v1620_v10 = vpop.permute.xlu0 %1619  ;;  %1334 = vmatprep.mubr.bf16.mxu0 %v5041_v29 }
 0x142   : > { %v5440_v11 = vpop.permute.xlu1 %1621 }
 0x143   : > { %1623 = vrot.lane.b32.xlu0 %v5351_v40, %s5042_s23  ;;  %v1641_v12 = vsel %vm1633_vm2, %v1620_v10, %v5440_v11 }
 0x144   : > { %2783 = vrot.lane.b32.xlu1 %v5196_v23, %s5046_s29  ;;  %1674 = vmatprep.subr.bf16.mxu0 %v1641_v12 }
 0x145   : > { %v1618_v14 = vpop.permute.xlu0 %1617 }
 0x146   : > { %v1640_v15 = vsel %vm1633_vm2, %v1618_v14, %v1620_v10  ;;  %v1628_v16 = vpop.permute.xlu1 %1627 }
 0x147   : > { %2785 = vrot.lane.b32.xlu0 %v5208_v25, %s5046_s29  ;;  %4081 = vmatmul.mubr.msk.bf16.gmra.mrb[8].mxu0 %vm493_vm0, %v5447_v13 }
 0x148   : > { %2781 = vrot.lane.b32.xlu1 %v5203_v24, %s5046_s29  ;;  %1675 = vmatpush1.bf16.msra.mxu0 %v1640_v15 }
 0x149   : > { %v5458_v28 = vpop.permute.xlu0 %1629  ;;  %1344 = vmatprep.mubr.bf16.mxu0 %v5041_v29 }
 0x14a   : > { %v1626_v31 = vpop.permute.xlu1 %1625  ;;  %v1644_v32 = vsel %vm1633_vm2, %v1628_v16, %v5458_v28 }
 0x14b   : > { %v1643_v33 = vsel %vm1633_vm2, %v1626_v31, %v1628_v16  ;;  %1631 = vrot.lane.b32.xlu0 %v5362_v43, %s5042_s23  ;;  %1676 = vmatprep.subr.bf16.mxu0 %v1644_v32 }
 0x14c   : > { %2791 = vrot.lane.b32.xlu1 %v5211_v26, %s5046_s29  ;;  %1677 = vmatpush1.bf16.msra.mxu0 %v1643_v33 }
 0x14d   : > { %v828_v35 = vpop.permute.xlu0 %827 }
 0x14e   : > { %v5471_v36 = vpop.permute.xlu1 %829 }
 0x14f   : > { %2793 = vrot.lane.b32.xlu0 %v5228_v30, %s5046_s29  ;;  %v859_v37 = vsel %vm857_vm3, %v828_v35, %v5471_v36  ;;  %4082 = vmatmul.mubr.msk.bf16.gmra.mrb[12].mxu0 %vm493_vm0, %v5467_v34 }
 0x150   : > { %2789 = vrot.lane.b32.xlu1 %v5218_v27, %s5046_s29  ;;  %894 = vmatprep.subr.bf16.mxu1 %v859_v37 }
 0x151   : > { %v1992_v41 = vpop.permute.xlu0 %1991  ;;  %1702 = vmatprep.mubr.bf16.mxu0 %v5041_v29 }
 0x152   : > { %v5482_v42 = vpop.permute.xlu1 %1993 }
 0x153   : > { %1995 = vrot.lane.b32.xlu0 %v5329_v38, %s5044_s26  ;;  %v2023_v45 = vsel %vm2021_vm4, %v1992_v41, %v5482_v42 }
 0x154   : > { %2003 = vrot.lane.b32.xlu1 %v5340_v39, %s5044_s26  ;;  %2058 = vmatprep.subr.bf16.mxu0 %v2023_v45 }
 0x155   : > { %v826_v47 = vpop.permute.xlu0 %825 }
 0x156   : > { %v1990_v49 = vpop.permute.xlu1 %1989  ;;  %v858_v50 = vsel %vm857_vm3, %v826_v47, %v828_v35 }
 0x157   : > { %v2022_v51 = vsel %vm2021_vm4, %v1990_v49, %v1992_v41  ;;  %2011 = vrot.lane.b32.xlu0 %v5351_v40, %s5044_s26  ;;  %895 = vmatpush1.bf16.msra.mxu1 %v858_v50  ;;  %v4936_v41 = vld [vmem:[%s5133_s9 + $0x4] ss:$16 sps:$4 sm:$0xff]   ;;  %v5609_v49 = vld [vmem:[%s5127_s30 + $0x28] sm:$0xff]  }
 0x158   : > { %2019 = vrot.lane.b32.xlu1 %v5362_v43, %s5044_s26  ;;  %4115 = vmatmul.mubr.msk.bf16.vlgmr.msra.gmra.mrb[0].mxu0 %vm493_vm0, %v5491_v46 }
 0x159   : > { %2059 = vmatpush1.bf16.msra.mxu0 %v2022_v51  ;;  %v836_v52 = vpop.permute.xlu0 %835  ;;  %1712 = vmatprep.mubr.bf16.mxu0 %v5041_v29  ;;  %v4941_v51 = vld [vmem:[%s5133_s9 + $0x8] ss:$16 sps:$4 sm:$0xff]  }
 0x15a   : > { %v5502_v54 = vpop.permute.xlu1 %837 }
 0x15b   : > { %2383 = vrot.lane.b32.xlu0 %v5329_v38, %s5045_s27  ;;  %v862_v55 = vsel %vm857_vm3, %v836_v52, %v5502_v54 }
 0x15c   : > { %3155 = vrot.lane.b32.xlu1 %v5169_v17, %s5047_s13  ;;  %896 = vmatprep.subr.bf16.mxu1 %v862_v55 }
 0x15d   : > { %v2000_v56 = vpop.permute.xlu0 %1999 }
 0x15e   : > { %v5513_v59 = vpop.permute.xlu1 %2001 }
 0x15f   : > { %3157 = vrot.lane.b32.xlu0 %v5177_v19, %s5047_s13  ;;  %v2026_v60 = vsel %vm2021_vm4, %v2000_v56, %v5513_v59  ;;  %v5531_v19 = vld [vmem:[%s5127_s30 + $0x70] sm:$0xff]  }
 0x160   : > { %3153 = vrot.lane.b32.xlu1 %v5172_v18, %s5047_s13  ;;  %2060 = vmatprep.subr.bf16.mxu0 %v2026_v60 }
 0x161   : > { %v834_v61 = vpop.permute.xlu0 %833  ;;  %4116 = vmatmul.mubr.msk.bf16.gmra.mrb[4].mxu0 %vm493_vm0, %v5511_v57 }
 0x162   : > { %v1998_v17 = vpop.permute.xlu1 %1997  ;;  %v861_v63 = vsel %vm857_vm3, %v834_v61, %v836_v52  ;;  %1722 = vmatprep.mubr.bf16.mxu0 %v5041_v29  ;;  %v4940_v52 = vld [vmem:[%s5133_s9] ss:$16 sps:$4 sm:$0xff]  }
 0x163   : > { %v2025_v1 = vsel %vm2021_vm4, %v1998_v17, %v2000_v56  ;;  %2391 = vrot.lane.b32.xlu0 %v5340_v39, %s5045_s27  ;;  %897 = vmatpush1.bf16.msra.mxu1 %v861_v63  ;;  %v5619_v56 = vld [vmem:[%s5127_s30 + $0x88] sm:$0xff]  }
 0x164   : > { %3163 = vrot.lane.b32.xlu1 %v5183_v20, %s5047_s13  ;;  %2061 = vmatpush1.bf16.msra.mxu0 %v2025_v1  ;;  %v5636_v1 = vld [vmem:[%s5127_s30 + $0x30] sm:$0xff]  }
 0x165   : > { %v844_v18 = vpop.permute.xlu0 %843 }
 0x166   : > { %v5533_v2 = vpop.permute.xlu1 %845 }
 0x167   : > { %3165 = vrot.lane.b32.xlu0 %v5193_v22, %s5047_s13  ;;  %v865_v3 = vsel %vm857_vm3, %v844_v18, %v5533_v2 }
 0x168   : > { %3161 = vrot.lane.b32.xlu1 %v5187_v21, %s5047_s13  ;;  %898 = vmatprep.subr.bf16.mxu1 %v865_v3  ;;  %v4947_v3 = vld [vmem:[%s5133_s9 + $0x28] ss:$16 sps:$4 sm:$0xff]  }
 0x169   : > { %v2008_v4 = vpop.permute.xlu0 %2007  ;;  %4117 = vmatmul.mubr.msk.bf16.gmra.mrb[8].mxu0 %vm493_vm0, %v5531_v19 }
 0x16a   : > { %v5543_v20 = vpop.permute.xlu1 %2009  ;;  %1732 = vmatprep.mubr.bf16.mxu0 %v5041_v29 }
 0x16b   : > { %2399 = vrot.lane.b32.xlu0 %v5351_v40, %s5045_s27  ;;  %v2029_v22 = vsel %vm2021_vm4, %v2008_v4, %v5543_v20 }
 0x16c   : > { %3171 = vrot.lane.b32.xlu1 %v5196_v23, %s5047_s13  ;;  %2062 = vmatprep.subr.bf16.mxu0 %v2029_v22 }
 0x16d   : > { %v842_v21 = vpop.permute.xlu0 %841 }
 0x16e   : > { %v2006_v8 = vpop.permute.xlu1 %2005  ;;  %v864_v9 = vsel %vm857_vm3, %v842_v21, %v844_v18  ;;  %v5646_v21 = vld [vmem:[%s5127_s30 + $0x90] sm:$0xff]  }
 0x16f   : > { %v2028_v10 = vsel %vm2021_vm4, %v2006_v8, %v2008_v4  ;;  %3173 = vrot.lane.b32.xlu0 %v5208_v25, %s5047_s13  ;;  %899 = vmatpush1.bf16.msra.mxu1 %v864_v9  ;;  %v4946_v4 = vld [vmem:[%s5133_s9 + $0x20] ss:$16 sps:$4 sm:$0xff]  }
 0x170   : > { %3169 = vrot.lane.b32.xlu1 %v5203_v24, %s5047_s13  ;;  %2063 = vmatpush1.bf16.msra.mxu0 %v2028_v10 }
 0x171   : > { %v852_v12 = vpop.permute.xlu0 %851  ;;  %4118 = vmatmul.mubr.msk.bf16.gmra.mrb[12].mxu0 %vm493_vm0, %v5553_v7 }
 0x172   : > { %v5563_v23 = vpop.permute.xlu1 %853  ;;  %2090 = vmatprep.mubr.bf16.mxu0 %v5041_v29 }
 0x173   : > { %2407 = vrot.lane.b32.xlu0 %v5362_v43, %s5045_s27  ;;  %v868_v25 = vsel %vm857_vm3, %v852_v12, %v5563_v23 }
 0x174   : > { %3179 = vrot.lane.b32.xlu1 %v5211_v26, %s5047_s13  ;;  %900 = vmatprep.subr.bf16.mxu1 %v868_v25  ;;  %v5582_v26 = vld [vmem:[%s5127_s30 + $0x20] sm:$0xff]   ;;  %v4952_v25 = vld [vmem:[%s5127_s30 + $0x38] sm:$0xff]  }
 0x175   : > { %v2016_v24 = vpop.permute.xlu0 %2015 }
 0x176   : > { %v5572_v14 = vpop.permute.xlu1 %2017 }
 0x177   : > { %3181 = vrot.lane.b32.xlu0 %v5228_v30, %s5047_s13  ;;  %v2032_v15 = vsel %vm2021_vm4, %v2016_v24, %v5572_v14 }
 0x178   : > { %3177 = vrot.lane.b32.xlu1 %v5218_v27, %s5047_s13  ;;  %2064 = vmatprep.subr.bf16.mxu0 %v2032_v15  ;;  %v5590_v27 = vld [vmem:[%s5127_s30 + $0x80] sm:$0xff]   ;;  %v4954_v15 = vld [vmem:[%s5133_s9 + $0x48] ss:$16 sps:$4 sm:$0xff]  }
 0x179   : > { %v850_v16 = vpop.permute.xlu0 %849 }
 0x17a   : > { %v2014_v31 = vpop.permute.xlu1 %2013  ;;  %v867_v32 = vsel %vm857_vm3, %v850_v16, %v852_v12  ;;  %v4953_v16 = vld [vmem:[%s5133_s9 + $0x40] ss:$16 sps:$4 sm:$0xff]  }
 0x17b   : > { %v2031_v33 = vsel %vm2021_vm4, %v2014_v31, %v2016_v24  ;;  %2771 = vrot.lane.b32.xlu0 %v5329_v38, %s5046_s29  ;;  %901 = vmatpush1.bf16.msra.mxu1 %v867_v32  ;;  %v5671_v32 = vld [vmem:[%s5127_s30 + $0x98] sm:$0xff]  }
 0x17c   : > { %2779 = vrot.lane.b32.xlu1 %v5340_v39, %s5046_s29  ;;  %2065 = vmatpush1.bf16.msra.mxu0 %v2031_v33 }
 0x17d   : > { %v832_v30 = vpop.permute.xlu0 %831 }
 0x17e   : > { %v2380_v35 = vpop.permute.xlu1 %2379  ;;  %4043 = vmatmul.mubr.msk.bf16.vlgmr.msra.gmra.mrb[0].mxu1 %vm493_vm0, %v5582_v26  ;;  %v860_v37 = vsel %vm857_vm3, %v5471_v36, %v832_v30 }
 0x17f   : > { %2787 = vrot.lane.b32.xlu0 %v5351_v40, %s5046_s29  ;;  %4400 = vmatprep.subr.bf16.mxu1 %v860_v37 }
 0x180   : > { %2795 = vrot.lane.b32.xlu1 %v5362_v43, %s5046_s29  ;;  %4401 = vmatpush3.bf16.msra.mxu1 %v860_v37 }
 0x181   : > { %v5601_v45 = vpop.permute.xlu0 %2381  ;;  %4151 = vmatmul.mubr.msk.bf16.vlgmr.msra.gmra.mrb[0].mxu0 %vm493_vm0, %v5590_v27  ;;  %936 = vmatprep.mubr.bf16.mxu1 %v5041_v29 }
 0x182   : > { %v2378_v36 = vpop.permute.xlu1 %2377  ;;  %v2411_v47 = vsel %vm2409_vm5, %v2380_v35, %v5601_v45  ;;  %2100 = vmatprep.mubr.bf16.mxu0 %v5041_v29 }
 0x183   : > { %v2410_v50 = vsel %vm2409_vm5, %v2378_v36, %v2380_v35  ;;  %3159 = vrot.lane.b32.xlu0 %v5329_v38, %s5047_s13  ;;  %2446 = vmatprep.subr.bf16.mxu0 %v2411_v47  ;;  %v4943_v38 = vld [vmem:[%s5133_s9 + $0x24] ss:$16 sps:$4 sm:$0xff]   ;;  %v4960_v36 = vld [vmem:[%s5133_s9 + $0x68] ss:$16 sps:$4 sm:$0xff]  }
 0x184   : > { %3543 = vrot.lane.b32.xlu1 %v4936_v41, %s5048_s14  ;;  %2447 = vmatpush1.bf16.msra.mxu0 %v2410_v50 }
 0x185   : > { %v840_v55 = vpop.permute.xlu0 %839 }
 0x186   : > { %v2388_v60 = vpop.permute.xlu1 %2387  ;;  %4044 = vmatmul.mubr.msk.bf16.gmra.mrb[4].mxu1 %vm493_vm0, %v5609_v49  ;;  %v863_v61 = vsel %vm857_vm3, %v5502_v54, %v840_v55 }
 0x187   : > { %3545 = vrot.lane.b32.xlu0 %v4941_v51, %s5048_s14  ;;  %4402 = vmatprep.subr.bf16.mxu1 %v863_v61 }
 0x188   : > { %3541 = vrot.lane.b32.xlu1 %v4940_v52, %s5048_s14  ;;  %4403 = vmatpush3.bf16.msra.mxu1 %v863_v61  ;;  %v5699_v52 = vld [vmem:[%s5127_s30 + $0xa0] sm:$0xff]  }
 0x189   : > { %v5628_v17 = vpop.permute.xlu0 %2389  ;;  %946 = vmatprep.mubr.bf16.mxu1 %v5041_v29  ;;  %4152 = vmatmul.mubr.msk.bf16.gmra.mrb[4].mxu0 %vm493_vm0, %v5619_v56 }
 0x18a   : > { %v2386_v63 = vpop.permute.xlu1 %2385  ;;  %v2414_v54 = vsel %vm2409_vm5, %v2388_v60, %v5628_v17  ;;  %2110 = vmatprep.mubr.bf16.mxu0 %v5041_v29 }
 0x18b   : > { %v2413_v18 = vsel %vm2409_vm5, %v2386_v63, %v2388_v60  ;;  %3167 = vrot.lane.b32.xlu0 %v5340_v39, %s5047_s13  ;;  %2448 = vmatprep.subr.bf16.mxu0 %v2414_v54  ;;  %v4949_v39 = vld [vmem:[%s5133_s9 + $0x44] ss:$16 sps:$4 sm:$0xff]   ;;  %v4962_v60 = vld [vmem:[%s5133_s9 + $0x2c] ss:$16 sps:$4 sm:$0xff]  }
 0x18c   : > { %3551 = vrot.lane.b32.xlu1 %v4943_v38, %s5048_s14  ;;  %2449 = vmatpush1.bf16.msra.mxu0 %v2413_v18  ;;  %v4965_v38 = vld [vmem:[%s5133_s9 + $0x6c] ss:$16 sps:$4 sm:$0xff]  }
 0x18d   : > { %v848_v22 = vpop.permute.xlu0 %847 }
 0x18e   : > { %v2396_v8 = vpop.permute.xlu1 %2395  ;;  %4045 = vmatmul.mubr.msk.bf16.gmra.mrb[8].mxu1 %vm493_vm0, %v5636_v1  ;;  %v866_v9 = vsel %vm857_vm3, %v5533_v2, %v848_v22 }
 0x18f   : > { %3553 = vrot.lane.b32.xlu0 %v4947_v3, %s5048_s14  ;;  %4404 = vmatprep.subr.bf16.mxu1 %v866_v9 }
 0x190   : > { %3549 = vrot.lane.b32.xlu1 %v4946_v4, %s5048_s14  ;;  %4405 = vmatpush3.bf16.msra.mxu1 %v866_v9  ;;  %v5739_v9 = vld [vmem:[%s5127_s30 + $0xb0] sm:$0xff]  }
 0x191   : > { %v5655_v10 = vpop.permute.xlu0 %2397  ;;  %956 = vmatprep.mubr.bf16.mxu1 %v5041_v29  ;;  %4153 = vmatmul.mubr.msk.bf16.gmra.mrb[8].mxu0 %vm493_vm0, %v5646_v21 }
 0x192   : > { %v2394_v12 = vpop.permute.xlu1 %2393  ;;  %v2417_v2 = vsel %vm2409_vm5, %v2396_v8, %v5655_v10  ;;  %2120 = vmatprep.mubr.bf16.mxu0 %v5041_v29 }
 0x193   : > { %v2416_v24 = vsel %vm2409_vm5, %v2394_v12, %v2396_v8  ;;  %3175 = vrot.lane.b32.xlu0 %v5351_v40, %s5047_s13  ;;  %2450 = vmatprep.subr.bf16.mxu0 %v2417_v2  ;;  %v4956_v40 = vld [vmem:[%s5133_s9 + $0x64] ss:$16 sps:$4 sm:$0xff]  }
 0x194   : > { %3559 = vrot.lane.b32.xlu1 %v4949_v39, %s5048_s14  ;;  %2451 = vmatpush1.bf16.msra.mxu0 %v2416_v24  ;;  %v5758_v24 = vld [vmem:[%s5127_s30 + $0xb8] sm:$0xff]  }
 0x195   : > { %v856_v31 = vpop.permute.xlu0 %855 }
 0x196   : > { %v2404_v33 = vpop.permute.xlu1 %2403  ;;  %4046 = vmatmul.mubr.msk.bf16.gmra.mrb[12].mxu1 %vm493_vm0, %v4952_v25  ;;  %v869_v30 = vsel %vm857_vm3, %v5563_v23, %v856_v31 }
 0x197   : > { %3561 = vrot.lane.b32.xlu0 %v4954_v15, %s5048_s14  ;;  %4406 = vmatprep.subr.bf16.mxu1 %v869_v30 }
 0x198   : > { %3557 = vrot.lane.b32.xlu1 %v4953_v16, %s5048_s14  ;;  %4407 = vmatpush3.bf16.msra.mxu1 %v869_v30 }
 0x199   : > { %v5679_v35 = vpop.permute.xlu0 %2405  ;;  %4408 = vmatprep.mubr.msk.bf16.mxu1 %vm493_vm0, %v5582_v26  ;;  %4154 = vmatmul.mubr.msk.bf16.gmra.mrb[12].mxu0 %vm493_vm0, %v5671_v32  ;;  %v4959_v26 = vld [vmem:[%s5133_s9 + $0x60] ss:$16 sps:$4 sm:$0xff]  }
 0x19a   : > { %v2402_v37 = vpop.permute.xlu1 %2401  ;;  %v2420_v23 = vsel %vm2409_vm5, %v2404_v33, %v5679_v35  ;;  %2478 = vmatprep.mubr.bf16.mxu0 %v5041_v29 }
 0x19b   : > { %v2419_v41 = vsel %vm2409_vm5, %v2402_v37, %v2404_v33  ;;  %3183 = vrot.lane.b32.xlu0 %v5362_v43, %s5047_s13  ;;  %2452 = vmatprep.subr.bf16.mxu0 %v2420_v23  ;;  %v4963_v43 = vld [vmem:[%s5133_s9 + $0xc] ss:$16 sps:$4 sm:$0xff]  }
 0x19c   : > { %3567 = vrot.lane.b32.xlu1 %v4956_v40, %s5048_s14  ;;  %2453 = vmatpush1.bf16.msra.mxu0 %v2419_v41  ;;  %v5782_v41 = vld [vmem:[%s5127_s30 + $0xc0] sm:$0xff]  }
 0x19d   : > { %v1220_v47 = vpop.permute.xlu0 %1219 }
 0x19e   : > { %v1228_v50 = vpop.permute.xlu1 %1227  ;;  %v1248_v51 = vsel %vm1245_vm1, %v5366_v44, %v1220_v47  ;;  %4409 = vmatmul.mubr.msk.bf16.vlgmr.msra.gmra.mrb[16].mxu1 %vm493_vm0, %v5609_v49  ;;  %v4966_v49 = vld [vmem:[%s5133_s9 + $0x4c] ss:$16 sps:$4 sm:$0xff]  }
 0x19f   : > { %3569 = vrot.lane.b32.xlu0 %v4960_v36, %s5048_s14  ;;  %4416 = vmatprep.subr.bf16.mxu1 %v1248_v51  ;;  %v1251_v55 = vsel %vm1245_vm1, %v5375_v48, %v1228_v50 }
 0x1a0   : > { %3565 = vrot.lane.b32.xlu1 %v4959_v26, %s5048_s14  ;;  %4417 = vmatpush3.bf16.msra.mxu1 %v1248_v51 }
 0x1a1   : > { %v1236_v61 = vpop.permute.xlu0 %1235  ;;  %4418 = vmatprep.subr.bf16.mxu1 %v1251_v55  ;;  %4412 = vmatprep.mubr.msk.bf16.mxu1 %vm493_vm0, %v5636_v1  ;;  %v5720_v1 = vld [vmem:[%s5127_s30 + $0xa8] sm:$0xff]  }
 0x1a2   : > { %v1244_v44 = vpop.permute.xlu1 %1243  ;;  %4187 = vmatmul.mubr.msk.bf16.vlgmr.msra.gmra.mrb[0].mxu0 %vm493_vm0, %v5699_v52  ;;  %v1254_v48 = vsel %vm1245_vm1, %v5384_v53, %v1236_v61 }
 0x1a3   : > { %3547 = vrot.lane.b32.xlu0 %v4963_v43, %s5048_s14  ;;  %2488 = vmatprep.mubr.bf16.mxu0 %v5041_v29  ;;  %v1257_v53 = vsel %vm1245_vm1, %v5397_v58, %v1244_v44 }
 0x1a4   : > { %3555 = vrot.lane.b32.xlu1 %v4962_v60, %s5048_s14  ;;  %4419 = vmatpush3.bf16.msra.mxu1 %v1251_v55  ;;  %v5813_v60 = vld [vmem:[%s5127_s30 + $0xd0] sm:$0xff]  }
 0x1a5   : > { %v1608_v63 = vpop.permute.xlu0 %1607  ;;  %4420 = vmatprep.subr.bf16.mxu1 %v1254_v48 }
 0x1a6   : > { %v2768_v54 = vpop.permute.xlu1 %2767  ;;  %4413 = vmatmul.mubr.msk.bf16.gmra.mrb[20].mxu1 %vm493_vm0, %v4952_v25  ;;  %v1636_v58 = vsel %vm1633_vm2, %v5409_v0, %v1608_v63 }
 0x1a7   : > { %3563 = vrot.lane.b32.xlu0 %v4966_v49, %s5048_s14  ;;  %4424 = vmatprep.mubr.msk.bf16.mxu1 %vm493_vm0, %v5405_v62 }
 0x1a8   : > { %3571 = vrot.lane.b32.xlu1 %v4965_v38, %s5048_s14  ;;  %4421 = vmatpush3.bf16.msra.mxu1 %v1254_v48 }
 0x1a9   : > { %v5728_v18 = vpop.permute.xlu0 %2769  ;;  %4422 = vmatprep.subr.bf16.mxu1 %v1257_v53 }
 0x1aa   : > { %v2766_v3 = vpop.permute.xlu1 %2765  ;;  %v2799_v4 = vsel %vm2797_vm6, %v2768_v54, %v5728_v18  ;;  %4188 = vmatmul.mubr.msk.bf16.gmra.mrb[4].mxu0 %vm493_vm0, %v5720_v1 }
 0x1ab   : > { %v2798_v22 = vsel %vm2797_vm6, %v2766_v3, %v2768_v54  ;;  %2834 = vmatprep.subr.bf16.mxu0 %v2799_v4  ;;  %2498 = vmatprep.mubr.bf16.mxu0 %v5041_v29  ;;  %v5832_v54 = vld [vmem:[%s5127_s30 + $0xd8] sm:$0xff]  }
 0x1ac   : > { %4423 = vmatpush3.bf16.msra.mxu1 %v1257_v53  ;;  %2835 = vmatpush1.bf16.msra.mxu0 %v2798_v22 }
 0x1ad   : > { %v1616_v62 = vpop.permute.xlu0 %1615  ;;  %4432 = vmatprep.subr.bf16.mxu1 %v1636_v58 }
 0x1ae   : > { %v2776_v8 = vpop.permute.xlu1 %2775  ;;  %v1639_v39 = vsel %vm1633_vm2, %v5428_v6, %v1616_v62 }
 0x1af   : > { %4425 = vmatmul.mubr.msk.bf16.vlgmr.msra.gmra.mrb[16].mxu1 %vm493_vm0, %v5424_v5 }
 0x1b0   : > { %4433 = vmatpush3.bf16.msra.mxu1 %v1636_v58  ;;  %4428 = vmatprep.mubr.msk.bf16.mxu1 %vm493_vm0, %v5447_v13 }
 0x1b1   : > { %v5747_v12 = vpop.permute.xlu0 %2777  ;;  %4434 = vmatprep.subr.bf16.mxu1 %v1639_v39 }
 0x1b2   : > { %v2774_v0 = vpop.permute.xlu1 %2773  ;;  %v2802_v2 = vsel %vm2797_vm6, %v2776_v8, %v5747_v12  ;;  %4189 = vmatmul.mubr.msk.bf16.gmra.mrb[8].mxu0 %vm493_vm0, %v5739_v9 }
 0x1b3   : > { %v2801_v5 = vsel %vm2797_vm6, %v2774_v0, %v2776_v8  ;;  %2836 = vmatprep.subr.bf16.mxu0 %v2802_v2  ;;  %2508 = vmatprep.mubr.bf16.mxu0 %v5041_v29  ;;  %v5858_v0 = vld [vmem:[%s5127_s30 + $0xe0] sm:$0xff]  }
 0x1b4   : > { %4435 = vmatpush3.bf16.msra.mxu1 %v1639_v39  ;;  %2837 = vmatpush1.bf16.msra.mxu0 %v2801_v5 }
 0x1b5   : > { %v1624_v6 = vpop.permute.xlu0 %1623 }
 0x1b6   : > { %v2784_v25 = vpop.permute.xlu1 %2783  ;;  %v1642_v13 = vsel %vm1633_vm2, %v5440_v11, %v1624_v6 }
 0x1b7   : > { %4436 = vmatprep.subr.bf16.mxu1 %v1642_v13  ;;  %4429 = vmatmul.mubr.msk.bf16.gmra.mrb[20].mxu1 %vm493_vm0, %v5467_v34 }
 0x1b8   : > { %4437 = vmatpush3.bf16.msra.mxu1 %v1642_v13  ;;  %4440 = vmatprep.mubr.msk.bf16.mxu1 %vm493_vm0, %v5491_v46 }
 0x1b9   : > { %v5764_v15 = vpop.permute.xlu0 %2785 }
 0x1ba   : > { %v2782_v16 = vpop.permute.xlu1 %2781  ;;  %v2805_v31 = vsel %vm2797_vm6, %v2784_v25, %v5764_v15  ;;  %4190 = vmatmul.mubr.msk.bf16.gmra.mrb[12].mxu0 %vm493_vm0, %v5758_v24 }
 0x1bb   : > { %v2804_v11 = vsel %vm2797_vm6, %v2782_v16, %v2784_v25  ;;  %2838 = vmatprep.subr.bf16.mxu0 %v2805_v31  ;;  %2866 = vmatprep.mubr.bf16.mxu0 %v5041_v29 }
 0x1bc   : > { %2839 = vmatpush1.bf16.msra.mxu0 %v2804_v11 }
 0x1bd   : > { %v1632_v34 = vpop.permute.xlu0 %1631 }
 0x1be   : > { %v2792_v33 = vpop.permute.xlu1 %2791  ;;  %v1645_v46 = vsel %vm1633_vm2, %v5458_v28, %v1632_v34  ;;  %v4977_v34 = vld [vmem:[%s5127_s30 + $0xf0] sm:$0xff]  }
 0x1bf   : > { %4438 = vmatprep.subr.bf16.mxu1 %v1645_v46 }
 0x1c0   : > { %4439 = vmatpush3.bf16.msra.mxu1 %v1645_v46 }
 0x1c1   : > { %v5774_v30 = vpop.permute.xlu0 %2793 }
 0x1c2   : > { %v2790_v40 = vpop.permute.xlu1 %2789  ;;  %v2808_v37 = vsel %vm2797_vm6, %v2792_v33, %v5774_v30 }
 0x1c3   : > { %v2807_v23 = vsel %vm2797_vm6, %v2790_v40, %v2792_v33  ;;  %2840 = vmatprep.subr.bf16.mxu0 %v2808_v37  ;;  %4441 = vmatmul.mubr.msk.bf16.vlgmr.msra.gmra.mrb[16].mxu1 %vm493_vm0, %v5511_v57 }
 0x1c4   : > { %2841 = vmatpush1.bf16.msra.mxu0 %v2807_v23  ;;  %4444 = vmatprep.mubr.msk.bf16.mxu1 %vm493_vm0, %v5531_v19  ;;  %v5796_v19 = vld [vmem:[%s5127_s30 + $0xc8] sm:$0xff]  }
 0x1c5   : > { %v1996_v28 = vpop.permute.xlu0 %1995 }
 0x1c6   : > { %v2004_v36 = vpop.permute.xlu1 %2003  ;;  %v2024_v26 = vsel %vm2021_vm4, %v5482_v42, %v1996_v28 }
 0x1c7   : > { %4448 = vmatprep.subr.bf16.mxu1 %v2024_v26  ;;  %4223 = vmatmul.mubr.msk.bf16.vlgmr.msra.gmra.mrb[0].mxu0 %vm493_vm0, %v5782_v41  ;;  %v2027_v57 = vsel %vm2021_vm4, %v5513_v59, %v2004_v36  ;;  %v4978_v36 = vld [vmem:[%s5127_s30 + $0xf8] sm:$0xff]  }
 0x1c8   : > { %4449 = vmatpush3.bf16.msra.mxu1 %v2024_v26  ;;  %2876 = vmatprep.mubr.bf16.mxu0 %v5041_v29 }
 0x1c9   : > { %v2012_v47 = vpop.permute.xlu0 %2011  ;;  %4450 = vmatprep.subr.bf16.mxu1 %v2027_v57 }
 0x1ca   : > { %v2020_v50 = vpop.permute.xlu1 %2019  ;;  %v2030_v42 = vsel %vm2021_vm4, %v5543_v20, %v2012_v47 }
 0x1cb   : > { %4445 = vmatmul.mubr.msk.bf16.gmra.mrb[20].mxu1 %vm493_vm0, %v5553_v7  ;;  %v2033_v7 = vsel %vm2021_vm4, %v5572_v14, %v2020_v50 }
 0x1cc   : > { %4451 = vmatpush3.bf16.msra.mxu1 %v2027_v57  ;;  %4456 = vmatprep.mubr.msk.bf16.mxu1 %vm493_vm0, %v5590_v27 }
 0x1cd   : > { %v2384_v51 = vpop.permute.xlu0 %2383  ;;  %4452 = vmatprep.subr.bf16.mxu1 %v2030_v42 }
 0x1ce   : > { %v3156_v59 = vpop.permute.xlu1 %3155  ;;  %v2412_v61 = vsel %vm2409_vm5, %v5601_v45, %v2384_v51 }
 0x1cf   : > { %4224 = vmatmul.mubr.msk.bf16.gmra.mrb[4].mxu0 %vm493_vm0, %v5796_v19 }
 0x1d0   : > { %4453 = vmatpush3.bf16.msra.mxu1 %v2030_v42  ;;  %2886 = vmatprep.mubr.bf16.mxu0 %v5041_v29 }
 0x1d1   : > { %v5807_v43 = vpop.permute.xlu0 %3157  ;;  %4454 = vmatprep.subr.bf16.mxu1 %v2033_v7 }
 0x1d2   : > { %v3154_v20 = vpop.permute.xlu1 %3153  ;;  %v3187_v27 = vsel %vm3185_vm7, %v3156_v59, %v5807_v43 }
 0x1d3   : > { %v3186_v55 = vsel %vm3185_vm7, %v3154_v20, %v3156_v59  ;;  %3222 = vmatprep.subr.bf16.mxu0 %v3187_v27 }
 0x1d4   : > { %4455 = vmatpush3.bf16.msra.mxu1 %v2033_v7  ;;  %3223 = vmatpush1.bf16.msra.mxu0 %v3186_v55 }
 0x1d5   : > { %v2392_v14 = vpop.permute.xlu0 %2391  ;;  %4464 = vmatprep.subr.bf16.mxu1 %v2412_v61 }
 0x1d6   : > { %v3164_v44 = vpop.permute.xlu1 %3163  ;;  %v2415_v49 = vsel %vm2409_vm5, %v5628_v17, %v2392_v14 }
 0x1d7   : > { %4457 = vmatmul.mubr.msk.bf16.vlgmr.msra.gmra.mrb[16].mxu1 %vm493_vm0, %v5619_v56  ;;  %4225 = vmatmul.mubr.msk.bf16.gmra.mrb[8].mxu0 %vm493_vm0, %v5813_v60 }
 0x1d8   : > { %4465 = vmatpush3.bf16.msra.mxu1 %v2412_v61  ;;  %4460 = vmatprep.mubr.msk.bf16.mxu1 %vm493_vm0, %v5646_v21  ;;  %v4979_v61 = vld [vmem:[%s5127_s30 + $0x100] sm:$0xff]  }
 0x1d9   : > { %v5825_v48 = vpop.permute.xlu0 %3165  ;;  %4466 = vmatprep.subr.bf16.mxu1 %v2415_v49  ;;  %2896 = vmatprep.mubr.bf16.mxu0 %v5041_v29 }
 0x1da   : > { %v3162_v45 = vpop.permute.xlu1 %3161  ;;  %v3190_v38 = vsel %vm3185_vm7, %v3164_v44, %v5825_v48 }
 0x1db   : > { %v3189_v56 = vsel %vm3185_vm7, %v3162_v45, %v3164_v44  ;;  %3224 = vmatprep.subr.bf16.mxu0 %v3190_v38  ;;  %v4980_v38 = vld [vmem:[%s5127_s30 + $0x108] sm:$0xff]  }
 0x1dc   : > { %4467 = vmatpush3.bf16.msra.mxu1 %v2415_v49  ;;  %3225 = vmatpush1.bf16.msra.mxu0 %v3189_v56 }
 0x1dd   : > { %v2400_v63 = vpop.permute.xlu0 %2399 }
 0x1de   : > { %v3172_v17 = vpop.permute.xlu1 %3171  ;;  %v2418_v21 = vsel %vm2409_vm5, %v5655_v10, %v2400_v63 }
 0x1df   : > { %4468 = vmatprep.subr.bf16.mxu1 %v2418_v21  ;;  %4461 = vmatmul.mubr.msk.bf16.gmra.mrb[20].mxu1 %vm493_vm0, %v5671_v32 }
 0x1e0   : > { %4469 = vmatpush3.bf16.msra.mxu1 %v2418_v21  ;;  %4472 = vmatprep.mubr.msk.bf16.mxu1 %vm493_vm0, %v5699_v52  ;;  %v4982_v21 = vld [vmem:[%s5127_s30 + $0x118] sm:$0xff]  }
 0x1e1   : > { %v5840_v53 = vpop.permute.xlu0 %3173  ;;  %4226 = vmatmul.mubr.msk.bf16.gmra.mrb[12].mxu0 %vm493_vm0, %v5832_v54 }
 0x1e2   : > { %v3170_v3 = vpop.permute.xlu1 %3169  ;;  %v3193_v4 = vsel %vm3185_vm7, %v3172_v17, %v5840_v53  ;;  %3254 = vmatprep.mubr.bf16.mxu0 %v5041_v29 }
 0x1e3   : > { %v3192_v10 = vsel %vm3185_vm7, %v3170_v3, %v3172_v17  ;;  %3226 = vmatprep.subr.bf16.mxu0 %v3193_v4  ;;  %v4981_v17 = vld [vmem:[%s5127_s30 + $0x110] sm:$0xff]  }
 0x1e4   : > { %3227 = vmatpush1.bf16.msra.mxu0 %v3192_v10 }
 0x1e5   : > { %v2408_v32 = vpop.permute.xlu0 %2407 }
 0x1e6   : > { %v3180_v22 = vpop.permute.xlu1 %3179  ;;  %v2421_v52 = vsel %vm2409_vm5, %v5679_v35, %v2408_v32 }
 0x1e7   : > { %4470 = vmatprep.subr.bf16.mxu1 %v2421_v52 }
 0x1e8   : > { %4471 = vmatpush3.bf16.msra.mxu1 %v2421_v52 }
 0x1e9   : > { %v5850_v58 = vpop.permute.xlu0 %3181 }
 0x1ea   : > { %v3178_v62 = vpop.permute.xlu1 %3177  ;;  %v3196_v8 = vsel %vm3185_vm7, %v3180_v22, %v5850_v58 }
 0x1eb   : > { %v3195_v39 = vsel %vm3185_vm7, %v3178_v62, %v3180_v22  ;;  %3228 = vmatprep.subr.bf16.mxu0 %v3196_v8  ;;  %4473 = vmatmul.mubr.msk.bf16.vlgmr.msra.gmra.mrb[16].mxu1 %vm493_vm0, %v5720_v1 }
 0x1ec   : > { %3229 = vmatpush1.bf16.msra.mxu0 %v3195_v39  ;;  %4476 = vmatprep.mubr.msk.bf16.mxu1 %vm493_vm0, %v5739_v9  ;;  %v5872_v9 = vld [vmem:[%s5127_s30 + $0xe8] sm:$0xff]  }
 0x1ed   : > { %v2772_v35 = vpop.permute.xlu0 %2771 }
 0x1ee   : > { %v2780_v2 = vpop.permute.xlu1 %2779  ;;  %v2800_v5 = vsel %vm2797_vm6, %v5728_v18, %v2772_v35 }
 0x1ef   : > { %4480 = vmatprep.subr.bf16.mxu1 %v2800_v5  ;;  %4259 = vmatmul.mubr.msk.bf16.vlgmr.msra.gmra.mrb[0].mxu0 %vm493_vm0, %v5858_v0  ;;  %v2803_v1 = vsel %vm2797_vm6, %v5747_v12, %v2780_v2 }
 0x1f0   : > { %4481 = vmatpush3.bf16.msra.mxu1 %v2800_v5  ;;  %3264 = vmatprep.mubr.bf16.mxu0 %v5041_v29 }
 0x1f1   : > { %v2788_v6 = vpop.permute.xlu0 %2787  ;;  %4482 = vmatprep.subr.bf16.mxu1 %v2803_v1 }
 0x1f2   : > { %v2796_v25 = vpop.permute.xlu1 %2795  ;;  %v2806_v18 = vsel %vm2797_vm6, %v5764_v15, %v2788_v6  ;;  %v378_v6 = vld [vmem:[#allocation2 + $0x8] sm:$0xff] }
 0x1f3   : > { %4477 = vmatmul.mubr.msk.bf16.gmra.mrb[20].mxu1 %vm493_vm0, %v5758_v24  ;;  %v2809_v24 = vsel %vm2797_vm6, %v5774_v30, %v2796_v25  ;;  %v380_v25 = vld [vmem:[#allocation2 + $0x18] sm:$0xff] }
 0x1f4   : > { %4483 = vmatpush3.bf16.msra.mxu1 %v2803_v1  ;;  %4488 = vmatprep.mubr.msk.bf16.mxu1 %vm493_vm0, %v5782_v41  ;;  %v377_v1 = vld [vmem:[#allocation2] sm:$0xff] }
 0x1f5   : > { %v3160_v13 = vpop.permute.xlu0 %3159  ;;  %4484 = vmatprep.subr.bf16.mxu1 %v2806_v18 }
 0x1f6   : > { %v3544_v12 = vpop.permute.xlu1 %3543  ;;  %v3188_v33 = vsel %vm3185_vm7, %v5807_v43, %v3160_v13 }
 0x1f7   : > { %4260 = vmatmul.mubr.msk.bf16.gmra.mrb[4].mxu0 %vm493_vm0, %v5872_v9 }
 0x1f8   : > { %4485 = vmatpush3.bf16.msra.mxu1 %v2806_v18  ;;  %3274 = vmatprep.mubr.bf16.mxu0 %v5041_v29  ;;  %v381_v18 = vld [vmem:[#allocation2 + $0x20] sm:$0xff] }
 0x1f9   : > { %v3546_v16 = vpop.permute.xlu0 %3545  ;;  %4486 = vmatprep.subr.bf16.mxu1 %v2809_v24 }
 0x1fa   : > { %v3542_v15 = vpop.permute.xlu1 %3541  ;;  %v3575_v31 = vsel %vm3573_vm8, %v3544_v12, %v3546_v16 }
 0x1fb   : > { %v3574_v11 = vsel %vm3573_vm8, %v3542_v15, %v3544_v12  ;;  %3610 = vmatprep.subr.bf16.mxu0 %v3575_v31 }
 0x1fc   : > { %4487 = vmatpush3.bf16.msra.mxu1 %v2809_v24  ;;  %3611 = vmatpush1.bf16.msra.mxu0 %v3574_v11 }
 0x1fd   : > { %v3168_v46 = vpop.permute.xlu0 %3167  ;;  %4496 = vmatprep.subr.bf16.mxu1 %v3188_v33 }
 0x1fe   : > { %v3552_v30 = vpop.permute.xlu1 %3551  ;;  %v3191_v40 = vsel %vm3185_vm7, %v5825_v48, %v3168_v46 }
 0x1ff   : > { %4489 = vmatmul.mubr.msk.bf16.vlgmr.msra.gmra.mrb[16].mxu1 %vm493_vm0, %v5796_v19  ;;  %4261 = vmatmul.mubr.msk.bf16.gmra.mrb[8].mxu0 %vm493_vm0, %v4977_v34 }
 0x200   : > { %4497 = vmatpush3.bf16.msra.mxu1 %v3188_v33  ;;  %4492 = vmatprep.mubr.msk.bf16.mxu1 %vm493_vm0, %v5813_v60 }
 0x201   : > { %v3554_v37 = vpop.permute.xlu0 %3553  ;;  %4498 = vmatprep.subr.bf16.mxu1 %v3191_v40  ;;  %3284 = vmatprep.mubr.bf16.mxu0 %v5041_v29 }
 0x202   : > { %v3550_v23 = vpop.permute.xlu1 %3549  ;;  %v3578_v41 = vsel %vm3573_vm8, %v3552_v30, %v3554_v37 }
 0x203   : > { %v3577_v28 = vsel %vm3573_vm8, %v3550_v23, %v3552_v30  ;;  %3612 = vmatprep.subr.bf16.mxu0 %v3578_v41  ;;  %v383_v30 = vld [vmem:[#allocation2 + $0x30] sm:$0xff]  ;;  %v386_v23 = vld [vmem:[#allocation2 + $0x48] sm:$0xff] }
 0x204   : > { %4499 = vmatpush3.bf16.msra.mxu1 %v3191_v40  ;;  %3613 = vmatpush1.bf16.msra.mxu0 %v3577_v28  ;;  %v387_v28 = vld [vmem:[#allocation2 + $0x50] sm:$0xff] }
 0x205   : > { %v3176_v26 = vpop.permute.xlu0 %3175 }
 0x206   : > { %v3560_v57 = vpop.permute.xlu1 %3559  ;;  %v3194_v47 = vsel %vm3185_vm7, %v5840_v53, %v3176_v26 }
 0x207   : > { %4500 = vmatprep.subr.bf16.mxu1 %v3194_v47  ;;  %4493 = vmatmul.mubr.msk.bf16.gmra.mrb[20].mxu1 %vm493_vm0, %v5832_v54 }
 0x208   : > { %4501 = vmatpush3.bf16.msra.mxu1 %v3194_v47  ;;  %4262 = vmatmul.mubr.msk.bf16.gmra.mrb[12].mxu0 %vm493_vm0, %v4978_v36 }
 0x209   : > { %v3562_v50 = vpop.permute.xlu0 %3561  ;;  %4504 = vmatprep.mubr.msk.bf16.mxu1 %vm493_vm0, %v5858_v0  ;;  %3642 = vmatprep.mubr.bf16.mxu0 %v5041_v29 }
 0x20a   : > { %v3558_v19 = vpop.permute.xlu1 %3557  ;;  %v3581_v42 = vsel %vm3573_vm8, %v3560_v57, %v3562_v50 }
 0x20b   : > { %v3580_v51 = vsel %vm3573_vm8, %v3558_v19, %v3560_v57  ;;  %3614 = vmatprep.subr.bf16.mxu0 %v3581_v42 }
 0x20c   : > { %3615 = vmatpush1.bf16.msra.mxu0 %v3580_v51 }
 0x20d   : > { %v3184_v59 = vpop.permute.xlu0 %3183 }
 0x20e   : > { %v3568_v7 = vpop.permute.xlu1 %3567  ;;  %v3197_v43 = vsel %vm3185_vm7, %v5850_v58, %v3184_v59 }
 0x20f   : > { %4502 = vmatprep.subr.bf16.mxu1 %v3197_v43 }
 0x210   : > { %4503 = vmatpush3.bf16.msra.mxu1 %v3197_v43  ;;  %v389_v43 = vld [vmem:[#allocation2 + $0x60] sm:$0xff] }
 0x211   : > { %v3570_v20 = vpop.permute.xlu0 %3569 }
 0x212   : > { %v3566_v27 = vpop.permute.xlu1 %3565  ;;  %v3584_v55 = vsel %vm3573_vm8, %v3568_v7, %v3570_v20 }
 0x213   : > { %v3583_v60 = vsel %vm3573_vm8, %v3566_v27, %v3568_v7  ;;  %3616 = vmatprep.subr.bf16.mxu0 %v3584_v55  ;;  %4505 = vmatmul.mubr.msk.bf16.vlgmr.msra.gmra.mrb[16].mxu1 %vm493_vm0, %v5872_v9  ;;  %v390_v27 = vld [vmem:[#allocation2 + $0x68] sm:$0xff]  ;;  %v392_v55 = vld [vmem:[#allocation2 + $0x78] sm:$0xff] }
 0x214   : > { %3617 = vmatpush1.bf16.msra.mxu0 %v3583_v60  ;;  %4508 = vmatprep.mubr.msk.bf16.mxu1 %vm493_vm0, %v4977_v34  ;;  %v385_v60 = vld [vmem:[#allocation2 + $0x40] sm:$0xff] }
 0x215   : > { %v3548_v14 = vpop.permute.xlu0 %3547 }
 0x216   : > { %v3556_v44 = vpop.permute.xlu1 %3555  ;;  %v3576_v49 = vsel %vm3573_vm8, %v3546_v16, %v3548_v14  ;;  %v393_v14 = vld [vmem:[#allocation2 + $0x80] sm:$0xff] }
 0x217   : > { %4295 = vmatmul.mubr.msk.bf16.vlgmr.msra.gmra.mrb[0].mxu0 %vm493_vm0, %v4979_v61  ;;  %4512 = vmatprep.subr.bf16.mxu1 %v3576_v49  ;;  %v3579_v48 = vsel %vm3573_vm8, %v3554_v37, %v3556_v44  ;;  %v384_v37 = vld [vmem:[#allocation2 + $0x38] sm:$0xff]  ;;  %v379_v44 = vld [vmem:[#allocation2 + $0x10] sm:$0xff] }
 0x218   : > { %4513 = vmatpush3.bf16.msra.mxu1 %v3576_v49  ;;  %3652 = vmatprep.mubr.bf16.mxu0 %v5041_v29 }
 0x219   : > { %v3564_v45 = vpop.permute.xlu0 %3563  ;;  %4514 = vmatprep.subr.bf16.mxu1 %v3579_v48 }
 0x21a   : > { %v3582_v56 = vsel %vm3573_vm8, %v3562_v50, %v3564_v45  ;;  %v3572_v63 = vpop.permute.xlu1 %3571 }
 0x21b   : > { %4509 = vmatmul.mubr.msk.bf16.gmra.mrb[20].mxu1 %vm493_vm0, %v4978_v36  ;;  %v3585_v54 = vsel %vm3573_vm8, %v3570_v20, %v3572_v63 }
 0x21c   : > { %4515 = vmatpush3.bf16.msra.mxu1 %v3579_v48  ;;  %4520 = vmatprep.mubr.msk.bf16.mxu1 %vm493_vm0, %v4979_v61 }
 0x21d   : > { %4516 = vmatprep.subr.bf16.mxu1 %v3582_v56 }
 0x21f   : > { %4296 = vmatmul.mubr.msk.bf16.gmra.mrb[4].mxu0 %vm493_vm0, %v4980_v38 }
 0x220   : > { %4517 = vmatpush3.bf16.msra.mxu1 %v3582_v56  ;;  %3662 = vmatprep.mubr.bf16.mxu0 %v5041_v29 }
 0x221   : > { %4518 = vmatprep.subr.bf16.mxu1 %v3585_v54 }
 0x224   : > { %4519 = vmatpush3.bf16.msra.mxu1 %v3585_v54 }
 0x227   : > { %4297 = vmatmul.mubr.msk.bf16.gmra.mrb[8].mxu0 %vm493_vm0, %v4981_v17  ;;  %4521 = vmatmul.mubr.msk.bf16.vlgmr.msra.gmra.mrb[16].mxu1 %vm493_vm0, %v4980_v38  ;;  %v388_v38 = vld [vmem:[#allocation2 + $0x58] sm:$0xff] }
 0x228   : > { %3672 = vmatprep.mubr.bf16.mxu0 %v5041_v29  ;;  %4524 = vmatprep.mubr.msk.bf16.mxu1 %vm493_vm0, %v4981_v17 }
 0x22f   : > { %4298 = vmatmul.mubr.msk.bf16.gmra.mrb[12].mxu0 %vm493_vm0, %v4982_v21  ;;  %4525 = vmatmul.mubr.msk.bf16.gmra.mrb[20].mxu1 %vm493_vm0, %v4982_v21 }
 0x251   : > { %v928_v53 = vpop.f32.mrb[0].mxu1 }
 0x252   : > { %v930_v3 = vpop.f32.mrb[1].mxu1  ;;  %v4530_v9 = vadd.f32 %v928_v53, %v377_v1  ;;  %v382_v53 = vld [vmem:[#allocation2 + $0x28] sm:$0xff]  ;;  %v395_v1 = vld [vmem:[#allocation2 + $0x90] sm:$0xff] }
 0x253   : > { %v932_v4 = vpop.f32.mrb[2].mxu1  ;;  %v4536_v13 = vadd.f32 %v930_v3, %v378_v6 }
 0x254   : > { %v934_v10 = vpop.f32.mrb[3].mxu1  ;;  %v4542_v24 = vadd.f32 %v932_v4, %v380_v25  ;;  %v396_v25 = vld [vmem:[#allocation2 + $0x98] sm:$0xff] }
 0x255   : > { %v4548_v31 = vadd.f32 %v934_v10, %v381_v18 }
 0x259   : > { %v938_v32 = vpop.f32.mrb[4].mxu1 }
 0x25a   : > { %v940_v22 = vpop.f32.mrb[5].mxu1  ;;  %v4554_v41 = vadd.f32 %v938_v32, %v383_v30 }
 0x25b   : > { %v942_v52 = vpop.f32.mrb[6].mxu1  ;;  %v4560_v36 = vadd.f32 %v940_v22, %v384_v37 }
 0x25c   : > { %v944_v58 = vpop.f32.mrb[7].mxu1  ;;  %v4566_v57 = vadd.f32 %v942_v52, %v386_v23 }
 0x25d   : > { %v4572_v19 = vadd.f32 %v944_v58, %v387_v28 }
 0x261   : > { %v948_v62 = vpop.f32.mrb[8].mxu1 }
 0x262   : > { %v950_v8 = vpop.f32.mrb[9].mxu1  ;;  %v4578_v61 = vadd.f32 %v948_v62, %v389_v43 }
 0x263   : > { %v952_v39 = vpop.f32.mrb[10].mxu1  ;;  %v4584_v49 = vadd.f32 %v950_v8, %v390_v27 }
 0x264   : > { %v954_v0 = vpop.f32.mrb[11].mxu1  ;;  %v4590_v56 = vadd.f32 %v952_v39, %v392_v55 }
 0x265   : > { %v4596_v3 = vadd.f32 %v954_v0, %v393_v14  ;;  %v397_v0 = vld [vmem:[#allocation2 + $0xa0] sm:$0xff] }
 0x269   : > { %v5936_v29 = vpop.f32.mrb[12].mxu1 }
 0x26a   : > { %v5938_v35 = vpop.f32.mrb[13].mxu1  ;;  %v4602_v18 = vadd.f32 %v5936_v29, %v395_v1 }
 0x26b   : > { %v5940_v2 = vpop.f32.mrb[14].mxu1 }
 0x26c   : > { %v5942_v5 = vpop.f32.mrb[15].mxu1 }
 0x2ea   : > { %v3644_v12 = vpop.f32.mrb[0].mxu0 }
 0x2eb   : > { %v4533_v16 = vadd.f32 %v4530_v9, %v3644_v12  ;;  %v3646_v15 = vpop.f32.mrb[1].mxu0  ;;  %v398_v9 = vld [vmem:[#allocation2 + $0xa8] sm:$0xff]  ;;  %v391_v12 = vld [vmem:[#allocation2 + $0x70] sm:$0xff] }
 0x2ec   : > { %v4539_v11 = vadd.f32 %v4536_v13, %v3646_v15  ;;  %v3648_v34 = vpop.f32.mrb[2].mxu0  ;;  %v399_v13 = vld [vmem:[#allocation2 + $0xb0] sm:$0xff] }
 0x2ed   : > { %3772 = vst [vmem:[#allocation2] sm:$0xff] %v4533_v16  ;;  %v4545_v33 = vadd.f32 %v4542_v24, %v3648_v34  ;;  %v3650_v46 = vpop.f32.mrb[3].mxu0  ;;  %v4608_v24 = vadd.f32 %v5938_v35, %v396_v25  ;;  %v4620_v37 = vadd.f32 %v5942_v5, %v399_v13 }
 0x2ee   : > { %3773 = vst [vmem:[#allocation2 + $0x8] sm:$0xff] %v4539_v11  ;;  %v4551_v40 = vadd.f32 %v4548_v31, %v3650_v46  ;;  %v400_v31 = vld [vmem:[#allocation2 + $0xb8] sm:$0xff]  ;;  %v4614_v11 = vadd.f32 %v5940_v2, %v398_v9 }
 0x2ef   : > { %3775 = vst [vmem:[#allocation2 + $0x18] sm:$0xff] %v4545_v33 }
 0x2f0   : > { %3776 = vst [vmem:[#allocation2 + $0x20] sm:$0xff] %v4551_v40  ;;  %v394_v40 = vld [vmem:[#allocation2 + $0x88] sm:$0xff] }
 0x2f2   : > { %v3654_v26 = vpop.f32.mrb[4].mxu0 }
 0x2f3   : > { %v4557_v47 = vadd.f32 %v4554_v41, %v3654_v26  ;;  %v3656_v50 = vpop.f32.mrb[5].mxu0 }
 0x2f4   : > { %v4563_v42 = vadd.f32 %v4560_v36, %v3656_v50  ;;  %v3658_v51 = vpop.f32.mrb[6].mxu0 }
 0x2f5   : > { %3778 = vst [vmem:[#allocation2 + $0x30] sm:$0xff] %v4557_v47  ;;  %v4569_v59 = vadd.f32 %v4566_v57, %v3658_v51  ;;  %v3660_v7 = vpop.f32.mrb[7].mxu0 }
 0x2f6   : > { %3779 = vst [vmem:[#allocation2 + $0x38] sm:$0xff] %v4563_v42  ;;  %v4575_v20 = vadd.f32 %v4572_v19, %v3660_v7 }
 0x2f7   : > { %3781 = vst [vmem:[#allocation2 + $0x48] sm:$0xff] %v4569_v59 }
 0x2f8   : > { %3782 = vst [vmem:[#allocation2 + $0x50] sm:$0xff] %v4575_v20 }
 0x2fa   : > { %v3664_v48 = vpop.f32.mrb[8].mxu0  ;;  %v4522_v45 = vpop.f32.mrb[16].mxu1 }
 0x2fb   : > { %v4581_v63 = vadd.f32 %v4578_v61, %v3664_v48  ;;  %v4626_v54 = vadd.f32 %v4522_v45, %v385_v60  ;;  %v3666_v17 = vpop.f32.mrb[9].mxu0  ;;  %v3717_v21 = vpop.f32.mrb[17].mxu1 }
 0x2fc   : > { %v4587_v4 = vadd.f32 %v4584_v49, %v3666_v17  ;;  %v4629_v10 = vadd.f32 %v3717_v21, %v379_v44  ;;  %v3668_v32 = vpop.f32.mrb[10].mxu0  ;;  %v4523_v22 = vpop.f32.mrb[18].mxu1 }
 0x2fd   : > { %3784 = vst [vmem:[#allocation2 + $0x60] sm:$0xff] %v4581_v63  ;;  %3780 = vst [vmem:[#allocation2 + $0x40] sm:$0xff] %v4626_v54  ;;  %v4593_v52 = vadd.f32 %v4590_v56, %v3668_v32  ;;  %v4632_v58 = vadd.f32 %v4523_v22, %v388_v38  ;;  %v3670_v62 = vpop.f32.mrb[11].mxu0  ;;  %v3720_v8 = vpop.f32.mrb[19].mxu1 }
 0x2fe   : > { %3785 = vst [vmem:[#allocation2 + $0x68] sm:$0xff] %v4587_v4  ;;  %3774 = vst [vmem:[#allocation2 + $0x10] sm:$0xff] %v4629_v10  ;;  %v4599_v39 = vadd.f32 %v4596_v3, %v3670_v62  ;;  %v4635_v6 = vadd.f32 %v3720_v8, %v382_v53 }
 0x2ff   : > { %3787 = vst [vmem:[#allocation2 + $0x78] sm:$0xff] %v4593_v52  ;;  %3783 = vst [vmem:[#allocation2 + $0x58] sm:$0xff] %v4632_v58 }
 0x300   : > { %3788 = vst [vmem:[#allocation2 + $0x80] sm:$0xff] %v4599_v39  ;;  %3777 = vst [vmem:[#allocation2 + $0x28] sm:$0xff] %v4635_v6 }
 0x302   : > { %v3674_v16 = vpop.f32.mrb[12].mxu0  ;;  %v4526_v15 = vpop.f32.mrb[20].mxu1 }
 0x303   : > { %v4605_v34 = vadd.f32 %v4602_v18, %v3674_v16  ;;  %v4638_v33 = vadd.f32 %v4526_v15, %v397_v0  ;;  %v3676_v46 = vpop.f32.mrb[13].mxu0  ;;  %v3733_v30 = vpop.f32.mrb[21].mxu1 }
 0x304   : > { %v4611_v23 = vadd.f32 %v4608_v24, %v3676_v46  ;;  %v4641_v41 = vadd.f32 %v3733_v30, %v391_v12  ;;  %v3678_v28 = vpop.f32.mrb[14].mxu0  ;;  %v4527_v29 = vpop.f32.mrb[22].mxu1 }
 0x305   : > { %3790 = vst [vmem:[#allocation2 + $0x90] sm:$0xff] %v4605_v34  ;;  %3792 = vst [vmem:[#allocation2 + $0xa0] sm:$0xff] %v4638_v33  ;;  %v4617_v36 = vadd.f32 %v4614_v11, %v3678_v28  ;;  %v4644_v35 = vadd.f32 %v4527_v29, %v400_v31  ;;  %v3680_v26 = vpop.f32.mrb[15].mxu0  ;;  %v3736_v57 = vpop.f32.mrb[23].mxu1 }
 0x306   : > { %3791 = vst [vmem:[#allocation2 + $0x98] sm:$0xff] %v4611_v23  ;;  %3786 = vst [vmem:[#allocation2 + $0x70] sm:$0xff] %v4641_v41  ;;  %v4623_v2 = vadd.f32 %v4620_v37, %v3680_v26  ;;  %v4647_v47 = vadd.f32 %v3736_v57, %v394_v40 }
 0x307   : > { %3793 = vst [vmem:[#allocation2 + $0xa8] sm:$0xff] %v4617_v36  ;;  %3795 = vst [vmem:[#allocation2 + $0xb8] sm:$0xff] %v4644_v35 }
 0x308   : > { %3794 = vst [vmem:[#allocation2 + $0xb0] sm:$0xff] %v4623_v2  ;;  %3789 = vst [vmem:[#allocation2 + $0x88] sm:$0xff] %v4647_v47 }
 0x309 PF: > { %p4303_p2 = scmp.ne.s32.totalorder %s5013_s12, 12 }
 0x30a   : > { %v3800_v5 = vld [vmem:[#allocation2] sm:$0xff] (!%p4303_p2)  ;;  %v3801_v50 = vld [vmem:[#allocation2 + $0x8] sm:$0xff] (!%p4303_p2)  ;;  %v3802_v19 = vld [vmem:[#allocation2 + $0x10] sm:$0xff] (!%p4303_p2) }
 0x30b   : > { %3799 = sbr.rel (%p4303_p2) target bundleno = 791 (0x317), region = 44  ;;  %3824 = vst [vmem:[%s5139_s28] sm:$0xff] (!%p4303_p2), %v3800_v5  ;;  %3825 = vst [vmem:[%s5139_s28 + $0x8] sm:$0xff] (!%p4303_p2), %v3801_v50  ;;  %v3803_v42 = vld [vmem:[#allocation2 + $0x18] sm:$0xff] (!%p4303_p2)  ;;  %v3804_v51 = vld [vmem:[#allocation2 + $0x20] sm:$0xff] (!%p4303_p2) }
 0x30c   : > { %3826 = vst [vmem:[%s5139_s28 + $0x10] sm:$0xff] (!%p4303_p2), %v3802_v19  ;;  %v3805_v59 = vld [vmem:[#allocation2 + $0x28] sm:$0xff] (!%p4303_p2)  ;;  %3827 = vst [vmem:[%s5139_s28 + $0x18] sm:$0xff] (!%p4303_p2), %v3803_v42  ;;  %v3806_v7 = vld [vmem:[#allocation2 + $0x30] sm:$0xff] (!%p4303_p2) }
 0x30d   : > { %3828 = vst [vmem:[%s5139_s28 + $0x20] sm:$0xff] (!%p4303_p2), %v3804_v51  ;;  %3829 = vst [vmem:[%s5139_s28 + $0x28] sm:$0xff] (!%p4303_p2), %v3805_v59  ;;  %v3807_v43 = vld [vmem:[#allocation2 + $0x38] sm:$0xff] (!%p4303_p2)  ;;  %v3808_v20 = vld [vmem:[#allocation2 + $0x40] sm:$0xff] (!%p4303_p2) }
 0x30e   : > { %3830 = vst [vmem:[%s5139_s28 + $0x30] sm:$0xff] (!%p4303_p2), %v3806_v7  ;;  %3831 = vst [vmem:[%s5139_s28 + $0x38] sm:$0xff] (!%p4303_p2), %v3807_v43  ;;  %v3809_v27 = vld [vmem:[#allocation2 + $0x48] sm:$0xff] (!%p4303_p2)  ;;  %v3810_v55 = vld [vmem:[#allocation2 + $0x50] sm:$0xff] (!%p4303_p2) }
 0x30f   : > { %3832 = vst [vmem:[%s5139_s28 + $0x40] sm:$0xff] (!%p4303_p2), %v3808_v20  ;;  %v3811_v60 = vld [vmem:[#allocation2 + $0x58] sm:$0xff] (!%p4303_p2)  ;;  %3833 = vst [vmem:[%s5139_s28 + $0x48] sm:$0xff] (!%p4303_p2), %v3809_v27  ;;  %v3812_v61 = vld [vmem:[#allocation2 + $0x60] sm:$0xff] (!%p4303_p2) }
 0x310   : > { %3834 = vst [vmem:[%s5139_s28 + $0x50] sm:$0xff] (!%p4303_p2), %v3810_v55  ;;  %3835 = vst [vmem:[%s5139_s28 + $0x58] sm:$0xff] (!%p4303_p2), %v3811_v60  ;;  %v3813_v14 = vld [vmem:[#allocation2 + $0x68] sm:$0xff] (!%p4303_p2)  ;;  %v3814_v44 = vld [vmem:[#allocation2 + $0x70] sm:$0xff] (!%p4303_p2) }
 0x311   : > { %3836 = vst [vmem:[%s5139_s28 + $0x60] sm:$0xff] (!%p4303_p2), %v3812_v61  ;;  %3837 = vst [vmem:[%s5139_s28 + $0x68] sm:$0xff] (!%p4303_p2), %v3813_v14  ;;  %v3815_v49 = vld [vmem:[#allocation2 + $0x78] sm:$0xff] (!%p4303_p2)  ;;  %v3816_v48 = vld [vmem:[#allocation2 + $0x80] sm:$0xff] (!%p4303_p2) }
 0x312   : > { %3838 = vst [vmem:[%s5139_s28 + $0x70] sm:$0xff] %v3814_v44  ;;  %v3817_v45 = vld [vmem:[#allocation2 + $0x88] sm:$0xff]  ;;  %3839 = vst [vmem:[%s5139_s28 + $0x78] sm:$0xff] %v3815_v49  ;;  %v3818_v38 = vld [vmem:[#allocation2 + $0x90] sm:$0xff] }
 0x313   : > { %3840 = vst [vmem:[%s5139_s28 + $0x80] sm:$0xff] %v3816_v48  ;;  %3841 = vst [vmem:[%s5139_s28 + $0x88] sm:$0xff] %v3817_v45  ;;  %v3819_v56 = vld [vmem:[#allocation2 + $0x98] sm:$0xff]  ;;  %v3820_v63 = vld [vmem:[#allocation2 + $0xa0] sm:$0xff] }
 0x314   : > { %3842 = vst [vmem:[%s5139_s28 + $0x90] sm:$0xff] %v3818_v38  ;;  %3843 = vst [vmem:[%s5139_s28 + $0x98] sm:$0xff] %v3819_v56  ;;  %v3821_v54 = vld [vmem:[#allocation2 + $0xa8] sm:$0xff]  ;;  %v3822_v17 = vld [vmem:[#allocation2 + $0xb0] sm:$0xff] }
 0x315   : > { %3844 = vst [vmem:[%s5139_s28 + $0xa0] sm:$0xff] %v3820_v63  ;;  %v3823_v21 = vld [vmem:[#allocation2 + $0xb8] sm:$0xff]  ;;  %3845 = vst [vmem:[%s5139_s28 + $0xa8] sm:$0xff] %v3821_v54 }
 0x316   : > { %3846 = vst [vmem:[%s5139_s28 + $0xb0] sm:$0xff] %v3822_v17  ;;  %3847 = vst [vmem:[%s5139_s28 + $0xb8] sm:$0xff] %v3823_v21 }
 0x317 PF: > { %s13_s18 = sadd.s32 1, %s5037_s18   ;;  %s6000_s30 = sld [smem:[#allocation3_spill]] }
 0x318   : > { %p10_p3 = scmp.ge.s32.totalorder %s13_s18, 210   ;;  %s6001_s9 = sld [smem:[#allocation4_spill]] }
 0x319   : > { %s6002_s12 = smov %s5025_s15  ;;  %s6003_s13 = smov %s5029_s16 }
 0x31a   : > { %s6004_s14 = smov %s5033_s17  ;;  %s6005_s15 = smov %s6009_s19 }
 0x31b   :  { %12 = sbr.rel (!%p10_p3) target bundleno = 4 (0x4), region = 85 }
 0x31d   : > { %s6006_s16 = smov %s6000_s30 }
 0x31e   : > { %s6007_s17 = smov %s6001_s9 }

// kernel: a_call__.6
= control target key start
LH: loop header
LB: loop body
LE: loop exit
PB: predicated region body
PF: predicated region fallthrough
CT: control target
= control target key end

     0   :  { %s5069_s12 = smov 0   ;;  %s5071_s13 = smov 0   ;;  %s5994_s0 = inlined_call_operand.vmem [shape: bf16[2,8,64,512], index: 0, kind: input, shape index: {}]   ;;  %s5995_s1 = inlined_call_operand.vmem [shape: bf16[9,9,64,64], index: 1, kind: input, shape index: {}]   ;;  %s5996_s2 = inlined_call_operand.vmem [shape: f32[64,1], index: 2, kind: input, shape index: {}]   ;;  %s5997_s3 = inlined_call_operand.vmem [shape: f32[2,8,64,384], index: 3, kind: output, shape index: {}]  }
   0x1   :  { %s5073_s14 = smov 0   ;;  %s5075_s15 = smov 0  }
   0x2   :  { %s5077_s16 = smov 0   ;;  %s5079_s17 = smov 0  }
   0x3   :  { %s5081_s18 = smov 0  }
   0x4 LB: > { %s25_s19 = sadd.s32 1, %s5025_s15  ;;  %s28_s20 = sadd.s32 1, %s5029_s16  ;;  %s5037_s18 = sphi %s5081_s18, %s13_s18   ;;  %s5033_s17 = sphi %s5079_s17, %s6007_s17   ;;  %s5029_s16 = sphi %s5077_s16, %s6006_s16   ;;  %s5025_s15 = sphi %s5075_s15, %s6005_s15   ;;  %s5021_s14 = sphi %s5073_s14, %s6004_s14   ;;  %s5017_s13 = sphi %s5071_s13, %s6003_s13   ;;  %s5013_s12 = sphi %s5069_s12, %s6002_s12  }
   0x5   : > { %p26_p0 = scmp.ge.s32.totalorder %s25_s19, 9  ;;  %p3977_p1 = scmp.ge.s32.totalorder %s5037_s18, 1 }
   0x6   : > { %p198_p2 = scmp.lt.s32.totalorder %s5037_s18, 145  ;;  %s32_s21 = sadd.s32 1, %s5033_s17 }
   0x7   : > { %s6009_s19 = smov (%p26_p0, %s25_s19), 0  ;;  %s6011_s20 = smov (!%p26_p0, %s28_s20), %s5029_s16 }
   0x8   : > { %p199_p3 = pnand %p3977_p1, %p198_p2  ;;  %p30_p4 = scmp.ge.s32.totalorder %s6011_s20, 2 }
   0x9   : > { %s241_s22 = sadd.s32 (!%p199_p3), %s5013_s12, %s5021_s14  ;;  %p247_p6 = scmp.lt.s32.totalorder (!%p199_p3), %s5017_s13, 1 }
   0xa   : > { %s6013_s20 = smov (%p30_p4, %s6011_s20), 0  ;;  %s6015_s21 = smov (!%p30_p4, %s32_s21), %s5033_s17 }
   0xb   : > { %5998 = sst [smem:[#allocation3_spill]] %s6013_s20  ;;  %p34_p5 = scmp.ge.s32.totalorder %s6015_s21, 8 }
   0xc   : > { %202 = sbr.rel (%p199_p3) target bundleno = 791 (0x317), region = 32  ;;  %s5117_s23 = sadd.s32 (!%p199_p3), 4294967292, %s241_s22 }
   0xd   : > { %s6017_s21 = smov (%p34_p5, %s6015_s21), 0  ;;  %p243_p7 = scmp.gt.s32.totalorder (!%p199_p3), %s5117_s23, 0 }
   0xe   : > { %5999 = sst [smem:[#allocation4_spill]] %s6017_s21  ;;  %p3979_p8 = scmp.lt.s32.totalorder (!%p199_p3), %s5117_s23, 7 }
   0xf   : > { %p262_p9 = scmp.lt.s32.totalorder (!%p199_p3), %s5013_s12, 8  ;;  %p269_p11 = scmp.lt.s32.totalorder (!%p199_p3), %s5021_s14, 7 }
  0x10   : > { %p3989_p12 = scmp.ne.s32.totalorder (!%p199_p3), %s5013_s12, 0 }
  0x13   : > { %s244_s24 = scalar_select %p243_p7, %s5117_s23, 0 }
  0x14   : > { %s6019_s13 = smov (!%p247_p6, %s5017_s13), 1  ;;  %s6025_s14 = smov (!%p269_p11, %s5021_s14), 7 }
  0x15   : > { %s6021_s24 = smov (!%p3979_p8, %s244_s24), 7  ;;  %s3985_s26 = sshll.u32 %s6019_s13, 8  ;;  %v283_v0 = vld [vmem:[%s5996_s2 + $0x10] sm:$0xff] (!%p3989_p12)  ;;  %v281_v1 = vld [vmem:[%s5996_s2] sm:$0xff] (!%p3989_p12)  ;;  %v5039_v2 = vmov (!%p3989_p12), 0   ;;  %v284_v3 = vld [vmem:[%s5996_s2 + $0x18] sm:$0xff] (!%p3989_p12) }
  0x16   : > { %s263_s25 = scalar_select %p262_p9, %s5013_s12, 8 }
  0x17   : > { %p249_p10 = scmp.lt.s32.totalorder %s6021_s24, 7  ;;  %s4826_s10 = smul.u32 192, %s6019_s13  ;;  %4894 = vset.pattern.permute.xlu1 (!%p3989_p12), %v5039_v2  ;;  %4893 = vset.pattern.permute.xlu0 (!%p3989_p12), %v5039_v2  ;;  %v282_v4 = vld [vmem:[%s5996_s2 + $0x8] sm:$0xff] (!%p3989_p12)  ;;  %v285_v6 = vld [vmem:[%s5996_s2 + $0x20] sm:$0xff] (!%p3989_p12)  ;;  %v288_v7 = vld [vmem:[%s5996_s2 + $0x38] sm:$0xff] (!%p3989_p12) }
  0x18   : > { %s4824_s27 = smul.u32 288, %s263_s25  ;;  %301 = vperm.xlu1 (!%p3989_p12), %4894, %v283_v0   ;;  %291 = vperm.xlu0 (!%p3989_p12), %4893, %v281_v1   ;;  %v286_v5 = vld [vmem:[%s5996_s2 + $0x28] sm:$0xff] (!%p3989_p12)  ;;  %v287_v8 = vld [vmem:[%s5996_s2 + $0x30] sm:$0xff] (!%p3989_p12) }
  0x19   : > { %s6023_s24 = smov (!%p249_p10, %s6021_s24), 7  ;;  %s4825_s11 = smul.u32 24, %s6025_s14 }
  0x1a   : > { %s5127_s30 = scalar_lea.vmem %s5995_s1, %s4824_s27  ;;  %s3984_s4 = sshll.u32 %s6023_s24, 5 }
  0x1b   : > { %s253_s5 = sadd.s32 %s3985_s26, %s3984_s4  ;;  %s273_s22 = sadd.s32 %s4826_s10, %s4825_s11 }
  0x1c   : > { %s3986_s6 = sshll.u32 %s253_s5, 2  ;;  %s3988_s25 = sshll.u32 %s273_s22, 3  ;;  %306 = vperm.xlu1 (!%p3989_p12), %4894, %v284_v3   ;;  %296 = vperm.xlu0 (!%p3989_p12), %4893, %v282_v4  }
  0x1d   : > { %s5133_s9 = scalar_lea.vmem %s5994_s0, %s3986_s6  ;;  %s5139_s28 = scalar_lea.vmem %s5997_s3, %s3988_s25 }
  0x1e   : > { %280 = sbr.rel (%p3989_p12) target bundleno = 167 (0xa7), region = 36 }
  0x20   : > { %316 = vperm.xlu1 (!%p3989_p12), %4894, %v286_v5   ;;  %311 = vperm.xlu0 (!%p3989_p12), %4893, %v285_v6  }
  0x24   : > { %326 = vperm.xlu1 (!%p3989_p12), %4894, %v288_v7   ;;  %321 = vperm.xlu0 (!%p3989_p12), %4893, %v287_v8  }
  0x97   : > { %v302_v9 = vpop.permute.xlu1 %301  ;;  %v292_v10 = vpop.permute.xlu0 %291 }
  0x98   : > { %335 = vst [vmem:[#allocation2 + $0x30] sm:$0xff] %v302_v9  ;;  %336 = vst [vmem:[#allocation2 + $0x38] sm:$0xff] %v302_v9 }
  0x99   : > { %337 = vst [vmem:[#allocation2 + $0x40] sm:$0xff] %v302_v9  ;;  %329 = vst [vmem:[#allocation2] sm:$0xff] %v292_v10 }
  0x9a   : > { %330 = vst [vmem:[#allocation2 + $0x8] sm:$0xff] %v292_v10  ;;  %331 = vst [vmem:[#allocation2 + $0x10] sm:$0xff] %v292_v10 }
  0x9b   : > { %v307_v11 = vpop.permute.xlu1 %306  ;;  %v297_v12 = vpop.permute.xlu0 %296 }
  0x9c   : > { %338 = vst [vmem:[#allocation2 + $0x48] sm:$0xff] %v307_v11  ;;  %339 = vst [vmem:[#allocation2 + $0x50] sm:$0xff] %v307_v11 }
  0x9d   : > { %340 = vst [vmem:[#allocation2 + $0x58] sm:$0xff] %v307_v11  ;;  %332 = vst [vmem:[#allocation2 + $0x18] sm:$0xff] %v297_v12 }
  0x9e   : > { %333 = vst [vmem:[#allocation2 + $0x20] sm:$0xff] %v297_v12  ;;  %334 = vst [vmem:[#allocation2 + $0x28] sm:$0xff] %v297_v12 }
  0x9f   : > { %v317_v13 = vpop.permute.xlu1 %316  ;;  %v312_v14 = vpop.permute.xlu0 %311 }
  0xa0   : > { %344 = vst [vmem:[#allocation2 + $0x78] sm:$0xff] %v317_v13  ;;  %345 = vst [vmem:[#allocation2 + $0x80] sm:$0xff] %v317_v13 }
  0xa1   : > { %346 = vst [vmem:[#allocation2 + $0x88] sm:$0xff] %v317_v13  ;;  %341 = vst [vmem:[#allocation2 + $0x60] sm:$0xff] %v312_v14 }
  0xa2   : > { %342 = vst [vmem:[#allocation2 + $0x68] sm:$0xff] %v312_v14  ;;  %343 = vst [vmem:[#allocation2 + $0x70] sm:$0xff] %v312_v14 }
  0xa3   : > { %v327_v15 = vpop.permute.xlu1 %326  ;;  %v322_v16 = vpop.permute.xlu0 %321 }
  0xa4   : > { %350 = vst [vmem:[#allocation2 + $0xa8] sm:$0xff] %v327_v15  ;;  %351 = vst [vmem:[#allocation2 + $0xb0] sm:$0xff] %v327_v15 }
  0xa5   : > { %352 = vst [vmem:[#allocation2 + $0xb8] sm:$0xff] %v327_v15  ;;  %347 = vst [vmem:[#allocation2 + $0x90] sm:$0xff] %v322_v16 }
  0xa6   : > { %348 = vst [vmem:[#allocation2 + $0x98] sm:$0xff] %v322_v16  ;;  %349 = vst [vmem:[#allocation2 + $0xa0] sm:$0xff] %v322_v16 }
  0xa7 PF: > { %p355_p13 = scmp.ge.s32.totalorder %s5117_s23, 0  ;;  %p356_p0 = scmp.lt.s32.totalorder %s5117_s23, 8 }
  0xa9   : > { %p357_p1 = pnand %p356_p0, %p355_p13 }
  0xaa   : > { %v5169_v17 = vld [vmem:[%s5133_s9 + $0x4] ss:$16 sps:$4 sm:$0xff] (!%p357_p1)   ;;  %v5172_v18 = vld [vmem:[%s5133_s9] ss:$16 sps:$4 sm:$0xff] (!%p357_p1)   ;;  %s5040_s25 = smov (!%p357_p1), 126   ;;  %v5041_v29 = vmov (!%p357_p1), 0  }
  0xab   : > { %360 = sbr.rel (%p357_p1) target bundleno = 777 (0x309), region = 40  ;;  %1215 = vrot.lane.b32.xlu0 (!%p357_p1), %v5169_v17, %s5040_s25  ;;  %v5177_v19 = vld [vmem:[%s5133_s9 + $0x8] ss:$16 sps:$4 sm:$0xff] (!%p357_p1)   ;;  %506 = vmatprep.subr.bf16.mxu1 (!%p357_p1), %v5169_v17  ;;  %v5183_v20 = vld [vmem:[%s5133_s9 + $0x24] ss:$16 sps:$4 sm:$0xff] (!%p357_p1)   ;;  %vm493_vm0 = vcmask (!%p357_p1), 523264  }
  0xac   : > { %1213 = vrot.lane.b32.xlu1 (!%p357_p1), %v5172_v18, %s5040_s25  ;;  %507 = vmatpush1.bf16.msra.mxu1 (!%p357_p1), %v5172_v18  ;;  %v5187_v21 = vld [vmem:[%s5133_s9 + $0x20] ss:$16 sps:$4 sm:$0xff] (!%p357_p1)   ;;  %v5193_v22 = vld [vmem:[%s5133_s9 + $0x28] ss:$16 sps:$4 sm:$0xff] (!%p357_p1)   ;;  %v5196_v23 = vld [vmem:[%s5133_s9 + $0x44] ss:$16 sps:$4 sm:$0xff] (!%p357_p1)  }
  0xad   : > { %508 = vmatprep.subr.bf16.mxu1 (!%p357_p1), %v5183_v20  ;;  %v5203_v24 = vld [vmem:[%s5133_s9 + $0x40] ss:$16 sps:$4 sm:$0xff] (!%p357_p1)   ;;  %v5208_v25 = vld [vmem:[%s5133_s9 + $0x48] ss:$16 sps:$4 sm:$0xff] (!%p357_p1)   ;;  %v5211_v26 = vld [vmem:[%s5133_s9 + $0x64] ss:$16 sps:$4 sm:$0xff] (!%p357_p1)   ;;  %538 = vmatprep.mubr.bf16.mxu1 (!%p357_p1), %v5041_v29 }
  0xae   : > { %v5218_v27 = vld [vmem:[%s5133_s9 + $0x60] ss:$16 sps:$4 sm:$0xff] (!%p357_p1)   ;;  %v5228_v30 = vld [vmem:[%s5133_s9 + $0x68] ss:$16 sps:$4 sm:$0xff] (!%p357_p1)   ;;  %1314 = vmatprep.mubr.bf16.mxu0 (!%p357_p1), %v5041_v29  ;;  %s5042_s23 = smov (!%p357_p1), 110   ;;  %s5043_s24 = smov (!%p357_p1), 127  }
  0xaf   : > { %1217 = vrot.lane.b32.xlu0 (!%p357_p1), %v5177_v19, %s5040_s25  ;;  %v4919_v28 = vld [vmem:[%s5127_s30] sm:$0xff] (!%p357_p1)   ;;  %v4921_v31 = vld [vmem:[%s5127_s30 + $0x8] sm:$0xff] (!%p357_p1)   ;;  %v4925_v34 = vld [vmem:[%s5127_s30 + $0x10] sm:$0xff] (!%p357_p1)   ;;  %s5044_s26 = smov (!%p357_p1), 109   ;;  %s5045_s27 = smov (!%p357_p1), 108   ;;  %vm1245_vm1 = vcmask (!%p357_p1), 1031168  }
  0xb0   : > { %1223 = vrot.lane.b32.xlu1 (!%p357_p1), %v5183_v20, %s5040_s25  ;;  %509 = vmatpush1.bf16.msra.mxu1 (!%p357_p1), %v5187_v21  ;;  %v4923_v32 = vld [vmem:[%s5133_s9 + $0x8] ss:$16 sps:$4 sm:$0xff] (!%p357_p1)   ;;  %v5329_v38 = vld [vmem:[%s5133_s9 + $0xc] ss:$16 sps:$4 sm:$0xff] (!%p357_p1)   ;;  %v5405_v62 = vld [vmem:[%s5127_s30 + $0x40] sm:$0xff] (!%p357_p1)   ;;  %s5046_s29 = smov (!%p357_p1), 92  }
  0xb1   : > { %510 = vmatprep.subr.bf16.mxu1 (!%p357_p1), %v5196_v23  ;;  %v4924_v33 = vld [vmem:[%s5133_s9 + $0x28] ss:$16 sps:$4 sm:$0xff] (!%p357_p1)   ;;  %v5340_v39 = vld [vmem:[%s5133_s9 + $0x2c] ss:$16 sps:$4 sm:$0xff] (!%p357_p1)   ;;  %vm1633_vm2 = vcmask (!%p357_p1), 900096   ;;  %v5447_v13 = vld [vmem:[%s5127_s30 + $0x50] sm:$0xff] (!%p357_p1)  }
  0xb2   : > { %v4927_v35 = vld [vmem:[%s5133_s9 + $0x48] ss:$16 sps:$4 sm:$0xff]   ;;  %v5351_v40 = vld [vmem:[%s5133_s9 + $0x4c] ss:$16 sps:$4 sm:$0xff]   ;;  %vm857_vm3 = vcmask 1039360   ;;  %vm2021_vm4 = vcmask 891904  }
  0xb3   : > { %1225 = vrot.lane.b32.xlu0 %v5193_v22, %s5040_s25  ;;  %v4928_v36 = vld [vmem:[%s5133_s9 + $0x68] ss:$16 sps:$4 sm:$0xff]   ;;  %v5362_v43 = vld [vmem:[%s5133_s9 + $0x6c] ss:$16 sps:$4 sm:$0xff]   ;;  %s5047_s13 = smov 91   ;;  %vm2409_vm5 = vcmask 883712  }
  0xb4   : > { %1221 = vrot.lane.b32.xlu1 %v5187_v21, %s5040_s25  ;;  %511 = vmatpush1.bf16.msra.mxu1 %v5203_v24  ;;  %v4929_v37 = vld [vmem:[%s5127_s30 + $0x18] sm:$0xff]   ;;  %v5424_v5 = vld [vmem:[%s5127_s30 + $0x48] sm:$0xff]   ;;  %s5048_s14 = smov 90   ;;  %vm2797_vm6 = vcmask 752640   ;;  %vm3185_vm7 = vcmask 744448   ;;  %vm3573_vm8 = vcmask 736256  }
  0xb5   : > { %512 = vmatprep.subr.bf16.mxu1 %v5211_v26 }
  0xb7   : > { %1231 = vrot.lane.b32.xlu0 %v5196_v23, %s5040_s25 }
  0xb8   : > { %1233 = vrot.lane.b32.xlu1 %v5208_v25, %s5040_s25  ;;  %513 = vmatpush1.bf16.msra.mxu1 %v5218_v27 }
  0xb9   : > { %4384 = vmatprep.subr.bf16.mxu1 %v4923_v32 }
  0xbb   : > { %1229 = vrot.lane.b32.xlu0 %v5203_v24, %s5040_s25  ;;  %4007 = vmatmul.mubr.msk.bf16.vlgmr.msra.gmra.mrb[0].mxu1 %vm493_vm0, %v4919_v28 }
  0xbc   : > { %1239 = vrot.lane.b32.xlu1 %v5211_v26, %s5040_s25  ;;  %548 = vmatprep.mubr.bf16.mxu1 %v5041_v29 }
  0xbd   : > { %4385 = vmatpush3.bf16.msra.mxu1 %v4923_v32 }
  0xbe   : > { %4386 = vmatprep.subr.bf16.mxu1 %v4924_v33 }
  0xbf   : > { %1241 = vrot.lane.b32.xlu0 %v5228_v30, %s5040_s25 }
  0xc0   : > { %1237 = vrot.lane.b32.xlu1 %v5218_v27, %s5040_s25 }
  0xc1   : > { %4387 = vmatpush3.bf16.msra.mxu1 %v4924_v33 }
  0xc2   : > { %4388 = vmatprep.subr.bf16.mxu1 %v4927_v35 }
  0xc3   : > { %1603 = vrot.lane.b32.xlu0 %v5169_v17, %s5042_s23  ;;  %4008 = vmatmul.mubr.msk.bf16.gmra.mrb[4].mxu1 %vm493_vm0, %v4921_v31 }
  0xc4   : > { %1605 = vrot.lane.b32.xlu1 %v5177_v19, %s5042_s23  ;;  %558 = vmatprep.mubr.bf16.mxu1 %v5041_v29 }
  0xc5   : > { %4389 = vmatpush3.bf16.msra.mxu1 %v4927_v35 }
  0xc6   : > { %4390 = vmatprep.subr.bf16.mxu1 %v4928_v36 }
  0xc7   : > { %1601 = vrot.lane.b32.xlu0 %v5172_v18, %s5042_s23 }
  0xc8   : > { %1611 = vrot.lane.b32.xlu1 %v5183_v20, %s5042_s23 }
  0xc9   : > { %4391 = vmatpush3.bf16.msra.mxu1 %v4928_v36 }
  0xcb   : > { %1613 = vrot.lane.b32.xlu0 %v5193_v22, %s5042_s23  ;;  %4009 = vmatmul.mubr.msk.bf16.gmra.mrb[8].mxu1 %vm493_vm0, %v4925_v34 }
  0xcc   : > { %1609 = vrot.lane.b32.xlu1 %v5187_v21, %s5042_s23  ;;  %568 = vmatprep.mubr.bf16.mxu1 %v5041_v29 }
  0xcf   : > { %1619 = vrot.lane.b32.xlu0 %v5196_v23, %s5042_s23 }
  0xd0   : > { %1621 = vrot.lane.b32.xlu1 %v5208_v25, %s5042_s23 }
  0xd3   : > { %1617 = vrot.lane.b32.xlu0 %v5203_v24, %s5042_s23  ;;  %4010 = vmatmul.mubr.msk.bf16.gmra.mrb[12].mxu1 %vm493_vm0, %v4929_v37 }
  0xd4   : > { %1627 = vrot.lane.b32.xlu1 %v5211_v26, %s5042_s23  ;;  %4392 = vmatprep.mubr.msk.bf16.mxu1 %vm493_vm0, %v4919_v28 }
  0xd7   : > { %1629 = vrot.lane.b32.xlu0 %v5228_v30, %s5042_s23 }
  0xd8   : > { %1625 = vrot.lane.b32.xlu1 %v5218_v27, %s5042_s23 }
  0xdb   : > { %827 = vrot.lane.b32.xlu0 %v5169_v17, %s5043_s24  ;;  %4393 = vmatmul.mubr.msk.bf16.vlgmr.msra.gmra.mrb[16].mxu1 %vm493_vm0, %v4921_v31 }
  0xdc   : > { %829 = vrot.lane.b32.xlu1 %v5177_v19, %s5043_s24  ;;  %4396 = vmatprep.mubr.msk.bf16.mxu1 %vm493_vm0, %v4925_v34  ;;  %v5467_v34 = vld [vmem:[%s5127_s30 + $0x58] sm:$0xff]  }
  0xdf   : > { %1991 = vrot.lane.b32.xlu0 %v5169_v17, %s5044_s26 }
  0xe0   : > { %1993 = vrot.lane.b32.xlu1 %v5177_v19, %s5044_s26 }
  0xe3   : > { %825 = vrot.lane.b32.xlu0 %v5172_v18, %s5043_s24  ;;  %4397 = vmatmul.mubr.msk.bf16.gmra.mrb[20].mxu1 %vm493_vm0, %v4929_v37 }
  0xe4   : > { %1989 = vrot.lane.b32.xlu1 %v5172_v18, %s5044_s26  ;;  %926 = vmatprep.mubr.bf16.mxu1 %v5041_v29 }
  0xe7   : > { %835 = vrot.lane.b32.xlu0 %v5183_v20, %s5043_s24 }
  0xe8   : > { %837 = vrot.lane.b32.xlu1 %v5193_v22, %s5043_s24 }
  0xeb   : > { %1999 = vrot.lane.b32.xlu0 %v5183_v20, %s5044_s26 }
  0xec   : > { %2001 = vrot.lane.b32.xlu1 %v5193_v22, %s5044_s26 }
  0xef   : > { %833 = vrot.lane.b32.xlu0 %v5187_v21, %s5043_s24 }
  0xf0   : > { %1997 = vrot.lane.b32.xlu1 %v5187_v21, %s5044_s26 }
  0xf3   : > { %843 = vrot.lane.b32.xlu0 %v5196_v23, %s5043_s24 }
  0xf4   : > { %845 = vrot.lane.b32.xlu1 %v5208_v25, %s5043_s24 }
  0xf7   : > { %2007 = vrot.lane.b32.xlu0 %v5196_v23, %s5044_s26 }
  0xf8   : > { %2009 = vrot.lane.b32.xlu1 %v5208_v25, %s5044_s26 }
  0xfb   : > { %841 = vrot.lane.b32.xlu0 %v5203_v24, %s5043_s24 }
  0xfc   : > { %2005 = vrot.lane.b32.xlu1 %v5203_v24, %s5044_s26 }
  0xff   : > { %851 = vrot.lane.b32.xlu0 %v5211_v26, %s5043_s24 }
 0x100   : > { %853 = vrot.lane.b32.xlu1 %v5228_v30, %s5043_s24 }
 0x103   : > { %2015 = vrot.lane.b32.xlu0 %v5211_v26, %s5044_s26 }
 0x104   : > { %2017 = vrot.lane.b32.xlu1 %v5228_v30, %s5044_s26 }
 0x107   : > { %849 = vrot.lane.b32.xlu0 %v5218_v27, %s5043_s24 }
 0x108   : > { %2013 = vrot.lane.b32.xlu1 %v5218_v27, %s5044_s26 }
 0x10b   : > { %831 = vrot.lane.b32.xlu0 %v5329_v38, %s5043_s24 }
 0x10c   : > { %2379 = vrot.lane.b32.xlu1 %v5169_v17, %s5045_s27 }
 0x10f   : > { %2381 = vrot.lane.b32.xlu0 %v5177_v19, %s5045_s27 }
 0x110   : > { %2377 = vrot.lane.b32.xlu1 %v5172_v18, %s5045_s27 }
 0x113   : > { %839 = vrot.lane.b32.xlu0 %v5340_v39, %s5043_s24 }
 0x114   : > { %2387 = vrot.lane.b32.xlu1 %v5183_v20, %s5045_s27 }
 0x117   : > { %2389 = vrot.lane.b32.xlu0 %v5193_v22, %s5045_s27 }
 0x118   : > { %2385 = vrot.lane.b32.xlu1 %v5187_v21, %s5045_s27 }
 0x11b   : > { %847 = vrot.lane.b32.xlu0 %v5351_v40, %s5043_s24 }
 0x11c   : > { %2395 = vrot.lane.b32.xlu1 %v5196_v23, %s5045_s27 }
 0x11d   : > { %v1216_v41 = vpop.permute.xlu0 %1215 }
 0x11e   : > { %v1214_v42 = vpop.permute.xlu1 %1213 }
 0x11f   : > { %2397 = vrot.lane.b32.xlu0 %v5208_v25, %s5045_s27  ;;  %v1246_v47 = vsel %vm1245_vm1, %v1214_v42, %v1216_v41 }
 0x120   : > { %2393 = vrot.lane.b32.xlu1 %v5203_v24, %s5045_s27 }
 0x121   : > { %v5366_v44 = vpop.permute.xlu0 %1217 }
 0x122   : > { %v1224_v45 = vpop.permute.xlu1 %1223  ;;  %v1247_v46 = vsel %vm1245_vm1, %v1216_v41, %v5366_v44 }
 0x123   : > { %1282 = vmatprep.subr.bf16.mxu0 %v1247_v46  ;;  %855 = vrot.lane.b32.xlu0 %v5362_v43, %s5043_s24  ;;  %v5491_v46 = vld [vmem:[%s5127_s30 + $0x60] sm:$0xff]  }
 0x124   : > { %2403 = vrot.lane.b32.xlu1 %v5211_v26, %s5045_s27  ;;  %1283 = vmatpush1.bf16.msra.mxu0 %v1246_v47 }
 0x125   : > { %v5375_v48 = vpop.permute.xlu0 %1225 }
 0x126   : > { %v1222_v49 = vpop.permute.xlu1 %1221  ;;  %v1250_v50 = vsel %vm1245_vm1, %v1224_v45, %v5375_v48 }
 0x127   : > { %1284 = vmatprep.subr.bf16.mxu0 %v1250_v50  ;;  %2405 = vrot.lane.b32.xlu0 %v5228_v30, %s5045_s27  ;;  %v1249_v51 = vsel %vm1245_vm1, %v1222_v49, %v1224_v45 }
 0x128   : > { %2401 = vrot.lane.b32.xlu1 %v5218_v27, %s5045_s27  ;;  %1285 = vmatpush1.bf16.msra.mxu0 %v1249_v51 }
 0x129   : > { %v1232_v52 = vpop.permute.xlu0 %1231 }
 0x12a   : > { %v5384_v53 = vpop.permute.xlu1 %1233 }
 0x12b   : > { %v1253_v54 = vsel %vm1245_vm1, %v1232_v52, %v5384_v53  ;;  %1219 = vrot.lane.b32.xlu0 %v5329_v38, %s5040_s25 }
 0x12c   : > { %1286 = vmatprep.subr.bf16.mxu0 %v1253_v54  ;;  %1227 = vrot.lane.b32.xlu1 %v5340_v39, %s5040_s25 }
 0x12d   : > { %v1230_v55 = vpop.permute.xlu0 %1229 }
 0x12e   : > { %v1240_v56 = vpop.permute.xlu1 %1239  ;;  %v1252_v57 = vsel %vm1245_vm1, %v1230_v55, %v1232_v52 }
 0x12f   : > { %1287 = vmatpush1.bf16.msra.mxu0 %v1252_v57  ;;  %1235 = vrot.lane.b32.xlu0 %v5351_v40, %s5040_s25  ;;  %v5511_v57 = vld [vmem:[%s5127_s30 + $0x68] sm:$0xff]  }
 0x130   : > { %1243 = vrot.lane.b32.xlu1 %v5362_v43, %s5040_s25 }
 0x131   : > { %v5397_v58 = vpop.permute.xlu0 %1241 }
 0x132   : > { %v1238_v59 = vpop.permute.xlu1 %1237  ;;  %v1256_v60 = vsel %vm1245_vm1, %v1240_v56, %v5397_v58 }
 0x133   : > { %1288 = vmatprep.subr.bf16.mxu0 %v1256_v60  ;;  %1607 = vrot.lane.b32.xlu0 %v5329_v38, %s5042_s23  ;;  %v1255_v61 = vsel %vm1245_vm1, %v1238_v59, %v1240_v56 }
 0x134   : > { %2767 = vrot.lane.b32.xlu1 %v5169_v17, %s5046_s29  ;;  %1289 = vmatpush1.bf16.msra.mxu0 %v1255_v61 }
 0x135   : > { %v1604_v63 = vpop.permute.xlu0 %1603 }
 0x136   : > { %v5409_v0 = vpop.permute.xlu1 %1605 }
 0x137   : > { %v1635_v1 = vsel %vm1633_vm2, %v1604_v63, %v5409_v0  ;;  %2769 = vrot.lane.b32.xlu0 %v5177_v19, %s5046_s29  ;;  %4079 = vmatmul.mubr.msk.bf16.vlgmr.msra.gmra.mrb[0].mxu0 %vm493_vm0, %v5405_v62 }
 0x138   : > { %1670 = vmatprep.subr.bf16.mxu0 %v1635_v1  ;;  %2765 = vrot.lane.b32.xlu1 %v5172_v18, %s5046_s29 }
 0x139   : > { %v1602_v2 = vpop.permute.xlu0 %1601  ;;  %1324 = vmatprep.mubr.bf16.mxu0 %v5041_v29 }
 0x13a   : > { %v1634_v3 = vsel %vm1633_vm2, %v1602_v2, %v1604_v63  ;;  %v1612_v4 = vpop.permute.xlu1 %1611 }
 0x13b   : > { %1615 = vrot.lane.b32.xlu0 %v5340_v39, %s5042_s23  ;;  %1671 = vmatpush1.bf16.msra.mxu0 %v1634_v3 }
 0x13c   : > { %2775 = vrot.lane.b32.xlu1 %v5183_v20, %s5046_s29 }
 0x13d   : > { %v5428_v6 = vpop.permute.xlu0 %1613 }
 0x13e   : > { %v1610_v7 = vpop.permute.xlu1 %1609  ;;  %v1638_v8 = vsel %vm1633_vm2, %v1612_v4, %v5428_v6 }
 0x13f   : > { %v1637_v9 = vsel %vm1633_vm2, %v1610_v7, %v1612_v4  ;;  %2777 = vrot.lane.b32.xlu0 %v5193_v22, %s5046_s29  ;;  %4080 = vmatmul.mubr.msk.bf16.gmra.mrb[4].mxu0 %vm493_vm0, %v5424_v5  ;;  %v5553_v7 = vld [vmem:[%s5127_s30 + $0x78] sm:$0xff]  }
 0x140   : > { %2773 = vrot.lane.b32.xlu1 %v5187_v21, %s5046_s29  ;;  %1672 = vmatprep.subr.bf16.mxu0 %v1638_v8 }
 0x141   : > { %1673 = vmatpush1.bf16.msra.mxu0 %v1637_v9  ;;  %v1620_v10 = vpop.permute.xlu0 %1619  ;;  %1334 = vmatprep.mubr.bf16.mxu0 %v5041_v29 }
 0x142   : > { %v5440_v11 = vpop.permute.xlu1 %1621 }
 0x143   : > { %1623 = vrot.lane.b32.xlu0 %v5351_v40, %s5042_s23  ;;  %v1641_v12 = vsel %vm1633_vm2, %v1620_v10, %v5440_v11 }
 0x144   : > { %2783 = vrot.lane.b32.xlu1 %v5196_v23, %s5046_s29  ;;  %1674 = vmatprep.subr.bf16.mxu0 %v1641_v12 }
 0x145   : > { %v1618_v14 = vpop.permute.xlu0 %1617 }
 0x146   : > { %v1640_v15 = vsel %vm1633_vm2, %v1618_v14, %v1620_v10  ;;  %v1628_v16 = vpop.permute.xlu1 %1627 }
 0x147   : > { %2785 = vrot.lane.b32.xlu0 %v5208_v25, %s5046_s29  ;;  %4081 = vmatmul.mubr.msk.bf16.gmra.mrb[8].mxu0 %vm493_vm0, %v5447_v13 }
 0x148   : > { %2781 = vrot.lane.b32.xlu1 %v5203_v24, %s5046_s29  ;;  %1675 = vmatpush1.bf16.msra.mxu0 %v1640_v15 }
 0x149   : > { %v5458_v28 = vpop.permute.xlu0 %1629  ;;  %1344 = vmatprep.mubr.bf16.mxu0 %v5041_v29 }
 0x14a   : > { %v1626_v31 = vpop.permute.xlu1 %1625  ;;  %v1644_v32 = vsel %vm1633_vm2, %v1628_v16, %v5458_v28 }
 0x14b   : > { %v1643_v33 = vsel %vm1633_vm2, %v1626_v31, %v1628_v16  ;;  %1631 = vrot.lane.b32.xlu0 %v5362_v43, %s5042_s23  ;;  %1676 = vmatprep.subr.bf16.mxu0 %v1644_v32 }
 0x14c   : > { %2791 = vrot.lane.b32.xlu1 %v5211_v26, %s5046_s29  ;;  %1677 = vmatpush1.bf16.msra.mxu0 %v1643_v33 }
 0x14d   : > { %v828_v35 = vpop.permute.xlu0 %827 }
 0x14e   : > { %v5471_v36 = vpop.permute.xlu1 %829 }
 0x14f   : > { %2793 = vrot.lane.b32.xlu0 %v5228_v30, %s5046_s29  ;;  %v859_v37 = vsel %vm857_vm3, %v828_v35, %v5471_v36  ;;  %4082 = vmatmul.mubr.msk.bf16.gmra.mrb[12].mxu0 %vm493_vm0, %v5467_v34 }
 0x150   : > { %2789 = vrot.lane.b32.xlu1 %v5218_v27, %s5046_s29  ;;  %894 = vmatprep.subr.bf16.mxu1 %v859_v37 }
 0x151   : > { %v1992_v41 = vpop.permute.xlu0 %1991  ;;  %1702 = vmatprep.mubr.bf16.mxu0 %v5041_v29 }
 0x152   : > { %v5482_v42 = vpop.permute.xlu1 %1993 }
 0x153   : > { %1995 = vrot.lane.b32.xlu0 %v5329_v38, %s5044_s26  ;;  %v2023_v45 = vsel %vm2021_vm4, %v1992_v41, %v5482_v42 }
 0x154   : > { %2003 = vrot.lane.b32.xlu1 %v5340_v39, %s5044_s26  ;;  %2058 = vmatprep.subr.bf16.mxu0 %v2023_v45 }
 0x155   : > { %v826_v47 = vpop.permute.xlu0 %825 }
 0x156   : > { %v1990_v49 = vpop.permute.xlu1 %1989  ;;  %v858_v50 = vsel %vm857_vm3, %v826_v47, %v828_v35 }
 0x157   : > { %v2022_v51 = vsel %vm2021_vm4, %v1990_v49, %v1992_v41  ;;  %2011 = vrot.lane.b32.xlu0 %v5351_v40, %s5044_s26  ;;  %895 = vmatpush1.bf16.msra.mxu1 %v858_v50  ;;  %v4936_v41 = vld [vmem:[%s5133_s9 + $0x4] ss:$16 sps:$4 sm:$0xff]   ;;  %v5609_v49 = vld [vmem:[%s5127_s30 + $0x28] sm:$0xff]  }
 0x158   : > { %2019 = vrot.lane.b32.xlu1 %v5362_v43, %s5044_s26  ;;  %4115 = vmatmul.mubr.msk.bf16.vlgmr.msra.gmra.mrb[0].mxu0 %vm493_vm0, %v5491_v46 }
 0x159   : > { %2059 = vmatpush1.bf16.msra.mxu0 %v2022_v51  ;;  %v836_v52 = vpop.permute.xlu0 %835  ;;  %1712 = vmatprep.mubr.bf16.mxu0 %v5041_v29  ;;  %v4941_v51 = vld [vmem:[%s5133_s9 + $0x8] ss:$16 sps:$4 sm:$0xff]  }
 0x15a   : > { %v5502_v54 = vpop.permute.xlu1 %837 }
 0x15b   : > { %2383 = vrot.lane.b32.xlu0 %v5329_v38, %s5045_s27  ;;  %v862_v55 = vsel %vm857_vm3, %v836_v52, %v5502_v54 }
 0x15c   : > { %3155 = vrot.lane.b32.xlu1 %v5169_v17, %s5047_s13  ;;  %896 = vmatprep.subr.bf16.mxu1 %v862_v55 }
 0x15d   : > { %v2000_v56 = vpop.permute.xlu0 %1999 }
 0x15e   : > { %v5513_v59 = vpop.permute.xlu1 %2001 }
 0x15f   : > { %3157 = vrot.lane.b32.xlu0 %v5177_v19, %s5047_s13  ;;  %v2026_v60 = vsel %vm2021_vm4, %v2000_v56, %v5513_v59  ;;  %v5531_v19 = vld [vmem:[%s5127_s30 + $0x70] sm:$0xff]  }
 0x160   : > { %3153 = vrot.lane.b32.xlu1 %v5172_v18, %s5047_s13  ;;  %2060 = vmatprep.subr.bf16.mxu0 %v2026_v60 }
 0x161   : > { %v834_v61 = vpop.permute.xlu0 %833  ;;  %4116 = vmatmul.mubr.msk.bf16.gmra.mrb[4].mxu0 %vm493_vm0, %v5511_v57 }
 0x162   : > { %v1998_v17 = vpop.permute.xlu1 %1997  ;;  %v861_v63 = vsel %vm857_vm3, %v834_v61, %v836_v52  ;;  %1722 = vmatprep.mubr.bf16.mxu0 %v5041_v29  ;;  %v4940_v52 = vld [vmem:[%s5133_s9] ss:$16 sps:$4 sm:$0xff]  }
 0x163   : > { %v2025_v1 = vsel %vm2021_vm4, %v1998_v17, %v2000_v56  ;;  %2391 = vrot.lane.b32.xlu0 %v5340_v39, %s5045_s27  ;;  %897 = vmatpush1.bf16.msra.mxu1 %v861_v63  ;;  %v5619_v56 = vld [vmem:[%s5127_s30 + $0x88] sm:$0xff]  }
 0x164   : > { %3163 = vrot.lane.b32.xlu1 %v5183_v20, %s5047_s13  ;;  %2061 = vmatpush1.bf16.msra.mxu0 %v2025_v1  ;;  %v5636_v1 = vld [vmem:[%s5127_s30 + $0x30] sm:$0xff]  }
 0x165   : > { %v844_v18 = vpop.permute.xlu0 %843 }
 0x166   : > { %v5533_v2 = vpop.permute.xlu1 %845 }
 0x167   : > { %3165 = vrot.lane.b32.xlu0 %v5193_v22, %s5047_s13  ;;  %v865_v3 = vsel %vm857_vm3, %v844_v18, %v5533_v2 }
 0x168   : > { %3161 = vrot.lane.b32.xlu1 %v5187_v21, %s5047_s13  ;;  %898 = vmatprep.subr.bf16.mxu1 %v865_v3  ;;  %v4947_v3 = vld [vmem:[%s5133_s9 + $0x28] ss:$16 sps:$4 sm:$0xff]  }
 0x169   : > { %v2008_v4 = vpop.permute.xlu0 %2007  ;;  %4117 = vmatmul.mubr.msk.bf16.gmra.mrb[8].mxu0 %vm493_vm0, %v5531_v19 }
 0x16a   : > { %v5543_v20 = vpop.permute.xlu1 %2009  ;;  %1732 = vmatprep.mubr.bf16.mxu0 %v5041_v29 }
 0x16b   : > { %2399 = vrot.lane.b32.xlu0 %v5351_v40, %s5045_s27  ;;  %v2029_v22 = vsel %vm2021_vm4, %v2008_v4, %v5543_v20 }
 0x16c   : > { %3171 = vrot.lane.b32.xlu1 %v5196_v23, %s5047_s13  ;;  %2062 = vmatprep.subr.bf16.mxu0 %v2029_v22 }
 0x16d   : > { %v842_v21 = vpop.permute.xlu0 %841 }
 0x16e   : > { %v2006_v8 = vpop.permute.xlu1 %2005  ;;  %v864_v9 = vsel %vm857_vm3, %v842_v21, %v844_v18  ;;  %v5646_v21 = vld [vmem:[%s5127_s30 + $0x90] sm:$0xff]  }
 0x16f   : > { %v2028_v10 = vsel %vm2021_vm4, %v2006_v8, %v2008_v4  ;;  %3173 = vrot.lane.b32.xlu0 %v5208_v25, %s5047_s13  ;;  %899 = vmatpush1.bf16.msra.mxu1 %v864_v9  ;;  %v4946_v4 = vld [vmem:[%s5133_s9 + $0x20] ss:$16 sps:$4 sm:$0xff]  }
 0x170   : > { %3169 = vrot.lane.b32.xlu1 %v5203_v24, %s5047_s13  ;;  %2063 = vmatpush1.bf16.msra.mxu0 %v2028_v10 }
 0x171   : > { %v852_v12 = vpop.permute.xlu0 %851  ;;  %4118 = vmatmul.mubr.msk.bf16.gmra.mrb[12].mxu0 %vm493_vm0, %v5553_v7 }
 0x172   : > { %v5563_v23 = vpop.permute.xlu1 %853  ;;  %2090 = vmatprep.mubr.bf16.mxu0 %v5041_v29 }
 0x173   : > { %2407 = vrot.lane.b32.xlu0 %v5362_v43, %s5045_s27  ;;  %v868_v25 = vsel %vm857_vm3, %v852_v12, %v5563_v23 }
 0x174   : > { %3179 = vrot.lane.b32.xlu1 %v5211_v26, %s5047_s13  ;;  %900 = vmatprep.subr.bf16.mxu1 %v868_v25  ;;  %v5582_v26 = vld [vmem:[%s5127_s30 + $0x20] sm:$0xff]   ;;  %v4952_v25 = vld [vmem:[%s5127_s30 + $0x38] sm:$0xff]  }
 0x175   : > { %v2016_v24 = vpop.permute.xlu0 %2015 }
 0x176   : > { %v5572_v14 = vpop.permute.xlu1 %2017 }
 0x177   : > { %3181 = vrot.lane.b32.xlu0 %v5228_v30, %s5047_s13  ;;  %v2032_v15 = vsel %vm2021_vm4, %v2016_v24, %v5572_v14 }
 0x178   : > { %3177 = vrot.lane.b32.xlu1 %v5218_v27, %s5047_s13  ;;  %2064 = vmatprep.subr.bf16.mxu0 %v2032_v15  ;;  %v5590_v27 = vld [vmem:[%s5127_s30 + $0x80] sm:$0xff]   ;;  %v4954_v15 = vld [vmem:[%s5133_s9 + $0x48] ss:$16 sps:$4 sm:$0xff]  }
 0x179   : > { %v850_v16 = vpop.permute.xlu0 %849 }
 0x17a   : > { %v2014_v31 = vpop.permute.xlu1 %2013  ;;  %v867_v32 = vsel %vm857_vm3, %v850_v16, %v852_v12  ;;  %v4953_v16 = vld [vmem:[%s5133_s9 + $0x40] ss:$16 sps:$4 sm:$0xff]  }
 0x17b   : > { %v2031_v33 = vsel %vm2021_vm4, %v2014_v31, %v2016_v24  ;;  %2771 = vrot.lane.b32.xlu0 %v5329_v38, %s5046_s29  ;;  %901 = vmatpush1.bf16.msra.mxu1 %v867_v32  ;;  %v5671_v32 = vld [vmem:[%s5127_s30 + $0x98] sm:$0xff]  }
 0x17c   : > { %2779 = vrot.lane.b32.xlu1 %v5340_v39, %s5046_s29  ;;  %2065 = vmatpush1.bf16.msra.mxu0 %v2031_v33 }
 0x17d   : > { %v832_v30 = vpop.permute.xlu0 %831 }
 0x17e   : > { %v2380_v35 = vpop.permute.xlu1 %2379  ;;  %4043 = vmatmul.mubr.msk.bf16.vlgmr.msra.gmra.mrb[0].mxu1 %vm493_vm0, %v5582_v26  ;;  %v860_v37 = vsel %vm857_vm3, %v5471_v36, %v832_v30 }
 0x17f   : > { %2787 = vrot.lane.b32.xlu0 %v5351_v40, %s5046_s29  ;;  %4400 = vmatprep.subr.bf16.mxu1 %v860_v37 }
 0x180   : > { %2795 = vrot.lane.b32.xlu1 %v5362_v43, %s5046_s29  ;;  %4401 = vmatpush3.bf16.msra.mxu1 %v860_v37 }
 0x181   : > { %v5601_v45 = vpop.permute.xlu0 %2381  ;;  %4151 = vmatmul.mubr.msk.bf16.vlgmr.msra.gmra.mrb[0].mxu0 %vm493_vm0, %v5590_v27  ;;  %936 = vmatprep.mubr.bf16.mxu1 %v5041_v29 }
 0x182   : > { %v2378_v36 = vpop.permute.xlu1 %2377  ;;  %v2411_v47 = vsel %vm2409_vm5, %v2380_v35, %v5601_v45  ;;  %2100 = vmatprep.mubr.bf16.mxu0 %v5041_v29 }
 0x183   : > { %v2410_v50 = vsel %vm2409_vm5, %v2378_v36, %v2380_v35  ;;  %3159 = vrot.lane.b32.xlu0 %v5329_v38, %s5047_s13  ;;  %2446 = vmatprep.subr.bf16.mxu0 %v2411_v47  ;;  %v4943_v38 = vld [vmem:[%s5133_s9 + $0x24] ss:$16 sps:$4 sm:$0xff]   ;;  %v4960_v36 = vld [vmem:[%s5133_s9 + $0x68] ss:$16 sps:$4 sm:$0xff]  }
 0x184   : > { %3543 = vrot.lane.b32.xlu1 %v4936_v41, %s5048_s14  ;;  %2447 = vmatpush1.bf16.msra.mxu0 %v2410_v50 }
 0x185   : > { %v840_v55 = vpop.permute.xlu0 %839 }
 0x186   : > { %v2388_v60 = vpop.permute.xlu1 %2387  ;;  %4044 = vmatmul.mubr.msk.bf16.gmra.mrb[4].mxu1 %vm493_vm0, %v5609_v49  ;;  %v863_v61 = vsel %vm857_vm3, %v5502_v54, %v840_v55 }
 0x187   : > { %3545 = vrot.lane.b32.xlu0 %v4941_v51, %s5048_s14  ;;  %4402 = vmatprep.subr.bf16.mxu1 %v863_v61 }
 0x188   : > { %3541 = vrot.lane.b32.xlu1 %v4940_v52, %s5048_s14  ;;  %4403 = vmatpush3.bf16.msra.mxu1 %v863_v61  ;;  %v5699_v52 = vld [vmem:[%s5127_s30 + $0xa0] sm:$0xff]  }
 0x189   : > { %v5628_v17 = vpop.permute.xlu0 %2389  ;;  %946 = vmatprep.mubr.bf16.mxu1 %v5041_v29  ;;  %4152 = vmatmul.mubr.msk.bf16.gmra.mrb[4].mxu0 %vm493_vm0, %v5619_v56 }
 0x18a   : > { %v2386_v63 = vpop.permute.xlu1 %2385  ;;  %v2414_v54 = vsel %vm2409_vm5, %v2388_v60, %v5628_v17  ;;  %2110 = vmatprep.mubr.bf16.mxu0 %v5041_v29 }
 0x18b   : > { %v2413_v18 = vsel %vm2409_vm5, %v2386_v63, %v2388_v60  ;;  %3167 = vrot.lane.b32.xlu0 %v5340_v39, %s5047_s13  ;;  %2448 = vmatprep.subr.bf16.mxu0 %v2414_v54  ;;  %v4949_v39 = vld [vmem:[%s5133_s9 + $0x44] ss:$16 sps:$4 sm:$0xff]   ;;  %v4962_v60 = vld [vmem:[%s5133_s9 + $0x2c] ss:$16 sps:$4 sm:$0xff]  }
 0x18c   : > { %3551 = vrot.lane.b32.xlu1 %v4943_v38, %s5048_s14  ;;  %2449 = vmatpush1.bf16.msra.mxu0 %v2413_v18  ;;  %v4965_v38 = vld [vmem:[%s5133_s9 + $0x6c] ss:$16 sps:$4 sm:$0xff]  }
 0x18d   : > { %v848_v22 = vpop.permute.xlu0 %847 }
 0x18e   : > { %v2396_v8 = vpop.permute.xlu1 %2395  ;;  %4045 = vmatmul.mubr.msk.bf16.gmra.mrb[8].mxu1 %vm493_vm0, %v5636_v1  ;;  %v866_v9 = vsel %vm857_vm3, %v5533_v2, %v848_v22 }
 0x18f   : > { %3553 = vrot.lane.b32.xlu0 %v4947_v3, %s5048_s14  ;;  %4404 = vmatprep.subr.bf16.mxu1 %v866_v9 }
 0x190   : > { %3549 = vrot.lane.b32.xlu1 %v4946_v4, %s5048_s14  ;;  %4405 = vmatpush3.bf16.msra.mxu1 %v866_v9  ;;  %v5739_v9 = vld [vmem:[%s5127_s30 + $0xb0] sm:$0xff]  }
 0x191   : > { %v5655_v10 = vpop.permute.xlu0 %2397  ;;  %956 = vmatprep.mubr.bf16.mxu1 %v5041_v29  ;;  %4153 = vmatmul.mubr.msk.bf16.gmra.mrb[8].mxu0 %vm493_vm0, %v5646_v21 }
 0x192   : > { %v2394_v12 = vpop.permute.xlu1 %2393  ;;  %v2417_v2 = vsel %vm2409_vm5, %v2396_v8, %v5655_v10  ;;  %2120 = vmatprep.mubr.bf16.mxu0 %v5041_v29 }
 0x193   : > { %v2416_v24 = vsel %vm2409_vm5, %v2394_v12, %v2396_v8  ;;  %3175 = vrot.lane.b32.xlu0 %v5351_v40, %s5047_s13  ;;  %2450 = vmatprep.subr.bf16.mxu0 %v2417_v2  ;;  %v4956_v40 = vld [vmem:[%s5133_s9 + $0x64] ss:$16 sps:$4 sm:$0xff]  }
 0x194   : > { %3559 = vrot.lane.b32.xlu1 %v4949_v39, %s5048_s14  ;;  %2451 = vmatpush1.bf16.msra.mxu0 %v2416_v24  ;;  %v5758_v24 = vld [vmem:[%s5127_s30 + $0xb8] sm:$0xff]  }
 0x195   : > { %v856_v31 = vpop.permute.xlu0 %855 }
 0x196   : > { %v2404_v33 = vpop.permute.xlu1 %2403  ;;  %4046 = vmatmul.mubr.msk.bf16.gmra.mrb[12].mxu1 %vm493_vm0, %v4952_v25  ;;  %v869_v30 = vsel %vm857_vm3, %v5563_v23, %v856_v31 }
 0x197   : > { %3561 = vrot.lane.b32.xlu0 %v4954_v15, %s5048_s14  ;;  %4406 = vmatprep.subr.bf16.mxu1 %v869_v30 }
 0x198   : > { %3557 = vrot.lane.b32.xlu1 %v4953_v16, %s5048_s14  ;;  %4407 = vmatpush3.bf16.msra.mxu1 %v869_v30 }
 0x199   : > { %v5679_v35 = vpop.permute.xlu0 %2405  ;;  %4408 = vmatprep.mubr.msk.bf16.mxu1 %vm493_vm0, %v5582_v26  ;;  %4154 = vmatmul.mubr.msk.bf16.gmra.mrb[12].mxu0 %vm493_vm0, %v5671_v32  ;;  %v4959_v26 = vld [vmem:[%s5133_s9 + $0x60] ss:$16 sps:$4 sm:$0xff]  }
 0x19a   : > { %v2402_v37 = vpop.permute.xlu1 %2401  ;;  %v2420_v23 = vsel %vm2409_vm5, %v2404_v33, %v5679_v35  ;;  %2478 = vmatprep.mubr.bf16.mxu0 %v5041_v29 }
 0x19b   : > { %v2419_v41 = vsel %vm2409_vm5, %v2402_v37, %v2404_v33  ;;  %3183 = vrot.lane.b32.xlu0 %v5362_v43, %s5047_s13  ;;  %2452 = vmatprep.subr.bf16.mxu0 %v2420_v23  ;;  %v4963_v43 = vld [vmem:[%s5133_s9 + $0xc] ss:$16 sps:$4 sm:$0xff]  }
 0x19c   : > { %3567 = vrot.lane.b32.xlu1 %v4956_v40, %s5048_s14  ;;  %2453 = vmatpush1.bf16.msra.mxu0 %v2419_v41  ;;  %v5782_v41 = vld [vmem:[%s5127_s30 + $0xc0] sm:$0xff]  }
 0x19d   : > { %v1220_v47 = vpop.permute.xlu0 %1219 }
 0x19e   : > { %v1228_v50 = vpop.permute.xlu1 %1227  ;;  %v1248_v51 = vsel %vm1245_vm1, %v5366_v44, %v1220_v47  ;;  %4409 = vmatmul.mubr.msk.bf16.vlgmr.msra.gmra.mrb[16].mxu1 %vm493_vm0, %v5609_v49  ;;  %v4966_v49 = vld [vmem:[%s5133_s9 + $0x4c] ss:$16 sps:$4 sm:$0xff]  }
 0x19f   : > { %3569 = vrot.lane.b32.xlu0 %v4960_v36, %s5048_s14  ;;  %4416 = vmatprep.subr.bf16.mxu1 %v1248_v51  ;;  %v1251_v55 = vsel %vm1245_vm1, %v5375_v48, %v1228_v50 }
 0x1a0   : > { %3565 = vrot.lane.b32.xlu1 %v4959_v26, %s5048_s14  ;;  %4417 = vmatpush3.bf16.msra.mxu1 %v1248_v51 }
 0x1a1   : > { %v1236_v61 = vpop.permute.xlu0 %1235  ;;  %4418 = vmatprep.subr.bf16.mxu1 %v1251_v55  ;;  %4412 = vmatprep.mubr.msk.bf16.mxu1 %vm493_vm0, %v5636_v1  ;;  %v5720_v1 = vld [vmem:[%s5127_s30 + $0xa8] sm:$0xff]  }
 0x1a2   : > { %v1244_v44 = vpop.permute.xlu1 %1243  ;;  %4187 = vmatmul.mubr.msk.bf16.vlgmr.msra.gmra.mrb[0].mxu0 %vm493_vm0, %v5699_v52  ;;  %v1254_v48 = vsel %vm1245_vm1, %v5384_v53, %v1236_v61 }
 0x1a3   : > { %3547 = vrot.lane.b32.xlu0 %v4963_v43, %s5048_s14  ;;  %2488 = vmatprep.mubr.bf16.mxu0 %v5041_v29  ;;  %v1257_v53 = vsel %vm1245_vm1, %v5397_v58, %v1244_v44 }
 0x1a4   : > { %3555 = vrot.lane.b32.xlu1 %v4962_v60, %s5048_s14  ;;  %4419 = vmatpush3.bf16.msra.mxu1 %v1251_v55  ;;  %v5813_v60 = vld [vmem:[%s5127_s30 + $0xd0] sm:$0xff]  }
 0x1a5   : > { %v1608_v63 = vpop.permute.xlu0 %1607  ;;  %4420 = vmatprep.subr.bf16.mxu1 %v1254_v48 }
 0x1a6   : > { %v2768_v54 = vpop.permute.xlu1 %2767  ;;  %4413 = vmatmul.mubr.msk.bf16.gmra.mrb[20].mxu1 %vm493_vm0, %v4952_v25  ;;  %v1636_v58 = vsel %vm1633_vm2, %v5409_v0, %v1608_v63 }
 0x1a7   : > { %3563 = vrot.lane.b32.xlu0 %v4966_v49, %s5048_s14  ;;  %4424 = vmatprep.mubr.msk.bf16.mxu1 %vm493_vm0, %v5405_v62 }
 0x1a8   : > { %3571 = vrot.lane.b32.xlu1 %v4965_v38, %s5048_s14  ;;  %4421 = vmatpush3.bf16.msra.mxu1 %v1254_v48 }
 0x1a9   : > { %v5728_v18 = vpop.permute.xlu0 %2769  ;;  %4422 = vmatprep.subr.bf16.mxu1 %v1257_v53 }
 0x1aa   : > { %v2766_v3 = vpop.permute.xlu1 %2765  ;;  %v2799_v4 = vsel %vm2797_vm6, %v2768_v54, %v5728_v18  ;;  %4188 = vmatmul.mubr.msk.bf16.gmra.mrb[4].mxu0 %vm493_vm0, %v5720_v1 }
 0x1ab   : > { %v2798_v22 = vsel %vm2797_vm6, %v2766_v3, %v2768_v54  ;;  %2834 = vmatprep.subr.bf16.mxu0 %v2799_v4  ;;  %2498 = vmatprep.mubr.bf16.mxu0 %v5041_v29  ;;  %v5832_v54 = vld [vmem:[%s5127_s30 + $0xd8] sm:$0xff]  }
 0x1ac   : > { %4423 = vmatpush3.bf16.msra.mxu1 %v1257_v53  ;;  %2835 = vmatpush1.bf16.msra.mxu0 %v2798_v22 }
 0x1ad   : > { %v1616_v62 = vpop.permute.xlu0 %1615  ;;  %4432 = vmatprep.subr.bf16.mxu1 %v1636_v58 }
 0x1ae   : > { %v2776_v8 = vpop.permute.xlu1 %2775  ;;  %v1639_v39 = vsel %vm1633_vm2, %v5428_v6, %v1616_v62 }
 0x1af   : > { %4425 = vmatmul.mubr.msk.bf16.vlgmr.msra.gmra.mrb[16].mxu1 %vm493_vm0, %v5424_v5 }
 0x1b0   : > { %4433 = vmatpush3.bf16.msra.mxu1 %v1636_v58  ;;  %4428 = vmatprep.mubr.msk.bf16.mxu1 %vm493_vm0, %v5447_v13 }
 0x1b1   : > { %v5747_v12 = vpop.permute.xlu0 %2777  ;;  %4434 = vmatprep.subr.bf16.mxu1 %v1639_v39 }
 0x1b2   : > { %v2774_v0 = vpop.permute.xlu1 %2773  ;;  %v2802_v2 = vsel %vm2797_vm6, %v2776_v8, %v5747_v12  ;;  %4189 = vmatmul.mubr.msk.bf16.gmra.mrb[8].mxu0 %vm493_vm0, %v5739_v9 }
 0x1b3   : > { %v2801_v5 = vsel %vm2797_vm6, %v2774_v0, %v2776_v8  ;;  %2836 = vmatprep.subr.bf16.mxu0 %v2802_v2  ;;  %2508 = vmatprep.mubr.bf16.mxu0 %v5041_v29  ;;  %v5858_v0 = vld [vmem:[%s5127_s30 + $0xe0] sm:$0xff]  }
 0x1b4   : > { %4435 = vmatpush3.bf16.msra.mxu1 %v1639_v39  ;;  %2837 = vmatpush1.bf16.msra.mxu0 %v2801_v5 }
 0x1b5   : > { %v1624_v6 = vpop.permute.xlu0 %1623 }
 0x1b6   : > { %v2784_v25 = vpop.permute.xlu1 %2783  ;;  %v1642_v13 = vsel %vm1633_vm2, %v5440_v11, %v1624_v6 }
 0x1b7   : > { %4436 = vmatprep.subr.bf16.mxu1 %v1642_v13  ;;  %4429 = vmatmul.mubr.msk.bf16.gmra.mrb[20].mxu1 %vm493_vm0, %v5467_v34 }
 0x1b8   : > { %4437 = vmatpush3.bf16.msra.mxu1 %v1642_v13  ;;  %4440 = vmatprep.mubr.msk.bf16.mxu1 %vm493_vm0, %v5491_v46 }
 0x1b9   : > { %v5764_v15 = vpop.permute.xlu0 %2785 }
 0x1ba   : > { %v2782_v16 = vpop.permute.xlu1 %2781  ;;  %v2805_v31 = vsel %vm2797_vm6, %v2784_v25, %v5764_v15  ;;  %4190 = vmatmul.mubr.msk.bf16.gmra.mrb[12].mxu0 %vm493_vm0, %v5758_v24 }
 0x1bb   : > { %v2804_v11 = vsel %vm2797_vm6, %v2782_v16, %v2784_v25  ;;  %2838 = vmatprep.subr.bf16.mxu0 %v2805_v31  ;;  %2866 = vmatprep.mubr.bf16.mxu0 %v5041_v29 }
 0x1bc   : > { %2839 = vmatpush1.bf16.msra.mxu0 %v2804_v11 }
 0x1bd   : > { %v1632_v34 = vpop.permute.xlu0 %1631 }
 0x1be   : > { %v2792_v33 = vpop.permute.xlu1 %2791  ;;  %v1645_v46 = vsel %vm1633_vm2, %v5458_v28, %v1632_v34  ;;  %v4977_v34 = vld [vmem:[%s5127_s30 + $0xf0] sm:$0xff]  }
 0x1bf   : > { %4438 = vmatprep.subr.bf16.mxu1 %v1645_v46 }
 0x1c0   : > { %4439 = vmatpush3.bf16.msra.mxu1 %v1645_v46 }
 0x1c1   : > { %v5774_v30 = vpop.permute.xlu0 %2793 }
 0x1c2   : > { %v2790_v40 = vpop.permute.xlu1 %2789  ;;  %v2808_v37 = vsel %vm2797_vm6, %v2792_v33, %v5774_v30 }
 0x1c3   : > { %v2807_v23 = vsel %vm2797_vm6, %v2790_v40, %v2792_v33  ;;  %2840 = vmatprep.subr.bf16.mxu0 %v2808_v37  ;;  %4441 = vmatmul.mubr.msk.bf16.vlgmr.msra.gmra.mrb[16].mxu1 %vm493_vm0, %v5511_v57 }
 0x1c4   : > { %2841 = vmatpush1.bf16.msra.mxu0 %v2807_v23  ;;  %4444 = vmatprep.mubr.msk.bf16.mxu1 %vm493_vm0, %v5531_v19  ;;  %v5796_v19 = vld [vmem:[%s5127_s30 + $0xc8] sm:$0xff]  }
 0x1c5   : > { %v1996_v28 = vpop.permute.xlu0 %1995 }
 0x1c6   : > { %v2004_v36 = vpop.permute.xlu1 %2003  ;;  %v2024_v26 = vsel %vm2021_vm4, %v5482_v42, %v1996_v28 }
 0x1c7   : > { %4448 = vmatprep.subr.bf16.mxu1 %v2024_v26  ;;  %4223 = vmatmul.mubr.msk.bf16.vlgmr.msra.gmra.mrb[0].mxu0 %vm493_vm0, %v5782_v41  ;;  %v2027_v57 = vsel %vm2021_vm4, %v5513_v59, %v2004_v36  ;;  %v4978_v36 = vld [vmem:[%s5127_s30 + $0xf8] sm:$0xff]  }
 0x1c8   : > { %4449 = vmatpush3.bf16.msra.mxu1 %v2024_v26  ;;  %2876 = vmatprep.mubr.bf16.mxu0 %v5041_v29 }
 0x1c9   : > { %v2012_v47 = vpop.permute.xlu0 %2011  ;;  %4450 = vmatprep.subr.bf16.mxu1 %v2027_v57 }
 0x1ca   : > { %v2020_v50 = vpop.permute.xlu1 %2019  ;;  %v2030_v42 = vsel %vm2021_vm4, %v5543_v20, %v2012_v47 }
 0x1cb   : > { %4445 = vmatmul.mubr.msk.bf16.gmra.mrb[20].mxu1 %vm493_vm0, %v5553_v7  ;;  %v2033_v7 = vsel %vm2021_vm4, %v5572_v14, %v2020_v50 }
 0x1cc   : > { %4451 = vmatpush3.bf16.msra.mxu1 %v2027_v57  ;;  %4456 = vmatprep.mubr.msk.bf16.mxu1 %vm493_vm0, %v5590_v27 }
 0x1cd   : > { %v2384_v51 = vpop.permute.xlu0 %2383  ;;  %4452 = vmatprep.subr.bf16.mxu1 %v2030_v42 }
 0x1ce   : > { %v3156_v59 = vpop.permute.xlu1 %3155  ;;  %v2412_v61 = vsel %vm2409_vm5, %v5601_v45, %v2384_v51 }
 0x1cf   : > { %4224 = vmatmul.mubr.msk.bf16.gmra.mrb[4].mxu0 %vm493_vm0, %v5796_v19 }
 0x1d0   : > { %4453 = vmatpush3.bf16.msra.mxu1 %v2030_v42  ;;  %2886 = vmatprep.mubr.bf16.mxu0 %v5041_v29 }
 0x1d1   : > { %v5807_v43 = vpop.permute.xlu0 %3157  ;;  %4454 = vmatprep.subr.bf16.mxu1 %v2033_v7 }
 0x1d2   : > { %v3154_v20 = vpop.permute.xlu1 %3153  ;;  %v3187_v27 = vsel %vm3185_vm7, %v3156_v59, %v5807_v43 }
 0x1d3   : > { %v3186_v55 = vsel %vm3185_vm7, %v3154_v20, %v3156_v59  ;;  %3222 = vmatprep.subr.bf16.mxu0 %v3187_v27 }
 0x1d4   : > { %4455 = vmatpush3.bf16.msra.mxu1 %v2033_v7  ;;  %3223 = vmatpush1.bf16.msra.mxu0 %v3186_v55 }
 0x1d5   : > { %v2392_v14 = vpop.permute.xlu0 %2391  ;;  %4464 = vmatprep.subr.bf16.mxu1 %v2412_v61 }
 0x1d6   : > { %v3164_v44 = vpop.permute.xlu1 %3163  ;;  %v2415_v49 = vsel %vm2409_vm5, %v5628_v17, %v2392_v14 }
 0x1d7   : > { %4457 = vmatmul.mubr.msk.bf16.vlgmr.msra.gmra.mrb[16].mxu1 %vm493_vm0, %v5619_v56  ;;  %4225 = vmatmul.mubr.msk.bf16.gmra.mrb[8].mxu0 %vm493_vm0, %v5813_v60 }
 0x1d8   : > { %4465 = vmatpush3.bf16.msra.mxu1 %v2412_v61  ;;  %4460 = vmatprep.mubr.msk.bf16.mxu1 %vm493_vm0, %v5646_v21  ;;  %v4979_v61 = vld [vmem:[%s5127_s30 + $0x100] sm:$0xff]  }
 0x1d9   : > { %v5825_v48 = vpop.permute.xlu0 %3165  ;;  %4466 = vmatprep.subr.bf16.mxu1 %v2415_v49  ;;  %2896 = vmatprep.mubr.bf16.mxu0 %v5041_v29 }
 0x1da   : > { %v3162_v45 = vpop.permute.xlu1 %3161  ;;  %v3190_v38 = vsel %vm3185_vm7, %v3164_v44, %v5825_v48 }
 0x1db   : > { %v3189_v56 = vsel %vm3185_vm7, %v3162_v45, %v3164_v44  ;;  %3224 = vmatprep.subr.bf16.mxu0 %v3190_v38  ;;  %v4980_v38 = vld [vmem:[%s5127_s30 + $0x108] sm:$0xff]  }
 0x1dc   : > { %4467 = vmatpush3.bf16.msra.mxu1 %v2415_v49  ;;  %3225 = vmatpush1.bf16.msra.mxu0 %v3189_v56 }
 0x1dd   : > { %v2400_v63 = vpop.permute.xlu0 %2399 }
 0x1de   : > { %v3172_v17 = vpop.permute.xlu1 %3171  ;;  %v2418_v21 = vsel %vm2409_vm5, %v5655_v10, %v2400_v63 }
 0x1df   : > { %4468 = vmatprep.subr.bf16.mxu1 %v2418_v21  ;;  %4461 = vmatmul.mubr.msk.bf16.gmra.mrb[20].mxu1 %vm493_vm0, %v5671_v32 }
 0x1e0   : > { %4469 = vmatpush3.bf16.msra.mxu1 %v2418_v21  ;;  %4472 = vmatprep.mubr.msk.bf16.mxu1 %vm493_vm0, %v5699_v52  ;;  %v4982_v21 = vld [vmem:[%s5127_s30 + $0x118] sm:$0xff]  }
 0x1e1   : > { %v5840_v53 = vpop.permute.xlu0 %3173  ;;  %4226 = vmatmul.mubr.msk.bf16.gmra.mrb[12].mxu0 %vm493_vm0, %v5832_v54 }
 0x1e2   : > { %v3170_v3 = vpop.permute.xlu1 %3169  ;;  %v3193_v4 = vsel %vm3185_vm7, %v3172_v17, %v5840_v53  ;;  %3254 = vmatprep.mubr.bf16.mxu0 %v5041_v29 }
 0x1e3   : > { %v3192_v10 = vsel %vm3185_vm7, %v3170_v3, %v3172_v17  ;;  %3226 = vmatprep.subr.bf16.mxu0 %v3193_v4  ;;  %v4981_v17 = vld [vmem:[%s5127_s30 + $0x110] sm:$0xff]  }
 0x1e4   : > { %3227 = vmatpush1.bf16.msra.mxu0 %v3192_v10 }
 0x1e5   : > { %v2408_v32 = vpop.permute.xlu0 %2407 }
 0x1e6   : > { %v3180_v22 = vpop.permute.xlu1 %3179  ;;  %v2421_v52 = vsel %vm2409_vm5, %v5679_v35, %v2408_v32 }
 0x1e7   : > { %4470 = vmatprep.subr.bf16.mxu1 %v2421_v52 }
 0x1e8   : > { %4471 = vmatpush3.bf16.msra.mxu1 %v2421_v52 }
 0x1e9   : > { %v5850_v58 = vpop.permute.xlu0 %3181 }
 0x1ea   : > { %v3178_v62 = vpop.permute.xlu1 %3177  ;;  %v3196_v8 = vsel %vm3185_vm7, %v3180_v22, %v5850_v58 }
 0x1eb   : > { %v3195_v39 = vsel %vm3185_vm7, %v3178_v62, %v3180_v22  ;;  %3228 = vmatprep.subr.bf16.mxu0 %v3196_v8  ;;  %4473 = vmatmul.mubr.msk.bf16.vlgmr.msra.gmra.mrb[16].mxu1 %vm493_vm0, %v5720_v1 }
 0x1ec   : > { %3229 = vmatpush1.bf16.msra.mxu0 %v3195_v39  ;;  %4476 = vmatprep.mubr.msk.bf16.mxu1 %vm493_vm0, %v5739_v9  ;;  %v5872_v9 = vld [vmem:[%s5127_s30 + $0xe8] sm:$0xff]  }
 0x1ed   : > { %v2772_v35 = vpop.permute.xlu0 %2771 }
 0x1ee   : > { %v2780_v2 = vpop.permute.xlu1 %2779  ;;  %v2800_v5 = vsel %vm2797_vm6, %v5728_v18, %v2772_v35 }
 0x1ef   : > { %4480 = vmatprep.subr.bf16.mxu1 %v2800_v5  ;;  %4259 = vmatmul.mubr.msk.bf16.vlgmr.msra.gmra.mrb[0].mxu0 %vm493_vm0, %v5858_v0  ;;  %v2803_v1 = vsel %vm2797_vm6, %v5747_v12, %v2780_v2 }
 0x1f0   : > { %4481 = vmatpush3.bf16.msra.mxu1 %v2800_v5  ;;  %3264 = vmatprep.mubr.bf16.mxu0 %v5041_v29 }
 0x1f1   : > { %v2788_v6 = vpop.permute.xlu0 %2787  ;;  %4482 = vmatprep.subr.bf16.mxu1 %v2803_v1 }
 0x1f2   : > { %v2796_v25 = vpop.permute.xlu1 %2795  ;;  %v2806_v18 = vsel %vm2797_vm6, %v5764_v15, %v2788_v6  ;;  %v378_v6 = vld [vmem:[#allocation2 + $0x8] sm:$0xff] }
 0x1f3   : > { %4477 = vmatmul.mubr.msk.bf16.gmra.mrb[20].mxu1 %vm493_vm0, %v5758_v24  ;;  %v2809_v24 = vsel %vm2797_vm6, %v5774_v30, %v2796_v25  ;;  %v380_v25 = vld [vmem:[#allocation2 + $0x18] sm:$0xff] }
 0x1f4   : > { %4483 = vmatpush3.bf16.msra.mxu1 %v2803_v1  ;;  %4488 = vmatprep.mubr.msk.bf16.mxu1 %vm493_vm0, %v5782_v41  ;;  %v377_v1 = vld [vmem:[#allocation2] sm:$0xff] }
 0x1f5   : > { %v3160_v13 = vpop.permute.xlu0 %3159  ;;  %4484 = vmatprep.subr.bf16.mxu1 %v2806_v18 }
 0x1f6   : > { %v3544_v12 = vpop.permute.xlu1 %3543  ;;  %v3188_v33 = vsel %vm3185_vm7, %v5807_v43, %v3160_v13 }
 0x1f7   : > { %4260 = vmatmul.mubr.msk.bf16.gmra.mrb[4].mxu0 %vm493_vm0, %v5872_v9 }
 0x1f8   : > { %4485 = vmatpush3.bf16.msra.mxu1 %v2806_v18  ;;  %3274 = vmatprep.mubr.bf16.mxu0 %v5041_v29  ;;  %v381_v18 = vld [vmem:[#allocation2 + $0x20] sm:$0xff] }
 0x1f9   : > { %v3546_v16 = vpop.permute.xlu0 %3545  ;;  %4486 = vmatprep.subr.bf16.mxu1 %v2809_v24 }
 0x1fa   : > { %v3542_v15 = vpop.permute.xlu1 %3541  ;;  %v3575_v31 = vsel %vm3573_vm8, %v3544_v12, %v3546_v16 }
 0x1fb   : > { %v3574_v11 = vsel %vm3573_vm8, %v3542_v15, %v3544_v12  ;;  %3610 = vmatprep.subr.bf16.mxu0 %v3575_v31 }
 0x1fc   : > { %4487 = vmatpush3.bf16.msra.mxu1 %v2809_v24  ;;  %3611 = vmatpush1.bf16.msra.mxu0 %v3574_v11 }
 0x1fd   : > { %v3168_v46 = vpop.permute.xlu0 %3167  ;;  %4496 = vmatprep.subr.bf16.mxu1 %v3188_v33 }
 0x1fe   : > { %v3552_v30 = vpop.permute.xlu1 %3551  ;;  %v3191_v40 = vsel %vm3185_vm7, %v5825_v48, %v3168_v46 }
 0x1ff   : > { %4489 = vmatmul.mubr.msk.bf16.vlgmr.msra.gmra.mrb[16].mxu1 %vm493_vm0, %v5796_v19  ;;  %4261 = vmatmul.mubr.msk.bf16.gmra.mrb[8].mxu0 %vm493_vm0, %v4977_v34 }
 0x200   : > { %4497 = vmatpush3.bf16.msra.mxu1 %v3188_v33  ;;  %4492 = vmatprep.mubr.msk.bf16.mxu1 %vm493_vm0, %v5813_v60 }
 0x201   : > { %v3554_v37 = vpop.permute.xlu0 %3553  ;;  %4498 = vmatprep.subr.bf16.mxu1 %v3191_v40  ;;  %3284 = vmatprep.mubr.bf16.mxu0 %v5041_v29 }
 0x202   : > { %v3550_v23 = vpop.permute.xlu1 %3549  ;;  %v3578_v41 = vsel %vm3573_vm8, %v3552_v30, %v3554_v37 }
 0x203   : > { %v3577_v28 = vsel %vm3573_vm8, %v3550_v23, %v3552_v30  ;;  %3612 = vmatprep.subr.bf16.mxu0 %v3578_v41  ;;  %v383_v30 = vld [vmem:[#allocation2 + $0x30] sm:$0xff]  ;;  %v386_v23 = vld [vmem:[#allocation2 + $0x48] sm:$0xff] }
 0x204   : > { %4499 = vmatpush3.bf16.msra.mxu1 %v3191_v40  ;;  %3613 = vmatpush1.bf16.msra.mxu0 %v3577_v28  ;;  %v387_v28 = vld [vmem:[#allocation2 + $0x50] sm:$0xff] }
 0x205   : > { %v3176_v26 = vpop.permute.xlu0 %3175 }
 0x206   : > { %v3560_v57 = vpop.permute.xlu1 %3559  ;;  %v3194_v47 = vsel %vm3185_vm7, %v5840_v53, %v3176_v26 }
 0x207   : > { %4500 = vmatprep.subr.bf16.mxu1 %v3194_v47  ;;  %4493 = vmatmul.mubr.msk.bf16.gmra.mrb[20].mxu1 %vm493_vm0, %v5832_v54 }
 0x208   : > { %4501 = vmatpush3.bf16.msra.mxu1 %v3194_v47  ;;  %4262 = vmatmul.mubr.msk.bf16.gmra.mrb[12].mxu0 %vm493_vm0, %v4978_v36 }
 0x209   : > { %v3562_v50 = vpop.permute.xlu0 %3561  ;;  %4504 = vmatprep.mubr.msk.bf16.mxu1 %vm493_vm0, %v5858_v0  ;;  %3642 = vmatprep.mubr.bf16.mxu0 %v5041_v29 }
 0x20a   : > { %v3558_v19 = vpop.permute.xlu1 %3557  ;;  %v3581_v42 = vsel %vm3573_vm8, %v3560_v57, %v3562_v50 }
 0x20b   : > { %v3580_v51 = vsel %vm3573_vm8, %v3558_v19, %v3560_v57  ;;  %3614 = vmatprep.subr.bf16.mxu0 %v3581_v42 }
 0x20c   : > { %3615 = vmatpush1.bf16.msra.mxu0 %v3580_v51 }
 0x20d   : > { %v3184_v59 = vpop.permute.xlu0 %3183 }
 0x20e   : > { %v3568_v7 = vpop.permute.xlu1 %3567  ;;  %v3197_v43 = vsel %vm3185_vm7, %v5850_v58, %v3184_v59 }
 0x20f   : > { %4502 = vmatprep.subr.bf16.mxu1 %v3197_v43 }
 0x210   : > { %4503 = vmatpush3.bf16.msra.mxu1 %v3197_v43  ;;  %v389_v43 = vld [vmem:[#allocation2 + $0x60] sm:$0xff] }
 0x211   : > { %v3570_v20 = vpop.permute.xlu0 %3569 }
 0x212   : > { %v3566_v27 = vpop.permute.xlu1 %3565  ;;  %v3584_v55 = vsel %vm3573_vm8, %v3568_v7, %v3570_v20 }
 0x213   : > { %v3583_v60 = vsel %vm3573_vm8, %v3566_v27, %v3568_v7  ;;  %3616 = vmatprep.subr.bf16.mxu0 %v3584_v55  ;;  %4505 = vmatmul.mubr.msk.bf16.vlgmr.msra.gmra.mrb[16].mxu1 %vm493_vm0, %v5872_v9  ;;  %v390_v27 = vld [vmem:[#allocation2 + $0x68] sm:$0xff]  ;;  %v392_v55 = vld [vmem:[#allocation2 + $0x78] sm:$0xff] }
 0x214   : > { %3617 = vmatpush1.bf16.msra.mxu0 %v3583_v60  ;;  %4508 = vmatprep.mubr.msk.bf16.mxu1 %vm493_vm0, %v4977_v34  ;;  %v385_v60 = vld [vmem:[#allocation2 + $0x40] sm:$0xff] }
 0x215   : > { %v3548_v14 = vpop.permute.xlu0 %3547 }
 0x216   : > { %v3556_v44 = vpop.permute.xlu1 %3555  ;;  %v3576_v49 = vsel %vm3573_vm8, %v3546_v16, %v3548_v14  ;;  %v393_v14 = vld [vmem:[#allocation2 + $0x80] sm:$0xff] }
 0x217   : > { %4295 = vmatmul.mubr.msk.bf16.vlgmr.msra.gmra.mrb[0].mxu0 %vm493_vm0, %v4979_v61  ;;  %4512 = vmatprep.subr.bf16.mxu1 %v3576_v49  ;;  %v3579_v48 = vsel %vm3573_vm8, %v3554_v37, %v3556_v44  ;;  %v384_v37 = vld [vmem:[#allocation2 + $0x38] sm:$0xff]  ;;  %v379_v44 = vld [vmem:[#allocation2 + $0x10] sm:$0xff] }
 0x218   : > { %4513 = vmatpush3.bf16.msra.mxu1 %v3576_v49  ;;  %3652 = vmatprep.mubr.bf16.mxu0 %v5041_v29 }
 0x219   : > { %v3564_v45 = vpop.permute.xlu0 %3563  ;;  %4514 = vmatprep.subr.bf16.mxu1 %v3579_v48 }
 0x21a   : > { %v3582_v56 = vsel %vm3573_vm8, %v3562_v50, %v3564_v45  ;;  %v3572_v63 = vpop.permute.xlu1 %3571 }
 0x21b   : > { %4509 = vmatmul.mubr.msk.bf16.gmra.mrb[20].mxu1 %vm493_vm0, %v4978_v36  ;;  %v3585_v54 = vsel %vm3573_vm8, %v3570_v20, %v3572_v63 }
 0x21c   : > { %4515 = vmatpush3.bf16.msra.mxu1 %v3579_v48  ;;  %4520 = vmatprep.mubr.msk.bf16.mxu1 %vm493_vm0, %v4979_v61 }
 0x21d   : > { %4516 = vmatprep.subr.bf16.mxu1 %v3582_v56 }
 0x21f   : > { %4296 = vmatmul.mubr.msk.bf16.gmra.mrb[4].mxu0 %vm493_vm0, %v4980_v38 }
 0x220   : > { %4517 = vmatpush3.bf16.msra.mxu1 %v3582_v56  ;;  %3662 = vmatprep.mubr.bf16.mxu0 %v5041_v29 }
 0x221   : > { %4518 = vmatprep.subr.bf16.mxu1 %v3585_v54 }
 0x224   : > { %4519 = vmatpush3.bf16.msra.mxu1 %v3585_v54 }
 0x227   : > { %4297 = vmatmul.mubr.msk.bf16.gmra.mrb[8].mxu0 %vm493_vm0, %v4981_v17  ;;  %4521 = vmatmul.mubr.msk.bf16.vlgmr.msra.gmra.mrb[16].mxu1 %vm493_vm0, %v4980_v38  ;;  %v388_v38 = vld [vmem:[#allocation2 + $0x58] sm:$0xff] }
 0x228   : > { %3672 = vmatprep.mubr.bf16.mxu0 %v5041_v29  ;;  %4524 = vmatprep.mubr.msk.bf16.mxu1 %vm493_vm0, %v4981_v17 }
 0x22f   : > { %4298 = vmatmul.mubr.msk.bf16.gmra.mrb[12].mxu0 %vm493_vm0, %v4982_v21  ;;  %4525 = vmatmul.mubr.msk.bf16.gmra.mrb[20].mxu1 %vm493_vm0, %v4982_v21 }
 0x251   : > { %v928_v53 = vpop.f32.mrb[0].mxu1 }
 0x252   : > { %v930_v3 = vpop.f32.mrb[1].mxu1  ;;  %v4530_v9 = vadd.f32 %v928_v53, %v377_v1  ;;  %v382_v53 = vld [vmem:[#allocation2 + $0x28] sm:$0xff]  ;;  %v395_v1 = vld [vmem:[#allocation2 + $0x90] sm:$0xff] }
 0x253   : > { %v932_v4 = vpop.f32.mrb[2].mxu1  ;;  %v4536_v13 = vadd.f32 %v930_v3, %v378_v6 }
 0x254   : > { %v934_v10 = vpop.f32.mrb[3].mxu1  ;;  %v4542_v24 = vadd.f32 %v932_v4, %v380_v25  ;;  %v396_v25 = vld [vmem:[#allocation2 + $0x98] sm:$0xff] }
 0x255   : > { %v4548_v31 = vadd.f32 %v934_v10, %v381_v18 }
 0x259   : > { %v938_v32 = vpop.f32.mrb[4].mxu1 }
 0x25a   : > { %v940_v22 = vpop.f32.mrb[5].mxu1  ;;  %v4554_v41 = vadd.f32 %v938_v32, %v383_v30 }
 0x25b   : > { %v942_v52 = vpop.f32.mrb[6].mxu1  ;;  %v4560_v36 = vadd.f32 %v940_v22, %v384_v37 }
 0x25c   : > { %v944_v58 = vpop.f32.mrb[7].mxu1  ;;  %v4566_v57 = vadd.f32 %v942_v52, %v386_v23 }
 0x25d   : > { %v4572_v19 = vadd.f32 %v944_v58, %v387_v28 }
 0x261   : > { %v948_v62 = vpop.f32.mrb[8].mxu1 }
 0x262   : > { %v950_v8 = vpop.f32.mrb[9].mxu1  ;;  %v4578_v61 = vadd.f32 %v948_v62, %v389_v43 }
 0x263   : > { %v952_v39 = vpop.f32.mrb[10].mxu1  ;;  %v4584_v49 = vadd.f32 %v950_v8, %v390_v27 }
 0x264   : > { %v954_v0 = vpop.f32.mrb[11].mxu1  ;;  %v4590_v56 = vadd.f32 %v952_v39, %v392_v55 }
 0x265   : > { %v4596_v3 = vadd.f32 %v954_v0, %v393_v14  ;;  %v397_v0 = vld [vmem:[#allocation2 + $0xa0] sm:$0xff] }
 0x269   : > { %v5936_v29 = vpop.f32.mrb[12].mxu1 }
 0x26a   : > { %v5938_v35 = vpop.f32.mrb[13].mxu1  ;;  %v4602_v18 = vadd.f32 %v5936_v29, %v395_v1 }
 0x26b   : > { %v5940_v2 = vpop.f32.mrb[14].mxu1 }
 0x26c   : > { %v5942_v5 = vpop.f32.mrb[15].mxu1 }
 0x2ea   : > { %v3644_v12 = vpop.f32.mrb[0].mxu0 }
 0x2eb   : > { %v4533_v16 = vadd.f32 %v4530_v9, %v3644_v12  ;;  %v3646_v15 = vpop.f32.mrb[1].mxu0  ;;  %v398_v9 = vld [vmem:[#allocation2 + $0xa8] sm:$0xff]  ;;  %v391_v12 = vld [vmem:[#allocation2 + $0x70] sm:$0xff] }
 0x2ec   : > { %v4539_v11 = vadd.f32 %v4536_v13, %v3646_v15  ;;  %v3648_v34 = vpop.f32.mrb[2].mxu0  ;;  %v399_v13 = vld [vmem:[#allocation2 + $0xb0] sm:$0xff] }
 0x2ed   : > { %3772 = vst [vmem:[#allocation2] sm:$0xff] %v4533_v16  ;;  %v4545_v33 = vadd.f32 %v4542_v24, %v3648_v34  ;;  %v3650_v46 = vpop.f32.mrb[3].mxu0  ;;  %v4608_v24 = vadd.f32 %v5938_v35, %v396_v25  ;;  %v4620_v37 = vadd.f32 %v5942_v5, %v399_v13 }
 0x2ee   : > { %3773 = vst [vmem:[#allocation2 + $0x8] sm:$0xff] %v4539_v11  ;;  %v4551_v40 = vadd.f32 %v4548_v31, %v3650_v46  ;;  %v400_v31 = vld [vmem:[#allocation2 + $0xb8] sm:$0xff]  ;;  %v4614_v11 = vadd.f32 %v5940_v2, %v398_v9 }
 0x2ef   : > { %3775 = vst [vmem:[#allocation2 + $0x18] sm:$0xff] %v4545_v33 }
 0x2f0   : > { %3776 = vst [vmem:[#allocation2 + $0x20] sm:$0xff] %v4551_v40  ;;  %v394_v40 = vld [vmem:[#allocation2 + $0x88] sm:$0xff] }
 0x2f2   : > { %v3654_v26 = vpop.f32.mrb[4].mxu0 }
 0x2f3   : > { %v4557_v47 = vadd.f32 %v4554_v41, %v3654_v26  ;;  %v3656_v50 = vpop.f32.mrb[5].mxu0 }
 0x2f4   : > { %v4563_v42 = vadd.f32 %v4560_v36, %v3656_v50  ;;  %v3658_v51 = vpop.f32.mrb[6].mxu0 }
 0x2f5   : > { %3778 = vst [vmem:[#allocation2 + $0x30] sm:$0xff] %v4557_v47  ;;  %v4569_v59 = vadd.f32 %v4566_v57, %v3658_v51  ;;  %v3660_v7 = vpop.f32.mrb[7].mxu0 }
 0x2f6   : > { %3779 = vst [vmem:[#allocation2 + $0x38] sm:$0xff] %v4563_v42  ;;  %v4575_v20 = vadd.f32 %v4572_v19, %v3660_v7 }
 0x2f7   : > { %3781 = vst [vmem:[#allocation2 + $0x48] sm:$0xff] %v4569_v59 }
 0x2f8   : > { %3782 = vst [vmem:[#allocation2 + $0x50] sm:$0xff] %v4575_v20 }
 0x2fa   : > { %v3664_v48 = vpop.f32.mrb[8].mxu0  ;;  %v4522_v45 = vpop.f32.mrb[16].mxu1 }
 0x2fb   : > { %v4581_v63 = vadd.f32 %v4578_v61, %v3664_v48  ;;  %v4626_v54 = vadd.f32 %v4522_v45, %v385_v60  ;;  %v3666_v17 = vpop.f32.mrb[9].mxu0  ;;  %v3717_v21 = vpop.f32.mrb[17].mxu1 }
 0x2fc   : > { %v4587_v4 = vadd.f32 %v4584_v49, %v3666_v17  ;;  %v4629_v10 = vadd.f32 %v3717_v21, %v379_v44  ;;  %v3668_v32 = vpop.f32.mrb[10].mxu0  ;;  %v4523_v22 = vpop.f32.mrb[18].mxu1 }
 0x2fd   : > { %3784 = vst [vmem:[#allocation2 + $0x60] sm:$0xff] %v4581_v63  ;;  %3780 = vst [vmem:[#allocation2 + $0x40] sm:$0xff] %v4626_v54  ;;  %v4593_v52 = vadd.f32 %v4590_v56, %v3668_v32  ;;  %v4632_v58 = vadd.f32 %v4523_v22, %v388_v38  ;;  %v3670_v62 = vpop.f32.mrb[11].mxu0  ;;  %v3720_v8 = vpop.f32.mrb[19].mxu1 }
 0x2fe   : > { %3785 = vst [vmem:[#allocation2 + $0x68] sm:$0xff] %v4587_v4  ;;  %3774 = vst [vmem:[#allocation2 + $0x10] sm:$0xff] %v4629_v10  ;;  %v4599_v39 = vadd.f32 %v4596_v3, %v3670_v62  ;;  %v4635_v6 = vadd.f32 %v3720_v8, %v382_v53 }
 0x2ff   : > { %3787 = vst [vmem:[#allocation2 + $0x78] sm:$0xff] %v4593_v52  ;;  %3783 = vst [vmem:[#allocation2 + $0x58] sm:$0xff] %v4632_v58 }
 0x300   : > { %3788 = vst [vmem:[#allocation2 + $0x80] sm:$0xff] %v4599_v39  ;;  %3777 = vst [vmem:[#allocation2 + $0x28] sm:$0xff] %v4635_v6 }
 0x302   : > { %v3674_v16 = vpop.f32.mrb[12].mxu0  ;;  %v4526_v15 = vpop.f32.mrb[20].mxu1 }
 0x303   : > { %v4605_v34 = vadd.f32 %v4602_v18, %v3674_v16  ;;  %v4638_v33 = vadd.f32 %v4526_v15, %v397_v0  ;;  %v3676_v46 = vpop.f32.mrb[13].mxu0  ;;  %v3733_v30 = vpop.f32.mrb[21].mxu1 }
 0x304   : > { %v4611_v23 = vadd.f32 %v4608_v24, %v3676_v46  ;;  %v4641_v41 = vadd.f32 %v3733_v30, %v391_v12  ;;  %v3678_v28 = vpop.f32.mrb[14].mxu0  ;;  %v4527_v29 = vpop.f32.mrb[22].mxu1 }
 0x305   : > { %3790 = vst [vmem:[#allocation2 + $0x90] sm:$0xff] %v4605_v34  ;;  %3792 = vst [vmem:[#allocation2 + $0xa0] sm:$0xff] %v4638_v33  ;;  %v4617_v36 = vadd.f32 %v4614_v11, %v3678_v28  ;;  %v4644_v35 = vadd.f32 %v4527_v29, %v400_v31  ;;  %v3680_v26 = vpop.f32.mrb[15].mxu0  ;;  %v3736_v57 = vpop.f32.mrb[23].mxu1 }
 0x306   : > { %3791 = vst [vmem:[#allocation2 + $0x98] sm:$0xff] %v4611_v23  ;;  %3786 = vst [vmem:[#allocation2 + $0x70] sm:$0xff] %v4641_v41  ;;  %v4623_v2 = vadd.f32 %v4620_v37, %v3680_v26  ;;  %v4647_v47 = vadd.f32 %v3736_v57, %v394_v40 }
 0x307   : > { %3793 = vst [vmem:[#allocation2 + $0xa8] sm:$0xff] %v4617_v36  ;;  %3795 = vst [vmem:[#allocation2 + $0xb8] sm:$0xff] %v4644_v35 }
 0x308   : > { %3794 = vst [vmem:[#allocation2 + $0xb0] sm:$0xff] %v4623_v2  ;;  %3789 = vst [vmem:[#allocation2 + $0x88] sm:$0xff] %v4647_v47 }
 0x309 PF: > { %p4303_p2 = scmp.ne.s32.totalorder %s5013_s12, 8 }
 0x30a   : > { %v3800_v5 = vld [vmem:[#allocation2] sm:$0xff] (!%p4303_p2)  ;;  %v3801_v50 = vld [vmem:[#allocation2 + $0x8] sm:$0xff] (!%p4303_p2)  ;;  %v3802_v19 = vld [vmem:[#allocation2 + $0x10] sm:$0xff] (!%p4303_p2) }
 0x30b   : > { %3799 = sbr.rel (%p4303_p2) target bundleno = 791 (0x317), region = 44  ;;  %3824 = vst [vmem:[%s5139_s28] sm:$0xff] (!%p4303_p2), %v3800_v5  ;;  %3825 = vst [vmem:[%s5139_s28 + $0x8] sm:$0xff] (!%p4303_p2), %v3801_v50  ;;  %v3803_v42 = vld [vmem:[#allocation2 + $0x18] sm:$0xff] (!%p4303_p2)  ;;  %v3804_v51 = vld [vmem:[#allocation2 + $0x20] sm:$0xff] (!%p4303_p2) }
 0x30c   : > { %3826 = vst [vmem:[%s5139_s28 + $0x10] sm:$0xff] (!%p4303_p2), %v3802_v19  ;;  %v3805_v59 = vld [vmem:[#allocation2 + $0x28] sm:$0xff] (!%p4303_p2)  ;;  %3827 = vst [vmem:[%s5139_s28 + $0x18] sm:$0xff] (!%p4303_p2), %v3803_v42  ;;  %v3806_v7 = vld [vmem:[#allocation2 + $0x30] sm:$0xff] (!%p4303_p2) }
 0x30d   : > { %3828 = vst [vmem:[%s5139_s28 + $0x20] sm:$0xff] (!%p4303_p2), %v3804_v51  ;;  %3829 = vst [vmem:[%s5139_s28 + $0x28] sm:$0xff] (!%p4303_p2), %v3805_v59  ;;  %v3807_v43 = vld [vmem:[#allocation2 + $0x38] sm:$0xff] (!%p4303_p2)  ;;  %v3808_v20 = vld [vmem:[#allocation2 + $0x40] sm:$0xff] (!%p4303_p2) }
 0x30e   : > { %3830 = vst [vmem:[%s5139_s28 + $0x30] sm:$0xff] (!%p4303_p2), %v3806_v7  ;;  %3831 = vst [vmem:[%s5139_s28 + $0x38] sm:$0xff] (!%p4303_p2), %v3807_v43  ;;  %v3809_v27 = vld [vmem:[#allocation2 + $0x48] sm:$0xff] (!%p4303_p2)  ;;  %v3810_v55 = vld [vmem:[#allocation2 + $0x50] sm:$0xff] (!%p4303_p2) }
 0x30f   : > { %3832 = vst [vmem:[%s5139_s28 + $0x40] sm:$0xff] (!%p4303_p2), %v3808_v20  ;;  %v3811_v60 = vld [vmem:[#allocation2 + $0x58] sm:$0xff] (!%p4303_p2)  ;;  %3833 = vst [vmem:[%s5139_s28 + $0x48] sm:$0xff] (!%p4303_p2), %v3809_v27  ;;  %v3812_v61 = vld [vmem:[#allocation2 + $0x60] sm:$0xff] (!%p4303_p2) }
 0x310   : > { %3834 = vst [vmem:[%s5139_s28 + $0x50] sm:$0xff] (!%p4303_p2), %v3810_v55  ;;  %3835 = vst [vmem:[%s5139_s28 + $0x58] sm:$0xff] (!%p4303_p2), %v3811_v60  ;;  %v3813_v14 = vld [vmem:[#allocation2 + $0x68] sm:$0xff] (!%p4303_p2)  ;;  %v3814_v44 = vld [vmem:[#allocation2 + $0x70] sm:$0xff] (!%p4303_p2) }
 0x311   : > { %3836 = vst [vmem:[%s5139_s28 + $0x60] sm:$0xff] (!%p4303_p2), %v3812_v61  ;;  %3837 = vst [vmem:[%s5139_s28 + $0x68] sm:$0xff] (!%p4303_p2), %v3813_v14  ;;  %v3815_v49 = vld [vmem:[#allocation2 + $0x78] sm:$0xff] (!%p4303_p2)  ;;  %v3816_v48 = vld [vmem:[#allocation2 + $0x80] sm:$0xff] (!%p4303_p2) }
 0x312   : > { %3838 = vst [vmem:[%s5139_s28 + $0x70] sm:$0xff] %v3814_v44  ;;  %v3817_v45 = vld [vmem:[#allocation2 + $0x88] sm:$0xff]  ;;  %3839 = vst [vmem:[%s5139_s28 + $0x78] sm:$0xff] %v3815_v49  ;;  %v3818_v38 = vld [vmem:[#allocation2 + $0x90] sm:$0xff] }
 0x313   : > { %3840 = vst [vmem:[%s5139_s28 + $0x80] sm:$0xff] %v3816_v48  ;;  %3841 = vst [vmem:[%s5139_s28 + $0x88] sm:$0xff] %v3817_v45  ;;  %v3819_v56 = vld [vmem:[#allocation2 + $0x98] sm:$0xff]  ;;  %v3820_v63 = vld [vmem:[#allocation2 + $0xa0] sm:$0xff] }
 0x314   : > { %3842 = vst [vmem:[%s5139_s28 + $0x90] sm:$0xff] %v3818_v38  ;;  %3843 = vst [vmem:[%s5139_s28 + $0x98] sm:$0xff] %v3819_v56  ;;  %v3821_v54 = vld [vmem:[#allocation2 + $0xa8] sm:$0xff]  ;;  %v3822_v17 = vld [vmem:[#allocation2 + $0xb0] sm:$0xff] }
 0x315   : > { %3844 = vst [vmem:[%s5139_s28 + $0xa0] sm:$0xff] %v3820_v63  ;;  %v3823_v21 = vld [vmem:[#allocation2 + $0xb8] sm:$0xff]  ;;  %3845 = vst [vmem:[%s5139_s28 + $0xa8] sm:$0xff] %v3821_v54 }
 0x316   : > { %3846 = vst [vmem:[%s5139_s28 + $0xb0] sm:$0xff] %v3822_v17  ;;  %3847 = vst [vmem:[%s5139_s28 + $0xb8] sm:$0xff] %v3823_v21 }
 0x317 PF: > { %s13_s18 = sadd.s32 1, %s5037_s18   ;;  %s6000_s30 = sld [smem:[#allocation3_spill]] }
 0x318   : > { %p10_p3 = scmp.ge.s32.totalorder %s13_s18, 146   ;;  %s6001_s9 = sld [smem:[#allocation4_spill]] }
 0x319   : > { %s6002_s12 = smov %s5025_s15  ;;  %s6003_s13 = smov %s5029_s16 }
 0x31a   : > { %s6004_s14 = smov %s5033_s17  ;;  %s6005_s15 = smov %s6009_s19 }
 0x31b   :  { %12 = sbr.rel (!%p10_p3) target bundleno = 4 (0x4), region = 85 }
 0x31d   : > { %s6006_s16 = smov %s6000_s30 }
 0x31e   : > { %s6007_s17 = smov %s6001_s9 }

</bundles_post_ra>
